<compile_context>
chip_gen: v7x
topology: tpu7x:2x2x1
jax: 0.10.0
libtpu: 0.0.40
codegen_flags: <defaults>
</compile_context>

<pallas_src>
import functools

import jax
import jax.numpy as jnp
from jax.experimental import pallas as pl
from jax.experimental.pallas import tpu as pltpu


_BSUB = 8  # batch rows processed per inner-loop step (one sublane group)


def _round_up(n, m):
    return ((n + m - 1) // m) * m


def fourier_kan_kernel(x_ref, e_ref, csin_ref, ccos_ref, o_ref, *, toc):
    # x_ref   : (TB, IN_PAD)   un-expanded inputs for this batch tile
    # e_ref   : (IN_PAD, KPAD) expansion matrix, E[i, i*G + t] = t + 1
    # csin_ref: (TO, KPAD)     sin coefficients for this out tile
    # ccos_ref: (TO, KPAD)     cos coefficients for this out tile
    # o_ref   : (TB, TO)       output tile
    tb = x_ref.shape[0]
    to = o_ref.shape[1]
    nsub = tb // _BSUB
    n_oc = to // toc

    e = e_ref[...]  # hoisted: loop-invariant expansion matrix

    def body(m, carry):
        r = pl.multiple_of(m * _BSUB, _BSUB)
        xb = x_ref[pl.ds(r, _BSUB), :]                              # (8, IN_PAD)
        # Frequency expansion on the idle MXU (f32-exact with HIGHEST precision).
        gx = jnp.dot(xb, e, precision=jax.lax.Precision.HIGHEST,
                     preferred_element_type=jnp.float32)            # (8, KPAD)
        # silu(v) = h + h*tanh(h) with h = v/2; fold the 1/2 in here (per row,
        # not per (b,o,k) element).
        sb = (0.5 * jnp.sin(gx))[:, None, :]                        # (8, 1, KPAD)
        cb = (0.5 * jnp.cos(gx))[:, None, :]
        for oc in range(n_oc):                                      # static loop
            lo = oc * toc
            cs = csin_ref[pl.ds(lo, toc), :][None, :, :]            # (1, TOC, KPAD)
            cc = ccos_ref[pl.ds(lo, toc), :][None, :, :]
            hs = cs * sb                                            # = v_sin / 2
            hc = cc * cb                                            # = v_cos / 2
            t = hs + hs * jnp.tanh(hs) + hc + hc * jnp.tanh(hc)     # (8, TOC, KPAD)
            o_ref[pl.ds(r, _BSUB), pl.ds(lo, toc)] = jnp.sum(t, axis=-1)
        return carry

    jax.lax.fori_loop(0, nsub, body, 0, unroll=2 if nsub % 2 == 0 else 1)


@functools.partial(jax.jit, static_argnames=("tb_max", "to_max"))
def fourier_series_kan_layer(x, fourier_coeffs, *, tb_max=128, to_max=128):
    """x: (B, in_dim) f32; fourier_coeffs: (2, out_dim, in_dim, G) f32 -> (B, out_dim) f32."""
    b, in_dim = x.shape
    two, out_dim, in_dim2, g = fourier_coeffs.shape
    assert two == 2 and in_dim2 == in_dim

    k = in_dim * g
    k_pad = _round_up(k, 128)                 # flattened (in_dim, G) lane axis
    in_pad = _round_up(in_dim, 128)           # MXU contraction dim

    out128 = _round_up(out_dim, 128)
    to = min(_round_up(to_max, 128), out128)
    out_pad = _round_up(out128, to)           # 'to' always divides 'out_pad'

    b8 = _round_up(b, _BSUB)
    tb = min(_round_up(tb_max, _BSUB), b8)
    b_pad = _round_up(b8, tb)

    # Out sub-chunk: power of two in [8, 128] keeping the (8, TOC, KPAD)
    # intermediate around ~16 vregs so the fused chain stays in registers.
    target = max(8, 16384 // (_BSUB * k_pad))
    toc = 8
    while toc * 2 <= min(target, 128):
        toc *= 2

    x = x.astype(jnp.float32)
    x_pad = jnp.pad(x, ((0, b_pad - b), (0, in_pad - in_dim)))

    # Coefficients flattened to (out, K), zero-padded (silu(0) = 0 -> no effect).
    coef = fourier_coeffs.astype(jnp.float32).reshape(2, out_dim, k)
    coef = jnp.pad(coef, ((0, 0), (0, out_pad - out_dim), (0, k_pad - k)))
    coef_sin, coef_cos = coef[0], coef[1]

    # Expansion matrix: E[i, i*G + t] = t + 1; zeros elsewhere (and in padding).
    rows = jnp.repeat(jnp.arange(in_dim), g)
    cols = jnp.arange(k)
    vals = jnp.tile(jnp.arange(1, g + 1, dtype=jnp.float32), in_dim)
    e_mat = jnp.zeros((in_pad, k_pad), jnp.float32).at[rows, cols].set(vals)

    grid = (b_pad // tb, out_pad // to)
    n_out_tiles = grid[1]
    cost = pl.CostEstimate(
        flops=int(2 * b_pad * in_pad * k_pad * n_out_tiles
                  + 9 * b_pad * out_pad * k_pad),
        transcendentals=int(2 * b_pad * k_pad * n_out_tiles
                            + 2 * b_pad * out_pad * k_pad),
        bytes_accessed=int(4 * (b_pad * in_pad + in_pad * k_pad
                                + 2 * out_pad * k_pad + b_pad * out_pad)),
    )

    out = pl.pallas_call(
        functools.partial(fourier_kan_kernel, toc=toc),
        out_shape=jax.ShapeDtypeStruct((b_pad, out_pad), jnp.float32),
        grid_spec=pltpu.PrefetchScalarGridSpec(
            num_scalar_prefetch=0,
            grid=grid,
            in_specs=[
                pl.BlockSpec((tb, in_pad), lambda i, j: (i, 0)),     # x tile
                pl.BlockSpec((in_pad, k_pad), lambda i, j: (0, 0)),  # E (constant)
                pl.BlockSpec((to, k_pad), lambda i, j: (j, 0)),      # sin coeffs
                pl.BlockSpec((to, k_pad), lambda i, j: (j, 0)),      # cos coeffs
            ],
            out_specs=pl.BlockSpec((tb, to), lambda i, j: (i, j)),
        ),
        compiler_params=pltpu.CompilerParams(
            dimension_semantics=("parallel", "parallel"),
            vmem_limit_bytes=48 * 1024 * 1024,
        ),
        cost_estimate=cost,
    )(x_pad, e_mat, coef_sin, coef_cos)

    return out[:b, :out_dim]


def _reference(x, fourier_coeffs):
    g = fourier_coeffs.shape[-1]
    grid = jnp.arange(1, g + 1, dtype=jnp.float32).reshape(1, 1, -1)
    grid_x = (x[:, :, None] * grid)[:, None, :, :]               # (B, 1, in_dim, G)
    silu = lambda v: v * jax.nn.sigmoid(v)
    series = silu(fourier_coeffs[0] * jnp.sin(grid_x))
    series = series + silu(fourier_coeffs[1] * jnp.cos(grid_x))
    return jnp.sum(series, axis=(-1, -2))


if __name__ == "__main__":
    in_dim, out_dim, grid_size = 16, 32, 8
    batch = 16

    key = jax.random.PRNGKey(0)
    k_x, k_c = jax.random.split(key)
    x = jax.random.normal(k_x, (batch, in_dim), dtype=jnp.float32)
    fourier_coeffs = jax.random.normal(
        k_c, (2, out_dim, in_dim, grid_size), dtype=jnp.float32
    )

    out = fourier_series_kan_layer(x, fourier_coeffs)
    out = jax.block_until_ready(out)

    ref = _reference(x, fourier_coeffs)
    assert out.shape == (batch, out_dim)
    assert jnp.allclose(out, ref, atol=1e-2, rtol=1e-2), float(
        jnp.max(jnp.abs(out - ref))
    )

    print("KERNEL_OK")
</pallas_src>

<mosaic_0001>
module attributes {stable_mosaic.version = 11 : i64} {
  func.func @fourier_kan_kernel(%arg0: i32, %arg1: i32, %arg2: memref<16x128xf32, #tpu.memory_space<vmem>>, %arg3: memref<128x128xf32, #tpu.memory_space<vmem>>, %arg4: memref<128x128xf32, #tpu.memory_space<vmem>>, %arg5: memref<128x128xf32, #tpu.memory_space<vmem>>, %arg6: memref<16x128xf32, #tpu.memory_space<vmem>>) attributes {dimension_semantics = [#tpu.dimension_semantics<parallel>, #tpu.dimension_semantics<parallel>], iteration_bounds = array<i64: 1, 1>, scalar_prefetch = 0 : i64, scratch_operands = 0 : i64, tpu.core_type = #tpu.core_type<tc>, window_params = [{transform_indices = @transform_0, window_bounds = array<i64: 16, 128>}, {pipeline_mode = #tpu.pipeline_mode<synchronous>, transform_indices = @transform_1, window_bounds = array<i64: 128, 128>}, {transform_indices = @transform_2, window_bounds = array<i64: 128, 128>}, {transform_indices = @transform_3, window_bounds = array<i64: 128, 128>}, {transform_indices = @transform_4, window_bounds = array<i64: 16, 128>}]} {
    %c0 = arith.constant 0 : index
    %c0_0 = arith.constant 0 : index
    %0 = vector.load %arg3[%c0, %c0_0] : memref<128x128xf32, #tpu.memory_space<vmem>>, vector<128x128xf32>
    %c0_i32 = arith.constant 0 : i32
    %c8_i32 = arith.constant 8 : i32
    %1 = arith.muli %c0_i32, %c8_i32 : i32
    %2 = tpu.assume_multiple %1, 8 : i32
    %3 = arith.index_cast %2 : i32 to index
    %c0_1 = arith.constant 0 : index
    %4 = vector.load %arg2[%3, %c0_1] : memref<16x128xf32, #tpu.memory_space<vmem>>, vector<8x128xf32>
    %cst = arith.constant dense<0.000000e+00> : vector<8x128xf32>
    %5 = tpu.matmul %4, %0, %cst {dimension_numbers = #tpu.dot_dimension_numbers<[1], [0], [0], [1], [0, 0, 1, 1], [], []>, precision = #tpu.contract_precision<fp32>} : vector<8x128xf32>, vector<128x128xf32>, vector<8x128xf32> -> vector<8x128xf32>
    %6 = math.sin %5 : vector<8x128xf32>
    %cst_2 = arith.constant 5.000000e-01 : f32
    %7 = vector.broadcast %cst_2 : f32 to vector<8x128xf32>
    %8 = arith.mulf %7, %6 : vector<8x128xf32>
    %9 = vector.shape_cast %8 : vector<8x128xf32> to vector<8x1x128xf32>
    %10 = math.cos %5 : vector<8x128xf32>
    %cst_3 = arith.constant 5.000000e-01 : f32
    %11 = vector.broadcast %cst_3 : f32 to vector<8x128xf32>
    %12 = arith.mulf %11, %10 : vector<8x128xf32>
    %13 = vector.shape_cast %12 : vector<8x128xf32> to vector<8x1x128xf32>
    %c0_4 = arith.constant 0 : index
    %c0_5 = arith.constant 0 : index
    %14 = vector.load %arg4[%c0_4, %c0_5] : memref<128x128xf32, #tpu.memory_space<vmem>>, vector<16x128xf32>
    %15 = vector.shape_cast %14 : vector<16x128xf32> to vector<1x16x128xf32>
    %c0_6 = arith.constant 0 : index
    %c0_7 = arith.constant 0 : index
    %16 = vector.load %arg5[%c0_6, %c0_7] : memref<128x128xf32, #tpu.memory_space<vmem>>, vector<16x128xf32>
    %17 = vector.shape_cast %16 : vector<16x128xf32> to vector<1x16x128xf32>
    %18 = vector.broadcast %15 : vector<1x16x128xf32> to vector<8x16x128xf32>
    %19 = vector.broadcast %9 : vector<8x1x128xf32> to vector<8x16x128xf32>
    %20 = arith.mulf %18, %19 : vector<8x16x128xf32>
    %21 = vector.broadcast %17 : vector<1x16x128xf32> to vector<8x16x128xf32>
    %22 = vector.broadcast %13 : vector<8x1x128xf32> to vector<8x16x128xf32>
    %23 = arith.mulf %21, %22 : vector<8x16x128xf32>
    %24 = math.tanh %20 : vector<8x16x128xf32>
    %25 = arith.mulf %20, %24 : vector<8x16x128xf32>
    %26 = arith.addf %20, %25 : vector<8x16x128xf32>
    %27 = arith.addf %26, %23 : vector<8x16x128xf32>
    %28 = math.tanh %23 : vector<8x16x128xf32>
    %29 = arith.mulf %23, %28 : vector<8x16x128xf32>
    %30 = arith.addf %27, %29 : vector<8x16x128xf32>
    %cst_8 = arith.constant dense<0.000000e+00> : vector<8x16xf32>
    %31 = vector.multi_reduction <add>, %30, %cst_8 [2] : vector<8x16x128xf32> to vector<8x16xf32>
    %32 = arith.index_cast %2 : i32 to index
    %c0_9 = arith.constant 0 : index
    %33 = vector.load %arg6[%32, %c0_9] : memref<16x128xf32, #tpu.memory_space<vmem>>, vector<8x16xf32>
    tpu.vector_store %arg6[%32, %c0_9], %31 {strides = array<i32>} : memref<16x128xf32, #tpu.memory_space<vmem>>, vector<8x16xf32>,
    %c16 = arith.constant 16 : index
    %c0_10 = arith.constant 0 : index
    %34 = vector.load %arg4[%c16, %c0_10] : memref<128x128xf32, #tpu.memory_space<vmem>>, vector<16x128xf32>
    %35 = vector.shape_cast %34 : vector<16x128xf32> to vector<1x16x128xf32>
    %c16_11 = arith.constant 16 : index
    %c0_12 = arith.constant 0 : index
    %36 = vector.load %arg5[%c16_11, %c0_12] : memref<128x128xf32, #tpu.memory_space<vmem>>, vector<16x128xf32>
    %37 = vector.shape_cast %36 : vector<16x128xf32> to vector<1x16x128xf32>
    %38 = vector.broadcast %35 : vector<1x16x128xf32> to vector<8x16x128xf32>
    %39 = vector.broadcast %9 : vector<8x1x128xf32> to vector<8x16x128xf32>
    %40 = arith.mulf %38, %39 : vector<8x16x128xf32>
    %41 = vector.broadcast %37 : vector<1x16x128xf32> to vector<8x16x128xf32>
    %42 = vector.broadcast %13 : vector<8x1x128xf32> to vector<8x16x128xf32>
    %43 = arith.mulf %41, %42 : vector<8x16x128xf32>
    %44 = math.tanh %40 : vector<8x16x128xf32>
    %45 = arith.mulf %40, %44 : vector<8x16x128xf32>
    %46 = arith.addf %40, %45 : vector<8x16x128xf32>
    %47 = arith.addf %46, %43 : vector<8x16x128xf32>
    %48 = math.tanh %43 : vector<8x16x128xf32>
    %49 = arith.mulf %43, %48 : vector<8x16x128xf32>
    %50 = arith.addf %47, %49 : vector<8x16x128xf32>
    %cst_13 = arith.constant dense<0.000000e+00> : vector<8x16xf32>
    %51 = vector.multi_reduction <add>, %50, %cst_13 [2] : vector<8x16x128xf32> to vector<8x16xf32>
    %52 = arith.index_cast %2 : i32 to index
    %c16_14 = arith.constant 16 : index
    %53 = vector.load %arg6[%52, %c16_14] : memref<16x128xf32, #tpu.memory_space<vmem>>, vector<8x16xf32>
    tpu.vector_store %arg6[%52, %c16_14], %51 {strides = array<i32>} : memref<16x128xf32, #tpu.memory_space<vmem>>, vector<8x16xf32>,
    %c32 = arith.constant 32 : index
    %c0_15 = arith.constant 0 : index
    %54 = vector.load %arg4[%c32, %c0_15] : memref<128x128xf32, #tpu.memory_space<vmem>>, vector<16x128xf32>
    %55 = vector.shape_cast %54 : vector<16x128xf32> to vector<1x16x128xf32>
    %c32_16 = arith.constant 32 : index
    %c0_17 = arith.constant 0 : index
    %56 = vector.load %arg5[%c32_16, %c0_17] : memref<128x128xf32, #tpu.memory_space<vmem>>, vector<16x128xf32>
    %57 = vector.shape_cast %56 : vector<16x128xf32> to vector<1x16x128xf32>
    %58 = vector.broadcast %55 : vector<1x16x128xf32> to vector<8x16x128xf32>
    %59 = vector.broadcast %9 : vector<8x1x128xf32> to vector<8x16x128xf32>
    %60 = arith.mulf %58, %59 : vector<8x16x128xf32>
    %61 = vector.broadcast %57 : vector<1x16x128xf32> to vector<8x16x128xf32>
    %62 = vector.broadcast %13 : vector<8x1x128xf32> to vector<8x16x128xf32>
    %63 = arith.mulf %61, %62 : vector<8x16x128xf32>
    %64 = math.tanh %60 : vector<8x16x128xf32>
    %65 = arith.mulf %60, %64 : vector<8x16x128xf32>
    %66 = arith.addf %60, %65 : vector<8x16x128xf32>
    %67 = arith.addf %66, %63 : vector<8x16x128xf32>
    %68 = math.tanh %63 : vector<8x16x128xf32>
    %69 = arith.mulf %63, %68 : vector<8x16x128xf32>
    %70 = arith.addf %67, %69 : vector<8x16x128xf32>
    %cst_18 = arith.constant dense<0.000000e+00> : vector<8x16xf32>
    %71 = vector.multi_reduction <add>, %70, %cst_18 [2] : vector<8x16x128xf32> to vector<8x16xf32>
    %72 = arith.index_cast %2 : i32 to index
    %c32_19 = arith.constant 32 : index
    %73 = vector.load %arg6[%72, %c32_19] : memref<16x128xf32, #tpu.memory_space<vmem>>, vector<8x16xf32>
    tpu.vector_store %arg6[%72, %c32_19], %71 {strides = array<i32>} : memref<16x128xf32, #tpu.memory_space<vmem>>, vector<8x16xf32>,
    %c48 = arith.constant 48 : index
    %c0_20 = arith.constant 0 : index
    %74 = vector.load %arg4[%c48, %c0_20] : memref<128x128xf32, #tpu.memory_space<vmem>>, vector<16x128xf32>
    %75 = vector.shape_cast %74 : vector<16x128xf32> to vector<1x16x128xf32>
    %c48_21 = arith.constant 48 : index
    %c0_22 = arith.constant 0 : index
    %76 = vector.load %arg5[%c48_21, %c0_22] : memref<128x128xf32, #tpu.memory_space<vmem>>, vector<16x128xf32>
    %77 = vector.shape_cast %76 : vector<16x128xf32> to vector<1x16x128xf32>
    %78 = vector.broadcast %75 : vector<1x16x128xf32> to vector<8x16x128xf32>
    %79 = vector.broadcast %9 : vector<8x1x128xf32> to vector<8x16x128xf32>
    %80 = arith.mulf %78, %79 : vector<8x16x128xf32>
    %81 = vector.broadcast %77 : vector<1x16x128xf32> to vector<8x16x128xf32>
    %82 = vector.broadcast %13 : vector<8x1x128xf32> to vector<8x16x128xf32>
    %83 = arith.mulf %81, %82 : vector<8x16x128xf32>
    %84 = math.tanh %80 : vector<8x16x128xf32>
    %85 = arith.mulf %80, %84 : vector<8x16x128xf32>
    %86 = arith.addf %80, %85 : vector<8x16x128xf32>
    %87 = arith.addf %86, %83 : vector<8x16x128xf32>
    %88 = math.tanh %83 : vector<8x16x128xf32>
    %89 = arith.mulf %83, %88 : vector<8x16x128xf32>
    %90 = arith.addf %87, %89 : vector<8x16x128xf32>
    %cst_23 = arith.constant dense<0.000000e+00> : vector<8x16xf32>
    %91 = vector.multi_reduction <add>, %90, %cst_23 [2] : vector<8x16x128xf32> to vector<8x16xf32>
    %92 = arith.index_cast %2 : i32 to index
    %c48_24 = arith.constant 48 : index
    %93 = vector.load %arg6[%92, %c48_24] : memref<16x128xf32, #tpu.memory_space<vmem>>, vector<8x16xf32>
    tpu.vector_store %arg6[%92, %c48_24], %91 {strides = array<i32>} : memref<16x128xf32, #tpu.memory_space<vmem>>, vector<8x16xf32>,
    %c64 = arith.constant 64 : index
    %c0_25 = arith.constant 0 : index
    %94 = vector.load %arg4[%c64, %c0_25] : memref<128x128xf32, #tpu.memory_space<vmem>>, vector<16x128xf32>
    %95 = vector.shape_cast %94 : vector<16x128xf32> to vector<1x16x128xf32>
    %c64_26 = arith.constant 64 : index
    %c0_27 = arith.constant 0 : index
    %96 = vector.load %arg5[%c64_26, %c0_27] : memref<128x128xf32, #tpu.memory_space<vmem>>, vector<16x128xf32>
    %97 = vector.shape_cast %96 : vector<16x128xf32> to vector<1x16x128xf32>
    %98 = vector.broadcast %95 : vector<1x16x128xf32> to vector<8x16x128xf32>
    %99 = vector.broadcast %9 : vector<8x1x128xf32> to vector<8x16x128xf32>
    %100 = arith.mulf %98, %99 : vector<8x16x128xf32>
    %101 = vector.broadcast %97 : vector<1x16x128xf32> to vector<8x16x128xf32>
    %102 = vector.broadcast %13 : vector<8x1x128xf32> to vector<8x16x128xf32>
    %103 = arith.mulf %101, %102 : vector<8x16x128xf32>
    %104 = math.tanh %100 : vector<8x16x128xf32>
    %105 = arith.mulf %100, %104 : vector<8x16x128xf32>
    %106 = arith.addf %100, %105 : vector<8x16x128xf32>
    %107 = arith.addf %106, %103 : vector<8x16x128xf32>
    %108 = math.tanh %103 : vector<8x16x128xf32>
    %109 = arith.mulf %103, %108 : vector<8x16x128xf32>
    %110 = arith.addf %107, %109 : vector<8x16x128xf32>
    %cst_28 = arith.constant dense<0.000000e+00> : vector<8x16xf32>
    %111 = vector.multi_reduction <add>, %110, %cst_28 [2] : vector<8x16x128xf32> to vector<8x16xf32>
    %112 = arith.index_cast %2 : i32 to index
    %c64_29 = arith.constant 64 : index
    %113 = vector.load %arg6[%112, %c64_29] : memref<16x128xf32, #tpu.memory_space<vmem>>, vector<8x16xf32>
    tpu.vector_store %arg6[%112, %c64_29], %111 {strides = array<i32>} : memref<16x128xf32, #tpu.memory_space<vmem>>, vector<8x16xf32>,
    %c80 = arith.constant 80 : index
    %c0_30 = arith.constant 0 : index
    %114 = vector.load %arg4[%c80, %c0_30] : memref<128x128xf32, #tpu.memory_space<vmem>>, vector<16x128xf32>
    %115 = vector.shape_cast %114 : vector<16x128xf32> to vector<1x16x128xf32>
    %c80_31 = arith.constant 80 : index
    %c0_32 = arith.constant 0 : index
    %116 = vector.load %arg5[%c80_31, %c0_32] : memref<128x128xf32, #tpu.memory_space<vmem>>, vector<16x128xf32>
    %117 = vector.shape_cast %116 : vector<16x128xf32> to vector<1x16x128xf32>
    %118 = vector.broadcast %115 : vector<1x16x128xf32> to vector<8x16x128xf32>
    %119 = vector.broadcast %9 : vector<8x1x128xf32> to vector<8x16x128xf32>
    %120 = arith.mulf %118, %119 : vector<8x16x128xf32>
    %121 = vector.broadcast %117 : vector<1x16x128xf32> to vector<8x16x128xf32>
    %122 = vector.broadcast %13 : vector<8x1x128xf32> to vector<8x16x128xf32>
    %123 = arith.mulf %121, %122 : vector<8x16x128xf32>
    %124 = math.tanh %120 : vector<8x16x128xf32>
    %125 = arith.mulf %120, %124 : vector<8x16x128xf32>
    %126 = arith.addf %120, %125 : vector<8x16x128xf32>
    %127 = arith.addf %126, %123 : vector<8x16x128xf32>
    %128 = math.tanh %123 : vector<8x16x128xf32>
    %129 = arith.mulf %123, %128 : vector<8x16x128xf32>
    %130 = arith.addf %127, %129 : vector<8x16x128xf32>
    %cst_33 = arith.constant dense<0.000000e+00> : vector<8x16xf32>
    %131 = vector.multi_reduction <add>, %130, %cst_33 [2] : vector<8x16x128xf32> to vector<8x16xf32>
    %132 = arith.index_cast %2 : i32 to index
    %c80_34 = arith.constant 80 : index
    %133 = vector.load %arg6[%132, %c80_34] : memref<16x128xf32, #tpu.memory_space<vmem>>, vector<8x16xf32>
    tpu.vector_store %arg6[%132, %c80_34], %131 {strides = array<i32>} : memref<16x128xf32, #tpu.memory_space<vmem>>, vector<8x16xf32>,
    %c96 = arith.constant 96 : index
    %c0_35 = arith.constant 0 : index
    %134 = vector.load %arg4[%c96, %c0_35] : memref<128x128xf32, #tpu.memory_space<vmem>>, vector<16x128xf32>
    %135 = vector.shape_cast %134 : vector<16x128xf32> to vector<1x16x128xf32>
    %c96_36 = arith.constant 96 : index
    %c0_37 = arith.constant 0 : index
    %136 = vector.load %arg5[%c96_36, %c0_37] : memref<128x128xf32, #tpu.memory_space<vmem>>, vector<16x128xf32>
    %137 = vector.shape_cast %136 : vector<16x128xf32> to vector<1x16x128xf32>
    %138 = vector.broadcast %135 : vector<1x16x128xf32> to vector<8x16x128xf32>
    %139 = vector.broadcast %9 : vector<8x1x128xf32> to vector<8x16x128xf32>
    %140 = arith.mulf %138, %139 : vector<8x16x128xf32>
    %141 = vector.broadcast %137 : vector<1x16x128xf32> to vector<8x16x128xf32>
    %142 = vector.broadcast %13 : vector<8x1x128xf32> to vector<8x16x128xf32>
    %143 = arith.mulf %141, %142 : vector<8x16x128xf32>
    %144 = math.tanh %140 : vector<8x16x128xf32>
    %145 = arith.mulf %140, %144 : vector<8x16x128xf32>
    %146 = arith.addf %140, %145 : vector<8x16x128xf32>
    %147 = arith.addf %146, %143 : vector<8x16x128xf32>
    %148 = math.tanh %143 : vector<8x16x128xf32>
    %149 = arith.mulf %143, %148 : vector<8x16x128xf32>
    %150 = arith.addf %147, %149 : vector<8x16x128xf32>
    %cst_38 = arith.constant dense<0.000000e+00> : vector<8x16xf32>
    %151 = vector.multi_reduction <add>, %150, %cst_38 [2] : vector<8x16x128xf32> to vector<8x16xf32>
    %152 = arith.index_cast %2 : i32 to index
    %c96_39 = arith.constant 96 : index
    %153 = vector.load %arg6[%152, %c96_39] : memref<16x128xf32, #tpu.memory_space<vmem>>, vector<8x16xf32>
    tpu.vector_store %arg6[%152, %c96_39], %151 {strides = array<i32>} : memref<16x128xf32, #tpu.memory_space<vmem>>, vector<8x16xf32>,
    %c112 = arith.constant 112 : index
    %c0_40 = arith.constant 0 : index
    %154 = vector.load %arg4[%c112, %c0_40] : memref<128x128xf32, #tpu.memory_space<vmem>>, vector<16x128xf32>
    %155 = vector.shape_cast %154 : vector<16x128xf32> to vector<1x16x128xf32>
    %c112_41 = arith.constant 112 : index
    %c0_42 = arith.constant 0 : index
    %156 = vector.load %arg5[%c112_41, %c0_42] : memref<128x128xf32, #tpu.memory_space<vmem>>, vector<16x128xf32>
    %157 = vector.shape_cast %156 : vector<16x128xf32> to vector<1x16x128xf32>
    %158 = vector.broadcast %155 : vector<1x16x128xf32> to vector<8x16x128xf32>
    %159 = vector.broadcast %9 : vector<8x1x128xf32> to vector<8x16x128xf32>
    %160 = arith.mulf %158, %159 : vector<8x16x128xf32>
    %161 = vector.broadcast %157 : vector<1x16x128xf32> to vector<8x16x128xf32>
    %162 = vector.broadcast %13 : vector<8x1x128xf32> to vector<8x16x128xf32>
    %163 = arith.mulf %161, %162 : vector<8x16x128xf32>
    %164 = math.tanh %160 : vector<8x16x128xf32>
    %165 = arith.mulf %160, %164 : vector<8x16x128xf32>
    %166 = arith.addf %160, %165 : vector<8x16x128xf32>
    %167 = arith.addf %166, %163 : vector<8x16x128xf32>
    %168 = math.tanh %163 : vector<8x16x128xf32>
    %169 = arith.mulf %163, %168 : vector<8x16x128xf32>
    %170 = arith.addf %167, %169 : vector<8x16x128xf32>
    %cst_43 = arith.constant dense<0.000000e+00> : vector<8x16xf32>
    %171 = vector.multi_reduction <add>, %170, %cst_43 [2] : vector<8x16x128xf32> to vector<8x16xf32>
    %172 = arith.index_cast %2 : i32 to index
    %c112_44 = arith.constant 112 : index
    %173 = vector.load %arg6[%172, %c112_44] : memref<16x128xf32, #tpu.memory_space<vmem>>, vector<8x16xf32>
    tpu.vector_store %arg6[%172, %c112_44], %171 {strides = array<i32>} : memref<16x128xf32, #tpu.memory_space<vmem>>, vector<8x16xf32>,
    %c1_i32 = arith.constant 1 : i32
    %c8_i32_45 = arith.constant 8 : i32
    %174 = arith.muli %c1_i32, %c8_i32_45 : i32
    %175 = tpu.assume_multiple %174, 8 : i32
    %176 = arith.index_cast %175 : i32 to index
    %c0_46 = arith.constant 0 : index
    %177 = vector.load %arg2[%176, %c0_46] : memref<16x128xf32, #tpu.memory_space<vmem>>, vector<8x128xf32>
    %cst_47 = arith.constant dense<0.000000e+00> : vector<8x128xf32>
    %178 = tpu.matmul %177, %0, %cst_47 {dimension_numbers = #tpu.dot_dimension_numbers<[1], [0], [0], [1], [0, 0, 1, 1], [], []>, precision = #tpu.contract_precision<fp32>} : vector<8x128xf32>, vector<128x128xf32>, vector<8x128xf32> -> vector<8x128xf32>
    %179 = math.sin %178 : vector<8x128xf32>
    %cst_48 = arith.constant 5.000000e-01 : f32
    %180 = vector.broadcast %cst_48 : f32 to vector<8x128xf32>
    %181 = arith.mulf %180, %179 : vector<8x128xf32>
    %182 = vector.shape_cast %181 : vector<8x128xf32> to vector<8x1x128xf32>
    %183 = math.cos %178 : vector<8x128xf32>
    %cst_49 = arith.constant 5.000000e-01 : f32
    %184 = vector.broadcast %cst_49 : f32 to vector<8x128xf32>
    %185 = arith.mulf %184, %183 : vector<8x128xf32>
    %186 = vector.shape_cast %185 : vector<8x128xf32> to vector<8x1x128xf32>
    %c0_50 = arith.constant 0 : index
    %c0_51 = arith.constant 0 : index
    %187 = vector.load %arg4[%c0_50, %c0_51] : memref<128x128xf32, #tpu.memory_space<vmem>>, vector<16x128xf32>
    %188 = vector.shape_cast %187 : vector<16x128xf32> to vector<1x16x128xf32>
    %c0_52 = arith.constant 0 : index
    %c0_53 = arith.constant 0 : index
    %189 = vector.load %arg5[%c0_52, %c0_53] : memref<128x128xf32, #tpu.memory_space<vmem>>, vector<16x128xf32>
    %190 = vector.shape_cast %189 : vector<16x128xf32> to vector<1x16x128xf32>
    %191 = vector.broadcast %188 : vector<1x16x128xf32> to vector<8x16x128xf32>
    %192 = vector.broadcast %182 : vector<8x1x128xf32> to vector<8x16x128xf32>
    %193 = arith.mulf %191, %192 : vector<8x16x128xf32>
    %194 = vector.broadcast %190 : vector<1x16x128xf32> to vector<8x16x128xf32>
    %195 = vector.broadcast %186 : vector<8x1x128xf32> to vector<8x16x128xf32>
    %196 = arith.mulf %194, %195 : vector<8x16x128xf32>
    %197 = math.tanh %193 : vector<8x16x128xf32>
    %198 = arith.mulf %193, %197 : vector<8x16x128xf32>
    %199 = arith.addf %193, %198 : vector<8x16x128xf32>
    %200 = arith.addf %199, %196 : vector<8x16x128xf32>
    %201 = math.tanh %196 : vector<8x16x128xf32>
    %202 = arith.mulf %196, %201 : vector<8x16x128xf32>
    %203 = arith.addf %200, %202 : vector<8x16x128xf32>
    %cst_54 = arith.constant dense<0.000000e+00> : vector<8x16xf32>
    %204 = vector.multi_reduction <add>, %203, %cst_54 [2] : vector<8x16x128xf32> to vector<8x16xf32>
    %205 = arith.index_cast %175 : i32 to index
    %c0_55 = arith.constant 0 : index
    %206 = vector.load %arg6[%205, %c0_55] : memref<16x128xf32, #tpu.memory_space<vmem>>, vector<8x16xf32>
    tpu.vector_store %arg6[%205, %c0_55], %204 {strides = array<i32>} : memref<16x128xf32, #tpu.memory_space<vmem>>, vector<8x16xf32>,
    %c16_56 = arith.constant 16 : index
    %c0_57 = arith.constant 0 : index
    %207 = vector.load %arg4[%c16_56, %c0_57] : memref<128x128xf32, #tpu.memory_space<vmem>>, vector<16x128xf32>
    %208 = vector.shape_cast %207 : vector<16x128xf32> to vector<1x16x128xf32>
    %c16_58 = arith.constant 16 : index
    %c0_59 = arith.constant 0 : index
    %209 = vector.load %arg5[%c16_58, %c0_59] : memref<128x128xf32, #tpu.memory_space<vmem>>, vector<16x128xf32>
    %210 = vector.shape_cast %209 : vector<16x128xf32> to vector<1x16x128xf32>
    %211 = vector.broadcast %208 : vector<1x16x128xf32> to vector<8x16x128xf32>
    %212 = vector.broadcast %182 : vector<8x1x128xf32> to vector<8x16x128xf32>
    %213 = arith.mulf %211, %212 : vector<8x16x128xf32>
    %214 = vector.broadcast %210 : vector<1x16x128xf32> to vector<8x16x128xf32>
    %215 = vector.broadcast %186 : vector<8x1x128xf32> to vector<8x16x128xf32>
    %216 = arith.mulf %214, %215 : vector<8x16x128xf32>
    %217 = math.tanh %213 : vector<8x16x128xf32>
    %218 = arith.mulf %213, %217 : vector<8x16x128xf32>
    %219 = arith.addf %213, %218 : vector<8x16x128xf32>
    %220 = arith.addf %219, %216 : vector<8x16x128xf32>
    %221 = math.tanh %216 : vector<8x16x128xf32>
    %222 = arith.mulf %216, %221 : vector<8x16x128xf32>
    %223 = arith.addf %220, %222 : vector<8x16x128xf32>
    %cst_60 = arith.constant dense<0.000000e+00> : vector<8x16xf32>
    %224 = vector.multi_reduction <add>, %223, %cst_60 [2] : vector<8x16x128xf32> to vector<8x16xf32>
    %225 = arith.index_cast %175 : i32 to index
    %c16_61 = arith.constant 16 : index
    %226 = vector.load %arg6[%225, %c16_61] : memref<16x128xf32, #tpu.memory_space<vmem>>, vector<8x16xf32>
    tpu.vector_store %arg6[%225, %c16_61], %224 {strides = array<i32>} : memref<16x128xf32, #tpu.memory_space<vmem>>, vector<8x16xf32>,
    %c32_62 = arith.constant 32 : index
    %c0_63 = arith.constant 0 : index
    %227 = vector.load %arg4[%c32_62, %c0_63] : memref<128x128xf32, #tpu.memory_space<vmem>>, vector<16x128xf32>
    %228 = vector.shape_cast %227 : vector<16x128xf32> to vector<1x16x128xf32>
    %c32_64 = arith.constant 32 : index
    %c0_65 = arith.constant 0 : index
    %229 = vector.load %arg5[%c32_64, %c0_65] : memref<128x128xf32, #tpu.memory_space<vmem>>, vector<16x128xf32>
    %230 = vector.shape_cast %229 : vector<16x128xf32> to vector<1x16x128xf32>
    %231 = vector.broadcast %228 : vector<1x16x128xf32> to vector<8x16x128xf32>
    %232 = vector.broadcast %182 : vector<8x1x128xf32> to vector<8x16x128xf32>
    %233 = arith.mulf %231, %232 : vector<8x16x128xf32>
    %234 = vector.broadcast %230 : vector<1x16x128xf32> to vector<8x16x128xf32>
    %235 = vector.broadcast %186 : vector<8x1x128xf32> to vector<8x16x128xf32>
    %236 = arith.mulf %234, %235 : vector<8x16x128xf32>
    %237 = math.tanh %233 : vector<8x16x128xf32>
    %238 = arith.mulf %233, %237 : vector<8x16x128xf32>
    %239 = arith.addf %233, %238 : vector<8x16x128xf32>
    %240 = arith.addf %239, %236 : vector<8x16x128xf32>
    %241 = math.tanh %236 : vector<8x16x128xf32>
    %242 = arith.mulf %236, %241 : vector<8x16x128xf32>
    %243 = arith.addf %240, %242 : vector<8x16x128xf32>
    %cst_66 = arith.constant dense<0.000000e+00> : vector<8x16xf32>
    %244 = vector.multi_reduction <add>, %243, %cst_66 [2] : vector<8x16x128xf32> to vector<8x16xf32>
    %245 = arith.index_cast %175 : i32 to index
    %c32_67 = arith.constant 32 : index
    %246 = vector.load %arg6[%245, %c32_67] : memref<16x128xf32, #tpu.memory_space<vmem>>, vector<8x16xf32>
    tpu.vector_store %arg6[%245, %c32_67], %244 {strides = array<i32>} : memref<16x128xf32, #tpu.memory_space<vmem>>, vector<8x16xf32>,
    %c48_68 = arith.constant 48 : index
    %c0_69 = arith.constant 0 : index
    %247 = vector.load %arg4[%c48_68, %c0_69] : memref<128x128xf32, #tpu.memory_space<vmem>>, vector<16x128xf32>
    %248 = vector.shape_cast %247 : vector<16x128xf32> to vector<1x16x128xf32>
    %c48_70 = arith.constant 48 : index
    %c0_71 = arith.constant 0 : index
    %249 = vector.load %arg5[%c48_70, %c0_71] : memref<128x128xf32, #tpu.memory_space<vmem>>, vector<16x128xf32>
    %250 = vector.shape_cast %249 : vector<16x128xf32> to vector<1x16x128xf32>
    %251 = vector.broadcast %248 : vector<1x16x128xf32> to vector<8x16x128xf32>
    %252 = vector.broadcast %182 : vector<8x1x128xf32> to vector<8x16x128xf32>
    %253 = arith.mulf %251, %252 : vector<8x16x128xf32>
    %254 = vector.broadcast %250 : vector<1x16x128xf32> to vector<8x16x128xf32>
    %255 = vector.broadcast %186 : vector<8x1x128xf32> to vector<8x16x128xf32>
    %256 = arith.mulf %254, %255 : vector<8x16x128xf32>
    %257 = math.tanh %253 : vector<8x16x128xf32>
    %258 = arith.mulf %253, %257 : vector<8x16x128xf32>
    %259 = arith.addf %253, %258 : vector<8x16x128xf32>
    %260 = arith.addf %259, %256 : vector<8x16x128xf32>
    %261 = math.tanh %256 : vector<8x16x128xf32>
    %262 = arith.mulf %256, %261 : vector<8x16x128xf32>
    %263 = arith.addf %260, %262 : vector<8x16x128xf32>
    %cst_72 = arith.constant dense<0.000000e+00> : vector<8x16xf32>
    %264 = vector.multi_reduction <add>, %263, %cst_72 [2] : vector<8x16x128xf32> to vector<8x16xf32>
    %265 = arith.index_cast %175 : i32 to index
    %c48_73 = arith.constant 48 : index
    %266 = vector.load %arg6[%265, %c48_73] : memref<16x128xf32, #tpu.memory_space<vmem>>, vector<8x16xf32>
    tpu.vector_store %arg6[%265, %c48_73], %264 {strides = array<i32>} : memref<16x128xf32, #tpu.memory_space<vmem>>, vector<8x16xf32>,
    %c64_74 = arith.constant 64 : index
    %c0_75 = arith.constant 0 : index
    %267 = vector.load %arg4[%c64_74, %c0_75] : memref<128x128xf32, #tpu.memory_space<vmem>>, vector<16x128xf32>
    %268 = vector.shape_cast %267 : vector<16x128xf32> to vector<1x16x128xf32>
    %c64_76 = arith.constant 64 : index
    %c0_77 = arith.constant 0 : index
    %269 = vector.load %arg5[%c64_76, %c0_77] : memref<128x128xf32, #tpu.memory_space<vmem>>, vector<16x128xf32>
    %270 = vector.shape_cast %269 : vector<16x128xf32> to vector<1x16x128xf32>
    %271 = vector.broadcast %268 : vector<1x16x128xf32> to vector<8x16x128xf32>
    %272 = vector.broadcast %182 : vector<8x1x128xf32> to vector<8x16x128xf32>
    %273 = arith.mulf %271, %272 : vector<8x16x128xf32>
    %274 = vector.broadcast %270 : vector<1x16x128xf32> to vector<8x16x128xf32>
    %275 = vector.broadcast %186 : vector<8x1x128xf32> to vector<8x16x128xf32>
    %276 = arith.mulf %274, %275 : vector<8x16x128xf32>
    %277 = math.tanh %273 : vector<8x16x128xf32>
    %278 = arith.mulf %273, %277 : vector<8x16x128xf32>
    %279 = arith.addf %273, %278 : vector<8x16x128xf32>
    %280 = arith.addf %279, %276 : vector<8x16x128xf32>
    %281 = math.tanh %276 : vector<8x16x128xf32>
    %282 = arith.mulf %276, %281 : vector<8x16x128xf32>
    %283 = arith.addf %280, %282 : vector<8x16x128xf32>
    %cst_78 = arith.constant dense<0.000000e+00> : vector<8x16xf32>
    %284 = vector.multi_reduction <add>, %283, %cst_78 [2] : vector<8x16x128xf32> to vector<8x16xf32>
    %285 = arith.index_cast %175 : i32 to index
    %c64_79 = arith.constant 64 : index
    %286 = vector.load %arg6[%285, %c64_79] : memref<16x128xf32, #tpu.memory_space<vmem>>, vector<8x16xf32>
    tpu.vector_store %arg6[%285, %c64_79], %284 {strides = array<i32>} : memref<16x128xf32, #tpu.memory_space<vmem>>, vector<8x16xf32>,
    %c80_80 = arith.constant 80 : index
    %c0_81 = arith.constant 0 : index
    %287 = vector.load %arg4[%c80_80, %c0_81] : memref<128x128xf32, #tpu.memory_space<vmem>>, vector<16x128xf32>
    %288 = vector.shape_cast %287 : vector<16x128xf32> to vector<1x16x128xf32>
    %c80_82 = arith.constant 80 : index
    %c0_83 = arith.constant 0 : index
    %289 = vector.load %arg5[%c80_82, %c0_83] : memref<128x128xf32, #tpu.memory_space<vmem>>, vector<16x128xf32>
    %290 = vector.shape_cast %289 : vector<16x128xf32> to vector<1x16x128xf32>
    %291 = vector.broadcast %288 : vector<1x16x128xf32> to vector<8x16x128xf32>
    %292 = vector.broadcast %182 : vector<8x1x128xf32> to vector<8x16x128xf32>
    %293 = arith.mulf %291, %292 : vector<8x16x128xf32>
    %294 = vector.broadcast %290 : vector<1x16x128xf32> to vector<8x16x128xf32>
    %295 = vector.broadcast %186 : vector<8x1x128xf32> to vector<8x16x128xf32>
    %296 = arith.mulf %294, %295 : vector<8x16x128xf32>
    %297 = math.tanh %293 : vector<8x16x128xf32>
    %298 = arith.mulf %293, %297 : vector<8x16x128xf32>
    %299 = arith.addf %293, %298 : vector<8x16x128xf32>
    %300 = arith.addf %299, %296 : vector<8x16x128xf32>
    %301 = math.tanh %296 : vector<8x16x128xf32>
    %302 = arith.mulf %296, %301 : vector<8x16x128xf32>
    %303 = arith.addf %300, %302 : vector<8x16x128xf32>
    %cst_84 = arith.constant dense<0.000000e+00> : vector<8x16xf32>
    %304 = vector.multi_reduction <add>, %303, %cst_84 [2] : vector<8x16x128xf32> to vector<8x16xf32>
    %305 = arith.index_cast %175 : i32 to index
    %c80_85 = arith.constant 80 : index
    %306 = vector.load %arg6[%305, %c80_85] : memref<16x128xf32, #tpu.memory_space<vmem>>, vector<8x16xf32>
    tpu.vector_store %arg6[%305, %c80_85], %304 {strides = array<i32>} : memref<16x128xf32, #tpu.memory_space<vmem>>, vector<8x16xf32>,
    %c96_86 = arith.constant 96 : index
    %c0_87 = arith.constant 0 : index
    %307 = vector.load %arg4[%c96_86, %c0_87] : memref<128x128xf32, #tpu.memory_space<vmem>>, vector<16x128xf32>
    %308 = vector.shape_cast %307 : vector<16x128xf32> to vector<1x16x128xf32>
    %c96_88 = arith.constant 96 : index
    %c0_89 = arith.constant 0 : index
    %309 = vector.load %arg5[%c96_88, %c0_89] : memref<128x128xf32, #tpu.memory_space<vmem>>, vector<16x128xf32>
    %310 = vector.shape_cast %309 : vector<16x128xf32> to vector<1x16x128xf32>
    %311 = vector.broadcast %308 : vector<1x16x128xf32> to vector<8x16x128xf32>
    %312 = vector.broadcast %182 : vector<8x1x128xf32> to vector<8x16x128xf32>
    %313 = arith.mulf %311, %312 : vector<8x16x128xf32>
    %314 = vector.broadcast %310 : vector<1x16x128xf32> to vector<8x16x128xf32>
    %315 = vector.broadcast %186 : vector<8x1x128xf32> to vector<8x16x128xf32>
    %316 = arith.mulf %314, %315 : vector<8x16x128xf32>
    %317 = math.tanh %313 : vector<8x16x128xf32>
    %318 = arith.mulf %313, %317 : vector<8x16x128xf32>
    %319 = arith.addf %313, %318 : vector<8x16x128xf32>
    %320 = arith.addf %319, %316 : vector<8x16x128xf32>
    %321 = math.tanh %316 : vector<8x16x128xf32>
    %322 = arith.mulf %316, %321 : vector<8x16x128xf32>
    %323 = arith.addf %320, %322 : vector<8x16x128xf32>
    %cst_90 = arith.constant dense<0.000000e+00> : vector<8x16xf32>
    %324 = vector.multi_reduction <add>, %323, %cst_90 [2] : vector<8x16x128xf32> to vector<8x16xf32>
    %325 = arith.index_cast %175 : i32 to index
    %c96_91 = arith.constant 96 : index
    %326 = vector.load %arg6[%325, %c96_91] : memref<16x128xf32, #tpu.memory_space<vmem>>, vector<8x16xf32>
    tpu.vector_store %arg6[%325, %c96_91], %324 {strides = array<i32>} : memref<16x128xf32, #tpu.memory_space<vmem>>, vector<8x16xf32>,
    %c112_92 = arith.constant 112 : index
    %c0_93 = arith.constant 0 : index
    %327 = vector.load %arg4[%c112_92, %c0_93] : memref<128x128xf32, #tpu.memory_space<vmem>>, vector<16x128xf32>
    %328 = vector.shape_cast %327 : vector<16x128xf32> to vector<1x16x128xf32>
    %c112_94 = arith.constant 112 : index
    %c0_95 = arith.constant 0 : index
    %329 = vector.load %arg5[%c112_94, %c0_95] : memref<128x128xf32, #tpu.memory_space<vmem>>, vector<16x128xf32>
    %330 = vector.shape_cast %329 : vector<16x128xf32> to vector<1x16x128xf32>
    %331 = vector.broadcast %328 : vector<1x16x128xf32> to vector<8x16x128xf32>
    %332 = vector.broadcast %182 : vector<8x1x128xf32> to vector<8x16x128xf32>
    %333 = arith.mulf %331, %332 : vector<8x16x128xf32>
    %334 = vector.broadcast %330 : vector<1x16x128xf32> to vector<8x16x128xf32>
    %335 = vector.broadcast %186 : vector<8x1x128xf32> to vector<8x16x128xf32>
    %336 = arith.mulf %334, %335 : vector<8x16x128xf32>
    %337 = math.tanh %333 : vector<8x16x128xf32>
    %338 = arith.mulf %333, %337 : vector<8x16x128xf32>
    %339 = arith.addf %333, %338 : vector<8x16x128xf32>
    %340 = arith.addf %339, %336 : vector<8x16x128xf32>
    %341 = math.tanh %336 : vector<8x16x128xf32>
    %342 = arith.mulf %336, %341 : vector<8x16x128xf32>
    %343 = arith.addf %340, %342 : vector<8x16x128xf32>
    %cst_96 = arith.constant dense<0.000000e+00> : vector<8x16xf32>
    %344 = vector.multi_reduction <add>, %343, %cst_96 [2] : vector<8x16x128xf32> to vector<8x16xf32>
    %345 = arith.index_cast %175 : i32 to index
    %c112_97 = arith.constant 112 : index
    %346 = vector.load %arg6[%345, %c112_97] : memref<16x128xf32, #tpu.memory_space<vmem>>, vector<8x16xf32>
    tpu.vector_store %arg6[%345, %c112_97], %344 {strides = array<i32>} : memref<16x128xf32, #tpu.memory_space<vmem>>, vector<8x16xf32>,
    %c2_i32 = arith.constant 2 : i32
    return
  }
  func.func @transform_0(%arg0: i32, %arg1: i32) -> (i32, i32) {
    %c0_i32 = arith.constant 0 : i32
    %c0_i32_0 = arith.constant 0 : i32
    return %arg0, %c0_i32 : i32, i32
  }
  func.func @transform_1(%arg0: i32, %arg1: i32) -> (i32, i32) {
    %c0_i32 = arith.constant 0 : i32
    %c0_i32_0 = arith.constant 0 : i32
    %c0_i32_1 = arith.constant 0 : i32
    return %c0_i32, %c0_i32_0 : i32, i32
  }
  func.func @transform_2(%arg0: i32, %arg1: i32) -> (i32, i32) {
    %c0_i32 = arith.constant 0 : i32
    %c0_i32_0 = arith.constant 0 : i32
    return %arg1, %c0_i32 : i32, i32
  }
  func.func @transform_3(%arg0: i32, %arg1: i32) -> (i32, i32) {
    %c0_i32 = arith.constant 0 : i32
    %c0_i32_0 = arith.constant 0 : i32
    return %arg1, %c0_i32 : i32, i32
  }
  func.func @transform_4(%arg0: i32, %arg1: i32) -> (i32, i32) {
    %c0_i32 = arith.constant 0 : i32
    return %arg0, %arg1 : i32, i32
  }
}

</mosaic_0001>

<bundles_post_ra>
// kernel: tile.8
= control target key start
LH: loop header
LB: loop body
LE: loop exit
PB: predicated region body
PF: predicated region fallthrough
CT: control target
= control target key end

     0   :  { %s28_s0 = inlined_call_operand.vmem [shape: f32[8], index: 0, kind: input, shape index: {}]   ;;  %s29_s1 = inlined_call_operand.vmem [shape: f32[16,8], index: 1, kind: output, shape index: {}]  }
   0x1   :  { %v4_v0 = vld [vmem:[%s28_s0] ss:$0 sm:$0xff] }
   0x2   :  { %5 = vst [vmem:[%s29_s1] sm:$0xff] %v4_v0  ;;  %8 = vst [vmem:[%s29_s1 + $0x8] sm:$0xff] %v4_v0 }

// kernel: fourier_series_kan_layer.1
= control target key start
LH: loop header
LB: loop body
LE: loop exit
PB: predicated region body
PF: predicated region fallthrough
CT: control target
= control target key end

     0   :  { %v8766_v3 = vmov 0.0|0.0   ;;  %vm8767_vm0 = vmmov 0   ;;  %v8768_v11 = vmov 0.0   ;;  %s15046_s0 = inlined_call_operand.vmem [shape: f32[16,128], index: 0, kind: input, shape index: {}]   ;;  %s15047_s1 = inlined_call_operand.vmem [shape: f32[128,128], index: 1, kind: input, shape index: {}]   ;;  %s15048_s2 = inlined_call_operand.vmem [shape: f32[128,128], index: 2, kind: input, shape index: {}]   ;;  %s15049_s3 = inlined_call_operand.vmem [shape: f32[128,128], index: 3, kind: input, shape index: {}]   ;;  %s15050_s4 = inlined_call_operand.hbm [shape: f32[16,128], index: 4, kind: output, shape index: {}]  }
   0x1   :  { %v18_v0 = vld [vmem:[%s15047_s1] sm:$0xff]  ;;  %v19_v1 = vld [vmem:[%s15047_s1 + $0x8] sm:$0xff]  ;;  %v8813_v2 = vld [vmem:[%s15047_s1 + $0x10] sm:$0xff]  ;;  %7227 = vmatprep.subr.bf16.mxu0 %v8766_v3  ;;  %7371 = vmatprep.subr.bf16.mxu1 %v8766_v3 }
   0x2   :  { %v36_v4 = vand.u32 4294901760, %v18_v0  ;;  %v39_v5 = vand.u32 4294901760, %v19_v1  ;;  %v8820_v6 = vld [vmem:[%s15047_s1 + $0x18] sm:$0xff]  ;;  %v42_v7 = vand.u32 4294901760, %v8813_v2  ;;  %v8827_v9 = vld [vmem:[%s15047_s1 + $0x20] sm:$0xff]  ;;  %v8832_v10 = vld [vmem:[%s15047_s1 + $0x28] sm:$0xff]  ;;  %6839 = vmatprep.mubr.msk.f32.mxu0 %vm8767_vm0, %v8768_v11  ;;  %7049 = vmatprep.mubr.msk.f32.mxu1 %vm8767_vm0, %v8768_v11 }
   0x3   :  { %v45_v8 = vand.u32 4294901760, %v8820_v6  ;;  %v48_v14 = vand.u32 4294901760, %v8827_v9  ;;  %v51_v15 = vand.u32 4294901760, %v8832_v10  ;;  %v8853_v16 = vld [vmem:[%s15047_s1 + $0x30] sm:$0xff]  ;;  %v8858_v17 = vld [vmem:[%s15047_s1 + $0x38] sm:$0xff] }
   0x4   :  { %v8838_v12 = vpack.c.bf16 %v39_v5, %v36_v4 }
   0x5   :  { %v8844_v13 = vpack.c.bf16 %v45_v8, %v42_v7 }
   0x6   :  { %7229 = vmatpush3.bf16.msra.mxu0 %v8838_v12  ;;  %7373 = vmatpush3.bf16.msra.mxu1 %v8838_v12 }
   0x7   :  { %7230 = vmatprep.subr.bf16.mxu0 %v8766_v3  ;;  %7374 = vmatprep.subr.bf16.mxu1 %v8766_v3 }
   0x8   :  { %9 = vsyncpa [#allocation3], 0  ;;  %v34_v18 = vld [vmem:[%s15046_s0] sm:$0xff]  ;;  %v8865_v19 = vpack.c.bf16 %v51_v15, %v48_v14  ;;  %v54_v20 = vand.u32 4294901760, %v8853_v16  ;;  %v57_v21 = vand.u32 4294901760, %v8858_v17  ;;  %v27_v23 = vld [vmem:[%s15047_s1 + $0x48] sm:$0xff]  ;;  %v8904_v35 = vsub.f32 %v18_v0, %v36_v4 }
   0x9   :  { %v26_v22 = vld [vmem:[%s15047_s1 + $0x40] sm:$0xff]  ;;  %v8877_v24 = vand.u32 4294901760, %v34_v18  ;;  %v6594_v25 = vld [vmem:[%s15046_s0 + $0x8] sm:$0xff]  ;;  %v28_v27 = vld [vmem:[%s15047_s1 + $0x50] sm:$0xff]  ;;  %v63_v31 = vand.u32 4294901760, %v27_v23  ;;  %v8906_v36 = vsub.f32 %v19_v1, %v39_v5  ;;  %v8922_v48 = vsub.f32 %v8813_v2, %v42_v7 }
   0xa   :  { %7232 = vmatpush3.bf16.msra.mxu0 %v8844_v13  ;;  %7376 = vmatpush3.bf16.msra.mxu1 %v8844_v13  ;;  %v60_v26 = vand.u32 4294901760, %v26_v22  ;;  %v29_v28 = vld [vmem:[%s15047_s1 + $0x58] sm:$0xff]  ;;  %v30_v29 = vld [vmem:[%s15047_s1 + $0x60] sm:$0xff]  ;;  %v8893_v30 = vpack.c.bf16 %v57_v21, %v54_v20  ;;  %v31_v32 = vld [vmem:[%s15047_s1 + $0x68] sm:$0xff]  ;;  %v8913_v38 = vand.u32 4294901760, %v6594_v25  ;;  %v66_v39 = vand.u32 4294901760, %v28_v27 }
   0xb   :  { %7233 = vmatprep.subr.bf16.mxu0 %v8766_v3  ;;  %7377 = vmatprep.subr.bf16.mxu1 %v8766_v3  ;;  %v32_v33 = vld [vmem:[%s15047_s1 + $0x70] sm:$0xff]  ;;  %v33_v34 = vld [vmem:[%s15047_s1 + $0x78] sm:$0xff]  ;;  %v8911_v37 = vsub.f32 %v34_v18, %v8877_v24  ;;  %v69_v40 = vand.u32 4294901760, %v29_v28  ;;  %v72_v41 = vand.u32 4294901760, %v30_v29  ;;  %v75_v42 = vand.u32 4294901760, %v31_v32 }
   0xc   :  { %v78_v43 = vand.u32 4294901760, %v32_v33  ;;  %v81_v44 = vand.u32 4294901760, %v33_v34  ;;  %v8917_v45 = vpack.c.bf16 %v63_v31, %v60_v26  ;;  %v129_v46 = vand.u32 4294901760, %v8904_v35 }
   0xd   :  { %v136_v47 = vand.u32 4294901760, %v8906_v36  ;;  %v15052_v49 = vand.u32 4294901760, %v8911_v37  ;;  %v8928_v50 = vsub.f32 %v6594_v25, %v8913_v38  ;;  %v8933_v51 = vsub.f32 %v8820_v6, %v45_v8 }
   0xe   :  { %7235 = vmatpush3.bf16.msra.mxu0 %v8865_v19  ;;  %7379 = vmatpush3.bf16.msra.mxu1 %v8865_v19  ;;  %v8936_v52 = vsub.f32 %v8827_v9, %v48_v14  ;;  %v8938_v53 = vpack.c.bf16 %v69_v40, %v66_v39  ;;  %v8940_v54 = vpack.c.bf16 %v75_v42, %v72_v41  ;;  %v143_v58 = vand.u32 4294901760, %v8922_v48 }
   0xf   :  { %7236 = vmatprep.subr.bf16.mxu0 %v8766_v3  ;;  %7380 = vmatprep.subr.bf16.mxu1 %v8766_v3  ;;  %v8942_v55 = vpack.c.bf16 %v81_v44, %v78_v43  ;;  %v130_v56 = vsub.f32 %v8904_v35, %v129_v46  ;;  %v137_v57 = vsub.f32 %v8906_v36, %v136_v47  ;;  %v15051_v61 = vand.u32 4294901760, %v8928_v50 }
  0x10   :  { %v8950_v59 = vsub.f32 %v8832_v10, %v51_v15  ;;  %v119_v60 = vsub.f32 %v8911_v37, %v15052_v49  ;;  %v150_v62 = vand.u32 4294901760, %v8933_v51  ;;  %v157_v63 = vand.u32 4294901760, %v8936_v52 }
  0x11   :  { %v8961_v0 = vsub.f32 %v8853_v16, %v54_v20  ;;  %v8964_v1 = vsub.f32 %v8858_v17, %v57_v21  ;;  %v8966_v2 = vsub.f32 %v26_v22, %v60_v26  ;;  %v8968_v4 = vsub.f32 %v27_v23, %v63_v31 }
  0x12   :  { %7238 = vmatpush3.bf16.msra.mxu0 %v8893_v30  ;;  %7382 = vmatpush3.bf16.msra.mxu1 %v8893_v30  ;;  %v8970_v5 = vsub.f32 %v28_v27, %v66_v39  ;;  %v8972_v6 = vsub.f32 %v29_v28, %v69_v40  ;;  %v8974_v7 = vsub.f32 %v30_v29, %v72_v41  ;;  %v164_v10 = vand.u32 4294901760, %v8950_v59 }
  0x13   :  { %7239 = vmatprep.subr.bf16.mxu0 %v8766_v3  ;;  %7383 = vmatprep.subr.bf16.mxu1 %v8766_v3  ;;  %v8976_v8 = vsub.f32 %v31_v32, %v75_v42  ;;  %v144_v9 = vsub.f32 %v8922_v48, %v143_v58  ;;  %v8982_v14 = vsub.f32 %v32_v33, %v78_v43  ;;  %v131_v16 = vand.u32 4294901760, %v130_v56 }
  0x14   :  { %v8984_v15 = vsub.f32 %v33_v34, %v81_v44  ;;  %v138_v17 = vand.u32 4294901760, %v137_v57  ;;  %v3407_v18 = vsub.f32 %v8928_v50, %v15051_v61  ;;  %v151_v20 = vsub.f32 %v8933_v51, %v150_v62 }
  0x15   :  { %v171_v21 = vand.u32 4294901760, %v8961_v0  ;;  %v178_v22 = vand.u32 4294901760, %v8964_v1  ;;  %v185_v23 = vand.u32 4294901760, %v8966_v2  ;;  %v192_v25 = vand.u32 4294901760, %v8968_v4 }
  0x16   :  { %7241 = vmatpush3.bf16.msra.mxu0 %v8917_v45  ;;  %7385 = vmatpush3.bf16.msra.mxu1 %v8917_v45  ;;  %v199_v26 = vand.u32 4294901760, %v8970_v5  ;;  %v206_v27 = vand.u32 4294901760, %v8972_v6  ;;  %v213_v28 = vand.u32 4294901760, %v8974_v7  ;;  %v220_v29 = vand.u32 4294901760, %v8976_v8 }
  0x17   :  { %7242 = vmatprep.subr.bf16.mxu0 %v8766_v3  ;;  %7386 = vmatprep.subr.bf16.mxu1 %v8766_v3  ;;  %v227_v31 = vand.u32 4294901760, %v8982_v14  ;;  %v234_v32 = vand.u32 4294901760, %v8984_v15  ;;  %v9004_v33 = vpack.c.bf16 %v136_v47, %v129_v46  ;;  %v9006_v34 = vpack.c.bf16 %v150_v62, %v143_v58 }
  0x18   :  { %v9010_v39 = vpack.c.bf16 %v164_v10, %v157_v63  ;;  %v9012_v40 = vpack.c.bf16 %v178_v22, %v171_v21  ;;  %v9014_v41 = vpack.c.bf16 %v192_v25, %v185_v23  ;;  %v9016_v42 = vpack.c.bf16 %v206_v27, %v199_v26 }
  0x19   :  { %v9020_v43 = vpack.c.bf16 %v220_v29, %v213_v28  ;;  %v9026_v44 = vpack.c.bf16 %v234_v32, %v227_v31  ;;  %v120_v46 = vand.u32 4294901760, %v119_v60  ;;  %v3408_v47 = vand.u32 4294901760, %v3407_v18 }
  0x1a   :  { %7244 = vmatpush3.bf16.msra.mxu0 %v8938_v53  ;;  %7388 = vmatpush3.bf16.msra.mxu1 %v8938_v53  ;;  %v158_v56 = vsub.f32 %v8936_v52, %v157_v63  ;;  %v165_v57 = vsub.f32 %v8950_v59, %v164_v10  ;;  %v7252_v58 = vpack.c.bf16 %v138_v17, %v131_v16  ;;  %v145_v62 = vand.u32 4294901760, %v144_v9 }
  0x1b   :  { %7245 = vmatprep.subr.bf16.mxu0 %v8766_v3  ;;  %7389 = vmatprep.subr.bf16.mxu1 %v8766_v3  ;;  %v152_v61 = vand.u32 4294901760, %v151_v20  ;;  %v172_v10 = vsub.f32 %v8961_v0, %v171_v21  ;;  %v179_v18 = vsub.f32 %v8964_v1, %v178_v22  ;;  %v193_v20 = vsub.f32 %v8968_v4, %v192_v25 }
  0x1c   :  { %v159_v49 = vand.u32 4294901760, %v158_v56  ;;  %v166_v60 = vand.u32 4294901760, %v165_v57  ;;  %v200_v21 = vsub.f32 %v8970_v5, %v199_v26  ;;  %v221_v26 = vsub.f32 %v8976_v8, %v220_v29 }
  0x1d   :  { %v7255_v63 = vpack.c.bf16 %v152_v61, %v145_v62  ;;  %v173_v16 = vand.u32 4294901760, %v172_v10  ;;  %v180_v17 = vand.u32 4294901760, %v179_v18  ;;  %v186_v61 = vsub.f32 %v8966_v2, %v185_v23 }
  0x1e   :  { %7247 = vmatpush3.bf16.msra.mxu0 %v8940_v54  ;;  %7391 = vmatpush3.bf16.msra.mxu1 %v8940_v54  ;;  %v7258_v9 = vpack.c.bf16 %v166_v60, %v159_v49  ;;  %v207_v49 = vsub.f32 %v8972_v6, %v206_v27  ;;  %v214_v23 = vsub.f32 %v8974_v7, %v213_v28  ;;  %v201_v56 = vand.u32 4294901760, %v200_v21 }
  0x1f   :  { %7248 = vmatprep.subr.bf16.mxu0 %v8766_v3  ;;  %7392 = vmatprep.subr.bf16.mxu1 %v8766_v3  ;;  %v7261_v22 = vpack.c.bf16 %v180_v17, %v173_v16  ;;  %v222_v62 = vand.u32 4294901760, %v221_v26  ;;  %v228_v28 = vsub.f32 %v8982_v14, %v227_v31  ;;  %v235_v60 = vsub.f32 %v8984_v15, %v234_v32 }
  0x20   :  { %v208_v57 = vand.u32 4294901760, %v207_v49  ;;  %v215_v27 = vand.u32 4294901760, %v214_v23  ;;  %v7276_v32 = vpack.c.bf16 %v8906_v36, %v8904_v35  ;;  %v7279_v18 = vpack.c.bf16 %v8933_v51, %v8922_v48 }
  0x21   :  { %v236_v10 = vand.u32 4294901760, %v235_v60  ;;  %v7282_v35 = vpack.c.bf16 %v8950_v59, %v8936_v52  ;;  %v7285_v36 = vpack.c.bf16 %v8964_v1, %v8961_v0  ;;  %v7288_v48 = vpack.c.bf16 %v8968_v4, %v8966_v2 }
  0x22   :  { %7250 = vmatpush3.bf16.msra.mxu0 %v8942_v55  ;;  %7394 = vmatpush3.bf16.msra.mxu1 %v8942_v55  ;;  %v7270_v29 = vpack.c.bf16 %v222_v62, %v215_v27  ;;  %v7291_v51 = vpack.c.bf16 %v8972_v6, %v8970_v5  ;;  %v7294_v52 = vpack.c.bf16 %v8976_v8, %v8974_v7  ;;  %v15137_v0 = vand.u32 4294901760, %v8911_v37 }
  0x23   :  { %7251 = vmatprep.subr.bf16.mxu0 %v8766_v3  ;;  %7395 = vmatprep.subr.bf16.mxu1 %v8766_v3  ;;  %v7297_v59 = vpack.c.bf16 %v8984_v15, %v8982_v14  ;;  %v15138_v1 = vand.u32 4294901760, %v8928_v50  ;;  %v8772_v17 = vmov 2102212464  }
  0x25   :  { %6840 = vmatmul.mubr.f32.vlgmr.msra.gmra.mrb[0].mxu0 %v120_v46  ;;  %7050 = vmatmul.mubr.f32.vlgmr.msra.gmra.mrb[0].mxu1 %v3408_v47  ;;  %v187_v46 = vand.u32 4294901760, %v186_v61  ;;  %v194_v47 = vand.u32 4294901760, %v193_v20  ;;  %v8773_v20 = vmov 920167782  }
  0x26   :  { %7253 = vmatpush3.bf16.msra.mxu0 %v7252_v58  ;;  %7397 = vmatpush3.bf16.msra.mxu1 %v7252_v58  ;;  %v7267_v58 = vpack.c.bf16 %v208_v57, %v201_v56 }
  0x27   :  { %7254 = vmatprep.subr.bf16.mxu0 %v8766_v3  ;;  %7398 = vmatprep.subr.bf16.mxu1 %v8766_v3  ;;  %v7264_v25 = vpack.c.bf16 %v194_v47, %v187_v46 }
  0x28   :  { %6874 = vmatprep.mubr.msk.f32.mxu0 %vm8767_vm0, %v8768_v11  ;;  %7084 = vmatprep.mubr.msk.f32.mxu1 %vm8767_vm0, %v8768_v11 }
  0x2a   :  { %7256 = vmatpush3.bf16.msra.mxu0 %v7255_v63  ;;  %7400 = vmatpush3.bf16.msra.mxu1 %v7255_v63  ;;  %v229_v63 = vand.u32 4294901760, %v228_v28 }
  0x2b   :  { %7257 = vmatprep.subr.bf16.mxu0 %v8766_v3  ;;  %7401 = vmatprep.subr.bf16.mxu1 %v8766_v3 }
  0x2c   :  { %v7273_v31 = vpack.c.bf16 %v236_v10, %v229_v63 }
  0x2e   :  { %7259 = vmatpush3.bf16.msra.mxu0 %v7258_v9  ;;  %7403 = vmatpush3.bf16.msra.mxu1 %v7258_v9  ;;  %v8771_v9 = vmov 2131351028  }
  0x2f   :  { %7260 = vmatprep.subr.bf16.mxu0 %v8766_v3  ;;  %7404 = vmatprep.subr.bf16.mxu1 %v8766_v3 }
  0x32   :  { %7262 = vmatpush3.bf16.msra.mxu0 %v7261_v22  ;;  %7406 = vmatpush3.bf16.msra.mxu1 %v7261_v22 }
  0x33   :  { %7263 = vmatprep.subr.bf16.mxu0 %v8766_v3  ;;  %7407 = vmatprep.subr.bf16.mxu1 %v8766_v3 }
  0x36   :  { %7265 = vmatpush3.bf16.msra.mxu0 %v7264_v25  ;;  %7409 = vmatpush3.bf16.msra.mxu1 %v7264_v25  ;;  %v8774_v25 = vmov 1326507024  }
  0x37   :  { %7266 = vmatprep.subr.bf16.mxu0 %v8766_v3  ;;  %7410 = vmatprep.subr.bf16.mxu1 %v8766_v3 }
  0x3a   :  { %7268 = vmatpush3.bf16.msra.mxu0 %v7267_v58  ;;  %7412 = vmatpush3.bf16.msra.mxu1 %v7267_v58 }
  0x3b   :  { %7269 = vmatprep.subr.bf16.mxu0 %v8766_v3  ;;  %7413 = vmatprep.subr.bf16.mxu1 %v8766_v3 }
  0x3e   :  { %7271 = vmatpush3.bf16.msra.mxu0 %v7270_v29  ;;  %7415 = vmatpush3.bf16.msra.mxu1 %v7270_v29 }
  0x3f   :  { %7272 = vmatprep.subr.bf16.mxu0 %v8766_v3  ;;  %7416 = vmatprep.subr.bf16.mxu1 %v8766_v3 }
  0x42   :  { %7274 = vmatpush3.bf16.msra.mxu0 %v7273_v31  ;;  %7418 = vmatpush3.bf16.msra.mxu1 %v7273_v31 }
  0x43   :  { %7275 = vmatprep.subr.bf16.mxu0 %v8766_v3  ;;  %7419 = vmatprep.subr.bf16.mxu1 %v8766_v3 }
  0x45   :  { %6875 = vmatmul.mubr.f32.vlgmr.msra.gmra.mrb[0].mxu0 %v8877_v24  ;;  %7085 = vmatmul.mubr.f32.vlgmr.msra.gmra.mrb[0].mxu1 %v8913_v38 }
  0x46   :  { %7277 = vmatpush3.bf16.msra.mxu0 %v7276_v32  ;;  %7421 = vmatpush3.bf16.msra.mxu1 %v7276_v32 }
  0x47   :  { %7278 = vmatprep.subr.bf16.mxu0 %v8766_v3  ;;  %7422 = vmatprep.subr.bf16.mxu1 %v8766_v3 }
  0x48   :  { %6909 = vmatprep.mubr.msk.f32.mxu0 %vm8767_vm0, %v8768_v11  ;;  %7119 = vmatprep.mubr.msk.f32.mxu1 %vm8767_vm0, %v8768_v11 }
  0x4a   :  { %7280 = vmatpush3.bf16.msra.mxu0 %v7279_v18  ;;  %7424 = vmatpush3.bf16.msra.mxu1 %v7279_v18 }
  0x4b   :  { %7281 = vmatprep.subr.bf16.mxu0 %v8766_v3  ;;  %7425 = vmatprep.subr.bf16.mxu1 %v8766_v3 }
  0x4e   :  { %7283 = vmatpush3.bf16.msra.mxu0 %v7282_v35  ;;  %7427 = vmatpush3.bf16.msra.mxu1 %v7282_v35 }
  0x4f   :  { %7284 = vmatprep.subr.bf16.mxu0 %v8766_v3  ;;  %7428 = vmatprep.subr.bf16.mxu1 %v8766_v3 }
  0x52   :  { %7286 = vmatpush3.bf16.msra.mxu0 %v7285_v36  ;;  %7430 = vmatpush3.bf16.msra.mxu1 %v7285_v36 }
  0x53   :  { %7287 = vmatprep.subr.bf16.mxu0 %v8766_v3  ;;  %7431 = vmatprep.subr.bf16.mxu1 %v8766_v3 }
  0x56   :  { %7289 = vmatpush3.bf16.msra.mxu0 %v7288_v48  ;;  %7433 = vmatpush3.bf16.msra.mxu1 %v7288_v48 }
  0x57   :  { %7290 = vmatprep.subr.bf16.mxu0 %v8766_v3  ;;  %7434 = vmatprep.subr.bf16.mxu1 %v8766_v3 }
  0x5a   :  { %7292 = vmatpush3.bf16.msra.mxu0 %v7291_v51  ;;  %7436 = vmatpush3.bf16.msra.mxu1 %v7291_v51 }
  0x5b   :  { %7293 = vmatprep.subr.bf16.mxu0 %v8766_v3  ;;  %7437 = vmatprep.subr.bf16.mxu1 %v8766_v3 }
  0x5e   :  { %7295 = vmatpush3.bf16.msra.mxu0 %v7294_v52  ;;  %7439 = vmatpush3.bf16.msra.mxu1 %v7294_v52 }
  0x5f   :  { %7296 = vmatprep.subr.bf16.mxu0 %v8766_v3  ;;  %7440 = vmatprep.subr.bf16.mxu1 %v8766_v3 }
  0x62   :  { %7298 = vmatpush3.bf16.msra.mxu0 %v7297_v59  ;;  %7442 = vmatpush3.bf16.msra.mxu1 %v7297_v59 }
  0x63   :  { %7299 = vmatprep.subr.bf16.mxu0 %v8766_v3  ;;  %7443 = vmatprep.subr.bf16.mxu1 %v8766_v3 }
  0x65   :  { %6910 = vmatmul.mubr.f32.vlgmr.msra.gmra.mrb[0].mxu0 %v8911_v37  ;;  %7120 = vmatmul.mubr.f32.vlgmr.msra.gmra.mrb[0].mxu1 %v8928_v50 }
  0x66   :  { %7301 = vmatpush3.bf16.msra.mxu0 %v8838_v12  ;;  %7445 = vmatpush3.bf16.msra.mxu1 %v8838_v12 }
  0x67   :  { %7302 = vmatprep.subr.bf16.mxu0 %v8766_v3  ;;  %7446 = vmatprep.subr.bf16.mxu1 %v8766_v3 }
  0x68   :  { %6944 = vmatprep.mubr.msk.f32.mxu0 %vm8767_vm0, %v8768_v11  ;;  %7154 = vmatprep.mubr.msk.f32.mxu1 %vm8767_vm0, %v8768_v11 }
  0x6a   :  { %7304 = vmatpush3.bf16.msra.mxu0 %v8844_v13  ;;  %7448 = vmatpush3.bf16.msra.mxu1 %v8844_v13 }
  0x6b   :  { %7305 = vmatprep.subr.bf16.mxu0 %v8766_v3  ;;  %7449 = vmatprep.subr.bf16.mxu1 %v8766_v3 }
  0x6e   :  { %7307 = vmatpush3.bf16.msra.mxu0 %v8865_v19  ;;  %7451 = vmatpush3.bf16.msra.mxu1 %v8865_v19 }
  0x6f   :  { %7308 = vmatprep.subr.bf16.mxu0 %v8766_v3  ;;  %7452 = vmatprep.subr.bf16.mxu1 %v8766_v3 }
  0x72   :  { %7310 = vmatpush3.bf16.msra.mxu0 %v8893_v30  ;;  %7454 = vmatpush3.bf16.msra.mxu1 %v8893_v30 }
  0x73   :  { %7311 = vmatprep.subr.bf16.mxu0 %v8766_v3  ;;  %7455 = vmatprep.subr.bf16.mxu1 %v8766_v3 }
  0x76   :  { %7313 = vmatpush3.bf16.msra.mxu0 %v8917_v45  ;;  %7457 = vmatpush3.bf16.msra.mxu1 %v8917_v45 }
  0x77   :  { %7314 = vmatprep.subr.bf16.mxu0 %v8766_v3  ;;  %7458 = vmatprep.subr.bf16.mxu1 %v8766_v3 }
  0x7a   :  { %7316 = vmatpush3.bf16.msra.mxu0 %v8938_v53  ;;  %7460 = vmatpush3.bf16.msra.mxu1 %v8938_v53 }
  0x7b   :  { %7317 = vmatprep.subr.bf16.mxu0 %v8766_v3  ;;  %7461 = vmatprep.subr.bf16.mxu1 %v8766_v3 }
  0x7e   :  { %7319 = vmatpush3.bf16.msra.mxu0 %v8940_v54  ;;  %7463 = vmatpush3.bf16.msra.mxu1 %v8940_v54 }
  0x7f   :  { %7320 = vmatprep.subr.bf16.mxu0 %v8766_v3  ;;  %7464 = vmatprep.subr.bf16.mxu1 %v8766_v3 }
  0x82   :  { %7322 = vmatpush3.bf16.msra.mxu0 %v8942_v55  ;;  %7466 = vmatpush3.bf16.msra.mxu1 %v8942_v55 }
  0x83   :  { %7323 = vmatprep.subr.bf16.mxu0 %v8766_v3  ;;  %7467 = vmatprep.subr.bf16.mxu1 %v8766_v3 }
  0x85   :  { %6945 = vmatmul.mubr.f32.vlgmr.msra.gmra.mrb[0].mxu0 %v15137_v0  ;;  %7155 = vmatmul.mubr.f32.vlgmr.msra.gmra.mrb[0].mxu1 %v15138_v1 }
  0x86   :  { %7325 = vmatpush3.bf16.msra.mxu0 %v9004_v33  ;;  %7469 = vmatpush3.bf16.msra.mxu1 %v9004_v33 }
  0x87   :  { %7326 = vmatprep.subr.bf16.mxu0 %v8766_v3  ;;  %7470 = vmatprep.subr.bf16.mxu1 %v8766_v3 }
  0x88   :  { %6979 = vmatprep.mubr.msk.f32.mxu0 %vm8767_vm0, %v8768_v11  ;;  %7189 = vmatprep.mubr.msk.f32.mxu1 %vm8767_vm0, %v8768_v11 }
  0x8a   :  { %7328 = vmatpush3.bf16.msra.mxu0 %v9006_v34  ;;  %7472 = vmatpush3.bf16.msra.mxu1 %v9006_v34 }
  0x8b   :  { %7329 = vmatprep.subr.bf16.mxu0 %v8766_v3  ;;  %7473 = vmatprep.subr.bf16.mxu1 %v8766_v3 }
  0x8e   :  { %7331 = vmatpush3.bf16.msra.mxu0 %v9010_v39  ;;  %7475 = vmatpush3.bf16.msra.mxu1 %v9010_v39  ;;  %v8769_v39 = vmov 683565275  }
  0x8f   :  { %7332 = vmatprep.subr.bf16.mxu0 %v8766_v3  ;;  %7476 = vmatprep.subr.bf16.mxu1 %v8766_v3 }
  0x92   :  { %7334 = vmatpush3.bf16.msra.mxu0 %v9012_v40  ;;  %7478 = vmatpush3.bf16.msra.mxu1 %v9012_v40 }
  0x93   :  { %7335 = vmatprep.subr.bf16.mxu0 %v8766_v3  ;;  %7479 = vmatprep.subr.bf16.mxu1 %v8766_v3 }
  0x96   :  { %7337 = vmatpush3.bf16.msra.mxu0 %v9014_v41  ;;  %7481 = vmatpush3.bf16.msra.mxu1 %v9014_v41 }
  0x97   :  { %7338 = vmatprep.subr.bf16.mxu0 %v8766_v3  ;;  %7482 = vmatprep.subr.bf16.mxu1 %v8766_v3 }
  0x9a   :  { %7340 = vmatpush3.bf16.msra.mxu0 %v9016_v42  ;;  %7484 = vmatpush3.bf16.msra.mxu1 %v9016_v42 }
  0x9b   :  { %7341 = vmatprep.subr.bf16.mxu0 %v8766_v3  ;;  %7485 = vmatprep.subr.bf16.mxu1 %v8766_v3 }
  0x9e   :  { %7343 = vmatpush3.bf16.msra.mxu0 %v9020_v43  ;;  %7487 = vmatpush3.bf16.msra.mxu1 %v9020_v43  ;;  %v8770_v43 = vmov 2475754826  }
  0x9f   :  { %7344 = vmatprep.subr.bf16.mxu0 %v8766_v3  ;;  %7488 = vmatprep.subr.bf16.mxu1 %v8766_v3 }
  0xa2   :  { %7346 = vmatpush3.bf16.msra.mxu0 %v9026_v44  ;;  %7490 = vmatpush3.bf16.msra.mxu1 %v9026_v44 }
  0xa3   :  { %7347 = vmatprep.subr.bf16.mxu0 %v8766_v3  ;;  %7491 = vmatprep.subr.bf16.mxu1 %v8766_v3 }
  0xa5   :  { %6980 = vmatmul.mubr.f32.vlgmr.msra.gmra.mrb[0].mxu0 %v8877_v24  ;;  %7190 = vmatmul.mubr.f32.vlgmr.msra.gmra.mrb[0].mxu1 %v8913_v38 }
  0xa6   :  { %7349 = vmatpush3.bf16.msra.mxu0 %v8838_v12  ;;  %7493 = vmatpush3.bf16.msra.mxu1 %v8838_v12 }
  0xa7   :  { %7350 = vmatprep.subr.bf16.mxu0 %v8766_v3  ;;  %7494 = vmatprep.subr.bf16.mxu1 %v8766_v3 }
  0xa8   :  { %7014 = vmatprep.mubr.msk.f32.mxu0 %vm8767_vm0, %v8768_v11  ;;  %7224 = vmatprep.mubr.msk.f32.mxu1 %vm8767_vm0, %v8768_v11 }
  0xaa   :  { %7352 = vmatpush3.bf16.msra.mxu0 %v8844_v13  ;;  %7496 = vmatpush3.bf16.msra.mxu1 %v8844_v13 }
  0xab   :  { %7353 = vmatprep.subr.bf16.mxu0 %v8766_v3  ;;  %7497 = vmatprep.subr.bf16.mxu1 %v8766_v3 }
  0xae   :  { %7355 = vmatpush3.bf16.msra.mxu0 %v8865_v19  ;;  %7499 = vmatpush3.bf16.msra.mxu1 %v8865_v19 }
  0xaf   :  { %7356 = vmatprep.subr.bf16.mxu0 %v8766_v3  ;;  %7500 = vmatprep.subr.bf16.mxu1 %v8766_v3 }
  0xb2   :  { %7358 = vmatpush3.bf16.msra.mxu0 %v8893_v30  ;;  %7502 = vmatpush3.bf16.msra.mxu1 %v8893_v30 }
  0xb3   :  { %7359 = vmatprep.subr.bf16.mxu0 %v8766_v3  ;;  %7503 = vmatprep.subr.bf16.mxu1 %v8766_v3 }
  0xb6   :  { %7361 = vmatpush3.bf16.msra.mxu0 %v8917_v45  ;;  %7505 = vmatpush3.bf16.msra.mxu1 %v8917_v45 }
  0xb7   :  { %7362 = vmatprep.subr.bf16.mxu0 %v8766_v3  ;;  %7506 = vmatprep.subr.bf16.mxu1 %v8766_v3 }
  0xba   :  { %7364 = vmatpush3.bf16.msra.mxu0 %v8938_v53  ;;  %7508 = vmatpush3.bf16.msra.mxu1 %v8938_v53 }
  0xbb   :  { %7365 = vmatprep.subr.bf16.mxu0 %v8766_v3  ;;  %7509 = vmatprep.subr.bf16.mxu1 %v8766_v3 }
  0xbe   :  { %7367 = vmatpush3.bf16.msra.mxu0 %v8940_v54  ;;  %7511 = vmatpush3.bf16.msra.mxu1 %v8940_v54 }
  0xbf   :  { %7368 = vmatprep.subr.bf16.mxu0 %v8766_v3  ;;  %7512 = vmatprep.subr.bf16.mxu1 %v8766_v3 }
  0xc2   :  { %7370 = vmatpush3.bf16.msra.mxu0 %v8942_v55  ;;  %7514 = vmatpush3.bf16.msra.mxu1 %v8942_v55 }
  0xc5   :  { %7015 = vmatmul.mubr.f32.vlgmr.msra.gmra.mrb[0].mxu0 %v8877_v24  ;;  %7225 = vmatmul.mubr.f32.vlgmr.msra.gmra.mrb[0].mxu1 %v8913_v38 }
 0x198   :  { %v9224_v11 = vpop.f32.mrb[0].mxu0  ;;  %v9226_v12 = vpop.f32.mrb[0].mxu1 }
 0x199   :  { %v676_v13 = vand.u32 2147483647, %v9224_v11  ;;  %v679_v19 = vand.u32 2139095040, %v9224_v11  ;;  %v7016_v30 = vpop.f32.mrb[1].mxu0  ;;  %v7226_v37 = vpop.f32.mrb[1].mxu1  ;;  %v3967_v3 = vand.u32 2139095040, %v9226_v12 }
 0x19a   :  { %v3964_v24 = vand.u32 2147483647, %v9226_v12  ;;  %vm678_vm15 = vcmp.lt.s32.totalorder %v9224_v11, 0 }
 0x19b   :  { %v680_v45 = vshrl.u32 %v679_v19, 23  ;;  %v683_v50 = vand.u32 8388607, %v676_v13  ;;  %v3968_v53 = vshrl.u32 %v3967_v3, 23  ;;  %vm677_vm0 = vcmp.le.f32.partialorder %v676_v13, 0.7853982 }
 0x19c   :  { %v9236_v4 = vand.u32 8388607, %v3964_v24  ;;  %v15053_v13 = vlaneseq }
 0x19d   :  { %v6586_v38 = vadd.s32 4294967169, %v680_v45  ;;  %v6595_v54 = vadd.s32 4294967169, %v3968_v53  ;;  %v684_v2 = vor.u32 8388608, %v683_v50 }
 0x19e   :  { %v3972_v33 = vor.u32 8388608, %v9236_v4 }
 0x19f   :  { %v686_v55 = vadd.s32 1, %v6586_v38  ;;  %v3974_v5 = vadd.s32 1, %v6595_v54  ;;  %v9238_v15 = vshll.u32 %v684_v2, 8 }
 0x1a1   :  { %vm687_vm1 = vcmp.gt.s32.totalorder %v686_v55, 0  ;;  %vm3975_vm2 = vcmp.gt.s32.totalorder %v3974_v5, 0 }
 0x1a2   :  { %v688_v6 = vsel %vm687_vm1, %v686_v55, 0  ;;  %v3976_v14 = vsel %vm3975_vm2, %v3974_v5, 0  ;;  %v4012_v5 = vshll.u32 %v3972_v33, 8  ;;  %vm3966_vm1 = vcmp.lt.s32.totalorder %v9226_v12, 0 }
 0x1a3   :  { %v689_v7 = vshrl.u32 %v688_v6, 5  ;;  %v690_v8 = vand.u32 31, %v688_v6  ;;  %v9241_v41 = vshrl.u32 %v3976_v14, 5  ;;  %v3978_v42 = vand.u32 31, %v3976_v14 }
 0x1a4   :  { %vm3965_vm2 = vcmp.le.f32.partialorder %v3964_v24, 0.7853982 }
 0x1a5   :  { %v691_v34 = vsub.s32 32, %v690_v8  ;;  %v693_v40 = vshll.u32 %v8769_v39, %v690_v8  ;;  %v696_v44 = vshll.u32 %v8770_v43, %v690_v8  ;;  %v699_v16 = vshll.u32 %v8771_v9, %v690_v8 }
 0x1a6   :  { %v702_v61 = vshll.u32 %v8772_v17, %v690_v8  ;;  %v705_v21 = vshll.u32 %v8773_v20, %v690_v8  ;;  %vm708_vm3 = vcmp.lt.s32.totalorder %v689_v7, 1  ;;  %vm709_vm4 = vcmp.lt.s32.totalorder %v689_v7, 2 }
 0x1a7   :  { %v694_v22 = vshrl.u32 %v8770_v43, %v691_v34  ;;  %v697_v46 = vshrl.u32 %v8771_v9, %v691_v34  ;;  %v700_v47 = vshrl.u32 %v8772_v17, %v691_v34  ;;  %v692_v49 = vshrl.u32 %v8769_v39, %v691_v34 }
 0x1a8   :  { %v703_v23 = vshrl.u32 %v8773_v20, %v691_v34  ;;  %v706_v56 = vshrl.u32 %v8774_v25, %v691_v34  ;;  %v3979_v58 = vsub.s32 32, %v3978_v42  ;;  %vm710_vm5 = vcmp.lt.s32.totalorder %v689_v7, 3 }
 0x1a9   :  { %v695_v57 = vor.u32 %v694_v22, %v693_v40  ;;  %v698_v26 = vor.u32 %v697_v46, %v696_v44  ;;  %v701_v27 = vor.u32 %v700_v47, %v699_v16  ;;  %vm711_vm6 = vcmp.lt.s32.totalorder %v689_v7, 4 }
 0x1aa   :  { %v704_v62 = vor.u32 %v703_v23, %v702_v61  ;;  %v707_v28 = vor.u32 %v706_v56, %v705_v21  ;;  %v3981_v35 = vshll.u32 %v8769_v39, %v3978_v42  ;;  %v3982_v51 = vshrl.u32 %v8770_v43, %v3979_v58 }
 0x1ab   :  { %v712_v60 = vsel %vm708_vm3, %v692_v49, %v695_v57  ;;  %v713_v29 = vsel %vm711_vm6, %v701_v27, 2102212464  ;;  %v716_v63 = vsel %vm708_vm3, %v695_v57, %v698_v26  ;;  %v720_v10 = vsel %vm708_vm3, %v698_v26, %v701_v27 }
 0x1ac   :  { %v714_v31 = vsel %vm710_vm5, %v698_v26, %v713_v29  ;;  %v717_v32 = vsel %vm711_vm6, %v704_v62, 920167782  ;;  %v721_v18 = vsel %vm711_vm6, %v707_v28, 1326507024  ;;  %v3984_v52 = vshll.u32 %v8770_v43, %v3978_v42 }
 0x1ad   :  { %v718_v36 = vsel %vm710_vm5, %v701_v27, %v717_v32  ;;  %v722_v48 = vsel %vm710_vm5, %v704_v62, %v721_v18  ;;  %v715_v59 = vsel %vm709_vm4, %v712_v60, %v714_v31  ;;  %v3985_v19 = vshrl.u32 %v8771_v9, %v3979_v58 }
 0x1ae   :  { %v719_v0 = vsel %vm709_vm4, %v716_v63, %v718_v36  ;;  %v723_v1 = vsel %vm709_vm4, %v720_v10, %v722_v48  ;;  %v3983_v50 = vor.u32 %v3982_v51, %v3981_v35  ;;  %v3987_v38 = vshll.u32 %v8771_v9, %v3978_v42 }
 0x1af   :  { %v9250_v30 = vmul.u32.u64.low %v9238_v15, %v723_v1  ;;  %v9251_v37 = vmul.u32.u64.high %v9238_v15, %v723_v1, %v9250_v30  ;;  %v9254_v3 = vmul.u32.u64.low %v9238_v15, %v719_v0  ;;  %v9255_v45 = vmul.u32.u64.high %v9238_v15, %v719_v0, %v9254_v3 }
 0x1b0   :  { %v3986_v53 = vor.u32 %v3985_v19, %v3984_v52  ;;  %v3988_v54 = vshrl.u32 %v8772_v17, %v3979_v58  ;;  %v3990_v55 = vshll.u32 %v8772_v17, %v3978_v42  ;;  %v3991_v2 = vshrl.u32 %v8773_v20, %v3979_v58 }
 0x1b1   :  { %v3994_v4 = vshrl.u32 %v8774_v25, %v3979_v58  ;;  %v731_v6 = vmul.u32 %v9238_v15, %v715_v59  ;;  %v3980_v7 = vshrl.u32 %v8769_v39, %v3979_v58  ;;  %v3993_v14 = vshll.u32 %v8773_v20, %v3978_v42 }
 0x1b2   :  { %v3989_v8 = vor.u32 %v3988_v54, %v3987_v38  ;;  %vm733_vm7 = vc.u32 %v9251_v37, %v9254_v3  ;;  %v734_v34 = vadd.s32 1, %v9255_v45  ;;  %v3992_v40 = vor.u32 %v3991_v2, %v3990_v55 }
 0x1b3   :  { %vm3996_vm8 = vcmp.lt.s32.totalorder %v9241_v41, 1  ;;  %v3995_v43 = vor.u32 %v3994_v4, %v3993_v14  ;;  %vm3998_vm9 = vcmp.lt.s32.totalorder %v9241_v41, 3  ;;  %vm3999_vm10 = vcmp.lt.s32.totalorder %v9241_v41, 4 }
 0x1b4   :  { %v4004_v44 = vsel %vm3996_vm8, %v3983_v50, %v3986_v53  ;;  %v735_v33 = vsel %vm733_vm7, %v734_v34, %v9255_v45  ;;  %v4001_v9 = vsel %vm3999_vm10, %v3989_v8, 2102212464  ;;  %v4005_v15 = vsel %vm3999_vm10, %v3992_v40, 920167782 }
 0x1b5   :  { %v4008_v39 = vsel %vm3996_vm8, %v3986_v53, %v3989_v8  ;;  %v736_v16 = vadd.s32 %v735_v33, %v731_v6  ;;  %vm3997_vm11 = vcmp.lt.s32.totalorder %v9241_v41, 2  ;;  %v4006_v42 = vsel %vm3998_vm9, %v3989_v8, %v4005_v15 }
 0x1b6   :  { %v4009_v17 = vsel %vm3999_vm10, %v3995_v43, 1326507024  ;;  %v4000_v61 = vsel %vm3996_vm8, %v3980_v7, %v3983_v50  ;;  %v4002_v20 = vsel %vm3998_vm9, %v3986_v53, %v4001_v9  ;;  %v4007_v21 = vsel %vm3997_vm11, %v4004_v44, %v4006_v42 }
 0x1b7   :  { %v4010_v22 = vsel %vm3998_vm9, %v3992_v40, %v4009_v17  ;;  %v737_v46 = vadd.s32 536870912, %v736_v16  ;;  %v9265_v49 = vmul.u32.u64.low %v4012_v5, %v4007_v21  ;;  %v9266_v23 = vmul.u32.u64.high %v4012_v5, %v4007_v21, %v9265_v49 }
 0x1b8   :  { %v4011_v47 = vsel %vm3997_vm11, %v4008_v39, %v4010_v22  ;;  %v4003_v26 = vsel %vm3997_vm11, %v4000_v61, %v4002_v20  ;;  %v732_v52 = vadd.s32 %v9254_v3, %v9251_v37  ;;  %vm768_vm9 = vweird.f32 %v9224_v11 }
 0x1b9   :  { %v9268_v25 = vmul.u32.u64.low %v4012_v5, %v4011_v47  ;;  %v9269_v56 = vmul.u32.u64.high %v4012_v5, %v4011_v47, %v9268_v25  ;;  %v738_v57 = vshrl.u32 %v737_v46, 30  ;;  %v4022_v58 = vadd.s32 1, %v9266_v23 }
 0x1ba   :  { %v4019_v41 = vmul.u32 %v4012_v5, %v4003_v26 }
 0x1bb   :  { %v739_v27 = vshll.u32 %v738_v57, 30  ;;  %vm4021_vm12 = vc.u32 %v9269_v56, %v9265_v49  ;;  %v4020_v6 = vadd.s32 %v9265_v49, %v9269_v56  ;;  %v762_v3 = vsub.s32 4, %v738_v57 }
 0x1bc   :  { %v4023_v28 = vsel %vm4021_vm12, %v4022_v58, %v9266_v23  ;;  %v8775_v49 = vmov 1966171168  }
 0x1bd   :  { %v740_v62 = vsub.s32 %v736_v16, %v739_v27  ;;  %v4024_v60 = vadd.s32 %v4023_v28, %v4019_v41  ;;  %v763_v15 = vsel %vm678_vm15, %v762_v3, %v738_v57  ;;  %v784_v23 = vunpack.c.l.s4 %v8775_v49 }
 0x1be   :  { %v765_v42 = vsel %vm677_vm0, 0, %v763_v15 }
 0x1bf   :  { %v742_v29 = vsub.s32 0, %v740_v62  ;;  %v4025_v63 = vadd.s32 536870912, %v4024_v60  ;;  %v769_v22 = vadd.s32 3, %v765_v42  ;;  %v924_v57 = vand.u32 3, %v765_v42 }
 0x1c0   :  { %v785_v28 = vunpack.c.0.s8 %v784_v23 }
 0x1c1   :  { %v6587_v10 = vmin.u32 %v742_v29, %v740_v62  ;;  %v4026_v31 = vshrl.u32 %v4025_v63, 30  ;;  %v770_v56 = vand.u32 3, %v769_v22  ;;  %vm929_vm4 = vcmp.eq.s32.totalorder %v924_v57, 2 }
 0x1c2   :  { %vm926_vm6 = vcmp.eq.s32.totalorder %v924_v57, 0  ;;  %vm925_vm8 = vcmp.lt.s32.totalorder %v924_v57, 2 }
 0x1c3   :  { %v744_v32 = vclz %v6587_v10  ;;  %v4027_v18 = vshll.u32 %v4026_v31, 30  ;;  %v4050_v20 = vsub.s32 4, %v4026_v31  ;;  %vm775_vm3 = vcmp.eq.s32.totalorder %v770_v56, 2 }
 0x1c4   :  { %vm772_vm5 = vcmp.eq.s32.totalorder %v770_v56, 0  ;;  %vm771_vm7 = vcmp.lt.s32.totalorder %v770_v56, 2 }
 0x1c5   :  { %v6588_v35 = vadd.s32 4294967294, %v744_v32  ;;  %v4028_v36 = vsub.s32 %v4024_v60, %v4027_v18  ;;  %v4051_v47 = vsel %vm3966_vm1, %v4050_v20, %v4026_v31  ;;  %v9285_v60 = vshrl.u32 %v15053_v13, 7 }
 0x1c6   :  { %v4053_v27 = vsel %vm3965_vm2, 0, %v4051_v47 }
 0x1c7   :  { %vm6589_vm13 = vcmp.lt.s32.totalorder %v6588_v35, 0  ;;  %v4030_v51 = vsub.s32 0, %v4028_v36  ;;  %15139 = vst [vmem:[#allocation5_spill] sm:$0xff] %v9285_v60  ;;  %v4057_v63 = vadd.s32 3, %v4053_v27 }
 0x1c8   :  { %v747_v48 = vsel %vm6589_vm13, 0, %v6588_v35  ;;  %v9289_v35 = vsub.s32 %v785_v28, %v9285_v60  ;;  %v9364_v28 = vld [vmem:[%s15049_s3 + $0x18] sm:$0xff] }
 0x1c9   :  { %v748_v59 = vsub.s32 32, %v747_v48  ;;  %v752_v0 = vsub.s32 4294967266, %v747_v48  ;;  %v6596_v1 = vmin.u32 %v4030_v51, %v4028_v36  ;;  %v749_v19 = vshll.u32 %v740_v62, %v747_v48 }
 0x1cb   :  { %v750_v30 = vshrl.u32 %v732_v52, %v748_v59  ;;  %v753_v45 = vadd.s32 127, %v752_v0  ;;  %v4032_v50 = vclz %v6596_v1  ;;  %v9291_v52 = vand.u32 3, %v4057_v63 }
 0x1cc   :  { %v9293_v1 = vand.u32 3, %v4053_v27 }
 0x1cd   :  { %v751_v53 = vor.u32 %v750_v30, %v749_v19  ;;  %v754_v38 = vshll.u32 %v753_v45, 23  ;;  %v6597_v54 = vadd.s32 4294967294, %v4032_v50  ;;  %vm4063_vm10 = vcmp.eq.s32.totalorder %v9291_v52, 2 }
 0x1ce   :  { %vm4060_vm11 = vcmp.eq.s32.totalorder %v9291_v52, 0  ;;  %vm4214_vm12 = vcmp.eq.s32.totalorder %v9293_v1, 0  ;;  %vm4217_vm13 = vcmp.eq.s32.totalorder %v9293_v1, 2 }
 0x1cf   :  { %v755_v55 = vor.u32 4788187, %v754_v38  ;;  %vm6598_vm14 = vcmp.lt.s32.totalorder %v6597_v54, 0  ;;  %v758_v4 = vcvt.s32.f32 %v751_v53  ;;  %v9300_v38 = vsub.s32 0, %v9285_v60 }
 0x1d0   :  { %v4035_v5 = vsel %vm6598_vm14, 0, %v6597_v54  ;;  %vm4059_vm14 = vcmp.lt.s32.totalorder %v9291_v52, 2 }
 0x1d1   :  { %v756_v2 = vand.u32 2147483647, %v755_v55  ;;  %v4036_v7 = vsub.s32 32, %v4035_v5  ;;  %v4040_v8 = vsub.s32 4294967266, %v4035_v5  ;;  %v4037_v14 = vshll.u32 %v4028_v36, %v4035_v5 }
 0x1d3   :  { %v759_v37 = vmul.f32 %v758_v4, %v756_v2  ;;  %v4038_v34 = vshrl.u32 %v4020_v6, %v4036_v7  ;;  %v4041_v40 = vadd.s32 127, %v4040_v8 }
 0x1d5   :  { %v760_v43 = vxor.u32 2147483648, %v759_v37  ;;  %v4039_v44 = vor.u32 %v4038_v34, %v4037_v14  ;;  %v4042_v33 = vshll.u32 %v4041_v40, 23 }
 0x1d7   :  { %v761_v9 = vsel %vm678_vm15, %v760_v43, %v759_v37  ;;  %v4043_v16 = vor.u32 4788187, %v4042_v33  ;;  %v4046_v61 = vcvt.s32.f32 %v4039_v44  ;;  %vm4213_vm15 = vcmp.lt.s32.totalorder %v9293_v1, 2 }
 0x1d8   :  { %v764_v39 = vsel %vm677_vm0, %v9224_v11, %v761_v9  ;;  %vm4056_vm0 = vweird.f32 %v9226_v12 }
 0x1d9   :  { %7556 = vcosq.f32 %v764_v39  ;;  %v4044_v17 = vand.u32 2147483647, %v4043_v16 }
 0x1da   :  { %7558 = vsinq.f32 %v764_v39 }
 0x1db   :  { %v4047_v21 = vmul.f32 %v4046_v61, %v4044_v17 }
 0x1dd   :  { %v4048_v46 = vxor.u32 2147483648, %v4047_v21 }
 0x1df   :  { %v4049_v25 = vsel %vm3966_vm1, %v4048_v46, %v4047_v21  ;;  %vm2684_vm1 = vcmask 786112  }
 0x1e0   :  { %v4052_v26 = vsel %vm3965_vm2, %v9226_v12, %v4049_v25  ;;  %vm2965_vm2 = vcmask 917312  }
 0x1e1   :  { %7560 = vcosq.f32 %v4052_v26 }
 0x1e2   :  { %7562 = vsinq.f32 %v4052_v26  ;;  %v9347_v26 = vld [vmem:[%s15048_s2 + $0x18] sm:$0xff] }
 0x1e3   :  { %v7557_v58 = vpop.eup %7556 }
 0x1e4   :  { %v7559_v41 = vpop.eup %7558  ;;  %v776_v62 = vxor.u32 2147483648, %v7557_v58 }
 0x1e5   :  { %v773_v29 = vxor.u32 2147483648, %v7559_v41 }
 0x1e6   :  { %v777_v24 = vsel %vm775_vm3, %v776_v62, %v7559_v41  ;;  %v931_v10 = vsel %vm929_vm4, %v776_v62, %v7559_v41  ;;  %vm3246_vm3 = vcmask 1048512   ;;  %vm1272_vm4 = vcmask 130112  }
 0x1e7   :  { %v774_v31 = vsel %vm772_vm5, %v7557_v58, %v773_v29  ;;  %v928_v32 = vsel %vm926_vm6, %v7557_v58, %v773_v29  ;;  %v9369_v29 = vld [vmem:[%s15048_s2] sm:$0xff]  ;;  %vm1560_vm5 = vcmask 261312   ;;  %vm1841_vm6 = vcmask 392512  }
 0x1e8   :  { %v778_v18 = vsel %vm771_vm7, %v774_v31, %v777_v24  ;;  %v932_v36 = vsel %vm925_vm8, %v928_v32, %v931_v10  ;;  %v9386_v32 = vld [vmem:[%s15049_s3] sm:$0xff]  ;;  %vm2122_vm7 = vcmask 523712   ;;  %vm2403_vm8 = vcmask 654912  }
 0x1e9   :  { %v779_v48 = vsel %vm768_vm9, nan, %v778_v18  ;;  %v933_v51 = vsel %vm768_vm9, nan, %v932_v36  ;;  %vm1337_vm9 = vcmask 1041409  }
 0x1ea   :  { %v780_v59 = vmul.f32 0.5, %v779_v48  ;;  %v934_v0 = vmul.f32 0.5, %v933_v51 }
 0x1eb   :  { %v9295_v19 = vpop.eup %7560 }
 0x1ec   :  { %v782_v30 = vcombine.high %v780_v59, %v780_v59  ;;  %v789_v45 = vrot.slane %v780_v59, %v9289_v35  ;;  %v936_v50 = vcombine.high %v934_v0, %v934_v0  ;;  %v943_v11 = vrot.slane %v934_v0, %v9289_v35  ;;  %v7563_v53 = vpop.eup %7562 }
 0x1ed   :  { %v4064_v54 = vxor.u32 2147483648, %v9295_v19  ;;  %v4061_v8 = vxor.u32 2147483648, %v7563_v53 }
 0x1ee   :  { %v796_v55 = vrot.slane %v782_v30, %v9289_v35  ;;  %v797_v2 = vcombine.high %v789_v45, %v789_v45  ;;  %v805_v4 = vrot.slane %v789_v45, %v9289_v35  ;;  %v950_v5 = vrot.slane %v936_v50, %v9289_v35  ;;  %v9415_v45 = vld [vmem:[%s15048_s2 + $0x28] sm:$0xff] }
 0x1ef   :  { %v951_v6 = vcombine.high %v943_v11, %v943_v11  ;;  %v959_v7 = vrot.slane %v943_v11, %v9289_v35  ;;  %v4065_v37 = vsel %vm4063_vm10, %v4064_v54, %v7563_v53  ;;  %v4062_v18 = vsel %vm4060_vm11, %v9295_v19, %v4061_v8 }
 0x1f0   :  { %v798_v3 = vcombine.high %v796_v55, %v796_v55  ;;  %v812_v14 = vrot.slane %v796_v55, %v9289_v35  ;;  %v819_v34 = vrot.slane %v797_v2, %v9289_v35  ;;  %v827_v40 = vcombine.high %v805_v4, %v805_v4 }
 0x1f1   :  { %v952_v43 = vcombine.high %v950_v5, %v950_v5  ;;  %v966_v44 = vrot.slane %v950_v5, %v9289_v35  ;;  %v973_v33 = vrot.slane %v951_v6, %v9289_v35  ;;  %v981_v9 = vcombine.high %v959_v7, %v959_v7  ;;  %v9437_v5 = vld [vmem:[%s15049_s3 + $0x28] sm:$0xff] }
 0x1f2   :  { %v826_v15 = vrot.slane %v798_v3, %v9289_v35  ;;  %v828_v39 = vcombine.high %v812_v14, %v812_v14  ;;  %v829_v16 = vcombine.high %v819_v34, %v819_v34  ;;  %v9320_v42 = vrot.slane %v805_v4, %v9300_v38  ;;  %v9448_v3 = vld [vmem:[%s15048_s2 + $0x8] sm:$0xff] }
 0x1f3   :  { %v980_v17 = vrot.slane %v952_v43, %v9289_v35  ;;  %v982_v61 = vcombine.high %v966_v44, %v966_v44  ;;  %v983_v20 = vcombine.high %v973_v33, %v973_v33  ;;  %v9324_v21 = vrot.slane %v819_v34, %v9300_v38 }
 0x1f4   :  { %v830_v22 = vcombine.high %v826_v15, %v826_v15  ;;  %v9327_v46 = vrot.slane %v827_v40, %v9300_v38  ;;  %v9330_v47 = vrot.slane %v829_v16, %v9300_v38  ;;  %v9333_v49 = vrot.slane %v812_v14, %v9300_v38 }
 0x1f5   :  { %15140 = vst [vmem:[#allocation6_spill] sm:$0xff] %v9324_v21  ;;  %v984_v23 = vcombine.high %v980_v17, %v980_v17  ;;  %v9336_v25 = vrot.slane %v826_v15, %v9300_v38  ;;  %v9339_v56 = vrot.slane %v828_v39, %v9300_v38  ;;  %v9342_v57 = vrot.slane %v959_v7, %v9300_v38 }
 0x1f6   :  { %15141 = vst [vmem:[#allocation7_spill] sm:$0xff] %v9327_v46  ;;  %15142 = vst [vmem:[#allocation8_spill] sm:$0xff] %v9330_v47  ;;  %v9350_v27 = vrot.slane %v830_v22, %v9300_v38  ;;  %v9353_v58 = vrot.slane %v973_v33, %v9300_v38  ;;  %v9356_v41 = vrot.slane %v981_v9, %v9300_v38  ;;  %v9683_v47 = vld [vmem:[%s15049_s3 + $0x40] sm:$0xff]  ;;  %vm1339_vm10 = vcmask 1042434  }
 0x1f7   :  { %15143 = vst [vmem:[#allocation9_spill] sm:$0xff] %v9333_v49  ;;  %15144 = vst [vmem:[#allocation10_spill] sm:$0xff] %v9336_v25  ;;  %v9359_v62 = vrot.slane %v983_v20, %v9300_v38  ;;  %v9372_v63 = vrot.slane %v966_v44, %v9300_v38  ;;  %v9375_v24 = vrot.slane %v980_v17, %v9300_v38  ;;  %vm1341_vm11 = vcmask 1043459  }
 0x1f8   :  { %15145 = vst [vmem:[#allocation11_spill] sm:$0xff] %v9339_v56  ;;  %15146 = vst [vmem:[#allocation12_spill] sm:$0xff] %v9350_v27  ;;  %v9378_v10 = vrot.slane %v982_v61, %v9300_v38  ;;  %v9381_v31 = vrot.slane %v984_v23, %v9300_v38  ;;  %v4216_v36 = vsel %vm4214_vm12, %v9295_v19, %v4061_v8  ;;  %v9575_v27 = vld [vmem:[%s15048_s2 + $0x20] sm:$0xff]  ;;  %vm1343_vm12 = vcmask 1044484  }
 0x1f9   :  { %15147 = vst [vmem:[#allocation13_spill] sm:$0xff] %v9353_v58  ;;  %15148 = vst [vmem:[#allocation14_spill] sm:$0xff] %v9356_v41  ;;  %v4219_v48 = vsel %vm4217_vm13, %v4064_v54, %v7563_v53  ;;  %v9398_v51 = vmul.f32 %v9347_v26, %v9320_v42  ;;  %v4066_v59 = vsel %vm4059_vm14, %v4062_v18, %v4065_v37  ;;  %v9474_v18 = vld [vmem:[%s15049_s3 + $0x8] sm:$0xff]  ;;  %v9725_v41 = vld [vmem:[%s15048_s2 + $0x50] sm:$0xff]  ;;  %vm1345_vm13 = vcmask 1045509  }
 0x1fa   :  { %15149 = vst [vmem:[#allocation15_spill] sm:$0xff] %v9359_v62  ;;  %15150 = vst [vmem:[#allocation16_spill] sm:$0xff] %v9372_v63  ;;  %v4220_v0 = vsel %vm4213_vm15, %v4216_v36, %v4219_v48  ;;  %v9406_v30 = vmul.f32 %v9364_v28, %v9342_v57  ;;  %v9410_v19 = vmul.f32 %v9320_v42, %v9369_v29  ;;  %v4067_v52 = vsel %vm4056_vm0, nan, %v4066_v59 }
 0x1fb   :  { %15151 = vst [vmem:[#allocation17_spill] sm:$0xff] %v9375_v24  ;;  %15152 = vst [vmem:[#allocation18_spill] sm:$0xff] %v9378_v10  ;;  %v4221_v1 = vsel %vm4056_vm0, nan, %v4220_v0  ;;  %7564 = vtanh.f32 %v9398_v51  ;;  %v9424_v50 = vmul.f32 %v9342_v57, %v9386_v32  ;;  %v4068_v11 = vmul.f32 0.5, %v4067_v52 }
 0x1fc   :  { %15153 = vst [vmem:[#allocation19_spill] sm:$0xff] %v9381_v31  ;;  %v4222_v53 = vmul.f32 0.5, %v4221_v1  ;;  %7566 = vtanh.f32 %v9406_v30  ;;  %v9430_v54 = vmul.f32 %v9415_v45, %v9320_v42  ;;  %v9455_v40 = vmul.f32 %v9437_v5, %v9342_v57  ;;  %v9570_v31 = vld [vmem:[%s15049_s3 + $0x48] sm:$0xff] }
 0x1fd   :  { %7568 = vtanh.f32 %v9410_v19  ;;  %v4070_v55 = vcombine.high %v4068_v11, %v4068_v11  ;;  %v4077_v12 = vrot.slane %v4068_v11, %v9289_v35  ;;  %v9466_v17 = vmul.f32 %v9320_v42, %v9448_v3 }
 0x1fe   :  { %v4224_v2 = vcombine.high %v4222_v53, %v4222_v53  ;;  %v4231_v4 = vrot.slane %v4222_v53, %v9289_v35  ;;  %7570 = vtanh.f32 %v9424_v50  ;;  %vm1347_vm14 = vcmask 1046534  }
 0x1ff   :  { %v4084_v6 = vrot.slane %v4070_v55, %v9289_v35  ;;  %v4085_v7 = vcombine.high %v4077_v12, %v4077_v12  ;;  %v9442_v8 = vrot.slane %v4077_v12, %v9289_v35  ;;  %7572 = vtanh.f32 %v9430_v54 }
 0x200   :  { %v4238_v37 = vrot.slane %v4224_v2, %v9289_v35  ;;  %v4239_v14 = vcombine.high %v4231_v4, %v4231_v4  ;;  %v9451_v34 = vrot.slane %v4231_v4, %v9289_v35  ;;  %7574 = vtanh.f32 %v9455_v40 }
 0x201   :  { %v4086_v43 = vcombine.high %v4084_v6, %v4084_v6  ;;  %v4100_v44 = vrot.slane %v4084_v6, %v9289_v35  ;;  %v4107_v33 = vrot.slane %v4085_v7, %v9289_v35  ;;  %v4115_v9 = vcombine.high %v9442_v8, %v9442_v8 }
 0x202   :  { %v4240_v15 = vcombine.high %v4238_v37, %v4238_v37  ;;  %v4254_v39 = vrot.slane %v4238_v37, %v9289_v35  ;;  %v4261_v16 = vrot.slane %v4239_v14, %v9289_v35  ;;  %v4269_v23 = vcombine.high %v9451_v34, %v9451_v34  ;;  %v9502_v37 = vld [vmem:[%s15048_s2 + $0x38] sm:$0xff] }
 0x203   :  { %v4114_v61 = vrot.slane %v4086_v43, %v9289_v35  ;;  %v4116_v20 = vcombine.high %v4100_v44, %v4100_v44  ;;  %v4117_v22 = vcombine.high %v4107_v33, %v4107_v33  ;;  %v9478_v52 = vrot.slane %v4107_v33, %v9300_v38 }
 0x204   :  { %v4268_v48 = vrot.slane %v4240_v15, %v9289_v35  ;;  %v4270_v59 = vcombine.high %v4254_v39, %v4254_v39  ;;  %v4271_v0 = vcombine.high %v4261_v16, %v4261_v16  ;;  %v9481_v53 = vrot.slane %v4115_v9, %v9300_v38  ;;  %v9519_v9 = vld [vmem:[%s15049_s3 + $0x38] sm:$0xff]  ;;  %v9524_v15 = vld [vmem:[%s15048_s2 + $0x10] sm:$0xff] }
 0x205   :  { %v7565_v36 = vpop.eup %7564  ;;  %15154 = vst [vmem:[#allocation20_spill] sm:$0xff] %v9478_v52  ;;  %v4118_v11 = vcombine.high %v4114_v61, %v4114_v61  ;;  %v9484_v55 = vrot.slane %v4117_v22, %v9300_v38  ;;  %v9487_v12 = vrot.slane %v4100_v44, %v9300_v38  ;;  %v9490_v35 = vrot.slane %v4114_v61, %v9300_v38 }
 0x206   :  { %v7567_v1 = vpop.eup %7566  ;;  %15155 = vst [vmem:[#allocation21_spill] sm:$0xff] %v9481_v53  ;;  %v4272_v4 = vcombine.high %v4268_v48, %v4268_v48  ;;  %v9493_v6 = vrot.slane %v4116_v20, %v9300_v38  ;;  %v9497_v7 = vmul.f32 %v9342_v57, %v9474_v18  ;;  %v9508_v43 = vrot.slane %v4261_v16, %v9300_v38  ;;  %v9696_v53 = vld [vmem:[%s15048_s2 + $0x78] sm:$0xff] }
 0x207   :  { %15156 = vst [vmem:[#allocation22_spill] sm:$0xff] %v9484_v55  ;;  %15157 = vst [vmem:[#allocation23_spill] sm:$0xff] %v9487_v12  ;;  %v7569_v2 = vpop.eup %7568  ;;  %v9505_v14 = vrot.slane %v4118_v11, %v9300_v38  ;;  %v9511_v44 = vrot.slane %v4269_v23, %v9300_v38  ;;  %v9514_v33 = vrot.slane %v4271_v0, %v9300_v38  ;;  %7576 = vtanh.f32 %v9466_v17 }
 0x208   :  { %15158 = vst [vmem:[#allocation24_spill] sm:$0xff] %v9490_v35  ;;  %15159 = vst [vmem:[#allocation25_spill] sm:$0xff] %v9493_v6  ;;  %v7571_v61 = vpop.eup %7570  ;;  %v9527_v16 = vrot.slane %v4254_v39, %v9300_v38  ;;  %v9530_v20 = vrot.slane %v4268_v48, %v9300_v38  ;;  %v9533_v22 = vrot.slane %v4270_v59, %v9300_v38  ;;  %v9547_v39 = vld [vmem:[%s15049_s3 + $0x10] sm:$0xff]  ;;  %7578 = vtanh.f32 %v9497_v7 }
 0x209   :  { %15160 = vst [vmem:[#allocation26_spill] sm:$0xff] %v9505_v14  ;;  %15161 = vst [vmem:[#allocation27_spill] sm:$0xff] %v9508_v43  ;;  %v9536_v23 = vrot.slane %v4272_v4, %v9300_v38  ;;  %v1407_v0 = vmul.f32 %v7565_v36, %v9398_v51  ;;  %v1117_v11 = vmul.f32 %v7569_v2, %v9410_v19  ;;  %v7573_v48 = vpop.eup %7572  ;;  %v9561_v2 = vld [vmem:[%s15048_s2 + $0x48] sm:$0xff]  ;;  %vm1349_vm15 = vcmask 1047559  }
 0x20a   :  { %15162 = vst [vmem:[#allocation28_spill] sm:$0xff] %v9511_v44  ;;  %15163 = vst [vmem:[#allocation29_spill] sm:$0xff] %v9514_v33  ;;  %v9542_v13 = vmul.f32 %v9502_v37, %v9320_v42  ;;  %v9552_v59 = vmul.f32 %v9519_v9, %v9342_v57  ;;  %v9556_v36 = vmul.f32 %v9524_v15, %v9320_v42  ;;  %v7575_v33 = vpop.eup %7574  ;;  %vm15134_vm0 = vcmask 130048  }
 0x20b   :  { %15164 = vst [vmem:[#allocation30_spill] sm:$0xff] %v9527_v16  ;;  %15165 = vst [vmem:[#allocation31_spill] sm:$0xff] %v9530_v20  ;;  %v1423_v4 = vadd.f32 %v1407_v0, %v9398_v51  ;;  %v1688_v14 = vmul.f32 %v7573_v48, %v9430_v54  ;;  %v1181_v51 = vmul.f32 %v7571_v61, %v9424_v50  ;;  %v9615_v20 = vld [vmem:[%s15049_s3 + $0x58] sm:$0xff] }
 0x20c   :  { %15166 = vst [vmem:[#allocation32_spill] sm:$0xff] %v9533_v22  ;;  %15167 = vst [vmem:[#allocation33_spill] sm:$0xff] %v9536_v23  ;;  %v1133_v23 = vadd.f32 %v1117_v11, %v9410_v19  ;;  %v1471_v22 = vmul.f32 %v7567_v1, %v9406_v30  ;;  %v9582_v19 = vmul.f32 %v9547_v39, %v9342_v57  ;;  %7580 = vtanh.f32 %v9542_v13  ;;  %v9594_v1 = vld [vmem:[%s15049_s3 + $0x20] sm:$0xff] }
 0x20d   :  { %v1439_v0 = vadd.f32 %v1423_v4, %v9406_v30  ;;  %v9589_v48 = vmul.f32 %v9561_v2, %v9320_v42  ;;  %7582 = vtanh.f32 %v9552_v59  ;;  %v9599_v61 = vmul.f32 %v9570_v31, %v9342_v57 }
 0x20e   :  { %v1149_v11 = vadd.f32 %v1133_v23, %v9424_v50  ;;  %v9603_v30 = vmul.f32 %v9575_v27, %v9320_v42  ;;  %v9608_v50 = vld [vmem:[%s15048_s2 + $0x58] sm:$0xff]  ;;  %v1704_v6 = vadd.f32 %v1688_v14, %v9430_v54  ;;  %7584 = vtanh.f32 %v9556_v36  ;;  %v9635_v14 = vld [vmem:[%s15049_s3 + $0x30] sm:$0xff] }
 0x20f   :  { %v1487_v23 = vadd.f32 %v1471_v22, %v1439_v0  ;;  %7586 = vtanh.f32 %v9582_v19  ;;  %v9620_v35 = vmul.f32 %v9594_v1, %v9342_v57  ;;  %v9625_v22 = vld [vmem:[%s15048_s2 + $0x30] sm:$0xff]  ;;  %v9630_v54 = vmul.f32 %v9608_v50, %v9320_v42  ;;  %v9645_v0 = vld [vmem:[%s15048_s2 + $0x68] sm:$0xff] }
 0x210   :  { %v1197_v4 = vadd.f32 %v1181_v51, %v1149_v11  ;;  %7588 = vtanh.f32 %v9589_v48  ;;  %v9640_v51 = vmul.f32 %v9615_v20, %v9342_v57  ;;  %v1720_v11 = vadd.f32 %v1704_v6, %v9455_v40  ;;  %v9666_v6 = vld [vmem:[%s15048_s2 + $0x40] sm:$0xff] }
 0x211   :  { %1504 = vadd.xlane.f32.xlu1 %v1487_v23  ;;  %7590 = vtanh.f32 %v9599_v61  ;;  %v9651_v23 = vmul.f32 %v9625_v22, %v9320_v42  ;;  %v9661_v55 = vmul.f32 %v9635_v14, %v9342_v57  ;;  %v7577_v60 = vpop.eup %7576  ;;  %v1752_v10 = vmul.f32 %v7575_v33, %v9455_v40 }
 0x212   :  { %1213 = vadd.xlane.f32.xlu0 %v1197_v4  ;;  %7592 = vtanh.f32 %v9603_v30  ;;  %v9656_v4 = vld [vmem:[%s15049_s3 + $0x68] sm:$0xff]  ;;  %v9672_v56 = vmul.f32 %v9645_v0, %v9320_v42  ;;  %v7579_v24 = vpop.eup %7578  ;;  %v1118_v25 = vmul.f32 %v7577_v60, %v9466_v17  ;;  %v9688_v16 = vmul.f32 %v9666_v6, %v9320_v42 }
 0x213   :  { %7594 = vtanh.f32 %v9620_v35  ;;  %v9678_v62 = vmul.f32 %v9656_v4, %v9342_v57  ;;  %v1768_v33 = vadd.f32 %v1752_v10, %v1720_v11  ;;  %v1182_v10 = vmul.f32 %v7579_v24, %v9497_v7 }
 0x214   :  { %7596 = vtanh.f32 %v9630_v54  ;;  %v1134_v12 = vadd.f32 %v1118_v25, %v9466_v17  ;;  %v9702_v11 = vmul.f32 %v9683_v47, %v9342_v57  ;;  %v9717_v49 = vmul.f32 %v9696_v53, %v9320_v42 }
 0x215   :  { %7598 = vtanh.f32 %v9640_v51  ;;  %1785 = vadd.xlane.f32.xlu1 %v1768_v33  ;;  %v9711_v33 = vld [vmem:[%s15049_s3 + $0x78] sm:$0xff] }
 0x216   :  { %v7581_v40 = vpop.eup %7580  ;;  %7600 = vtanh.f32 %v9651_v23  ;;  %v1150_v17 = vadd.f32 %v1134_v12, %v9497_v7  ;;  %v9731_v58 = vmul.f32 %v9711_v33, %v9342_v57 }
 0x217   :  { %v7583_v60 = vpop.eup %7582  ;;  %v1969_v44 = vmul.f32 %v7581_v40, %v9542_v13  ;;  %7602 = vtanh.f32 %v9661_v55 }
 0x218   :  { %v7585_v43 = vpop.eup %7584  ;;  %7604 = vtanh.f32 %v9672_v56  ;;  %v2033_v63 = vmul.f32 %v7583_v60, %v9552_v59 }
 0x219   :  { %v7587_v25 = vpop.eup %7586  ;;  %v1985_v40 = vadd.f32 %v1969_v44, %v9542_v13  ;;  %v1406_v52 = vmul.f32 %v7585_v43, %v9556_v36  ;;  %7606 = vtanh.f32 %v9678_v62  ;;  %v1198_v13 = vadd.f32 %v1182_v10, %v1150_v17 }
 0x21a   :  { %v7589_v24 = vpop.eup %7588  ;;  %7608 = vtanh.f32 %v9688_v16  ;;  %v1470_v46 = vmul.f32 %v7587_v25, %v9582_v19 }
 0x21b   :  { %v7591_v12 = vpop.eup %7590  ;;  %v2001_v7 = vadd.f32 %v1985_v40, %v9552_v59  ;;  %v1422_v43 = vadd.f32 %v1406_v52, %v9556_v36  ;;  %v2250_v44 = vmul.f32 %v7589_v24, %v9589_v48  ;;  %7610 = vtanh.f32 %v9702_v11  ;;  %1215 = vadd.xlane.f32.xlu0 %v1198_v13  ;;  %v9739_v40 = vld [vmem:[%s15049_s3 + $0x50] sm:$0xff] }
 0x21c   :  { %v7593_v60 = vpop.eup %7592  ;;  %v9743_v24 = vrot.slane %v9442_v8, %v9300_v38  ;;  %v2314_v21 = vmul.f32 %v7591_v12, %v9599_v61  ;;  %7612 = vtanh.f32 %v9717_v49  ;;  %v9756_v8 = vrot.slane %v9451_v34, %v9300_v38  ;;  %v9770_v38 = vld [vmem:[%s15048_s2 + $0x60] sm:$0xff] }
 0x21d   :  { %v7595_v10 = vpop.eup %7594  ;;  %v2049_v59 = vadd.f32 %v2033_v63, %v2001_v7  ;;  %v1438_v52 = vadd.f32 %v1422_v43, %v9582_v19  ;;  %v2266_v36 = vadd.f32 %v2250_v44, %v9589_v48  ;;  %v1687_v17 = vmul.f32 %v7593_v60, %v9603_v30 }
 0x21e   :  { %v7597_v25 = vpop.eup %7596  ;;  %v9749_v63 = vmul.f32 %v9725_v41, %v9320_v42  ;;  %v1751_v12 = vmul.f32 %v7595_v10, %v9620_v35  ;;  %7614 = vtanh.f32 %v9731_v58  ;;  %v9762_v60 = vmul.f32 %v9739_v40, %v9342_v57 }
 0x21f   :  { %v7599_v19 = vpop.eup %7598  ;;  %2066 = vadd.xlane.f32.xlu1 %v2049_v59  ;;  %v1486_v48 = vadd.f32 %v1470_v46, %v1438_v52  ;;  %v2282_v13 = vadd.f32 %v2266_v36, %v9599_v61  ;;  %v1703_v7 = vadd.f32 %v1687_v17, %v9603_v30  ;;  %v2531_v43 = vmul.f32 %v7597_v25, %v9630_v54 }
 0x220   :  { %v7601_v44 = vpop.eup %7600  ;;  %v2595_v10 = vmul.f32 %v7599_v19, %v9640_v51  ;;  %7616 = vtanh.f32 %v9749_v63  ;;  %v9776_v36 = vmul.f32 %v9743_v24, %v9448_v3 }
 0x221   :  { %v7603_v46 = vpop.eup %7602  ;;  %1502 = vadd.xlane.f32.xlu0 %v1486_v48  ;;  %v2330_v61 = vadd.f32 %v2314_v21, %v2282_v13  ;;  %v1719_v30 = vadd.f32 %v1703_v7, %v9620_v35  ;;  %v2547_v59 = vadd.f32 %v2531_v43, %v9630_v54  ;;  %v1968_v52 = vmul.f32 %v7601_v44, %v9651_v23  ;;  %v9784_v48 = vld [vmem:[%s15049_s3 + $0x60] sm:$0xff] }
 0x222   :  { %v7605_v34 = vpop.eup %7604  ;;  %v2032_v13 = vmul.f32 %v7603_v46, %v9661_v55  ;;  %7618 = vtanh.f32 %v9762_v60  ;;  %v9790_v7 = vmul.f32 %v9756_v8, %v9474_v18  ;;  %v9802_v46 = vld [vmem:[%s15048_s2 + $0x70] sm:$0xff] }
 0x223   :  { %v7607_v21 = vpop.eup %7606  ;;  %2347 = vadd.xlane.f32.xlu1 %v2330_v61  ;;  %v1767_v35 = vadd.f32 %v1751_v12, %v1719_v30  ;;  %v2563_v54 = vadd.f32 %v2547_v59, %v9640_v51  ;;  %v1984_v17 = vadd.f32 %v1968_v52, %v9651_v23  ;;  %v2812_v25 = vmul.f32 %v7605_v34, %v9672_v56 }
 0x224   :  { %v7609_v19 = vpop.eup %7608  ;;  %v9794_v51 = vmul.f32 %v9770_v38, %v9320_v42  ;;  %7620 = vtanh.f32 %v9776_v36  ;;  %v9807_v30 = vmul.f32 %v9784_v48, %v9342_v57  ;;  %v9811_v59 = vmul.f32 %v9743_v24, %v9347_v26 }
 0x225   :  { %1783 = vadd.xlane.f32.xlu0 %v1767_v35  ;;  %v2611_v23 = vadd.f32 %v2595_v10, %v2563_v54  ;;  %v2000_v43 = vadd.f32 %v1984_v17, %v9661_v55  ;;  %v2828_v44 = vadd.f32 %v2812_v25, %v9672_v56  ;;  %v2249_v12 = vmul.f32 %v7609_v19, %v9688_v16  ;;  %v7611_v61 = vpop.eup %7610  ;;  %v9819_v10 = vld [vmem:[%s15049_s3 + $0x70] sm:$0xff] }
 0x226   :  { %v2876_v52 = vmul.f32 %v7607_v21, %v9678_v62  ;;  %v7613_v35 = vpop.eup %7612  ;;  %v2313_v54 = vmul.f32 %v7611_v61, %v9702_v11  ;;  %7622 = vtanh.f32 %v9790_v7  ;;  %v9825_v17 = vmul.f32 %v9756_v8, %v9364_v28 }
 0x227   :  { %2628 = vadd.xlane.f32.xlu1 %v2611_v23  ;;  %v2048_v56 = vadd.f32 %v2032_v13, %v2000_v43  ;;  %v2844_v55 = vadd.f32 %v2828_v44, %v9678_v62  ;;  %v2265_v34 = vadd.f32 %v2249_v12, %v9688_v16  ;;  %v9829_v25 = vmul.f32 %v9802_v46, %v9320_v42 }
 0x228   :  { %v3093_v21 = vmul.f32 %v7613_v35, %v9717_v49  ;;  %7624 = vtanh.f32 %v9794_v51  ;;  %v7615_v19 = vpop.eup %7614  ;;  %v9837_v13 = vmul.f32 %v9819_v10, %v9342_v57  ;;  %v9848_v44 = vmul.f32 %v9756_v8, %v9437_v5 }
 0x229   :  { %2064 = vadd.xlane.f32.xlu0 %v2048_v56  ;;  %v2892_v62 = vadd.f32 %v2876_v52, %v2844_v55  ;;  %v2281_v16 = vadd.f32 %v2265_v34, %v9702_v11  ;;  %7626 = vtanh.f32 %v9807_v30  ;;  %v9843_v11 = vmul.f32 %v9743_v24, %v9415_v45 }
 0x22a   :  { %v3109_v42 = vadd.f32 %v3093_v21, %v9717_v49  ;;  %7628 = vtanh.f32 %v9811_v59  ;;  %v7617_v43 = vpop.eup %7616  ;;  %v9852_v57 = vmul.f32 %v9743_v24, %v9369_v29  ;;  %v3157_v12 = vmul.f32 %v7615_v19, %v9731_v58 }
 0x22b   :  { %2909 = vadd.xlane.f32.xlu1 %v2892_v62  ;;  %v2329_v23 = vadd.f32 %v2313_v54, %v2281_v16  ;;  %7630 = vtanh.f32 %v9825_v17  ;;  %v2530_v61 = vmul.f32 %v7617_v43, %v9749_v63  ;;  %v9861_v5 = vmul.f32 %v9756_v8, %v9386_v32 }
 0x22c   :  { %v3125_v49 = vadd.f32 %v3109_v42, %v9731_v58  ;;  %7632 = vtanh.f32 %v9829_v25  ;;  %v7619_v45 = vpop.eup %7618  ;;  %v9867_v52 = vmul.f32 %v9743_v24, %v9502_v37  ;;  %v9872_v34 = vmul.f32 %v9756_v8, %v9519_v9 }
 0x22d   :  { %2345 = vadd.xlane.f32.xlu0 %v2329_v23  ;;  %7634 = vtanh.f32 %v9837_v13  ;;  %v2546_v55 = vadd.f32 %v2530_v61, %v9749_v63  ;;  %v9876_v35 = vmul.f32 %v9743_v24, %v9524_v15  ;;  %v2594_v54 = vmul.f32 %v7619_v45, %v9762_v60 }
 0x22e   :  { %v3173_v56 = vadd.f32 %v3157_v12, %v3125_v49  ;;  %7636 = vtanh.f32 %v9843_v11  ;;  %v7621_v58 = vpop.eup %7620  ;;  %v9885_v9 = vmul.f32 %v9756_v8, %v9547_v39  ;;  %v9897_v43 = vmul.f32 %v9756_v8, %v9570_v31 }
 0x22f   :  { %7638 = vtanh.f32 %v9848_v44  ;;  %v2562_v63 = vadd.f32 %v2546_v55, %v9762_v60  ;;  %v4406_v62 = vmul.f32 %v7621_v58, %v9776_v36  ;;  %v9891_v60 = vmul.f32 %v9743_v24, %v9561_v2 }
 0x230   :  { %3190 = vadd.xlane.f32.xlu1 %v3173_v56  ;;  %7640 = vtanh.f32 %v9852_v57  ;;  %v7623_v37 = vpop.eup %7622  ;;  %v9904_v2 = vmul.f32 %v9743_v24, %v9575_v27 }
 0x231   :  { %7642 = vtanh.f32 %v9861_v5  ;;  %v2610_v21 = vadd.f32 %v2594_v54, %v2562_v63  ;;  %v4422_v19 = vadd.f32 %v4406_v62, %v9776_v36  ;;  %v4470_v36 = vmul.f32 %v7623_v37, %v9790_v7 }
 0x232   :  { %v7625_v16 = vpop.eup %7624  ;;  %7644 = vtanh.f32 %v9867_v52 }
 0x233   :  { %v7627_v23 = vpop.eup %7626  ;;  %v2811_v42 = vmul.f32 %v7625_v16, %v9794_v51  ;;  %7646 = vtanh.f32 %v9872_v34  ;;  %2626 = vadd.xlane.f32.xlu0 %v2610_v21  ;;  %v4438_v12 = vadd.f32 %v4422_v19, %v9790_v7  ;;  %v9913_v7 = vmul.f32 %v9756_v8, %v9594_v1 }
 0x234   :  { %v7629_v49 = vpop.eup %7628  ;;  %7648 = vtanh.f32 %v9876_v35  ;;  %v2875_v58 = vmul.f32 %v7627_v23, %v9807_v30  ;;  %v9923_v21 = vmul.f32 %v9743_v24, %v9608_v50 }
 0x235   :  { %v7631_v61 = vpop.eup %7630  ;;  %v2827_v45 = vadd.f32 %v2811_v42, %v9794_v51  ;;  %v4684_v56 = vmul.f32 %v7629_v49, %v9811_v59  ;;  %7650 = vtanh.f32 %v9885_v9  ;;  %v4486_v55 = vadd.f32 %v4470_v36, %v4438_v12 }
 0x236   :  { %v7633_v31 = vpop.eup %7632  ;;  %7652 = vtanh.f32 %v9891_v60  ;;  %v4748_v16 = vmul.f32 %v7631_v61, %v9825_v17  ;;  %v9932_v36 = vmul.f32 %v9756_v8, %v9615_v20 }
 0x237   :  { %v7635_v63 = vpop.eup %7634  ;;  %v2843_v54 = vadd.f32 %v2827_v45, %v9807_v30  ;;  %v4700_v62 = vadd.f32 %v4684_v56, %v9811_v59  ;;  %v3092_v51 = vmul.f32 %v7633_v31, %v9829_v25  ;;  %7654 = vtanh.f32 %v9897_v43  ;;  %4503 = vadd.xlane.f32.xlu1 %v4486_v55 }
 0x238   :  { %v7637_v37 = vpop.eup %7636  ;;  %7656 = vtanh.f32 %v9904_v2  ;;  %v3156_v12 = vmul.f32 %v7635_v63, %v9837_v13  ;;  %v9941_v55 = vmul.f32 %v9743_v24, %v9625_v22 }
 0x239   :  { %v7639_v19 = vpop.eup %7638  ;;  %v2891_v23 = vadd.f32 %v2875_v58, %v2843_v54  ;;  %v4716_v30 = vadd.f32 %v4700_v62, %v9825_v17  ;;  %v3108_v59 = vadd.f32 %v3092_v51, %v9829_v25  ;;  %v4961_v42 = vmul.f32 %v7637_v37, %v9843_v11 }
 0x23a   :  { %v7641_v49 = vpop.eup %7640  ;;  %7658 = vtanh.f32 %v9913_v7  ;;  %v5025_v31 = vmul.f32 %v7639_v19, %v9848_v44  ;;  %v9950_v51 = vmul.f32 %v9756_v8, %v9635_v14 }
 0x23b   :  { %v7643_v61 = vpop.eup %7642  ;;  %2907 = vadd.xlane.f32.xlu0 %v2891_v23  ;;  %v4764_v50 = vadd.f32 %v4748_v16, %v4716_v30  ;;  %v3124_v45 = vadd.f32 %v3108_v59, %v9837_v13  ;;  %v4977_v17 = vadd.f32 %v4961_v42, %v9843_v11  ;;  %v4405_v25 = vmul.f32 %v7641_v49, %v9852_v57 }
 0x23c   :  { %v7645_v56 = vpop.eup %7644  ;;  %7660 = vtanh.f32 %v9923_v21  ;;  %v4469_v62 = vmul.f32 %v7643_v61, %v9861_v5  ;;  %v9959_v30 = vmul.f32 %v9743_v24, %v9645_v0  ;;  %v9968_v61 = vmul.f32 %v9756_v8, %v9656_v4 }
 0x23d   :  { %v7647_v20 = vpop.eup %7646  ;;  %4781 = vadd.xlane.f32.xlu1 %v4764_v50  ;;  %v3172_v58 = vadd.f32 %v3156_v12, %v3124_v45  ;;  %v4993_v63 = vadd.f32 %v4977_v17, %v9848_v44  ;;  %v4421_v13 = vadd.f32 %v4405_v25, %v9852_v57  ;;  %v5238_v11 = vmul.f32 %v7645_v56, %v9867_v52 }
 0x23e   :  { %v7649_v54 = vpop.eup %7648  ;;  %7662 = vtanh.f32 %v9932_v36  ;;  %v5302_v23 = vmul.f32 %v7647_v20, %v9872_v34  ;;  %v9972_v0 = vmul.f32 %v9743_v24, %v9666_v6  ;;  %v9980_v25 = vmul.f32 %v9756_v8, %v9683_v47 }
 0x23f   :  { %v7651_v22 = vpop.eup %7650  ;;  %3188 = vadd.xlane.f32.xlu0 %v3172_v58  ;;  %v5041_v37 = vadd.f32 %v5025_v31, %v4993_v63  ;;  %v4437_v16 = vadd.f32 %v4421_v13, %v9861_v5  ;;  %v5254_v44 = vadd.f32 %v5238_v11, %v9867_v52  ;;  %v4683_v57 = vmul.f32 %v7649_v54, %v9876_v35 }
 0x240   :  { %v7653_v19 = vpop.eup %7652  ;;  %7664 = vtanh.f32 %v9941_v55  ;;  %v4747_v12 = vmul.f32 %v7651_v22, %v9885_v9  ;;  %v9984_v4 = vmul.f32 %v9743_v24, %v9696_v53  ;;  %v9993_v47 = vmul.f32 %v9756_v8, %v9711_v33 }
 0x241   :  { %v7655_v14 = vpop.eup %7654  ;;  %5058 = vadd.xlane.f32.xlu1 %v5041_v37  ;;  %v4485_v59 = vadd.f32 %v4469_v62, %v4437_v16  ;;  %v5270_v42 = vadd.f32 %v5254_v44, %v9872_v34  ;;  %v4699_v5 = vadd.f32 %v4683_v57, %v9876_v35  ;;  %v5515_v52 = vmul.f32 %v7653_v19, %v9891_v60  ;;  %v15169_v16 = vld [vmem:[#allocation13_spill] sm:$0xff] }
 0x242   :  { %v7657_v49 = vpop.eup %7656  ;;  %7666 = vtanh.f32 %v9950_v51  ;;  %v9997_v53 = vmul.f32 %v9743_v24, %v9725_v41  ;;  %v10005_v13 = vmul.f32 %v9756_v8, %v9739_v40  ;;  %v10016_v54 = vmul.f32 %v9756_v8, %v9784_v48  ;;  %v15168_v40 = vld [vmem:[#allocation6_spill] sm:$0xff] }
 0x243   :  { %4501 = vadd.xlane.f32.xlu0 %v4485_v59  ;;  %v5318_v50 = vadd.f32 %v5302_v23, %v5270_v42  ;;  %v4715_v34 = vadd.f32 %v4699_v5, %v9885_v9  ;;  %v5531_v35 = vadd.f32 %v5515_v52, %v9891_v60  ;;  %v4960_v45 = vmul.f32 %v7657_v49, %v9904_v2  ;;  %v15170_v52 = vld [vmem:[#allocation7_spill] sm:$0xff] }
 0x244   :  { %v7659_v17 = vpop.eup %7658  ;;  %7668 = vtanh.f32 %v9959_v30  ;;  %v5579_v9 = vmul.f32 %v7655_v14, %v9897_v43  ;;  %v10020_v62 = vmul.f32 %v15168_v40, %v9369_v29  ;;  %v10029_v48 = vmul.f32 %v15169_v16, %v9386_v32 }
 0x245   :  { %5335 = vadd.xlane.f32.xlu1 %v5318_v50  ;;  %v4763_v6 = vadd.f32 %v4747_v12, %v4715_v34  ;;  %v5547_v56 = vadd.f32 %v5531_v35, %v9897_v43  ;;  %v4976_v60 = vadd.f32 %v4960_v45, %v9904_v2  ;;  %v5024_v20 = vmul.f32 %v7659_v17, %v9913_v7  ;;  %v15171_v50 = vld [vmem:[#allocation14_spill] sm:$0xff] }
 0x246   :  { %v7661_v31 = vpop.eup %7660  ;;  %7670 = vtanh.f32 %v9968_v61  ;;  %v10035_v19 = vmul.f32 %v9743_v24, %v9802_v46  ;;  %v10040_v23 = vmul.f32 %v9756_v8, %v9819_v10  ;;  %v10044_v14 = vmul.f32 %v15168_v40, %v9448_v3 }
 0x247   :  { %4779 = vadd.xlane.f32.xlu0 %v4763_v6  ;;  %v5595_v58 = vadd.f32 %v5579_v9, %v5547_v56  ;;  %v4992_v63 = vadd.f32 %v4976_v60, %v9913_v7  ;;  %v5792_v43 = vmul.f32 %v7661_v31, %v9923_v21  ;;  %7672 = vtanh.f32 %v9972_v0 }
 0x248   :  { %v7663_v2 = vpop.eup %7662  ;;  %7674 = vtanh.f32 %v9980_v25  ;;  %v10011_v7 = vmul.f32 %v9743_v24, %v9770_v38  ;;  %v10053_v8 = vmul.f32 %v15169_v16, %v9474_v18  ;;  %v10065_v34 = vmul.f32 %v15171_v50, %v9386_v32 }
 0x249   :  { %5612 = vadd.xlane.f32.xlu1 %v5595_v58  ;;  %v5040_v33 = vadd.f32 %v5024_v20, %v4992_v63  ;;  %v5808_v41 = vadd.f32 %v5792_v43, %v9923_v21  ;;  %7676 = vtanh.f32 %v9984_v4  ;;  %v5856_v22 = vmul.f32 %v7663_v2, %v9932_v36 }
 0x24a   :  { %v7665_v11 = vpop.eup %7664  ;;  %7678 = vtanh.f32 %v9993_v47  ;;  %v10072_v17 = vmul.f32 %v15170_v52, %v9448_v3 }
 0x24b   :  { %5056 = vadd.xlane.f32.xlu0 %v5040_v33  ;;  %v5824_v21 = vadd.f32 %v5808_v41, %v9932_v36  ;;  %v5237_v37 = vmul.f32 %v7665_v11, %v9941_v55  ;;  %7680 = vtanh.f32 %v9997_v53  ;;  %v15172_v41 = vld [vmem:[#allocation9_spill] sm:$0xff] }
 0x24c   :  { %v7667_v38 = vpop.eup %7666  ;;  %7682 = vtanh.f32 %v10005_v13  ;;  %v10091_v11 = vmul.f32 %v15172_v41, %v9448_v3 }
 0x24d   :  { %v5872_v44 = vadd.f32 %v5856_v22, %v5824_v21  ;;  %v5253_v57 = vadd.f32 %v5237_v37, %v9941_v55  ;;  %7684 = vtanh.f32 %v10011_v7  ;;  %v5301_v59 = vmul.f32 %v7667_v38, %v9950_v51 }
 0x24e   :  { %v7669_v36 = vpop.eup %7668  ;;  %7686 = vtanh.f32 %v10016_v54 }
 0x24f   :  { %5889 = vadd.xlane.f32.xlu1 %v5872_v44  ;;  %v5269_v55 = vadd.f32 %v5253_v57, %v9950_v51  ;;  %v6069_v42 = vmul.f32 %v7669_v36, %v9959_v30  ;;  %7688 = vtanh.f32 %v10020_v62  ;;  %v10059_v51 = vmul.f32 %v15170_v52, %v9369_v29  ;;  %v15173_v57 = vld [vmem:[#allocation16_spill] sm:$0xff] }
 0x250   :  { %v7671_v24 = vpop.eup %7670  ;;  %7690 = vtanh.f32 %v10029_v48  ;;  %v10100_v36 = vmul.f32 %v15173_v57, %v9474_v18 }
 0x251   :  { %v7673_v46 = vpop.eup %7672  ;;  %v5317_v10 = vadd.f32 %v5301_v59, %v5269_v55  ;;  %v6085_v5 = vadd.f32 %v6069_v42, %v9959_v30  ;;  %7692 = vtanh.f32 %v10035_v19  ;;  %v6133_v30 = vmul.f32 %v7671_v24, %v9968_v61 }
 0x252   :  { %v7675_v49 = vpop.eup %7674  ;;  %v5514_v12 = vmul.f32 %v7673_v46, %v9972_v0  ;;  %7694 = vtanh.f32 %v10040_v23  ;;  %v10108_v24 = vmul.f32 %v15172_v41, %v9369_v29  ;;  %v10121_v29 = vmul.f32 %v9347_v26, %v15168_v40 }
 0x253   :  { %v7677_v35 = vpop.eup %7676  ;;  %5333 = vadd.xlane.f32.xlu0 %v5317_v10  ;;  %v6101_v45 = vadd.f32 %v6085_v5, %v9968_v61  ;;  %7696 = vtanh.f32 %v10044_v14  ;;  %v5578_v20 = vmul.f32 %v7675_v49, %v9980_v25  ;;  %v10081_v61 = vmul.f32 %v15171_v50, %v9474_v18 }
 0x254   :  { %v7679_v6 = vpop.eup %7678  ;;  %v5530_v56 = vadd.f32 %v5514_v12, %v9972_v0  ;;  %v6346_v9 = vmul.f32 %v7677_v35, %v9984_v4  ;;  %7698 = vtanh.f32 %v10053_v8  ;;  %v10117_v35 = vmul.f32 %v15173_v57, %v9386_v32 }
 0x255   :  { %v7681_v60 = vpop.eup %7680  ;;  %v6149_v31 = vadd.f32 %v6133_v30, %v6101_v45  ;;  %7700 = vtanh.f32 %v10059_v51  ;;  %v6410_v33 = vmul.f32 %v7679_v6, %v9993_v47  ;;  %v10130_v32 = vmul.f32 %v9364_v28, %v15169_v16 }
 0x256   :  { %v7683_v58 = vpop.eup %7682  ;;  %v5546_v63 = vadd.f32 %v5530_v56, %v9980_v25  ;;  %v6362_v43 = vadd.f32 %v6346_v9, %v9984_v4  ;;  %v5791_v0 = vmul.f32 %v7681_v60, %v9997_v53  ;;  %7702 = vtanh.f32 %v10065_v34 }
 0x257   :  { %v7685_v2 = vpop.eup %7684  ;;  %6166 = vadd.xlane.f32.xlu1 %v6149_v31  ;;  %7704 = vtanh.f32 %v10072_v17  ;;  %v5855_v44 = vmul.f32 %v7683_v58, %v10005_v13  ;;  %v10134_v26 = vmul.f32 %v9524_v15, %v15168_v40  ;;  %v10143_v28 = vmul.f32 %v9547_v39, %v15169_v16 }
 0x258   :  { %v7687_v21 = vpop.eup %7686  ;;  %v5594_v22 = vadd.f32 %v5578_v20, %v5546_v63  ;;  %v6378_v25 = vadd.f32 %v6362_v43, %v9993_v47  ;;  %v5807_v4 = vadd.f32 %v5791_v0, %v9997_v53  ;;  %v6068_v37 = vmul.f32 %v7685_v2, %v10011_v7  ;;  %v8588_v63 = vld [vmem:[%s15048_s2 + $0x18] sm:$0xff] }
 0x259   :  { %v7689_v38 = vpop.eup %7688  ;;  %7706 = vtanh.f32 %v10081_v61  ;;  %v10149_v43 = vmul.f32 %v8588_v63, %v15170_v52 }
 0x25a   :  { %v7691_v55 = vpop.eup %7690  ;;  %5610 = vadd.xlane.f32.xlu0 %v5594_v22  ;;  %v6426_v3 = vadd.f32 %v6410_v33, %v6378_v25  ;;  %v5823_v59 = vadd.f32 %v5807_v4, %v10005_v13  ;;  %v6084_v47 = vadd.f32 %v6068_v37, %v10011_v7  ;;  %v1119_v53 = vmul.f32 %v7689_v38, %v10020_v62 }
 0x25b   :  { %v7693_v42 = vpop.eup %7692  ;;  %7708 = vtanh.f32 %v10091_v11  ;;  %v6132_v7 = vmul.f32 %v7687_v21, %v10016_v54  ;;  %v1183_v12 = vmul.f32 %v7691_v55, %v10029_v48  ;;  %v8589_v21 = vld [vmem:[%s15049_s3 + $0x18] sm:$0xff]  ;;  %v10165_v25 = vmul.f32 %v9524_v15, %v15170_v52 }
 0x25c   :  { %v7695_v46 = vpop.eup %7694  ;;  %6443 = vadd.xlane.f32.xlu1 %v6426_v3  ;;  %v5871_v18 = vadd.f32 %v5855_v44, %v5823_v59  ;;  %v6100_v10 = vadd.f32 %v6084_v47, %v10016_v54  ;;  %v1135_v5 = vadd.f32 %v1119_v53, %v10020_v62  ;;  %v6345_v13 = vmul.f32 %v7693_v42, %v10035_v19 }
 0x25d   :  { %v7697_v49 = vpop.eup %7696  ;;  %7710 = vtanh.f32 %v10100_v36  ;;  %v6409_v58 = vmul.f32 %v7695_v46, %v10040_v23  ;;  %v10161_v22 = vmul.f32 %v8589_v21, %v15171_v50  ;;  %v10173_v44 = vmul.f32 %v9547_v39, %v15171_v50 }
 0x25e   :  { %v7699_v45 = vpop.eup %7698  ;;  %5887 = vadd.xlane.f32.xlu0 %v5871_v18  ;;  %v1151_v30 = vadd.f32 %v1135_v5, %v10029_v48  ;;  %v6361_v62 = vadd.f32 %v6345_v13, %v10035_v19  ;;  %v1120_v6 = vmul.f32 %v7697_v49, %v10044_v14  ;;  %v6148_v56 = vadd.f32 %v6132_v7, %v6100_v10 }
 0x25f   :  { %v7701_v54 = vpop.eup %7700  ;;  %7712 = vtanh.f32 %v10108_v24  ;;  %v1184_v0 = vmul.f32 %v7699_v45, %v10053_v8  ;;  %v10179_v59 = vmul.f32 %v8588_v63, %v15172_v41  ;;  %v10185_v53 = vmul.f32 %v8589_v21, %v15173_v57 }
 0x260   :  { %v7703_v9 = vpop.eup %7702  ;;  %v1199_v48 = vadd.f32 %v1183_v12, %v1151_v30  ;;  %v6377_v19 = vadd.f32 %v6361_v62, %v10040_v23  ;;  %v1136_v60 = vadd.f32 %v1120_v6, %v10044_v14  ;;  %v1121_v31 = vmul.f32 %v7701_v54, %v10059_v51 }
 0x261   :  { %v7705_v20 = vpop.eup %7704  ;;  %7714 = vtanh.f32 %v10117_v35  ;;  %v1185_v55 = vmul.f32 %v7703_v9, %v10065_v34  ;;  %v10191_v18 = vmul.f32 %v9524_v15, %v15172_v41  ;;  %v8590_v15 = vld [vmem:[%s15048_s2 + $0x28] sm:$0xff]  ;;  %v10222_v6 = vmul.f32 %v9575_v27, %v15168_v40 }
 0x262   :  { %6164 = vadd.xlane.f32.xlu0 %v6148_v56  ;;  %1217 = vadd.xlane.f32.xlu1 %v1199_v48  ;;  %v1152_v14 = vadd.f32 %v1136_v60, %v10053_v8  ;;  %v1137_v23 = vadd.f32 %v1121_v31, %v10059_v51  ;;  %7716 = vtanh.f32 %v10121_v29  ;;  %v1122_v33 = vmul.f32 %v7705_v20, %v10072_v17 }
 0x263   :  { %v7707_v2 = vpop.eup %7706  ;;  %7718 = vtanh.f32 %v10130_v32  ;;  %v6425_v8 = vadd.f32 %v6409_v58, %v6377_v19  ;;  %v10228_v9 = vmul.f32 %v9594_v1, %v15169_v16  ;;  %v10234_v60 = vmul.f32 %v8590_v15, %v15170_v52 }
 0x264   :  { %v1200_v51 = vadd.f32 %v1184_v0, %v1152_v14  ;;  %v1153_v4 = vadd.f32 %v1137_v23, %v10065_v34  ;;  %7720 = vtanh.f32 %v10134_v26  ;;  %v1138_v38 = vadd.f32 %v1122_v33, %v10072_v17 }
 0x265   :  { %v7709_v37 = vpop.eup %7708  ;;  %7722 = vtanh.f32 %v10143_v28  ;;  %v1186_v17 = vmul.f32 %v7707_v2, %v10081_v61 }
 0x266   :  { %6441 = vadd.xlane.f32.xlu0 %v6425_v8  ;;  %1219 = vadd.xlane.f32.xlu1 %v1200_v51  ;;  %v1126_v3 = vmul.f32 %v7709_v37, %v10091_v11  ;;  %7724 = vtanh.f32 %v10149_v43  ;;  %v1154_v47 = vadd.f32 %v1138_v38, %v10081_v61  ;;  %v1201_v46 = vadd.f32 %v1185_v55, %v1153_v4 }
 0x267   :  { %7726 = vtanh.f32 %v10161_v22  ;;  %v7711_v42 = vpop.eup %7710  ;;  %v10196_v61 = vmul.f32 %v9547_v39, %v15173_v57  ;;  %v10212_v39 = vld [vmem:[%s15049_s3 + $0x28] sm:$0xff]  ;;  %v10253_v51 = vmul.f32 %v9575_v27, %v15170_v52 }
 0x268   :  { %v1142_v34 = vadd.f32 %v1126_v3, %v10091_v11  ;;  %7728 = vtanh.f32 %v10165_v25  ;;  %v1202_v5 = vadd.f32 %v1186_v17, %v1154_v47  ;;  %v10205_v11 = vmul.f32 %v8590_v15, %v15168_v40 }
 0x269   :  { %v7713_v10 = vpop.eup %7712  ;;  %7730 = vtanh.f32 %v10173_v44  ;;  %v1190_v12 = vmul.f32 %v7711_v42, %v10100_v36  ;;  %v10216_v45 = vmul.f32 %v10212_v39, %v15169_v16  ;;  %v10262_v47 = vmul.f32 %v9594_v1, %v15171_v50 }
 0x26a   :  { %1221 = vadd.xlane.f32.xlu0 %v1201_v46  ;;  %v1158_v13 = vadd.f32 %v1142_v34, %v10100_v36  ;;  %v1125_v49 = vmul.f32 %v7713_v10, %v10108_v24  ;;  %7732 = vtanh.f32 %v10179_v59  ;;  %1223 = vadd.xlane.f32.xlu1 %v1202_v5  ;;  %v10270_v10 = vmul.f32 %v8590_v15, %v15172_v41 }
 0x26b   :  { %v7715_v7 = vpop.eup %7714  ;;  %7734 = vtanh.f32 %v10185_v53 }
 0x26c   :  { %v7717_v30 = vpop.eup %7716  ;;  %v1141_v62 = vadd.f32 %v1125_v49, %v10108_v24  ;;  %7736 = vtanh.f32 %v10191_v18  ;;  %v1206_v54 = vadd.f32 %v1190_v12, %v1158_v13  ;;  %v1189_v24 = vmul.f32 %v7715_v7, %v10117_v35 }
 0x26d   :  { %v7719_v36 = vpop.eup %7718  ;;  %v1409_v56 = vmul.f32 %v7717_v30, %v10121_v29  ;;  %7738 = vtanh.f32 %v10196_v61  ;;  %v10279_v12 = vmul.f32 %v10212_v39, %v15173_v57 }
 0x26e   :  { %v7721_v48 = vpop.eup %7720  ;;  %v1157_v19 = vadd.f32 %v1141_v62, %v10117_v35  ;;  %7740 = vtanh.f32 %v10205_v11  ;;  %1231 = vadd.xlane.f32.xlu1 %v1206_v54  ;;  %v1473_v0 = vmul.f32 %v7719_v36, %v10130_v32  ;;  %v10243_v35 = vmul.f32 %v10212_v39, %v15171_v50 }
 0x26f   :  { %v7723_v31 = vpop.eup %7722  ;;  %v1425_v20 = vadd.f32 %v1409_v56, %v10121_v29  ;;  %v1408_v58 = vmul.f32 %v7721_v48, %v10134_v26  ;;  %7742 = vtanh.f32 %v10216_v45  ;;  %v8592_v56 = vld [vmem:[%s15048_s2 + $0x20] sm:$0xff] }
 0x270   :  { %v7725_v63 = vpop.eup %7724  ;;  %v1205_v14 = vadd.f32 %v1189_v24, %v1157_v19  ;;  %7744 = vtanh.f32 %v10222_v6  ;;  %v1472_v8 = vmul.f32 %v7723_v31, %v10143_v28  ;;  %v10290_v39 = vmul.f32 %v8592_v56, %v15172_v41 }
 0x271   :  { %v7727_v23 = vpop.eup %7726  ;;  %v1441_v2 = vadd.f32 %v1425_v20, %v10130_v32  ;;  %v1424_v33 = vadd.f32 %v1408_v58, %v10134_v26  ;;  %v1411_v29 = vmul.f32 %v7725_v63, %v10149_v43  ;;  %7746 = vtanh.f32 %v10228_v9  ;;  %v8593_v58 = vld [vmem:[%s15049_s3 + $0x20] sm:$0xff] }
 0x272   :  { %v7729_v21 = vpop.eup %7728  ;;  %1229 = vadd.xlane.f32.xlu0 %v1205_v14  ;;  %7748 = vtanh.f32 %v10234_v60  ;;  %v1475_v3 = vmul.f32 %v7727_v23, %v10161_v22  ;;  %v10301_v63 = vmul.f32 %v8593_v58, %v15173_v57 }
 0x273   :  { %v7731_v4 = vpop.eup %7730  ;;  %v1489_v37 = vadd.f32 %v1473_v0, %v1441_v2  ;;  %v1440_v32 = vadd.f32 %v1424_v33, %v10143_v28  ;;  %v1427_v26 = vadd.f32 %v1411_v29, %v10149_v43  ;;  %v1410_v38 = vmul.f32 %v7729_v21, %v10165_v25  ;;  %v8595_v29 = vld [vmem:[%s15049_s3 + $0x38] sm:$0xff] }
 0x274   :  { %v7733_v55 = vpop.eup %7732  ;;  %7750 = vtanh.f32 %v10243_v35  ;;  %v1474_v34 = vmul.f32 %v7731_v4, %v10173_v44  ;;  %v10317_v21 = vmul.f32 %v8595_v29, %v15169_v16 }
 0x275   :  { %v7735_v17 = vpop.eup %7734  ;;  %1508 = vadd.xlane.f32.xlu1 %v1489_v37  ;;  %v1488_v27 = vadd.f32 %v1472_v8, %v1440_v32  ;;  %v1443_v42 = vadd.f32 %v1427_v26, %v10161_v22  ;;  %v1426_v28 = vadd.f32 %v1410_v38, %v10165_v25  ;;  %v1415_v43 = vmul.f32 %v7733_v55, %v10179_v59  ;;  %v8596_v8 = vld [vmem:[%s15048_s2 + $0x30] sm:$0xff] }
 0x276   :  { %v7737_v46 = vpop.eup %7736  ;;  %7752 = vtanh.f32 %v10253_v51  ;;  %v1479_v7 = vmul.f32 %v7735_v17, %v10185_v53  ;;  %v8597_v55 = vld [vmem:[%s15049_s3 + $0x30] sm:$0xff] }
 0x277   :  { %v7739_v5 = vpop.eup %7738  ;;  %1506 = vadd.xlane.f32.xlu0 %v1488_v27  ;;  %v1491_v1 = vadd.f32 %v1475_v3, %v1443_v42  ;;  %v1442_v13 = vadd.f32 %v1426_v28, %v10173_v44  ;;  %v1431_v49 = vadd.f32 %v1415_v43, %v10179_v59  ;;  %v1414_v22 = vmul.f32 %v7737_v46, %v10191_v18 }
 0x278   :  { %v7741_v25 = vpop.eup %7740  ;;  %7754 = vtanh.f32 %v10262_v47  ;;  %v1478_v54 = vmul.f32 %v7739_v5, %v10196_v61  ;;  %v10334_v3 = vmul.f32 %v8597_v55, %v15169_v16  ;;  %v10344_v28 = vmul.f32 %v8595_v29, %v15171_v50 }
 0x279   :  { %v7743_v15 = vpop.eup %7742  ;;  %1512 = vadd.xlane.f32.xlu1 %v1491_v1  ;;  %v1490_v30 = vadd.f32 %v1474_v34, %v1442_v13  ;;  %v1447_v62 = vadd.f32 %v1431_v49, %v10185_v53  ;;  %v1430_v44 = vadd.f32 %v1414_v22, %v10191_v18  ;;  %v1690_v59 = vmul.f32 %v7741_v25, %v10205_v11 }
 0x27a   :  { %v7745_v36 = vpop.eup %7744  ;;  %7756 = vtanh.f32 %v10270_v10  ;;  %v1754_v20 = vmul.f32 %v7743_v15, %v10216_v45  ;;  %v10349_v34 = vmul.f32 %v8596_v8, %v15170_v52  ;;  %v10353_v5 = vmul.f32 %v8597_v55, %v15171_v50 }
 0x27b   :  { %v7747_v48 = vpop.eup %7746  ;;  %1510 = vadd.xlane.f32.xlu0 %v1490_v30  ;;  %v1495_v19 = vadd.f32 %v1479_v7, %v1447_v62  ;;  %v1446_v53 = vadd.f32 %v1430_v44, %v10196_v61  ;;  %v1706_v18 = vadd.f32 %v1690_v59, %v10205_v11  ;;  %v1689_v24 = vmul.f32 %v7745_v36, %v10222_v6  ;;  %v8594_v61 = vld [vmem:[%s15048_s2 + $0x38] sm:$0xff]  ;;  %v10378_v44 = vld [vmem:[%s15048_s2 + $0x48] sm:$0xff] }
 0x27c   :  { %v7749_v31 = vpop.eup %7748  ;;  %7758 = vtanh.f32 %v10279_v12  ;;  %v10307_v11 = vmul.f32 %v8594_v61, %v15168_v40  ;;  %v1753_v37 = vmul.f32 %v7747_v48, %v10228_v9  ;;  %v10337_v17 = vmul.f32 %v8594_v61, %v15170_v52  ;;  %v10392_v48 = vld [vmem:[%s15049_s3 + $0x48] sm:$0xff] }
 0x27d   :  { %1520 = vadd.xlane.f32.xlu1 %v1495_v19  ;;  %v1494_v14 = vadd.f32 %v1478_v54, %v1446_v53  ;;  %v1722_v0 = vadd.f32 %v1706_v18, %v10216_v45  ;;  %v1705_v23 = vadd.f32 %v1689_v24, %v10222_v6  ;;  %v1692_v2 = vmul.f32 %v7749_v31, %v10234_v60  ;;  %v10403_v24 = vld [vmem:[%s15048_s2 + $0x40] sm:$0xff] }
 0x27e   :  { %v7751_v33 = vpop.eup %7750  ;;  %7760 = vtanh.f32 %v10290_v39  ;;  %v10323_v45 = vmul.f32 %v8596_v8, %v15168_v40  ;;  %v10356_v1 = vmul.f32 %v8594_v61, %v15172_v41  ;;  %v10364_v25 = vmul.f32 %v8595_v29, %v15173_v57 }
 0x27f   :  { %1518 = vadd.xlane.f32.xlu0 %v1494_v14  ;;  %v1770_v6 = vadd.f32 %v1754_v20, %v1722_v0  ;;  %v1721_v4 = vadd.f32 %v1705_v23, %v10228_v9  ;;  %v1708_v32 = vadd.f32 %v1692_v2, %v10234_v60  ;;  %v1756_v38 = vmul.f32 %v7751_v33, %v10243_v35 }
 0x280   :  { %v7753_v26 = vpop.eup %7752  ;;  %7762 = vtanh.f32 %v10301_v63  ;;  %v10369_v30 = vmul.f32 %v8596_v8, %v15172_v41  ;;  %v10382_v59 = vmul.f32 %v10378_v44, %v15168_v40  ;;  %v10396_v19 = vmul.f32 %v10392_v48, %v15169_v16 }
 0x281   :  { %1789 = vadd.xlane.f32.xlu1 %v1770_v6  ;;  %v1769_v27 = vadd.f32 %v1753_v37, %v1721_v4  ;;  %v1724_v9 = vadd.f32 %v1708_v32, %v10243_v35  ;;  %v1691_v60 = vmul.f32 %v7753_v26, %v10253_v51  ;;  %7764 = vtanh.f32 %v10307_v11 }
 0x282   :  { %v7755_v42 = vpop.eup %7754  ;;  %7766 = vtanh.f32 %v10317_v21  ;;  %v10407_v31 = vmul.f32 %v10403_v24, %v15168_v40  ;;  %v10425_v2 = vmul.f32 %v10378_v44, %v15170_v52 }
 0x283   :  { %1787 = vadd.xlane.f32.xlu0 %v1769_v27  ;;  %v1772_v43 = vadd.f32 %v1756_v38, %v1724_v9  ;;  %v1707_v46 = vadd.f32 %v1691_v60, %v10253_v51  ;;  %7768 = vtanh.f32 %v10323_v45  ;;  %v1755_v49 = vmul.f32 %v7755_v42, %v10262_v47 }
 0x284   :  { %v7757_v35 = vpop.eup %7756  ;;  %7770 = vtanh.f32 %v10334_v3  ;;  %v10444_v9 = vmul.f32 %v10403_v24, %v15170_v52 }
 0x285   :  { %1793 = vadd.xlane.f32.xlu1 %v1772_v43  ;;  %v1723_v13 = vadd.f32 %v1707_v46, %v10262_v47  ;;  %v1696_v51 = vmul.f32 %v7757_v35, %v10270_v10  ;;  %7772 = vtanh.f32 %v10337_v17  ;;  %v10373_v47 = vmul.f32 %v8597_v55, %v15173_v57 }
 0x286   :  { %v7759_v22 = vpop.eup %7758  ;;  %7774 = vtanh.f32 %v10344_v28 }
 0x287   :  { %v1771_v7 = vadd.f32 %v1755_v49, %v1723_v13  ;;  %v1712_v15 = vadd.f32 %v1696_v51, %v10270_v10  ;;  %7776 = vtanh.f32 %v10349_v34  ;;  %v1760_v36 = vmul.f32 %v7759_v22, %v10279_v12 }
 0x288   :  { %v7761_v62 = vpop.eup %7760  ;;  %7778 = vtanh.f32 %v10353_v5 }
 0x289   :  { %1791 = vadd.xlane.f32.xlu0 %v1771_v7  ;;  %v1728_v10 = vadd.f32 %v1712_v15, %v10279_v12  ;;  %v1695_v54 = vmul.f32 %v7761_v62, %v10290_v39  ;;  %7780 = vtanh.f32 %v10356_v1  ;;  %v10462_v62 = vmul.f32 %v10378_v44, %v15172_v41 }
 0x28a   :  { %v7763_v56 = vpop.eup %7762  ;;  %7782 = vtanh.f32 %v10364_v25 }
 0x28b   :  { %v7765_v53 = vpop.eup %7764  ;;  %v1776_v18 = vadd.f32 %v1760_v36, %v1728_v10  ;;  %v1711_v12 = vadd.f32 %v1695_v54, %v10290_v39  ;;  %7784 = vtanh.f32 %v10369_v30  ;;  %v10414_v39 = vld [vmem:[%s15049_s3 + $0x40] sm:$0xff]  ;;  %v1759_v23 = vmul.f32 %v7763_v56, %v10301_v63 }
 0x28c   :  { %v7767_v20 = vpop.eup %7766  ;;  %v1971_v58 = vmul.f32 %v7765_v53, %v10307_v11  ;;  %7786 = vtanh.f32 %v10373_v47  ;;  %v10418_v61 = vmul.f32 %v10414_v39, %v15169_v16  ;;  %v10453_v13 = vmul.f32 %v10414_v39, %v15171_v50 }
 0x28d   :  { %v7769_v14 = vpop.eup %7768  ;;  %1801 = vadd.xlane.f32.xlu1 %v1776_v18  ;;  %v1727_v0 = vadd.f32 %v1711_v12, %v10301_v63  ;;  %7788 = vtanh.f32 %v10382_v59  ;;  %v2035_v37 = vmul.f32 %v7767_v20, %v10317_v21  ;;  %v10434_v63 = vmul.f32 %v10392_v48, %v15171_v50 }
 0x28e   :  { %v7771_v33 = vpop.eup %7770  ;;  %v1987_v29 = vadd.f32 %v1971_v58, %v10307_v11  ;;  %v1970_v8 = vmul.f32 %v7769_v14, %v10323_v45  ;;  %7790 = vtanh.f32 %v10396_v19  ;;  %v10471_v18 = vmul.f32 %v10392_v48, %v15173_v57 }
 0x28f   :  { %v7773_v6 = vpop.eup %7772  ;;  %v1775_v4 = vadd.f32 %v1759_v23, %v1727_v0  ;;  %7792 = vtanh.f32 %v10407_v31  ;;  %v2034_v27 = vmul.f32 %v7771_v33, %v10334_v3  ;;  %v10480_v0 = vmul.f32 %v10403_v24, %v15172_v41  ;;  %v8602_v24 = vld [vmem:[%s15048_s2 + $0x58] sm:$0xff] }
 0x290   :  { %v7775_v32 = vpop.eup %7774  ;;  %v2003_v26 = vadd.f32 %v1987_v29, %v10317_v21  ;;  %v1986_v38 = vadd.f32 %v1970_v8, %v10323_v45  ;;  %v1973_v11 = vmul.f32 %v7773_v6, %v10337_v17  ;;  %7794 = vtanh.f32 %v10418_v61 }
 0x291   :  { %v7777_v55 = vpop.eup %7776  ;;  %1799 = vadd.xlane.f32.xlu0 %v1775_v4  ;;  %7796 = vtanh.f32 %v10425_v2  ;;  %v2037_v35 = vmul.f32 %v7775_v32, %v10344_v28  ;;  %v10489_v6 = vmul.f32 %v10414_v39, %v15173_v57  ;;  %v10495_v4 = vmul.f32 %v8602_v24, %v15168_v40  ;;  %v8603_v39 = vld [vmem:[%s15049_s3 + $0x58] sm:$0xff] }
 0x292   :  { %v7779_v60 = vpop.eup %7778  ;;  %v2051_v42 = vadd.f32 %v2035_v37, %v2003_v26  ;;  %v2002_v21 = vadd.f32 %v1986_v38, %v10334_v3  ;;  %v1989_v45 = vadd.f32 %v1973_v11, %v10337_v17  ;;  %v1972_v43 = vmul.f32 %v7777_v55, %v10349_v34  ;;  %v8604_v11 = vld [vmem:[%s15048_s2 + $0x50] sm:$0xff] }
 0x293   :  { %v7781_v46 = vpop.eup %7780  ;;  %7798 = vtanh.f32 %v10434_v63  ;;  %v2036_v15 = vmul.f32 %v7779_v60, %v10353_v5  ;;  %v10505_v38 = vmul.f32 %v8603_v39, %v15169_v16 }
 0x294   :  { %v7783_v49 = vpop.eup %7782  ;;  %2070 = vadd.xlane.f32.xlu1 %v2051_v42  ;;  %v2050_v51 = vadd.f32 %v2034_v27, %v2002_v21  ;;  %v2005_v22 = vadd.f32 %v1989_v45, %v10344_v28  ;;  %v1988_v3 = vadd.f32 %v1972_v43, %v10349_v34  ;;  %v1977_v17 = vmul.f32 %v7781_v46, %v10356_v1  ;;  %v8605_v45 = vld [vmem:[%s15049_s3 + $0x50] sm:$0xff] }
 0x295   :  { %v7785_v7 = vpop.eup %7784  ;;  %7800 = vtanh.f32 %v10444_v9  ;;  %v2041_v53 = vmul.f32 %v7783_v49, %v10364_v25  ;;  %v10522_v43 = vmul.f32 %v8605_v45, %v15169_v16  ;;  %v10525_v46 = vmul.f32 %v8602_v24, %v15170_v52 }
 0x296   :  { %v7787_v10 = vpop.eup %7786  ;;  %2068 = vadd.xlane.f32.xlu0 %v2050_v51  ;;  %v2053_v36 = vadd.f32 %v2037_v35, %v2005_v22  ;;  %v2004_v54 = vadd.f32 %v1988_v3, %v10353_v5  ;;  %v1993_v28 = vadd.f32 %v1977_v17, %v10356_v1  ;;  %v1976_v34 = vmul.f32 %v7785_v7, %v10369_v30 }
 0x297   :  { %v7789_v56 = vpop.eup %7788  ;;  %7802 = vtanh.f32 %v10453_v13  ;;  %v2040_v14 = vmul.f32 %v7787_v10, %v10373_v47  ;;  %v10534_v22 = vmul.f32 %v8603_v39, %v15171_v50  ;;  %v10539_v7 = vmul.f32 %v8604_v11, %v15170_v52 }
 0x298   :  { %v7791_v44 = vpop.eup %7790  ;;  %2074 = vadd.xlane.f32.xlu1 %v2053_v36  ;;  %v2052_v12 = vadd.f32 %v2036_v15, %v2004_v54  ;;  %v2009_v20 = vadd.f32 %v1993_v28, %v10364_v25  ;;  %v1992_v5 = vadd.f32 %v1976_v34, %v10369_v30  ;;  %v2252_v1 = vmul.f32 %v7789_v56, %v10382_v59 }
 0x299   :  { %v7793_v58 = vpop.eup %7792  ;;  %7804 = vtanh.f32 %v10462_v62  ;;  %v2316_v8 = vmul.f32 %v7791_v44, %v10396_v19  ;;  %v10543_v15 = vmul.f32 %v8605_v45, %v15171_v50  ;;  %v10546_v10 = vmul.f32 %v8602_v24, %v15172_v41  ;;  %v10599_v24 = vld [vmem:[%s15048_s2 + $0x60] sm:$0xff] }
 0x29a   :  { %v7795_v48 = vpop.eup %7794  ;;  %2072 = vadd.xlane.f32.xlu0 %v2052_v12  ;;  %v2057_v23 = vadd.f32 %v2041_v53, %v2009_v20  ;;  %v2008_v33 = vadd.f32 %v1992_v5, %v10373_v47  ;;  %v2268_v25 = vadd.f32 %v2252_v1, %v10382_v59  ;;  %v2251_v30 = vmul.f32 %v7793_v58, %v10407_v31  ;;  %v10572_v1 = vld [vmem:[%s15048_s2 + $0x68] sm:$0xff] }
 0x29b   :  { %v7797_v29 = vpop.eup %7796  ;;  %7806 = vtanh.f32 %v10471_v18  ;;  %v2315_v27 = vmul.f32 %v7795_v48, %v10418_v61  ;;  %v10556_v56 = vmul.f32 %v8603_v39, %v15173_v57  ;;  %v10563_v20 = vmul.f32 %v8604_v11, %v15172_v41 }
 0x29c   :  { %2082 = vadd.xlane.f32.xlu1 %v2057_v23  ;;  %v2056_v47 = vadd.f32 %v2040_v14, %v2008_v33  ;;  %v2284_v59 = vadd.f32 %v2268_v25, %v10396_v19  ;;  %v2267_v37 = vadd.f32 %v2251_v30, %v10407_v31  ;;  %v2254_v32 = vmul.f32 %v7797_v29, %v10425_v2  ;;  %v10586_v33 = vld [vmem:[%s15049_s3 + $0x68] sm:$0xff] }
 0x29d   :  { %v7799_v26 = vpop.eup %7798  ;;  %7808 = vtanh.f32 %v10480_v0  ;;  %v10511_v19 = vmul.f32 %v8604_v11, %v15168_v40  ;;  %v10567_v5 = vmul.f32 %v8605_v45, %v15173_v57  ;;  %v10576_v58 = vmul.f32 %v10572_v1, %v15168_v40 }
 0x29e   :  { %2080 = vadd.xlane.f32.xlu0 %v2056_v47  ;;  %v2332_v31 = vadd.f32 %v2316_v8, %v2284_v59  ;;  %v2283_v55 = vadd.f32 %v2267_v37, %v10418_v61  ;;  %v2270_v60 = vadd.f32 %v2254_v32, %v10425_v2  ;;  %v2318_v21 = vmul.f32 %v7799_v26, %v10434_v63  ;;  %v10527_v35 = vpop.xlane.xlu1 %1504 }
 0x29f   :  { %v7801_v42 = vpop.eup %7800  ;;  %7810 = vtanh.f32 %v10489_v6  ;;  %15174 = vst [vmem:[#allocation6_spill] sm:$0xff] %v10527_v35  ;;  %v10548_v36 = vpop.xlane.xlu0 %1213  ;;  %v10590_v25 = vmul.f32 %v10586_v33, %v15169_v16  ;;  %v10603_v47 = vmul.f32 %v10599_v24, %v15168_v40 }
 0x2a0   :  { %2351 = vadd.xlane.f32.xlu1 %v2332_v31  ;;  %v2331_v61 = vadd.f32 %v2315_v27, %v2283_v55  ;;  %v2286_v2 = vadd.f32 %v2270_v60, %v10434_v63  ;;  %v2253_v49 = vmul.f32 %v7801_v42, %v10444_v9  ;;  %7812 = vtanh.f32 %v10495_v4  ;;  %15175 = vst [vmem:[#allocation13_spill] sm:$0xff] %v10548_v36  ;;  %v11510_v36 = vld [vmem:[%s15049_s3 + $0x78] sm:$0xff] }
 0x2a1   :  { %v7803_v51 = vpop.eup %7802  ;;  %7814 = vtanh.f32 %v10505_v38  ;;  %v10623_v55 = vmul.f32 %v10572_v1, %v15170_v52 }
 0x2a2   :  { %2349 = vadd.xlane.f32.xlu0 %v2331_v61  ;;  %v2334_v3 = vadd.f32 %v2318_v21, %v2286_v2  ;;  %v2269_v17 = vadd.f32 %v2253_v49, %v10444_v9  ;;  %7816 = vtanh.f32 %v10511_v19  ;;  %v2317_v9 = vmul.f32 %v7803_v51, %v10453_v13  ;;  %v10558_v53 = vpop.xlane.xlu1 %1785 }
 0x2a3   :  { %v7805_v63 = vpop.eup %7804  ;;  %7818 = vtanh.f32 %v10522_v43  ;;  %15176 = vst [vmem:[#allocation7_spill] sm:$0xff] %v10558_v53 }
 0x2a4   :  { %2355 = vadd.xlane.f32.xlu1 %v2334_v3  ;;  %v2285_v54 = vadd.f32 %v2269_v17, %v10453_v13  ;;  %v2258_v28 = vmul.f32 %v7805_v63, %v10462_v62  ;;  %7820 = vtanh.f32 %v10525_v46 }
 0x2a5   :  { %v7807_v34 = vpop.eup %7806  ;;  %7822 = vtanh.f32 %v10534_v22 }
 0x2a6   :  { %v2333_v44 = vadd.f32 %v2317_v9, %v2285_v54  ;;  %v2274_v12 = vadd.f32 %v2258_v28, %v10462_v62  ;;  %7824 = vtanh.f32 %v10539_v7  ;;  %v2322_v14 = vmul.f32 %v7807_v34, %v10471_v18 }
 0x2a7   :  { %v7809_v13 = vpop.eup %7808  ;;  %7826 = vtanh.f32 %v10543_v15  ;;  %v10646_v9 = vmul.f32 %v10599_v24, %v15170_v52 }
 0x2a8   :  { %2353 = vadd.xlane.f32.xlu0 %v2333_v44  ;;  %v2290_v62 = vadd.f32 %v2274_v12, %v10471_v18  ;;  %v2257_v48 = vmul.f32 %v7809_v13, %v10480_v0  ;;  %7828 = vtanh.f32 %v10546_v10  ;;  %v10592_v30 = vpop.xlane.xlu0 %1215 }
 0x2a9   :  { %v7811_v23 = vpop.eup %7810  ;;  %7830 = vtanh.f32 %v10556_v56  ;;  %15177 = vst [vmem:[#allocation14_spill] sm:$0xff] %v10592_v30 }
 0x2aa   :  { %v7813_v29 = vpop.eup %7812  ;;  %v2338_v18 = vadd.f32 %v2322_v14, %v2290_v62  ;;  %v2273_v8 = vadd.f32 %v2257_v48, %v10480_v0  ;;  %7832 = vtanh.f32 %v10563_v20  ;;  %v10610_v0 = vld [vmem:[%s15049_s3 + $0x60] sm:$0xff]  ;;  %v2321_v31 = vmul.f32 %v7811_v23, %v10489_v6 }
 0x2ab   :  { %v7815_v59 = vpop.eup %7814  ;;  %v2533_v37 = vmul.f32 %v7813_v29, %v10495_v4  ;;  %7834 = vtanh.f32 %v10567_v5  ;;  %v10614_v32 = vmul.f32 %v10610_v0, %v15169_v16  ;;  %v10657_v14 = vmul.f32 %v10610_v0, %v15171_v50 }
 0x2ac   :  { %v10616_v26 = vpop.xlane.xlu1 %2066  ;;  %v7817_v39 = vpop.eup %7816  ;;  %2363 = vadd.xlane.f32.xlu1 %v2338_v18  ;;  %v2289_v11 = vadd.f32 %v2273_v8, %v10489_v6  ;;  %7836 = vtanh.f32 %v10576_v58  ;;  %v2597_v2 = vmul.f32 %v7815_v59, %v10505_v38  ;;  %v10634_v6 = vmul.f32 %v10586_v33, %v15171_v50 }
 0x2ad   :  { %15178 = vst [vmem:[#allocation9_spill] sm:$0xff] %v10616_v26  ;;  %v7819_v27 = vpop.eup %7818  ;;  %v2549_v60 = vadd.f32 %v2533_v37, %v10495_v4  ;;  %v2532_v42 = vmul.f32 %v7817_v39, %v10511_v19  ;;  %7838 = vtanh.f32 %v10590_v25  ;;  %v10668_v37 = vmul.f32 %v10572_v1, %v15172_v41 }
 0x2ae   :  { %v10628_v21 = vpop.xlane.xlu0 %1502  ;;  %v7821_v45 = vpop.eup %7820  ;;  %v2337_v61 = vadd.f32 %v2321_v31, %v2289_v11  ;;  %7840 = vtanh.f32 %v10603_v47  ;;  %v2596_v54 = vmul.f32 %v7819_v27, %v10522_v43 }
 0x2af   :  { %15179 = vst [vmem:[#allocation16_spill] sm:$0xff] %v10628_v21  ;;  %v7823_v49 = vpop.eup %7822  ;;  %v2565_v51 = vadd.f32 %v2549_v60, %v10505_v38  ;;  %v2548_v4 = vadd.f32 %v2532_v42, %v10511_v19  ;;  %v2535_v3 = vmul.f32 %v7821_v45, %v10525_v46  ;;  %7842 = vtanh.f32 %v10614_v32 }
 0x2b0   :  { %v10640_v17 = vpop.xlane.xlu1 %2347  ;;  %v7825_v63 = vpop.eup %7824  ;;  %2361 = vadd.xlane.f32.xlu0 %v2337_v61  ;;  %7844 = vtanh.f32 %v10623_v55  ;;  %v2599_v62 = vmul.f32 %v7823_v49, %v10534_v22  ;;  %v10677_v42 = vmul.f32 %v10586_v33, %v15173_v57  ;;  %v10688_v33 = vmul.f32 %v10599_v24, %v15172_v41 }
 0x2b1   :  { %15180 = vst [vmem:[#allocation34_spill] sm:$0xff] %v10640_v17  ;;  %v7827_v28 = vpop.eup %7826  ;;  %v2613_v38 = vadd.f32 %v2597_v2, %v2565_v51  ;;  %v2564_v19 = vadd.f32 %v2548_v4, %v10522_v43  ;;  %v2551_v34 = vadd.f32 %v2535_v3, %v10525_v46  ;;  %v2534_v44 = vmul.f32 %v7825_v63, %v10539_v7 }
 0x2b2   :  { %v10651_v12 = vpop.xlane.xlu0 %1783  ;;  %v7829_v13 = vpop.eup %7828  ;;  %7846 = vtanh.f32 %v10634_v6  ;;  %v2598_v59 = vmul.f32 %v7827_v28, %v10543_v15  ;;  %v10699_v24 = vmul.f32 %v10610_v0, %v15173_v57  ;;  %v8611_v0 = vld [vmem:[%s15049_s3 + $0x78] sm:$0xff] }
 0x2b3   :  { %15181 = vst [vmem:[#allocation35_spill] sm:$0xff] %v10651_v12  ;;  %v7831_v48 = vpop.eup %7830  ;;  %2632 = vadd.xlane.f32.xlu1 %v2613_v38  ;;  %v2612_v23 = vadd.f32 %v2596_v54, %v2564_v19  ;;  %v2567_v43 = vadd.f32 %v2551_v34, %v10534_v22  ;;  %v2550_v46 = vadd.f32 %v2534_v44, %v10539_v7  ;;  %7848 = vtanh.f32 %v10646_v9  ;;  %v8610_v19 = vld [vmem:[%s15048_s2 + $0x78] sm:$0xff] }
 0x2b4   :  { %v2539_v29 = vmul.f32 %v7829_v13, %v10546_v10  ;;  %v10662_v18 = vpop.xlane.xlu1 %2628  ;;  %v7833_v8 = vpop.eup %7832  ;;  %v2603_v60 = vmul.f32 %v7831_v48, %v10556_v56  ;;  %7850 = vtanh.f32 %v10657_v14  ;;  %v10715_v48 = vmul.f32 %v8611_v0, %v15169_v16 }
 0x2b5   :  { %v7835_v39 = vpop.eup %7834  ;;  %2630 = vadd.xlane.f32.xlu0 %v2612_v23  ;;  %v2615_v11 = vadd.f32 %v2599_v62, %v2567_v43  ;;  %v2566_v22 = vadd.f32 %v2550_v46, %v10543_v15  ;;  %v2538_v31 = vmul.f32 %v7833_v8, %v10563_v20  ;;  %7852 = vtanh.f32 %v10668_v37  ;;  %v8612_v23 = vld [vmem:[%s15048_s2 + $0x70] sm:$0xff] }
 0x2b6   :  { %v2555_v7 = vadd.f32 %v2539_v29, %v10546_v10  ;;  %v7837_v27 = vpop.eup %7836  ;;  %v10679_v1 = vpop.xlane.xlu0 %2064  ;;  %v2602_v51 = vmul.f32 %v7835_v39, %v10567_v5  ;;  %7854 = vtanh.f32 %v10677_v42 }
 0x2b7   :  { %15182 = vst [vmem:[#allocation36_spill] sm:$0xff] %v10679_v1  ;;  %v7839_v45 = vpop.eup %7838  ;;  %2636 = vadd.xlane.f32.xlu1 %v2615_v11  ;;  %v2614_v61 = vadd.f32 %v2598_v59, %v2566_v22  ;;  %v2554_v10 = vadd.f32 %v2538_v31, %v10563_v20  ;;  %v2814_v2 = vmul.f32 %v7837_v27, %v10576_v58  ;;  %7856 = vtanh.f32 %v10688_v33 }
 0x2b8   :  { %v2571_v15 = vadd.f32 %v2555_v7, %v10556_v56  ;;  %v7841_v49 = vpop.eup %7840  ;;  %v10693_v54 = vpop.xlane.xlu1 %2909  ;;  %v2878_v38 = vmul.f32 %v7839_v45, %v10590_v25  ;;  %7858 = vtanh.f32 %v10699_v24  ;;  %v10737_v22 = vmul.f32 %v8610_v19, %v15170_v52 }
 0x2b9   :  { %v7843_v4 = vpop.eup %7842  ;;  %2634 = vadd.xlane.f32.xlu0 %v2614_v61  ;;  %v2570_v63 = vadd.f32 %v2554_v10, %v10567_v5  ;;  %v2830_v56 = vadd.f32 %v2814_v2, %v10576_v58  ;;  %v2813_v20 = vmul.f32 %v7841_v49, %v10603_v47  ;;  %v10705_v5 = vmul.f32 %v8610_v19, %v15168_v40 }
 0x2ba   :  { %v2619_v3 = vadd.f32 %v2603_v60, %v2571_v15  ;;  %v7845_v28 = vpop.eup %7844  ;;  %v2877_v29 = vmul.f32 %v7843_v4, %v10614_v32  ;;  %v10746_v60 = vmul.f32 %v8611_v0, %v15171_v50  ;;  %v10758_v10 = vmul.f32 %v8610_v19, %v15172_v41 }
 0x2bb   :  { %v2618_v58 = vadd.f32 %v2602_v51, %v2570_v63  ;;  %v2846_v34 = vadd.f32 %v2830_v56, %v10590_v25  ;;  %v2829_v44 = vadd.f32 %v2813_v20, %v10603_v47  ;;  %v2816_v13 = vmul.f32 %v7845_v28, %v10623_v55  ;;  %v10723_v47 = vpop.xlane.xlu0 %2345  ;;  %v10784_v28 = vld [vmem:[%s15048_s2 + $0x8] sm:$0xff] }
 0x2bc   :  { %2644 = vadd.xlane.f32.xlu1 %v2619_v3  ;;  %v7847_v62 = vpop.eup %7846  ;;  %v10721_v25 = vmul.f32 %v8612_v23, %v15168_v40  ;;  %15183 = vst [vmem:[#allocation37_spill] sm:$0xff] %v10723_v47  ;;  %v8613_v40 = vld [vmem:[%s15049_s3 + $0x70] sm:$0xff]  ;;  %7860 = vtanh.f32 %v10705_v5  ;;  %v10773_v63 = vmul.f32 %v8612_v23, %v15172_v41 }
 0x2bd   :  { %2642 = vadd.xlane.f32.xlu0 %v2618_v58  ;;  %v2894_v43 = vadd.f32 %v2878_v38, %v2846_v34  ;;  %v2845_v46 = vadd.f32 %v2829_v44, %v10614_v32  ;;  %v2832_v8 = vadd.f32 %v2816_v13, %v10623_v55  ;;  %v7849_v59 = vpop.eup %7848  ;;  %v2880_v39 = vmul.f32 %v7847_v62, %v10634_v6  ;;  %v10742_v31 = vpop.xlane.xlu1 %3190  ;;  %v15184_v38 = vld [vmem:[#allocation20_spill] sm:$0xff]  ;;  %v15185_v44 = vld [vmem:[#allocation27_spill] sm:$0xff] }
 0x2be   :  { %v10734_v11 = vmul.f32 %v8613_v40, %v15169_v16  ;;  %v2815_v55 = vmul.f32 %v7849_v59, %v10646_v9  ;;  %v7851_v27 = vpop.eup %7850  ;;  %7862 = vtanh.f32 %v10715_v48  ;;  %v10755_v15 = vmul.f32 %v8613_v40, %v15171_v50  ;;  %v10798_v34 = vld [vmem:[%s15049_s3 + $0x8] sm:$0xff] }
 0x2bf   :  { %v2893_v7 = vadd.f32 %v2877_v29, %v2845_v46  ;;  %v2848_v32 = vadd.f32 %v2832_v8, %v10634_v6  ;;  %7864 = vtanh.f32 %v10721_v25  ;;  %v10751_v6 = vmul.f32 %v8612_v23, %v15170_v52  ;;  %v7853_v61 = vpop.eup %7852 }
 0x2c0   :  { %2913 = vadd.xlane.f32.xlu1 %v2894_v43  ;;  %v2831_v45 = vadd.f32 %v2815_v55, %v10646_v9  ;;  %7866 = vtanh.f32 %v10734_v11  ;;  %v10760_v2 = vpop.xlane.xlu0 %2626  ;;  %v2879_v9 = vmul.f32 %v7851_v27, %v10657_v14  ;;  %v2820_v51 = vmul.f32 %v7853_v61, %v10668_v37  ;;  %v7855_v52 = vpop.eup %7854  ;;  %v10811_v43 = vld [vmem:[%s15048_s2] sm:$0xff]  ;;  %v15186_v55 = vld [vmem:[#allocation21_spill] sm:$0xff] }
 0x2c1   :  { %2911 = vadd.xlane.f32.xlu0 %v2893_v7  ;;  %v2896_v16 = vadd.f32 %v2880_v39, %v2848_v32  ;;  %7868 = vtanh.f32 %v10737_v22  ;;  %v10768_v50 = vmul.f32 %v8611_v0, %v15173_v57  ;;  %v10779_v20 = vmul.f32 %v8613_v40, %v15173_v57 }
 0x2c2   :  { %v2847_v49 = vadd.f32 %v2831_v45, %v10657_v14  ;;  %7870 = vtanh.f32 %v10746_v60  ;;  %v2836_v3 = vadd.f32 %v2820_v51, %v10668_v37  ;;  %v7857_v14 = vpop.eup %7856  ;;  %v10788_v37 = vmul.f32 %v10784_v28, %v15184_v38 }
 0x2c3   :  { %7872 = vtanh.f32 %v10751_v6  ;;  %v2884_v19 = vmul.f32 %v7855_v52, %v10677_v42  ;;  %v2819_v58 = vmul.f32 %v7857_v14, %v10688_v33  ;;  %v7859_v57 = vpop.eup %7858  ;;  %v10802_v13 = vmul.f32 %v10798_v34, %v15185_v44 }
 0x2c4   :  { %2917 = vadd.xlane.f32.xlu1 %v2896_v16  ;;  %v2895_v4 = vadd.f32 %v2879_v9, %v2847_v49  ;;  %v10775_v56 = vpop.xlane.xlu1 %4503  ;;  %7874 = vtanh.f32 %v10755_v15  ;;  %v2852_v41 = vadd.f32 %v2836_v3, %v10677_v42  ;;  %v10815_v46 = vmul.f32 %v10811_v43, %v15184_v38 }
 0x2c5   :  { %7876 = vtanh.f32 %v10758_v10  ;;  %v2835_v23 = vadd.f32 %v2819_v58, %v10688_v33  ;;  %v10822_v33 = vld [vmem:[%s15049_s3] sm:$0xff]  ;;  %v2883_v32 = vmul.f32 %v7859_v57, %v10699_v24  ;;  %v10835_v27 = vmul.f32 %v10784_v28, %v15186_v55 }
 0x2c6   :  { %2915 = vadd.xlane.f32.xlu0 %v2895_v4  ;;  %7878 = vtanh.f32 %v10768_v50  ;;  %v7861_v0 = vpop.eup %7860  ;;  %v2900_v42 = vadd.f32 %v2884_v19, %v2852_v41  ;;  %v10826_v59 = vmul.f32 %v10822_v33, %v15185_v44 }
 0x2c7   :  { %7880 = vtanh.f32 %v10773_v63  ;;  %v3095_v8 = vmul.f32 %v7861_v0, %v10705_v5  ;;  %v2851_v7 = vadd.f32 %v2835_v23, %v10699_v24  ;;  %v15187_v24 = vld [vmem:[#allocation28_spill] sm:$0xff]  ;;  %v10858_v0 = vmul.f32 %v10811_v43, %v15186_v55 }
 0x2c8   :  { %v10804_v62 = vpop.xlane.xlu0 %2907  ;;  %v7863_v29 = vpop.eup %7862  ;;  %7882 = vtanh.f32 %v10779_v20  ;;  %2925 = vadd.xlane.f32.xlu1 %v2900_v42  ;;  %v10846_v4 = vmul.f32 %v10798_v34, %v15187_v24 }
 0x2c9   :  { %v7865_v40 = vpop.eup %7864  ;;  %7884 = vtanh.f32 %v10788_v37  ;;  %v3111_v45 = vadd.f32 %v3095_v8, %v10705_v5  ;;  %v2899_v51 = vadd.f32 %v2883_v32, %v2851_v7  ;;  %v3159_v52 = vmul.f32 %v7863_v29, %v10715_v48 }
 0x2ca   :  { %v10828_v39 = vpop.xlane.xlu1 %4781  ;;  %v7867_v16 = vpop.eup %7866  ;;  %v3094_v61 = vmul.f32 %v7865_v40, %v10721_v25  ;;  %7886 = vtanh.f32 %v10802_v13  ;;  %v10869_v32 = vmul.f32 %v10822_v33, %v15187_v24 }
 0x2cb   :  { %v7869_v9 = vpop.eup %7868  ;;  %7888 = vtanh.f32 %v10815_v46  ;;  %v3127_v14 = vadd.f32 %v3111_v45, %v10715_v48  ;;  %2923 = vadd.xlane.f32.xlu0 %v2899_v51  ;;  %v3158_v57 = vmul.f32 %v7867_v16, %v10734_v11 }
 0x2cc   :  { %v10840_v49 = vpop.xlane.xlu0 %3188  ;;  %v7871_v3 = vpop.eup %7870  ;;  %v3110_v5 = vadd.f32 %v3094_v61, %v10721_v25  ;;  %v3097_v41 = vmul.f32 %v7869_v9, %v10737_v22  ;;  %7890 = vtanh.f32 %v10826_v59 }
 0x2cd   :  { %v7873_v58 = vpop.eup %7872  ;;  %7892 = vtanh.f32 %v10835_v27  ;;  %v3175_v48 = vadd.f32 %v3159_v52, %v3127_v14  ;;  %v3161_v7 = vmul.f32 %v7871_v3, %v10746_v60  ;;  %v15189_v3 = vld [vmem:[#allocation23_spill] sm:$0xff] }
 0x2ce   :  { %v10852_v19 = vpop.xlane.xlu1 %5058  ;;  %v7875_v42 = vpop.eup %7874  ;;  %v3126_v25 = vadd.f32 %v3110_v5, %v10734_v11  ;;  %v3113_v23 = vadd.f32 %v3097_v41, %v10737_v22  ;;  %v3096_v29 = vmul.f32 %v7873_v58, %v10751_v6  ;;  %7894 = vtanh.f32 %v10846_v4 }
 0x2cf   :  { %v7877_v40 = vpop.eup %7876  ;;  %3194 = vadd.xlane.f32.xlu1 %v3175_v48  ;;  %v3160_v52 = vmul.f32 %v7875_v42, %v10755_v15  ;;  %7896 = vtanh.f32 %v10858_v0  ;;  %v10880_v14 = vmul.f32 %v10784_v28, %v15189_v3  ;;  %v15190_v42 = vld [vmem:[#allocation30_spill] sm:$0xff] }
 0x2d0   :  { %v10863_v8 = vpop.xlane.xlu0 %4501  ;;  %v7879_v16 = vpop.eup %7878  ;;  %v3174_v45 = vadd.f32 %v3158_v57, %v3126_v25  ;;  %v3129_v11 = vadd.f32 %v3113_v23, %v10746_v60  ;;  %v3112_v22 = vadd.f32 %v3096_v29, %v10751_v6  ;;  %v3101_v61 = vmul.f32 %v7877_v40, %v10758_v10 }
 0x2d1   :  { %v7881_v51 = vpop.eup %7880  ;;  %v3165_v48 = vmul.f32 %v7879_v16, %v10768_v50  ;;  %7898 = vtanh.f32 %v10869_v32  ;;  %v10889_v25 = vmul.f32 %v10798_v34, %v15190_v42  ;;  %v10900_v34 = vmul.f32 %v10811_v43, %v15189_v3 }
 0x2d2   :  { %v10874_v9 = vpop.xlane.xlu1 %5335  ;;  %v7883_v5 = vpop.eup %7882  ;;  %3192 = vadd.xlane.f32.xlu0 %v3174_v45  ;;  %v3177_v41 = vadd.f32 %v3161_v7, %v3129_v11  ;;  %v3128_v60 = vadd.f32 %v3112_v22, %v10755_v15  ;;  %v3117_v6 = vadd.f32 %v3101_v61, %v10758_v10  ;;  %v3100_v58 = vmul.f32 %v7881_v51, %v10773_v63 }
 0x2d3   :  { %15188 = vst [vmem:[#allocation20_spill] sm:$0xff] %v10874_v9  ;;  %v7885_v57 = vpop.eup %7884  ;;  %v3164_v16 = vmul.f32 %v7883_v5, %v10779_v20  ;;  %7900 = vtanh.f32 %v10880_v14  ;;  %v10911_v43 = vmul.f32 %v10822_v33, %v15190_v42  ;;  %v8618_v5 = vld [vmem:[%s15048_s2 + $0x18] sm:$0xff] }
 0x2d4   :  { %v10891_v28 = vpop.xlane.xlu0 %4779  ;;  %v7887_v23 = vpop.eup %7886  ;;  %3198 = vadd.xlane.f32.xlu1 %v3177_v41  ;;  %v3176_v29 = vadd.f32 %v3160_v52, %v3128_v60  ;;  %v3133_v15 = vadd.f32 %v3117_v6, %v10768_v50  ;;  %v3116_v10 = vadd.f32 %v3100_v58, %v10773_v63  ;;  %v4408_v40 = vmul.f32 %v7885_v57, %v10788_v37  ;;  %v8619_v33 = vld [vmem:[%s15049_s3 + $0x18] sm:$0xff] }
 0x2d5   :  { %15191 = vst [vmem:[#allocation27_spill] sm:$0xff] %v10891_v28  ;;  %v7889_v7 = vpop.eup %7888  ;;  %v4472_v52 = vmul.f32 %v7887_v23, %v10802_v13  ;;  %7902 = vtanh.f32 %v10889_v25  ;;  %v10927_v57 = vmul.f32 %v8619_v33, %v15185_v44 }
 0x2d6   :  { %v7891_v45 = vpop.eup %7890  ;;  %3196 = vadd.xlane.f32.xlu0 %v3176_v29  ;;  %v3181_v11 = vadd.f32 %v3165_v48, %v3133_v15  ;;  %v3132_v22 = vadd.f32 %v3116_v10, %v10779_v20  ;;  %v4424_v50 = vadd.f32 %v4408_v40, %v10788_v37  ;;  %v4407_v63 = vmul.f32 %v7889_v7, %v10815_v46  ;;  %v10905_v61 = vpop.xlane.xlu1 %5612  ;;  %v8620_v48 = vld [vmem:[%s15048_s2 + $0x10] sm:$0xff] }
 0x2d7   :  { %15192 = vst [vmem:[#allocation21_spill] sm:$0xff] %v10905_v61  ;;  %v7893_v51 = vpop.eup %7892  ;;  %v10917_v20 = vmul.f32 %v8618_v5, %v15184_v38  ;;  %7904 = vtanh.f32 %v10900_v34  ;;  %v4471_v15 = vmul.f32 %v7891_v45, %v10826_v59 }
 0x2d8   :  { %3206 = vadd.xlane.f32.xlu1 %v3181_v11  ;;  %v3180_v37 = vadd.f32 %v3164_v16, %v3132_v22  ;;  %v4440_v41 = vadd.f32 %v4424_v50, %v10802_v13  ;;  %v4423_v60 = vadd.f32 %v4407_v63, %v10815_v46  ;;  %v4410_v6 = vmul.f32 %v7893_v51, %v10835_v27  ;;  %v7895_v58 = vpop.eup %7894  ;;  %v10935_v46 = vpop.xlane.xlu0 %5056  ;;  %v8621_v16 = vld [vmem:[%s15049_s3 + $0x10] sm:$0xff] }
 0x2d9   :  { %v10933_v13 = vmul.f32 %v8620_v48, %v15184_v38  ;;  %15193 = vst [vmem:[#allocation28_spill] sm:$0xff] %v10935_v46  ;;  %v7897_v40 = vpop.eup %7896  ;;  %v4474_v7 = vmul.f32 %v7895_v58, %v10846_v4  ;;  %7906 = vtanh.f32 %v10911_v43  ;;  %v10946_v11 = vmul.f32 %v8621_v16, %v15185_v44 }
 0x2da   :  { %3204 = vadd.xlane.f32.xlu0 %v3180_v37  ;;  %v4488_v23 = vadd.f32 %v4472_v52, %v4440_v41  ;;  %v4439_v29 = vadd.f32 %v4423_v60, %v10826_v59  ;;  %v4426_v10 = vadd.f32 %v4410_v6, %v10835_v27  ;;  %v10949_v22 = vmul.f32 %v8618_v5, %v15186_v55 }
 0x2db   :  { %v4409_v27 = vmul.f32 %v7897_v40, %v10858_v0  ;;  %7908 = vtanh.f32 %v10917_v20  ;;  %v7899_v63 = vpop.eup %7898  ;;  %v10958_v51 = vmul.f32 %v8619_v33, %v15187_v24  ;;  %v10967_v60 = vmul.f32 %v8621_v16, %v15187_v24 }
 0x2dc   :  { %4507 = vadd.xlane.f32.xlu1 %v4488_v23  ;;  %v4487_v50 = vadd.f32 %v4471_v15, %v4439_v29  ;;  %v4442_v59 = vadd.f32 %v4426_v10, %v10846_v4  ;;  %v10954_v45 = vpop.xlane.xlu1 %5889  ;;  %7910 = vtanh.f32 %v10927_v57  ;;  %v10963_v4 = vmul.f32 %v8620_v48, %v15186_v55 }
 0x2dd   :  { %15194 = vst [vmem:[#allocation23_spill] sm:$0xff] %v10954_v45  ;;  %v4425_v37 = vadd.f32 %v4409_v27, %v10858_v0  ;;  %7912 = vtanh.f32 %v10933_v13  ;;  %v7901_v41 = vpop.eup %7900  ;;  %v10970_v6 = vmul.f32 %v8618_v5, %v15189_v3  ;;  %v4473_v0 = vmul.f32 %v7899_v63, %v10869_v32  ;;  %v11527_v45 = vld [vmem:[%s15048_s2 + $0x70] sm:$0xff] }
 0x2de   :  { %4505 = vadd.xlane.f32.xlu0 %v4487_v50  ;;  %v4490_v52 = vadd.f32 %v4474_v7, %v4442_v59  ;;  %7914 = vtanh.f32 %v10946_v11  ;;  %v4414_v29 = vmul.f32 %v7901_v41, %v10880_v14  ;;  %v10980_v10 = vmul.f32 %v8619_v33, %v15190_v42  ;;  %v10996_v33 = vld [vmem:[%s15048_s2 + $0x28] sm:$0xff] }
 0x2df   :  { %v4441_v23 = vadd.f32 %v4425_v37, %v10869_v32  ;;  %7916 = vtanh.f32 %v10949_v22  ;;  %v7903_v15 = vpop.eup %7902  ;;  %v10985_v7 = vmul.f32 %v8620_v48, %v15189_v3  ;;  %v10991_v59 = vmul.f32 %v8621_v16, %v15190_v42 }
 0x2e0   :  { %v10972_v58 = vpop.xlane.xlu0 %5333  ;;  %4511 = vadd.xlane.f32.xlu1 %v4490_v52  ;;  %7918 = vtanh.f32 %v10958_v51  ;;  %v4430_v5 = vadd.f32 %v4414_v29, %v10880_v14  ;;  %v11000_v14 = vmul.f32 %v10996_v33, %v15184_v38  ;;  %v4478_v27 = vmul.f32 %v7903_v15, %v10889_v25  ;;  %v11010_v52 = vld [vmem:[%s15049_s3 + $0x28] sm:$0xff]  ;;  %v11023_v29 = vld [vmem:[%s15048_s2 + $0x20] sm:$0xff] }
 0x2e1   :  { %15195 = vst [vmem:[#allocation30_spill] sm:$0xff] %v10972_v58  ;;  %v4489_v40 = vadd.f32 %v4473_v0, %v4441_v23  ;;  %7920 = vtanh.f32 %v10963_v4  ;;  %v7905_v32 = vpop.eup %7904  ;;  %v11014_v37 = vmul.f32 %v11010_v52, %v15185_v44  ;;  %v11027_v15 = vmul.f32 %v11023_v29, %v15184_v38 }
 0x2e2   :  { %7922 = vtanh.f32 %v10967_v60  ;;  %v4446_v48 = vadd.f32 %v4430_v5, %v10889_v25  ;;  %v4413_v63 = vmul.f32 %v7905_v32, %v10900_v34 }
 0x2e3   :  { %4509 = vadd.xlane.f32.xlu0 %v4489_v40  ;;  %7924 = vtanh.f32 %v10970_v6  ;;  %v7907_v16 = vpop.eup %7906 }
 0x2e4   :  { %v10987_v50 = vpop.xlane.xlu1 %6166  ;;  %7926 = vtanh.f32 %v10980_v10  ;;  %v4494_v25 = vadd.f32 %v4478_v27, %v4446_v48  ;;  %v4429_v0 = vadd.f32 %v4413_v63, %v10900_v34  ;;  %v11034_v34 = vld [vmem:[%s15049_s3 + $0x20] sm:$0xff]  ;;  %v4477_v47 = vmul.f32 %v7907_v16, %v10911_v43 }
 0x2e5   :  { %15196 = vst [vmem:[#allocation38_spill] sm:$0xff] %v10987_v50  ;;  %v7909_v23 = vpop.eup %7908  ;;  %7928 = vtanh.f32 %v10985_v7  ;;  %v11038_v32 = vmul.f32 %v11034_v34, %v15185_v44  ;;  %v11081_v12 = vmul.f32 %v11034_v34, %v15187_v24 }
 0x2e6   :  { %v7911_v40 = vpop.eup %7910  ;;  %v4686_v5 = vmul.f32 %v7909_v23, %v10917_v20  ;;  %7930 = vtanh.f32 %v10991_v59  ;;  %4519 = vadd.xlane.f32.xlu1 %v4494_v25  ;;  %v4445_v63 = vadd.f32 %v4429_v0, %v10911_v43  ;;  %v11047_v23 = vmul.f32 %v10996_v33, %v15186_v55 }
 0x2e7   :  { %v11016_v41 = vpop.xlane.xlu0 %5610  ;;  %v7913_v27 = vpop.eup %7912  ;;  %7932 = vtanh.f32 %v11000_v14  ;;  %v4750_v0 = vmul.f32 %v7911_v40, %v10927_v57  ;;  %v11058_v43 = vmul.f32 %v11010_v52, %v15187_v24  ;;  %v11068_v40 = vmul.f32 %v11023_v29, %v15186_v55 }
 0x2e8   :  { %15197 = vst [vmem:[#allocation39_spill] sm:$0xff] %v11016_v41  ;;  %v7915_v17 = vpop.eup %7914  ;;  %v4702_v50 = vadd.f32 %v4686_v5, %v10917_v20  ;;  %v4685_v26 = vmul.f32 %v7913_v27, %v10933_v13  ;;  %7934 = vtanh.f32 %v11014_v37  ;;  %v4493_v53 = vadd.f32 %v4477_v47, %v4445_v63 }
 0x2e9   :  { %v11040_v48 = vpop.xlane.xlu1 %6443  ;;  %v7917_v25 = vpop.eup %7916  ;;  %7936 = vtanh.f32 %v11027_v15  ;;  %v4749_v47 = vmul.f32 %v7915_v17, %v10946_v11 }
 0x2ea   :  { %15198 = vst [vmem:[#allocation40_spill] sm:$0xff] %v11040_v48  ;;  %v7919_v16 = vpop.eup %7918  ;;  %v4718_v35 = vadd.f32 %v4702_v50, %v10927_v57  ;;  %v4701_v20 = vadd.f32 %v4685_v26, %v10933_v13  ;;  %v4688_v5 = vmul.f32 %v7917_v25, %v10949_v22  ;;  %7938 = vtanh.f32 %v11038_v32  ;;  %4517 = vadd.xlane.f32.xlu0 %v4493_v53 }
 0x2eb   :  { %v11052_v48 = vpop.xlane.xlu0 %5887  ;;  %v7921_v27 = vpop.eup %7920  ;;  %7940 = vtanh.f32 %v11047_v23  ;;  %v4752_v17 = vmul.f32 %v7919_v16, %v10958_v51  ;;  %v11090_v16 = vmul.f32 %v10996_v33, %v15189_v3  ;;  %v11103_v33 = vmul.f32 %v11010_v52, %v15190_v42 }
 0x2ec   :  { %15199 = vst [vmem:[#allocation41_spill] sm:$0xff] %v11052_v48  ;;  %v7923_v63 = vpop.eup %7922  ;;  %v4766_v1 = vadd.f32 %v4750_v0, %v4718_v35  ;;  %v4717_v57 = vadd.f32 %v4701_v20, %v10946_v11  ;;  %v4704_v26 = vadd.f32 %v4688_v5, %v10949_v22  ;;  %v4687_v13 = vmul.f32 %v7921_v27, %v10963_v4  ;;  %v11541_v48 = vld [vmem:[%s15049_s3 + $0x70] sm:$0xff] }
 0x2ed   :  { %v7925_v53 = vpop.eup %7924  ;;  %7942 = vtanh.f32 %v11058_v43  ;;  %v4751_v27 = vmul.f32 %v7923_v63, %v10967_v60 }
 0x2ee   :  { %v7927_v35 = vpop.eup %7926  ;;  %4785 = vadd.xlane.f32.xlu1 %v4766_v1  ;;  %v4765_v11 = vadd.f32 %v4749_v47, %v4717_v57  ;;  %v4720_v22 = vadd.f32 %v4704_v26, %v10958_v51  ;;  %v4703_v0 = vadd.f32 %v4687_v13, %v10963_v4  ;;  %v4692_v20 = vmul.f32 %v7925_v53, %v10970_v6 }
 0x2ef   :  { %v11073_v50 = vpop.xlane.xlu0 %6164  ;;  %v11075_v25 = vpop.xlane.xlu1 %1217  ;;  %7944 = vtanh.f32 %v11068_v40  ;;  %v4756_v26 = vmul.f32 %v7927_v35, %v10980_v10  ;;  %v11112_v35 = vmul.f32 %v11023_v29, %v15189_v3  ;;  %v8626_v29 = vld [vmem:[%s15048_s2 + $0x38] sm:$0xff] }
 0x2f0   :  { %15200 = vst [vmem:[#allocation42_spill] sm:$0xff] %v11073_v50  ;;  %15201 = vst [vmem:[#allocation43_spill] sm:$0xff] %v11075_v25  ;;  %v7929_v5 = vpop.eup %7928  ;;  %4783 = vadd.xlane.f32.xlu0 %v4765_v11  ;;  %v4768_v50 = vadd.f32 %v4752_v17, %v4720_v22  ;;  %v4719_v1 = vadd.f32 %v4703_v0, %v10967_v60  ;;  %v4708_v51 = vadd.f32 %v4692_v20, %v10970_v6 }
 0x2f1   :  { %v7931_v25 = vpop.eup %7930  ;;  %v4691_v4 = vmul.f32 %v7929_v5, %v10985_v7  ;;  %7946 = vtanh.f32 %v11081_v12 }
 0x2f2   :  { %v7933_v63 = vpop.eup %7932  ;;  %4789 = vadd.xlane.f32.xlu1 %v4768_v50  ;;  %v4767_v60 = vadd.f32 %v4751_v27, %v4719_v1  ;;  %v4724_v6 = vadd.f32 %v4708_v51, %v10980_v10  ;;  %v4755_v22 = vmul.f32 %v7931_v25, %v10991_v59  ;;  %7948 = vtanh.f32 %v11090_v16 }
 0x2f3   :  { %v11095_v47 = vpop.xlane.xlu0 %6441  ;;  %v11097_v57 = vpop.xlane.xlu1 %1219  ;;  %v4707_v53 = vadd.f32 %v4691_v4, %v10985_v7  ;;  %v4963_v17 = vmul.f32 %v7933_v63, %v11000_v14  ;;  %7950 = vtanh.f32 %v11103_v33  ;;  %v11121_v25 = vmul.f32 %v11034_v34, %v15190_v42 }
 0x2f4   :  { %15202 = vst [vmem:[#allocation44_spill] sm:$0xff] %v11095_v47  ;;  %15203 = vst [vmem:[#allocation45_spill] sm:$0xff] %v11097_v57  ;;  %v7935_v13 = vpop.eup %7934  ;;  %4787 = vadd.xlane.f32.xlu0 %v4767_v60  ;;  %v4772_v0 = vadd.f32 %v4756_v26, %v4724_v6  ;;  %v11127_v27 = vmul.f32 %v8626_v29, %v15184_v38  ;;  %7952 = vtanh.f32 %v11112_v35  ;;  %v8627_v26 = vld [vmem:[%s15049_s3 + $0x38] sm:$0xff] }
 0x2f5   :  { %v7937_v11 = vpop.eup %7936  ;;  %v4723_v50 = vadd.f32 %v4707_v53, %v10991_v59  ;;  %v4979_v10 = vadd.f32 %v4963_v17, %v11000_v14  ;;  %v5027_v5 = vmul.f32 %v7935_v13, %v11014_v37  ;;  %v11141_v13 = vmul.f32 %v8627_v26, %v15185_v44 }
 0x2f6   :  { %v7939_v52 = vpop.eup %7938  ;;  %v4962_v7 = vmul.f32 %v7937_v11, %v11027_v15  ;;  %4797 = vadd.xlane.f32.xlu1 %v4772_v0  ;;  %7954 = vtanh.f32 %v11121_v25  ;;  %v8629_v0 = vld [vmem:[%s15049_s3 + $0x30] sm:$0xff] }
 0x2f7   :  { %v7941_v20 = vpop.eup %7940  ;;  %v11129_v59 = vpop.xlane.xlu1 %1223  ;;  %v4771_v14 = vadd.f32 %v4755_v22, %v4723_v50  ;;  %v4995_v1 = vadd.f32 %v4979_v10, %v11014_v37  ;;  %v8628_v37 = vld [vmem:[%s15048_s2 + $0x30] sm:$0xff]  ;;  %v5026_v53 = vmul.f32 %v7939_v52, %v11038_v32  ;;  %v11158_v50 = vmul.f32 %v8629_v0, %v15185_v44 }
 0x2f8   :  { %15204 = vst [vmem:[#allocation46_spill] sm:$0xff] %v11129_v59  ;;  %v4978_v51 = vadd.f32 %v4962_v7, %v11027_v15  ;;  %v4965_v4 = vmul.f32 %v7941_v20, %v11047_v23  ;;  %v11134_v63 = vpop.xlane.xlu0 %1221  ;;  %v7943_v34 = vpop.eup %7942  ;;  %v11147_v15 = vmul.f32 %v8628_v37, %v15184_v38  ;;  %v11161_v10 = vmul.f32 %v8626_v29, %v15186_v55 }
 0x2f9   :  { %15205 = vst [vmem:[#allocation47_spill] sm:$0xff] %v11134_v63  ;;  %4795 = vadd.xlane.f32.xlu0 %v4771_v14  ;;  %v5043_v60 = vadd.f32 %v5027_v5, %v4995_v1  ;;  %v7945_v11 = vpop.eup %7944  ;;  %v5029_v22 = vmul.f32 %v7943_v34, %v11058_v43  ;;  %7956 = vtanh.f32 %v11127_v27  ;;  %v11170_v5 = vmul.f32 %v8627_v26, %v15187_v24 }
 0x2fa   :  { %v4994_v6 = vadd.f32 %v4978_v51, %v11038_v32  ;;  %v4981_v17 = vadd.f32 %v4965_v4, %v11047_v23  ;;  %v4964_v52 = vmul.f32 %v7945_v11, %v11068_v40  ;;  %7958 = vtanh.f32 %v11141_v13 }
 0x2fb   :  { %v11163_v7 = vpop.xlane.xlu1 %1231  ;;  %5062 = vadd.xlane.f32.xlu1 %v5043_v60  ;;  %v7947_v20 = vpop.eup %7946  ;;  %7960 = vtanh.f32 %v11147_v15  ;;  %v11175_v51 = vmul.f32 %v8628_v37, %v15186_v55  ;;  %v11181_v34 = vmul.f32 %v8629_v0, %v15187_v24  ;;  %v11184_v60 = vmul.f32 %v8626_v29, %v15189_v3 }
 0x2fc   :  { %15206 = vst [vmem:[#allocation48_spill] sm:$0xff] %v11163_v7  ;;  %v5042_v32 = vadd.f32 %v5026_v53, %v4994_v6  ;;  %v4997_v23 = vadd.f32 %v4981_v17, %v11058_v43  ;;  %v4980_v1 = vadd.f32 %v4964_v52, %v11068_v40  ;;  %v7949_v4 = vpop.eup %7948  ;;  %7962 = vtanh.f32 %v11158_v50 }
 0x2fd   :  { %v5028_v40 = vmul.f32 %v7947_v20, %v11081_v12  ;;  %v4969_v53 = vmul.f32 %v7949_v4, %v11090_v16  ;;  %7964 = vtanh.f32 %v11161_v10  ;;  %v7951_v17 = vpop.eup %7950  ;;  %v11192_v11 = vmul.f32 %v8627_v26, %v15190_v42  ;;  %v11208_v26 = vld [vmem:[%s15048_s2 + $0x48] sm:$0xff] }
 0x2fe   :  { %5060 = vadd.xlane.f32.xlu0 %v5042_v32  ;;  %v5045_v14 = vadd.f32 %v5029_v22, %v4997_v23  ;;  %v4996_v6 = vadd.f32 %v4980_v1, %v11081_v12  ;;  %7966 = vtanh.f32 %v11170_v5  ;;  %v11199_v23 = vmul.f32 %v8628_v37, %v15189_v3  ;;  %v7953_v12 = vpop.eup %7952  ;;  %v11224_v4 = vld [vmem:[%s15049_s3 + $0x48] sm:$0xff] }
 0x2ff   :  { %v11177_v43 = vpop.xlane.xlu0 %1229  ;;  %v4985_v29 = vadd.f32 %v4969_v53, %v11090_v16  ;;  %7968 = vtanh.f32 %v11175_v51  ;;  %v11203_v52 = vmul.f32 %v8629_v0, %v15190_v42  ;;  %v11212_v20 = vmul.f32 %v11208_v26, %v15184_v38 }
 0x300   :  { %15207 = vst [vmem:[#allocation49_spill] sm:$0xff] %v11177_v43  ;;  %5066 = vadd.xlane.f32.xlu1 %v5045_v14  ;;  %v5044_v32 = vadd.f32 %v5028_v40, %v4996_v6  ;;  %7970 = vtanh.f32 %v11181_v34  ;;  %v5033_v14 = vmul.f32 %v7951_v17, %v11103_v33  ;;  %v4968_v1 = vmul.f32 %v7953_v12, %v11112_v35  ;;  %v7955_v0 = vpop.eup %7954 }
 0x301   :  { %v5001_v37 = vadd.f32 %v4985_v29, %v11103_v33  ;;  %7972 = vtanh.f32 %v11184_v60  ;;  %v11228_v6 = vmul.f32 %v11224_v4, %v15185_v44  ;;  %v5032_v7 = vmul.f32 %v7955_v0, %v11121_v25 }
 0x302   :  { %v11194_v22 = vpop.xlane.xlu1 %1508  ;;  %5064 = vadd.xlane.f32.xlu0 %v5044_v32  ;;  %7974 = vtanh.f32 %v11192_v11  ;;  %v4984_v17 = vadd.f32 %v4968_v1, %v11112_v35  ;;  %v11237_v32 = vld [vmem:[%s15048_s2 + $0x40] sm:$0xff] }
 0x303   :  { %15208 = vst [vmem:[#allocation50_spill] sm:$0xff] %v11194_v22  ;;  %v7957_v53 = vpop.eup %7956  ;;  %v5049_v33 = vadd.f32 %v5033_v14, %v5001_v37  ;;  %7976 = vtanh.f32 %v11199_v23  ;;  %v11241_v29 = vmul.f32 %v11237_v32, %v15184_v38  ;;  %v11248_v35 = vld [vmem:[%s15049_s3 + $0x40] sm:$0xff] }
 0x304   :  { %v11214_v16 = vpop.xlane.xlu0 %1506  ;;  %v7959_v12 = vpop.eup %7958  ;;  %v5240_v43 = vmul.f32 %v7957_v53, %v11127_v27  ;;  %7978 = vtanh.f32 %v11203_v52  ;;  %v11252_v37 = vmul.f32 %v11248_v35, %v15185_v44  ;;  %v11261_v53 = vmul.f32 %v11208_v26, %v15186_v55 }
 0x305   :  { %15209 = vst [vmem:[#allocation51_spill] sm:$0xff] %v11214_v16  ;;  %v7961_v1 = vpop.eup %7960  ;;  %5074 = vadd.xlane.f32.xlu1 %v5049_v33  ;;  %7980 = vtanh.f32 %v11212_v20 }
 0x306   :  { %v11230_v40 = vpop.xlane.xlu1 %1512  ;;  %v7963_v16 = vpop.eup %7962  ;;  %v5256_v22 = vadd.f32 %v5240_v43, %v11127_v27  ;;  %v5239_v59 = vmul.f32 %v7961_v1, %v11147_v15  ;;  %7982 = vtanh.f32 %v11228_v6 }
 0x307   :  { %15210 = vst [vmem:[#allocation52_spill] sm:$0xff] %v11230_v40  ;;  %v5000_v40 = vadd.f32 %v4984_v17, %v11121_v25  ;;  %v7965_v33 = vpop.eup %7964  ;;  %v5304_v17 = vmul.f32 %v7959_v12, %v11141_v13  ;;  %7984 = vtanh.f32 %v11241_v29  ;;  %v11272_v25 = vmul.f32 %v11224_v4, %v15187_v24 }
 0x308   :  { %v11254_v14 = vpop.xlane.xlu0 %1510  ;;  %v7967_v0 = vpop.eup %7966  ;;  %v5272_v47 = vadd.f32 %v5256_v22, %v11141_v13  ;;  %v5255_v27 = vadd.f32 %v5239_v59, %v11147_v15  ;;  %v5242_v43 = vmul.f32 %v7965_v33, %v11161_v10  ;;  %7986 = vtanh.f32 %v11252_v37 }
 0x309   :  { %15211 = vst [vmem:[#allocation53_spill] sm:$0xff] %v11254_v14  ;;  %v5048_v63 = vadd.f32 %v5032_v7, %v5000_v40  ;;  %v7969_v7 = vpop.eup %7968  ;;  %v5303_v40 = vmul.f32 %v7963_v16, %v11158_v50  ;;  %7988 = vtanh.f32 %v11261_v53  ;;  %v11284_v12 = vmul.f32 %v11237_v32, %v15186_v55 }
 0x30a   :  { %v11266_v14 = vpop.xlane.xlu1 %1520  ;;  %v5320_v13 = vadd.f32 %v5304_v17, %v5272_v47  ;;  %v5271_v59 = vadd.f32 %v5255_v27, %v11158_v50  ;;  %v5258_v15 = vadd.f32 %v5242_v43, %v11161_v10  ;;  %v5241_v22 = vmul.f32 %v7969_v7, %v11175_v51 }
 0x30b   :  { %15212 = vst [vmem:[#allocation54_spill] sm:$0xff] %v11266_v14  ;;  %5072 = vadd.xlane.f32.xlu0 %v5048_v63  ;;  %v7971_v14 = vpop.eup %7970  ;;  %7990 = vtanh.f32 %v11272_v25  ;;  %v11293_v63 = vmul.f32 %v11248_v35, %v15187_v24  ;;  %v11304_v43 = vmul.f32 %v11208_v26, %v15189_v3  ;;  %v11315_v26 = vmul.f32 %v11224_v4, %v15190_v42 }
 0x30c   :  { %v11278_v1 = vpop.xlane.xlu0 %1518  ;;  %v7973_v33 = vpop.eup %7972  ;;  %5339 = vadd.xlane.f32.xlu1 %v5320_v13  ;;  %v5319_v47 = vadd.f32 %v5303_v40, %v5271_v59  ;;  %v5274_v50 = vadd.f32 %v5258_v15, %v11170_v5  ;;  %v5257_v10 = vadd.f32 %v5241_v22, %v11175_v51  ;;  %7992 = vtanh.f32 %v11284_v12 }
 0x30d   :  { %15213 = vst [vmem:[#allocation55_spill] sm:$0xff] %v11278_v1  ;;  %v5306_v1 = vmul.f32 %v7967_v0, %v11170_v5  ;;  %v7975_v57 = vpop.eup %7974  ;;  %v5246_v17 = vmul.f32 %v7973_v33, %v11184_v60  ;;  %v5305_v0 = vmul.f32 %v7971_v14, %v11181_v34  ;;  %7994 = vtanh.f32 %v11293_v63 }
 0x30e   :  { %v11295_v16 = vpop.xlane.xlu1 %1789  ;;  %v7977_v27 = vpop.eup %7976  ;;  %v5273_v40 = vadd.f32 %v5257_v10, %v11181_v34  ;;  %v5310_v14 = vmul.f32 %v7975_v57, %v11192_v11  ;;  %7996 = vtanh.f32 %v11304_v43  ;;  %v11324_v57 = vmul.f32 %v11237_v32, %v15189_v3 }
 0x30f   :  { %15214 = vst [vmem:[#allocation56_spill] sm:$0xff] %v11295_v16  ;;  %v7979_v7 = vpop.eup %7978  ;;  %5337 = vadd.xlane.f32.xlu0 %v5319_v47  ;;  %v5322_v16 = vadd.f32 %v5306_v1, %v5274_v50  ;;  %v5262_v5 = vadd.f32 %v5246_v17, %v11184_v60  ;;  %v5245_v51 = vmul.f32 %v7977_v27, %v11199_v23  ;;  %7998 = vtanh.f32 %v11315_v26 }
 0x310   :  { %v11309_v13 = vpop.xlane.xlu0 %1787  ;;  %v7981_v59 = vpop.eup %7980  ;;  %v5321_v1 = vadd.f32 %v5305_v0, %v5273_v40  ;;  %v5309_v47 = vmul.f32 %v7979_v7, %v11203_v52  ;;  %v11335_v32 = vmul.f32 %v11248_v35, %v15190_v42  ;;  %v11340_v0 = vld [vmem:[%s15048_s2 + $0x58] sm:$0xff]  ;;  %8000 = vtanh.f32 %v11324_v57 }
 0x311   :  { %15215 = vst [vmem:[#allocation57_spill] sm:$0xff] %v11309_v13  ;;  %v7983_v15 = vpop.eup %7982  ;;  %5343 = vadd.xlane.f32.xlu1 %v5322_v16  ;;  %v5278_v34 = vadd.f32 %v5262_v5, %v11192_v11  ;;  %v5261_v60 = vadd.f32 %v5245_v51, %v11199_v23  ;;  %v5517_v22 = vmul.f32 %v7981_v59, %v11212_v20  ;;  %v11355_v59 = vld [vmem:[%s15049_s3 + $0x58] sm:$0xff] }
 0x312   :  { %v7985_v33 = vpop.eup %7984  ;;  %v11326_v4 = vpop.xlane.xlu1 %1793  ;;  %v5581_v27 = vmul.f32 %v7983_v15, %v11228_v6  ;;  %8002 = vtanh.f32 %v11335_v32 }
 0x313   :  { %15216 = vst [vmem:[#allocation58_spill] sm:$0xff] %v11326_v4  ;;  %v7987_v50 = vpop.eup %7986  ;;  %5341 = vadd.xlane.f32.xlu0 %v5321_v1  ;;  %v5326_v16 = vadd.f32 %v5310_v14, %v5278_v34  ;;  %v5277_v11 = vadd.f32 %v5261_v60, %v11203_v52  ;;  %v5533_v23 = vadd.f32 %v5517_v22, %v11212_v20 }
 0x314   :  { %v5516_v10 = vmul.f32 %v7985_v33, %v11241_v29  ;;  %v7989_v17 = vpop.eup %7988  ;;  %v11344_v52 = vmul.f32 %v11340_v0, %v15184_v38  ;;  %v11359_v14 = vmul.f32 %v11355_v59, %v15185_v44  ;;  %v5580_v34 = vmul.f32 %v7987_v50, %v11252_v37 }
 0x315   :  { %5351 = vadd.xlane.f32.xlu1 %v5326_v16  ;;  %v5325_v20 = vadd.f32 %v5309_v47, %v5277_v11  ;;  %v5549_v7 = vadd.f32 %v5533_v23, %v11228_v6  ;;  %v5519_v5 = vmul.f32 %v7989_v17, %v11261_v53  ;;  %v7991_v35 = vpop.eup %7990  ;;  %v11364_v6 = vld [vmem:[%s15048_s2 + $0x50] sm:$0xff]  ;;  %v11386_v11 = vmul.f32 %v11340_v0, %v15186_v55 }
 0x316   :  { %v5532_v40 = vadd.f32 %v5516_v10, %v11241_v29  ;;  %v11349_v51 = vpop.xlane.xlu0 %1791  ;;  %v11368_v29 = vmul.f32 %v11364_v6, %v15184_v38  ;;  %v7993_v22 = vpop.eup %7992  ;;  %v5583_v33 = vmul.f32 %v7991_v35, %v11272_v25  ;;  %v11378_v47 = vld [vmem:[%s15049_s3 + $0x50] sm:$0xff]  ;;  %8004 = vtanh.f32 %v11344_v52  ;;  %v11414_v35 = vld [vmem:[%s15048_s2 + $0x68] sm:$0xff] }
 0x317   :  { %15217 = vst [vmem:[#allocation59_spill] sm:$0xff] %v11349_v51  ;;  %5349 = vadd.xlane.f32.xlu0 %v5325_v20  ;;  %v5597_v15 = vadd.f32 %v5581_v27, %v5549_v7  ;;  %v5535_v60 = vadd.f32 %v5519_v5, %v11261_v53  ;;  %v11382_v16 = vmul.f32 %v11378_v47, %v15185_v44  ;;  %v7995_v10 = vpop.eup %7994  ;;  %8006 = vtanh.f32 %v11359_v14 }
 0x318   :  { %v5548_v1 = vadd.f32 %v5532_v40, %v11252_v37  ;;  %v5518_v23 = vmul.f32 %v7993_v22, %v11284_v12  ;;  %v11396_v17 = vmul.f32 %v11355_v59, %v15187_v24  ;;  %8008 = vtanh.f32 %v11368_v29  ;;  %v7997_v40 = vpop.eup %7996  ;;  %v11428_v22 = vld [vmem:[%s15049_s3 + $0x68] sm:$0xff] }
 0x319   :  { %5616 = vadd.xlane.f32.xlu1 %v5597_v15  ;;  %v5551_v50 = vadd.f32 %v5535_v60, %v11272_v25  ;;  %v11402_v25 = vmul.f32 %v11364_v6, %v15186_v55  ;;  %8010 = vtanh.f32 %v11382_v16  ;;  %v11409_v5 = vmul.f32 %v11378_v47, %v15187_v24  ;;  %v7999_v60 = vpop.eup %7998 }
 0x31a   :  { %v11388_v37 = vpop.xlane.xlu1 %1801  ;;  %v5596_v53 = vadd.f32 %v5580_v34, %v5548_v1  ;;  %v5534_v20 = vadd.f32 %v5518_v23, %v11284_v12  ;;  %v11418_v12 = vmul.f32 %v11414_v35, %v15184_v38  ;;  %v5582_v1 = vmul.f32 %v7995_v10, %v11293_v63  ;;  %v11441_v23 = vld [vmem:[%s15048_s2 + $0x60] sm:$0xff] }
 0x31b   :  { %15218 = vst [vmem:[#allocation60_spill] sm:$0xff] %v11388_v37  ;;  %v5599_v27 = vadd.f32 %v5583_v33, %v5551_v50  ;;  %v5523_v34 = vmul.f32 %v7997_v40, %v11304_v43  ;;  %8012 = vtanh.f32 %v11386_v11  ;;  %v11432_v33 = vmul.f32 %v11428_v22, %v15185_v44 }
 0x31c   :  { %5614 = vadd.xlane.f32.xlu0 %v5596_v53  ;;  %v5550_v15 = vadd.f32 %v5534_v20, %v11293_v63  ;;  %8014 = vtanh.f32 %v11396_v17  ;;  %v11445_v10 = vmul.f32 %v11441_v23, %v15184_v38  ;;  %v11451_v20 = vld [vmem:[%s15049_s3 + $0x60] sm:$0xff]  ;;  %v11459_v40 = vmul.f32 %v11414_v35, %v15186_v55 }
 0x31d   :  { %5620 = vadd.xlane.f32.xlu1 %v5599_v27  ;;  %v5539_v63 = vadd.f32 %v5523_v34, %v11304_v43  ;;  %8016 = vtanh.f32 %v11402_v25  ;;  %v8001_v27 = vpop.eup %8000  ;;  %v11455_v43 = vmul.f32 %v11451_v20, %v15185_v44  ;;  %v5587_v34 = vmul.f32 %v7999_v60, %v11315_v26 }
 0x31e   :  { %v11404_v7 = vpop.xlane.xlu0 %1799  ;;  %v5598_v50 = vadd.f32 %v5582_v1, %v5550_v15  ;;  %8018 = vtanh.f32 %v11409_v5  ;;  %v8003_v37 = vpop.eup %8002 }
 0x31f   :  { %15219 = vst [vmem:[#allocation61_spill] sm:$0xff] %v11404_v7  ;;  %v5555_v1 = vadd.f32 %v5539_v63, %v11315_v26  ;;  %v5522_v7 = vmul.f32 %v8001_v27, %v11324_v57  ;;  %8020 = vtanh.f32 %v11418_v12  ;;  %v11478_v26 = vmul.f32 %v11441_v23, %v15186_v55 }
 0x320   :  { %5618 = vadd.xlane.f32.xlu0 %v5598_v50  ;;  %8022 = vtanh.f32 %v11432_v33  ;;  %v8005_v4 = vpop.eup %8004  ;;  %v11484_v27 = vmul.f32 %v11451_v20, %v15187_v24 }
 0x321   :  { %v11434_v53 = vpop.xlane.xlu1 %2070  ;;  %v5538_v50 = vadd.f32 %v5522_v7, %v11324_v57  ;;  %8024 = vtanh.f32 %v11445_v10  ;;  %v8007_v60 = vpop.eup %8006  ;;  %v5794_v63 = vmul.f32 %v8005_v4, %v11344_v52  ;;  %v5586_v7 = vmul.f32 %v8003_v37, %v11335_v32  ;;  %v11494_v4 = vld [vmem:[%s15048_s2 + $0x78] sm:$0xff] }
 0x322   :  { %15220 = vst [vmem:[#allocation62_spill] sm:$0xff] %v11434_v53  ;;  %v11470_v53 = vmul.f32 %v11428_v22, %v15187_v24  ;;  %8026 = vtanh.f32 %v11455_v43  ;;  %v5858_v21 = vmul.f32 %v8007_v60, %v11359_v14 }
 0x323   :  { %v11461_v15 = vpop.xlane.xlu0 %2068  ;;  %v5554_v57 = vadd.f32 %v5538_v50, %v11335_v32  ;;  %8028 = vtanh.f32 %v11459_v40 }
 0x324   :  { %15221 = vst [vmem:[#allocation63_spill] sm:$0xff] %v11461_v15  ;;  %v5603_v15 = vadd.f32 %v5587_v34, %v5555_v1  ;;  %v8009_v1 = vpop.eup %8008  ;;  %v11498_v34 = vmul.f32 %v11494_v4, %v15184_v38  ;;  %8030 = vtanh.f32 %v11470_v53 }
 0x325   :  { %v11472_v51 = vpop.xlane.xlu1 %2074  ;;  %v8011_v13 = vpop.eup %8010  ;;  %v5602_v37 = vadd.f32 %v5586_v7, %v5554_v57  ;;  %8032 = vtanh.f32 %v11478_v26 }
 0x326   :  { %15222 = vst [vmem:[#allocation64_spill] sm:$0xff] %v11472_v51  ;;  %5628 = vadd.xlane.f32.xlu1 %v5603_v15  ;;  %v5793_v15 = vmul.f32 %v8009_v1, %v11368_v29  ;;  %v8013_v32 = vpop.eup %8012  ;;  %8034 = vtanh.f32 %v11484_v27  ;;  %v5857_v30 = vmul.f32 %v8011_v13, %v11382_v16 }
 0x327   :  { %v11486_v51 = vpop.xlane.xlu0 %2072  ;;  %v5796_v57 = vmul.f32 %v8013_v32, %v11386_v11  ;;  %5626 = vadd.xlane.f32.xlu0 %v5602_v37  ;;  %8036 = vtanh.f32 %v11498_v34 }
 0x328   :  { %15223 = vst [vmem:[#allocation65_spill] sm:$0xff] %v11486_v51  ;;  %v5810_v51 = vadd.f32 %v5794_v63, %v11344_v52  ;;  %v11514_v52 = vmul.f32 %v11510_v36, %v15185_v44  ;;  %v8015_v63 = vpop.eup %8014 }
 0x329   :  { %v11503_v50 = vpop.xlane.xlu1 %2082  ;;  %v8017_v7 = vpop.eup %8016  ;;  %v5812_v32 = vadd.f32 %v5796_v57, %v11386_v11 }
 0x32a   :  { %15224 = vst [vmem:[#allocation66_spill] sm:$0xff] %v11503_v50  ;;  %v5826_v1 = vadd.f32 %v5810_v51, %v11359_v14  ;;  %v5809_v50 = vadd.f32 %v5793_v15, %v11368_v29  ;;  %v11531_v51 = vmul.f32 %v11527_v45, %v15184_v38  ;;  %v8019_v14 = vpop.eup %8018  ;;  %v5795_v37 = vmul.f32 %v8017_v7, %v11402_v25 }
 0x32b   :  { %v11520_v60 = vpop.xlane.xlu0 %2080  ;;  %v8021_v13 = vpop.eup %8020  ;;  %8038 = vtanh.f32 %v11514_v52  ;;  %v11545_v38 = vmul.f32 %v11541_v48, %v15185_v44  ;;  %v5859_v7 = vmul.f32 %v8019_v14, %v11409_v5  ;;  %v11556_v44 = vmul.f32 %v11340_v0, %v15189_v3 }
 0x32c   :  { %15225 = vst [vmem:[#allocation67_spill] sm:$0xff] %v11520_v60  ;;  %v5874_v29 = vadd.f32 %v5858_v21, %v5826_v1  ;;  %v5825_v15 = vadd.f32 %v5809_v50, %v11382_v16  ;;  %v5860_v60 = vmul.f32 %v8015_v63, %v11396_v17  ;;  %v8023_v16 = vpop.eup %8022  ;;  %v5828_v50 = vadd.f32 %v5812_v32, %v11396_v17 }
 0x32d   :  { %v11547_v21 = vpop.xlane.xlu1 %2351  ;;  %v5811_v63 = vadd.f32 %v5795_v37, %v11402_v25  ;;  %v6071_v1 = vmul.f32 %v8021_v13, %v11418_v12  ;;  %v8025_v57 = vpop.eup %8024  ;;  %8040 = vtanh.f32 %v11531_v51  ;;  %v6135_v14 = vmul.f32 %v8023_v16, %v11432_v33 }
 0x32e   :  { %15226 = vst [vmem:[#allocation68_spill] sm:$0xff] %v11547_v21  ;;  %5893 = vadd.xlane.f32.xlu1 %v5874_v29  ;;  %v5873_v11 = vadd.f32 %v5857_v30, %v5825_v15  ;;  %v8027_v41 = vpop.eup %8026  ;;  %v5876_v21 = vadd.f32 %v5860_v60, %v5828_v50  ;;  %v6070_v25 = vmul.f32 %v8025_v57, %v11445_v10  ;;  %8042 = vtanh.f32 %v11545_v38 }
 0x32f   :  { %v5827_v30 = vadd.f32 %v5811_v63, %v11409_v5  ;;  %v6087_v17 = vadd.f32 %v6071_v1, %v11418_v12  ;;  %v11561_v29 = vpop.xlane.xlu0 %2349  ;;  %v8029_v15 = vpop.eup %8028  ;;  %v11567_v0 = vmul.f32 %v11355_v59, %v15190_v42  ;;  %8044 = vtanh.f32 %v11556_v44 }
 0x330   :  { %5891 = vadd.xlane.f32.xlu0 %v5873_v11  ;;  %15227 = vst [vmem:[#allocation69_spill] sm:$0xff] %v11561_v29  ;;  %v8031_v32 = vpop.eup %8030  ;;  %v6086_v12 = vadd.f32 %v6070_v25, %v11445_v10  ;;  %v6073_v37 = vmul.f32 %v8029_v15, %v11459_v40  ;;  %v6134_v11 = vmul.f32 %v8027_v41, %v11455_v43 }
 0x331   :  { %v5875_v60 = vadd.f32 %v5859_v7, %v5827_v30  ;;  %v6103_v5 = vadd.f32 %v6087_v17, %v11432_v33  ;;  %v8033_v13 = vpop.eup %8032  ;;  %v11576_v16 = vmul.f32 %v11364_v6, %v15189_v3  ;;  %v11578_v59 = vpop.xlane.xlu1 %2355  ;;  %v6137_v41 = vmul.f32 %v8031_v32, %v11470_v53 }
 0x332   :  { %5897 = vadd.xlane.f32.xlu1 %v5876_v21  ;;  %15228 = vst [vmem:[#allocation70_spill] sm:$0xff] %v11578_v59  ;;  %v8035_v50 = vpop.eup %8034  ;;  %v6102_v33 = vadd.f32 %v6086_v12, %v11455_v43  ;;  %v6089_v10 = vadd.f32 %v6073_v37, %v11459_v40  ;;  %v6072_v63 = vmul.f32 %v8033_v13, %v11478_v26  ;;  %8046 = vtanh.f32 %v11567_v0 }
 0x333   :  { %v6151_v21 = vadd.f32 %v6135_v14, %v6103_v5  ;;  %v8037_v1 = vpop.eup %8036  ;;  %v11587_v6 = vmul.f32 %v11378_v47, %v15190_v42  ;;  %v11591_v57 = vmul.f32 %v11494_v4, %v15186_v55  ;;  %8048 = vtanh.f32 %v11576_v16 }
 0x334   :  { %5895 = vadd.xlane.f32.xlu0 %v5875_v60  ;;  %v6150_v7 = vadd.f32 %v6134_v11, %v6102_v33  ;;  %v6105_v43 = vadd.f32 %v6089_v10, %v11470_v53  ;;  %v6088_v40 = vadd.f32 %v6072_v63, %v11478_v26  ;;  %v6348_v30 = vmul.f32 %v8037_v1, %v11498_v34 }
 0x335   :  { %v11596_v17 = vpop.xlane.xlu0 %2353  ;;  %v8039_v25 = vpop.eup %8038  ;;  %v11601_v47 = vmul.f32 %v11510_v36, %v15187_v24  ;;  %v11605_v15 = vmul.f32 %v11527_v45, %v15186_v55  ;;  %v6136_v26 = vmul.f32 %v8035_v50, %v11484_v27  ;;  %8050 = vtanh.f32 %v11587_v6 }
 0x336   :  { %6170 = vadd.xlane.f32.xlu1 %v6151_v21  ;;  %15229 = vst [vmem:[#allocation71_spill] sm:$0xff] %v11596_v17  ;;  %v6153_v14 = vadd.f32 %v6137_v41, %v6105_v43  ;;  %v6104_v53 = vadd.f32 %v6088_v40, %v11484_v27  ;;  %v6364_v32 = vadd.f32 %v6348_v30, %v11498_v34  ;;  %8052 = vtanh.f32 %v11591_v57  ;;  %v15233_v30 = vld [vmem:[#allocation8_spill] sm:$0xff] }
 0x337   :  { %v8041_v60 = vpop.eup %8040  ;;  %v6412_v5 = vmul.f32 %v8039_v25, %v11514_v52  ;;  %v11614_v12 = vmul.f32 %v11541_v48, %v15187_v24  ;;  %v11618_v55 = vmul.f32 %v11414_v35, %v15189_v3  ;;  %8054 = vtanh.f32 %v11601_v47 }
 0x338   :  { %6168 = vadd.xlane.f32.xlu0 %v6150_v7  ;;  %v6152_v13 = vadd.f32 %v6136_v26, %v6104_v53  ;;  %v6380_v27 = vadd.f32 %v6364_v32, %v11514_v52  ;;  %v6347_v34 = vmul.f32 %v8041_v60, %v11531_v51  ;;  %v8043_v11 = vpop.eup %8042  ;;  %v11628_v24 = vmul.f32 %v11428_v22, %v15190_v42  ;;  %v15235_v53 = vld [vmem:[#allocation15_spill] sm:$0xff] }
 0x339   :  { %v11620_v37 = vpop.xlane.xlu1 %2363  ;;  %8056 = vtanh.f32 %v11605_v15  ;;  %v11634_v52 = vmul.f32 %v11441_v23, %v15189_v3  ;;  %v8045_v33 = vpop.eup %8044  ;;  %v11641_v10 = vmul.f32 %v11451_v20, %v15190_v42  ;;  %v11645_v22 = vmul.f32 %v11494_v4, %v15189_v3 }
 0x33a   :  { %15230 = vst [vmem:[#allocation72_spill] sm:$0xff] %v11620_v37  ;;  %6174 = vadd.xlane.f32.xlu1 %v6153_v14  ;;  %v6428_v35 = vadd.f32 %v6412_v5, %v6380_v27  ;;  %v6363_v50 = vadd.f32 %v6347_v34, %v11531_v51  ;;  %8058 = vtanh.f32 %v11614_v12  ;;  %v6411_v63 = vmul.f32 %v8043_v11, %v11545_v38 }
 0x33b   :  { %v5800_v23 = vmul.f32 %v8045_v33, %v11556_v44  ;;  %8060 = vtanh.f32 %v11618_v55  ;;  %v11654_v20 = vmul.f32 %v11510_v36, %v15190_v42  ;;  %v11667_v40 = vmul.f32 %v11541_v48, %v15190_v42  ;;  %v11672_v36 = vld [vmem:[%s15048_s2 + $0x8] sm:$0xff] }
 0x33c   :  { %6172 = vadd.xlane.f32.xlu0 %v6152_v13  ;;  %v6379_v51 = vadd.f32 %v6363_v50, %v11545_v38  ;;  %v8047_v1 = vpop.eup %8046  ;;  %8062 = vtanh.f32 %v11628_v24  ;;  %v11662_v38 = vmul.f32 %v11527_v45, %v15189_v3  ;;  %v11688_v48 = vld [vmem:[%s15049_s3 + $0x8] sm:$0xff]  ;;  %v11701_v13 = vld [vmem:[%s15048_s2] sm:$0xff] }
 0x33d   :  { %v11636_v21 = vpop.xlane.xlu0 %2361  ;;  %v5816_v7 = vadd.f32 %v5800_v23, %v11556_v44  ;;  %8064 = vtanh.f32 %v11634_v52  ;;  %v8049_v43 = vpop.eup %8048  ;;  %v11676_v44 = vmul.f32 %v11672_v36, %v15233_v30  ;;  %v5864_v45 = vmul.f32 %v8047_v1, %v11567_v0  ;;  %v15238_v23 = vld [vmem:[#allocation10_spill] sm:$0xff] }
 0x33e   :  { %15231 = vst [vmem:[#allocation73_spill] sm:$0xff] %v11636_v21  ;;  %6447 = vadd.xlane.f32.xlu1 %v6428_v35  ;;  %v6427_v4 = vadd.f32 %v6411_v63, %v6379_v51  ;;  %8066 = vtanh.f32 %v11641_v10  ;;  %v5799_v14 = vmul.f32 %v8049_v43, %v11576_v16  ;;  %v11692_v26 = vmul.f32 %v11688_v48, %v15235_v53 }
 0x33f   :  { %v5832_v3 = vadd.f32 %v5816_v7, %v11567_v0  ;;  %8068 = vtanh.f32 %v11645_v22  ;;  %v8051_v42 = vpop.eup %8050  ;;  %v11705_v27 = vmul.f32 %v11701_v13, %v15233_v30  ;;  %v11725_v1 = vmul.f32 %v11672_v36, %v15238_v23 }
 0x340   :  { %v11656_v41 = vpop.xlane.xlu1 %2632  ;;  %6445 = vadd.xlane.f32.xlu0 %v6427_v4  ;;  %8070 = vtanh.f32 %v11654_v20  ;;  %v8053_v60 = vpop.eup %8052  ;;  %v5815_v5 = vadd.f32 %v5799_v14, %v11576_v16  ;;  %v11712_v16 = vld [vmem:[%s15049_s3] sm:$0xff]  ;;  %v5863_v63 = vmul.f32 %v8051_v42, %v11587_v6 }
 0x341   :  { %15232 = vst [vmem:[#allocation74_spill] sm:$0xff] %v11656_v41  ;;  %v5880_v0 = vadd.f32 %v5864_v45, %v5832_v3  ;;  %8072 = vtanh.f32 %v11662_v38  ;;  %v8055_v34 = vpop.eup %8054  ;;  %v6350_v11 = vmul.f32 %v8053_v60, %v11591_v57  ;;  %v11716_v35 = vmul.f32 %v11712_v16, %v15235_v53 }
 0x342   :  { %v11678_v25 = vpop.xlane.xlu0 %2630  ;;  %8074 = vtanh.f32 %v11667_v40  ;;  %v5831_v51 = vadd.f32 %v5815_v5, %v11587_v6  ;;  %v6414_v60 = vmul.f32 %v8055_v34, %v11601_v47  ;;  %v15240_v6 = vld [vmem:[#allocation17_spill] sm:$0xff] }
 0x343   :  { %15234 = vst [vmem:[#allocation8_spill] sm:$0xff] %v11678_v25  ;;  %v8057_v33 = vpop.eup %8056  ;;  %5905 = vadd.xlane.f32.xlu1 %v5880_v0  ;;  %8076 = vtanh.f32 %v11676_v44  ;;  %v6366_v7 = vadd.f32 %v6350_v11, %v11591_v57  ;;  %v11736_v42 = vmul.f32 %v11688_v48, %v15240_v6 }
 0x344   :  { %v11694_v32 = vpop.xlane.xlu1 %2636  ;;  %v8059_v4 = vpop.eup %8058  ;;  %v6349_v43 = vmul.f32 %v8057_v33, %v11605_v15  ;;  %8078 = vtanh.f32 %v11692_v26  ;;  %v5879_v14 = vadd.f32 %v5863_v63, %v5831_v51  ;;  %v11748_v63 = vmul.f32 %v11701_v13, %v15238_v23 }
 0x345   :  { %15236 = vst [vmem:[#allocation15_spill] sm:$0xff] %v11694_v32  ;;  %v8061_v45 = vpop.eup %8060  ;;  %8080 = vtanh.f32 %v11705_v27  ;;  %v6382_v5 = vadd.f32 %v6366_v7, %v11601_v47  ;;  %v6413_v34 = vmul.f32 %v8059_v4, %v11614_v12  ;;  %v11757_v4 = vmul.f32 %v11712_v16, %v15240_v6 }
 0x346   :  { %v11718_v50 = vpop.xlane.xlu0 %2634  ;;  %v8063_v0 = vpop.eup %8062  ;;  %v6365_v57 = vadd.f32 %v6349_v43, %v11605_v15  ;;  %v6077_v11 = vmul.f32 %v8061_v45, %v11618_v55  ;;  %8082 = vtanh.f32 %v11716_v35  ;;  %5903 = vadd.xlane.f32.xlu0 %v5879_v14 }
 0x347   :  { %15237 = vst [vmem:[#allocation75_spill] sm:$0xff] %v11718_v50  ;;  %v8065_v51 = vpop.eup %8064  ;;  %8084 = vtanh.f32 %v11725_v1  ;;  %v6430_v47 = vadd.f32 %v6414_v60, %v6382_v5  ;;  %v6141_v37 = vmul.f32 %v8063_v0, %v11628_v24 }
 0x348   :  { %v8067_v21 = vpop.eup %8066  ;;  %v6381_v15 = vadd.f32 %v6365_v57, %v11614_v12  ;;  %v6093_v7 = vadd.f32 %v6077_v11, %v11618_v55  ;;  %v6076_v43 = vmul.f32 %v8065_v51, %v11634_v52  ;;  %8086 = vtanh.f32 %v11736_v42  ;;  %v15243_v11 = vld [vmem:[#allocation11_spill] sm:$0xff] }
 0x349   :  { %v11730_v3 = vpop.xlane.xlu1 %2644  ;;  %v8069_v45 = vpop.eup %8068  ;;  %6451 = vadd.xlane.f32.xlu1 %v6430_v47  ;;  %v6140_v0 = vmul.f32 %v8067_v21, %v11641_v10  ;;  %8088 = vtanh.f32 %v11748_v63  ;;  %v11768_v51 = vmul.f32 %v11672_v36, %v15243_v11 }
 0x34a   :  { %15239 = vst [vmem:[#allocation10_spill] sm:$0xff] %v11730_v3  ;;  %v11742_v33 = vpop.xlane.xlu0 %2642  ;;  %v8071_v17 = vpop.eup %8070  ;;  %v6429_v60 = vadd.f32 %v6413_v34, %v6381_v15  ;;  %v6109_v12 = vadd.f32 %v6093_v7, %v11628_v24  ;;  %v6092_v55 = vadd.f32 %v6076_v43, %v11634_v52  ;;  %v6354_v5 = vmul.f32 %v8069_v45, %v11645_v22  ;;  %v15245_v7 = vld [vmem:[#allocation18_spill] sm:$0xff] }
 0x34b   :  { %15241 = vst [vmem:[#allocation17_spill] sm:$0xff] %v11742_v33  ;;  %v8073_v57 = vpop.eup %8072  ;;  %v6418_v21 = vmul.f32 %v8071_v17, %v11654_v20  ;;  %8090 = vtanh.f32 %v11757_v4  ;;  %v11779_v36 = vmul.f32 %v11688_v48, %v15245_v7  ;;  %v11788_v17 = vmul.f32 %v11701_v13, %v15243_v11 }
 0x34c   :  { %v8075_v59 = vpop.eup %8074  ;;  %6449 = vadd.xlane.f32.xlu0 %v6429_v60  ;;  %v6157_v29 = vadd.f32 %v6141_v37, %v6109_v12  ;;  %v6108_v34 = vadd.f32 %v6092_v55, %v11641_v10  ;;  %v6370_v24 = vadd.f32 %v6354_v5, %v11645_v22  ;;  %v6353_v52 = vmul.f32 %v8073_v57, %v11662_v38 }
 0x34d   :  { %v11759_v14 = vpop.xlane.xlu1 %2913  ;;  %v8077_v15 = vpop.eup %8076  ;;  %v6417_v12 = vmul.f32 %v8075_v59, %v11667_v40  ;;  %8092 = vtanh.f32 %v11768_v51  ;;  %v11799_v13 = vmul.f32 %v11712_v16, %v15245_v7  ;;  %v8651_v16 = vld [vmem:[%s15049_s3 + $0x18] sm:$0xff] }
 0x34e   :  { %15242 = vst [vmem:[#allocation76_spill] sm:$0xff] %v11759_v14  ;;  %v11773_v47 = vpop.xlane.xlu0 %2911  ;;  %v8079_v43 = vpop.eup %8078  ;;  %6182 = vadd.xlane.f32.xlu1 %v6157_v29  ;;  %v6156_v37 = vadd.f32 %v6140_v0, %v6108_v34  ;;  %v6386_v10 = vadd.f32 %v6370_v24, %v11654_v20  ;;  %v6369_v22 = vadd.f32 %v6353_v52, %v11662_v38  ;;  %8094 = vtanh.f32 %v11779_v36  ;;  %v8650_v0 = vld [vmem:[%s15048_s2 + $0x18] sm:$0xff] }
 0x34f   :  { %15244 = vst [vmem:[#allocation11_spill] sm:$0xff] %v11773_v47  ;;  %v1124_v45 = vmul.f32 %v8077_v15, %v11676_v44  ;;  %v8081_v60 = vpop.eup %8080  ;;  %v1188_v59 = vmul.f32 %v8079_v43, %v11692_v26  ;;  %v11805_v34 = vmul.f32 %v8650_v0, %v15233_v30  ;;  %8096 = vtanh.f32 %v11788_v17 }
 0x350   :  { %v8083_v55 = vpop.eup %8082  ;;  %6180 = vadd.xlane.f32.xlu0 %v6156_v37  ;;  %v6434_v29 = vadd.f32 %v6418_v21, %v6386_v10  ;;  %v6385_v20 = vadd.f32 %v6369_v22, %v11667_v40  ;;  %v1123_v5 = vmul.f32 %v8081_v60, %v11705_v27  ;;  %v11817_v43 = vmul.f32 %v8651_v16, %v15235_v53 }
 0x351   :  { %v11790_v48 = vpop.xlane.xlu1 %2917  ;;  %v1140_v38 = vadd.f32 %v1124_v45, %v11676_v44  ;;  %v8085_v57 = vpop.eup %8084  ;;  %v1187_v22 = vmul.f32 %v8083_v55, %v11716_v35  ;;  %8098 = vtanh.f32 %v11799_v13 }
 0x352   :  { %15246 = vst [vmem:[#allocation18_spill] sm:$0xff] %v11790_v48  ;;  %6459 = vadd.xlane.f32.xlu1 %v6434_v29  ;;  %v6433_v40 = vadd.f32 %v6417_v12, %v6385_v20  ;;  %v1139_v24 = vadd.f32 %v1123_v5, %v11705_v27  ;;  %v1128_v52 = vmul.f32 %v8085_v57, %v11725_v1  ;;  %v8087_v21 = vpop.eup %8086  ;;  %v8653_v29 = vld [vmem:[%s15049_s3 + $0x10] sm:$0xff]  ;;  %8100 = vtanh.f32 %v11805_v34 }
 0x353   :  { %v1156_v44 = vadd.f32 %v1140_v38, %v11692_v26  ;;  %v11810_v15 = vpop.xlane.xlu0 %2915  ;;  %v8652_v26 = vld [vmem:[%s15048_s2 + $0x10] sm:$0xff]  ;;  %v8089_v60 = vpop.eup %8088  ;;  %v1192_v12 = vmul.f32 %v8087_v21, %v11736_v42  ;;  %v11834_v20 = vmul.f32 %v8653_v29, %v15235_v53  ;;  %v11837_v38 = vmul.f32 %v8650_v0, %v15238_v23 }
 0x354   :  { %15247 = vst [vmem:[#allocation77_spill] sm:$0xff] %v11810_v15  ;;  %v11823_v27 = vmul.f32 %v8652_v26, %v15233_v30  ;;  %6457 = vadd.xlane.f32.xlu0 %v6433_v40  ;;  %v1155_v10 = vadd.f32 %v1139_v24, %v11716_v35  ;;  %v1144_v45 = vadd.f32 %v1128_v52, %v11725_v1  ;;  %8102 = vtanh.f32 %v11817_v43 }
 0x355   :  { %v1204_v37 = vadd.f32 %v1188_v59, %v1156_v44  ;;  %v11839_v5 = vpop.xlane.xlu1 %2925  ;;  %v1127_v55 = vmul.f32 %v8089_v60, %v11748_v63  ;;  %v8091_v57 = vpop.eup %8090  ;;  %v11846_v59 = vmul.f32 %v8651_v16, %v15240_v6  ;;  %v11851_v24 = vmul.f32 %v8652_v26, %v15238_v23 }
 0x356   :  { %15248 = vst [vmem:[#allocation78_spill] sm:$0xff] %v11839_v5  ;;  %v1203_v35 = vadd.f32 %v1187_v22, %v1155_v10  ;;  %v1160_v1 = vadd.f32 %v1144_v45, %v11736_v42  ;;  %8104 = vtanh.f32 %v11823_v27  ;;  %v11857_v21 = vmul.f32 %v8653_v29, %v15240_v6 }
 0x357   :  { %1227 = vadd.xlane.f32.xlu1 %v1204_v37  ;;  %v1143_v44 = vadd.f32 %v1127_v55, %v11748_v63  ;;  %v8093_v52 = vpop.eup %8092  ;;  %8106 = vtanh.f32 %v11834_v20  ;;  %v11860_v37 = vmul.f32 %v8650_v0, %v15243_v11  ;;  %v1191_v63 = vmul.f32 %v8091_v57, %v11757_v4 }
 0x358   :  { %1225 = vadd.xlane.f32.xlu0 %v1203_v35  ;;  %v1208_v40 = vadd.f32 %v1192_v12, %v1160_v1  ;;  %v11853_v42 = vpop.xlane.xlu0 %2923  ;;  %v1130_v22 = vmul.f32 %v8093_v52, %v11768_v51  ;;  %8108 = vtanh.f32 %v11837_v38  ;;  %v8095_v45 = vpop.eup %8094  ;;  %v11868_v60 = vmul.f32 %v8651_v16, %v15245_v7  ;;  %v11884_v16 = vld [vmem:[%s15048_s2 + $0x28] sm:$0xff] }
 0x359   :  { %15249 = vst [vmem:[#allocation79_spill] sm:$0xff] %v11853_v42  ;;  %v1159_v10 = vadd.f32 %v1143_v44, %v11757_v4  ;;  %8110 = vtanh.f32 %v11846_v59  ;;  %v11875_v1 = vmul.f32 %v8652_v26, %v15243_v11  ;;  %v8097_v4 = vpop.eup %8096  ;;  %v11879_v55 = vmul.f32 %v8653_v29, %v15245_v7  ;;  %v11900_v52 = vld [vmem:[%s15049_s3 + $0x28] sm:$0xff] }
 0x35a   :  { %v1146_v0 = vadd.f32 %v1130_v22, %v11768_v51  ;;  %8112 = vtanh.f32 %v11851_v24  ;;  %v11888_v57 = vmul.f32 %v11884_v16, %v15233_v30  ;;  %v1129_v44 = vmul.f32 %v8097_v4, %v11788_v17 }
 0x35b   :  { %1235 = vadd.xlane.f32.xlu1 %v1208_v40  ;;  %v1207_v35 = vadd.f32 %v1191_v63, %v1159_v10  ;;  %8114 = vtanh.f32 %v11857_v21  ;;  %v1194_v40 = vmul.f32 %v8095_v45, %v11779_v36  ;;  %v8099_v29 = vpop.eup %8098  ;;  %v11904_v10 = vmul.f32 %v11900_v52, %v15235_v53 }
 0x35c   :  { %v11870_v12 = vpop.xlane.xlu1 %3194  ;;  %v1162_v26 = vadd.f32 %v1146_v0, %v11779_v36  ;;  %8116 = vtanh.f32 %v11860_v37  ;;  %v8101_v22 = vpop.eup %8100  ;;  %v1145_v45 = vadd.f32 %v1129_v44, %v11788_v17  ;;  %v11924_v17 = vld [vmem:[%s15049_s3 + $0x20] sm:$0xff]  ;;  %v1193_v5 = vmul.f32 %v8099_v29, %v11799_v13 }
 0x35d   :  { %15250 = vst [vmem:[#allocation80_spill] sm:$0xff] %v11870_v12  ;;  %1233 = vadd.xlane.f32.xlu0 %v1207_v35  ;;  %8118 = vtanh.f32 %v11868_v60  ;;  %v11913_v35 = vld [vmem:[%s15048_s2 + $0x20] sm:$0xff]  ;;  %v1413_v42 = vmul.f32 %v8101_v22, %v11805_v34  ;;  %v11937_v22 = vmul.f32 %v11884_v16, %v15238_v23 }
 0x35e   :  { %v1210_v36 = vadd.f32 %v1194_v40, %v1162_v26  ;;  %8120 = vtanh.f32 %v11875_v1  ;;  %v11917_v0 = vmul.f32 %v11913_v35, %v15233_v30  ;;  %v8103_v4 = vpop.eup %8102  ;;  %v11928_v26 = vmul.f32 %v11924_v17, %v15235_v53 }
 0x35f   :  { %v11890_v51 = vpop.xlane.xlu0 %3192  ;;  %8122 = vtanh.f32 %v11879_v55  ;;  %v1429_v12 = vadd.f32 %v1413_v42, %v11805_v34 }
 0x360   :  { %15251 = vst [vmem:[#allocation81_spill] sm:$0xff] %v11890_v51  ;;  %v8105_v44 = vpop.eup %8104  ;;  %1239 = vadd.xlane.f32.xlu1 %v1210_v36  ;;  %8124 = vtanh.f32 %v11888_v57 }
 0x361   :  { %v11906_v63 = vpop.xlane.xlu1 %3198  ;;  %v8107_v51 = vpop.eup %8106  ;;  %v1412_v15 = vmul.f32 %v8105_v44, %v11823_v27  ;;  %8126 = vtanh.f32 %v11904_v10  ;;  %v1445_v47 = vadd.f32 %v1429_v12, %v11817_v43 }
 0x362   :  { %15252 = vst [vmem:[#allocation82_spill] sm:$0xff] %v11906_v63  ;;  %v1161_v63 = vadd.f32 %v1145_v45, %v11799_v13  ;;  %v8109_v36 = vpop.eup %8108  ;;  %v1477_v45 = vmul.f32 %v8103_v4, %v11817_v43  ;;  %8128 = vtanh.f32 %v11917_v0  ;;  %v11948_v13 = vmul.f32 %v11900_v52, %v15240_v6 }
 0x363   :  { %v11930_v40 = vpop.xlane.xlu0 %3196  ;;  %v8111_v29 = vpop.eup %8110  ;;  %v1428_v34 = vadd.f32 %v1412_v15, %v11823_v27  ;;  %v1417_v42 = vmul.f32 %v8109_v36, %v11837_v38  ;;  %8130 = vtanh.f32 %v11928_v26  ;;  %v11963_v43 = vmul.f32 %v11913_v35, %v15238_v23 }
 0x364   :  { %15253 = vst [vmem:[#allocation83_spill] sm:$0xff] %v11930_v40  ;;  %v1209_v48 = vadd.f32 %v1193_v5, %v1161_v63  ;;  %v8113_v5 = vpop.eup %8112  ;;  %v15256_v63 = vlaneseq  ;;  %8132 = vtanh.f32 %v11937_v22  ;;  %v1493_v27 = vadd.f32 %v1477_v45, %v1445_v47 }
 0x365   :  { %v11942_v40 = vpop.xlane.xlu1 %3206  ;;  %v8115_v15 = vpop.eup %8114  ;;  %v1444_v12 = vadd.f32 %v1428_v34, %v11834_v20  ;;  %v1433_v36 = vadd.f32 %v1417_v42, %v11837_v38  ;;  %8134 = vtanh.f32 %v11948_v13 }
 0x366   :  { %15254 = vst [vmem:[#allocation84_spill] sm:$0xff] %v11942_v40  ;;  %v11957_v4 = vand.u32 127, %v15256_v63  ;;  %1237 = vadd.xlane.f32.xlu0 %v1209_v48  ;;  %v1476_v40 = vmul.f32 %v8107_v51, %v11834_v20  ;;  %v8117_v14 = vpop.eup %8116  ;;  %v1481_v63 = vmul.f32 %v8111_v29, %v11846_v59  ;;  %v11972_v48 = vmul.f32 %v11924_v17, %v15240_v6 }
 0x367   :  { %v11954_v44 = vpop.xlane.xlu0 %3204  ;;  %v8119_v33 = vpop.eup %8118  ;;  %1516 = vadd.xlane.f32.xlu1 %v1493_v27  ;;  %v1449_v20 = vadd.f32 %v1433_v36, %v11846_v59  ;;  %v1419_v45 = vmul.f32 %v8117_v14, %v11860_v37  ;;  %v1480_v42 = vmul.f32 %v8115_v15, %v11857_v21  ;;  %8136 = vtanh.f32 %v11963_v43 }
 0x368   :  { %15255 = vst [vmem:[#allocation85_spill] sm:$0xff] %v11954_v44  ;;  %v1416_v44 = vmul.f32 %v8113_v5, %v11851_v24  ;;  %v1492_v47 = vadd.f32 %v1476_v40, %v1444_v12  ;;  %v8121_v34 = vpop.eup %8120  ;;  %v1555_v29 = vadd.s32 4294967272, %v11957_v4  ;;  %v11984_v5 = vmul.f32 %v11884_v16, %v15243_v11  ;;  %v15259_v12 = vld [vmem:[#allocation5_spill] sm:$0xff] }
 0x369   :  { %v11974_v51 = vpop.xlane.xlu1 %4507  ;;  %v1497_v40 = vadd.f32 %v1481_v63, %v1449_v20  ;;  %v1418_v14 = vmul.f32 %v8121_v34, %v11875_v1  ;;  %v11993_v15 = vsub.s32 %v11957_v4, %v15259_v12  ;;  %v1483_v36 = vmul.f32 %v8119_v33, %v11868_v60 }
 0x36a   :  { %15257 = vst [vmem:[#allocation86_spill] sm:$0xff] %v11974_v51  ;;  %v1432_v38 = vadd.f32 %v1416_v44, %v11851_v24  ;;  %v8123_v51 = vpop.eup %8122  ;;  %1514 = vadd.xlane.f32.xlu0 %v1492_v47  ;;  %v1435_v24 = vadd.f32 %v1419_v45, %v11860_v37  ;;  %8138 = vtanh.f32 %v11972_v48  ;;  %v11999_v16 = vmul.f32 %v11900_v52, %v15245_v7 }
 0x36b   :  { %v11989_v44 = vpop.xlane.xlu0 %4505  ;;  %v8125_v27 = vpop.eup %8124  ;;  %15260 = vst [vmem:[#allocation5_spill] sm:$0xff] %v11993_v15  ;;  %1524 = vadd.xlane.f32.xlu1 %v1497_v40  ;;  %v1434_v47 = vadd.f32 %v1418_v14, %v11875_v1  ;;  %v12005_v45 = vsub.s32 %v1555_v29, %v15259_v12  ;;  %v1482_v33 = vmul.f32 %v8123_v51, %v11879_v55  ;;  %8140 = vtanh.f32 %v11984_v5 }
 0x36c   :  { %v1448_v59 = vadd.f32 %v1432_v38, %v11857_v21  ;;  %15258 = vst [vmem:[#allocation87_spill] sm:$0xff] %v11989_v44  ;;  %v8127_v21 = vpop.eup %8126  ;;  %v1451_v63 = vadd.f32 %v1435_v24, %v11868_v60  ;;  %v1694_v20 = vmul.f32 %v8125_v27, %v11888_v57  ;;  %v12011_v52 = vmul.f32 %v11913_v35, %v15243_v11  ;;  %v8658_v24 = vld [vmem:[%s15048_s2 + $0x38] sm:$0xff] }
 0x36d   :  { %v8129_v38 = vpop.eup %8128  ;;  %15261 = vst [vmem:[#allocation88_spill] sm:$0xff] %v12005_v45  ;;  %v12013_v34 = vpop.xlane.xlu1 %4511  ;;  %v1450_v1 = vadd.f32 %v1434_v47, %v11879_v55  ;;  %v1758_v51 = vmul.f32 %v8127_v21, %v11904_v10  ;;  %8142 = vtanh.f32 %v11999_v16  ;;  %v12022_v35 = vmul.f32 %v11924_v17, %v15245_v7 }
 0x36e   :  { %v1496_v37 = vadd.f32 %v1480_v42, %v1448_v59  ;;  %15262 = vst [vmem:[#allocation89_spill] sm:$0xff] %v12013_v34  ;;  %v8131_v42 = vpop.eup %8130  ;;  %v1499_v60 = vadd.f32 %v1483_v36, %v1451_v63  ;;  %v1710_v40 = vadd.f32 %v1694_v20, %v11888_v57  ;;  %v1693_v29 = vmul.f32 %v8129_v38, %v11917_v0  ;;  %v8659_v63 = vld [vmem:[%s15049_s3 + $0x38] sm:$0xff] }
 0x36f   :  { %v8133_v59 = vpop.eup %8132  ;;  %v12028_v14 = vmul.f32 %v8658_v24, %v15233_v30  ;;  %v1498_v55 = vadd.f32 %v1482_v33, %v1450_v1  ;;  %v1836_v17 = vadd.s32 4294967256, %v11957_v4  ;;  %8144 = vtanh.f32 %v12011_v52 }
 0x370   :  { %1522 = vadd.xlane.f32.xlu0 %v1496_v37  ;;  %1528 = vadd.xlane.f32.xlu1 %v1499_v60  ;;  %v1726_v57 = vadd.f32 %v1710_v40, %v11904_v10  ;;  %v1709_v27 = vadd.f32 %v1693_v29, %v11917_v0  ;;  %v1698_v36 = vmul.f32 %v8133_v59, %v11937_v22  ;;  %v12033_v21 = vpop.xlane.xlu0 %4509  ;;  %v8135_v37 = vpop.eup %8134  ;;  %v8660_v10 = vld [vmem:[%s15048_s2 + $0x30] sm:$0xff]  ;;  %8146 = vtanh.f32 %v12022_v35 }
 0x371   :  { %15263 = vst [vmem:[#allocation90_spill] sm:$0xff] %v12033_v21  ;;  %v12041_v47 = vmul.f32 %v8659_v63, %v15235_v53  ;;  %v12047_v0 = vmul.f32 %v8660_v10, %v15233_v30  ;;  %v1757_v33 = vmul.f32 %v8131_v42, %v11928_v26  ;;  %v8137_v1 = vpop.eup %8136  ;;  %v1762_v40 = vmul.f32 %v8135_v37, %v11948_v13  ;;  %v8661_v29 = vld [vmem:[%s15049_s3 + $0x30] sm:$0xff] }
 0x372   :  { %v1774_v20 = vadd.f32 %v1758_v51, %v1726_v57  ;;  %v1725_v38 = vadd.f32 %v1709_v27, %v11928_v26  ;;  %v1714_v60 = vadd.f32 %v1698_v36, %v11937_v22  ;;  %v12058_v59 = vmul.f32 %v8661_v29, %v15235_v53 }
 0x373   :  { %v12061_v51 = vmul.f32 %v8658_v24, %v15238_v23  ;;  %v1697_v42 = vmul.f32 %v8137_v1, %v11963_v43  ;;  %8148 = vtanh.f32 %v12028_v14  ;;  %v12069_v27 = vsub.s32 %v1836_v17, %v15259_v12 }
 0x374   :  { %1526 = vadd.xlane.f32.xlu0 %v1498_v55  ;;  %v12063_v55 = vpop.xlane.xlu1 %4519  ;;  %1797 = vadd.xlane.f32.xlu1 %v1774_v20  ;;  %v1773_v26 = vadd.f32 %v1757_v33, %v1725_v38  ;;  %v1730_v22 = vadd.f32 %v1714_v60, %v11948_v13  ;;  %v8139_v57 = vpop.eup %8138  ;;  %v1267_v36 = vadd.s32 4294967288, %v11957_v4  ;;  %8150 = vtanh.f32 %v12041_v47 }
 0x375   :  { %15264 = vst [vmem:[#allocation91_spill] sm:$0xff] %v12063_v55  ;;  %15265 = vst [vmem:[#allocation92_spill] sm:$0xff] %v12069_v27  ;;  %v12074_v37 = vmul.f32 %v8659_v63, %v15240_v6  ;;  %v1713_v38 = vadd.f32 %v1697_v42, %v11963_v43  ;;  %8152 = vtanh.f32 %v12047_v0  ;;  %v12079_v13 = vmul.f32 %v8660_v10, %v15238_v23  ;;  %v8141_v17 = vpop.eup %8140 }
 0x376   :  { %v1778_v20 = vadd.f32 %v1762_v40, %v1730_v22  ;;  %v2117_v60 = vadd.s32 4294967240, %v11957_v4  ;;  %8154 = vtanh.f32 %v12058_v59  ;;  %v12086_v1 = vmul.f32 %v8661_v29, %v15240_v6 }
 0x377   :  { %v12081_v33 = vpop.xlane.xlu0 %4517  ;;  %v1729_v43 = vadd.f32 %v1713_v38, %v11972_v48  ;;  %v1761_v40 = vmul.f32 %v8139_v57, %v11972_v48  ;;  %v1700_v22 = vmul.f32 %v8141_v17, %v11984_v5  ;;  %8156 = vtanh.f32 %v12061_v51  ;;  %v8143_v42 = vpop.eup %8142 }
 0x378   :  { %1795 = vadd.xlane.f32.xlu0 %v1773_v26  ;;  %15266 = vst [vmem:[#allocation93_spill] sm:$0xff] %v12081_v33  ;;  %v12089_v26 = vmul.f32 %v8658_v24, %v15243_v11  ;;  %1805 = vadd.xlane.f32.xlu1 %v1778_v20  ;;  %v12096_v33 = vsub.s32 %v1267_v36, %v15259_v12  ;;  %v1550_v55 = vadd.s32 4294967280, %v11957_v4  ;;  %8158 = vtanh.f32 %v12074_v37 }
 0x379   :  { %v12101_v24 = vmul.f32 %v8659_v63, %v15245_v7  ;;  %v1777_v38 = vadd.f32 %v1761_v40, %v1729_v43  ;;  %v1716_v48 = vadd.f32 %v1700_v22, %v11984_v5  ;;  %8160 = vtanh.f32 %v12079_v13  ;;  %v8145_v17 = vpop.eup %8144  ;;  %v12120_v63 = vld [vmem:[%s15048_s2 + $0x48] sm:$0xff] }
 0x37a   :  { %15267 = vst [vmem:[#allocation94_spill] sm:$0xff] %v12096_v33  ;;  %v12108_v57 = vmul.f32 %v8660_v10, %v15243_v11  ;;  %v12111_v36 = vsub.s32 %v2117_v60, %v15259_v12  ;;  %8162 = vtanh.f32 %v12086_v1  ;;  %v12115_v21 = vmul.f32 %v8661_v29, %v15245_v7  ;;  %v8147_v29 = vpop.eup %8146 }
 0x37b   :  { %v12103_v20 = vpop.xlane.xlu1 %4785  ;;  %v12124_v5 = vmul.f32 %v12120_v63, %v15233_v30  ;;  %v1732_v60 = vadd.f32 %v1716_v48, %v11999_v16  ;;  %v1764_v43 = vmul.f32 %v8143_v42, %v11999_v16  ;;  %v1699_v40 = vmul.f32 %v8145_v17, %v12011_v52 }
 0x37c   :  { %15268 = vst [vmem:[#allocation95_spill] sm:$0xff] %v12103_v20  ;;  %15269 = vst [vmem:[#allocation96_spill] sm:$0xff] %v12111_v36  ;;  %1803 = vadd.xlane.f32.xlu0 %v1777_v38  ;;  %8164 = vtanh.f32 %v12089_v26  ;;  %v12133_v22 = vsub.s32 %v1550_v55, %v15259_v12  ;;  %v2398_v20 = vadd.s32 4294967224, %v11957_v4  ;;  %v12140_v38 = vld [vmem:[%s15049_s3 + $0x48] sm:$0xff]  ;;  %v1831_v3 = vadd.s32 4294967264, %v11957_v4 }
 0x37d   :  { %v12126_v10 = vpop.xlane.xlu0 %4783  ;;  %8166 = vtanh.f32 %v12101_v24  ;;  %v12144_v16 = vmul.f32 %v12140_v38, %v15235_v53  ;;  %v8149_v48 = vpop.eup %8148  ;;  %v1780_v17 = vadd.f32 %v1764_v43, %v1732_v60  ;;  %v1715_v55 = vadd.f32 %v1699_v40, %v12011_v52  ;;  %v12165_v52 = vld [vmem:[%s15049_s3 + $0x40] sm:$0xff] }
 0x37e   :  { %15270 = vst [vmem:[#allocation97_spill] sm:$0xff] %v12126_v10  ;;  %15271 = vst [vmem:[#allocation98_spill] sm:$0xff] %v12133_v22  ;;  %8168 = vtanh.f32 %v12108_v57  ;;  %v12153_v10 = vld [vmem:[%s15048_s2 + $0x40] sm:$0xff]  ;;  %v8151_v44 = vpop.eup %8150  ;;  %v12169_v60 = vmul.f32 %v12165_v52, %v15235_v53  ;;  %v1763_v32 = vmul.f32 %v8147_v29, %v12022_v35  ;;  %v12181_v41 = vsub.s32 %v2398_v20, %v15259_v12 }
 0x37f   :  { %v12146_v42 = vpop.xlane.xlu1 %4789  ;;  %v12157_v34 = vmul.f32 %v12153_v10, %v15233_v30  ;;  %8170 = vtanh.f32 %v12115_v21  ;;  %v8153_v40 = vpop.eup %8152  ;;  %1809 = vadd.xlane.f32.xlu1 %v1780_v17  ;;  %v1731_v50 = vadd.f32 %v1715_v55, %v12022_v35  ;;  %v2039_v29 = vmul.f32 %v8151_v44, %v12041_v47 }
 0x380   :  { %15272 = vst [vmem:[#allocation99_spill] sm:$0xff] %v12146_v42  ;;  %v1975_v42 = vmul.f32 %v8149_v48, %v12028_v14  ;;  %8172 = vtanh.f32 %v12124_v5  ;;  %v12178_v48 = vmul.f32 %v12120_v63, %v15238_v23  ;;  %v8155_v25 = vpop.eup %8154  ;;  %15274 = vst [vmem:[#allocation101_spill] sm:$0xff] %v12181_v41  ;;  %v12192_v61 = vmul.f32 %v12140_v38, %v15240_v6 }
 0x381   :  { %v12171_v43 = vpop.xlane.xlu0 %4787  ;;  %8174 = vtanh.f32 %v12144_v16  ;;  %v8157_v55 = vpop.eup %8156  ;;  %v1779_v35 = vadd.f32 %v1763_v32, %v1731_v50  ;;  %v12201_v50 = vsub.s32 %v1831_v3, %v15259_v12  ;;  %v2038_v44 = vmul.f32 %v8155_v25, %v12058_v59 }
 0x382   :  { %15273 = vst [vmem:[#allocation100_spill] sm:$0xff] %v12171_v43  ;;  %v1991_v58 = vadd.f32 %v1975_v42, %v12028_v14  ;;  %v1974_v43 = vmul.f32 %v8153_v40, %v12047_v0  ;;  %8176 = vtanh.f32 %v12157_v34  ;;  %v8159_v20 = vpop.eup %8158  ;;  %v1979_v42 = vmul.f32 %v8157_v55, %v12061_v51 }
 0x383   :  { %v12186_v17 = vpop.xlane.xlu1 %4797  ;;  %8178 = vtanh.f32 %v12169_v60  ;;  %v8161_v32 = vpop.eup %8160  ;;  %15277 = vst [vmem:[#allocation104_spill] sm:$0xff] %v12201_v50  ;;  %1807 = vadd.xlane.f32.xlu0 %v1779_v35  ;;  %v2679_v3 = vadd.s32 4294967208, %v11957_v4  ;;  %v2043_v35 = vmul.f32 %v8159_v20, %v12074_v37  ;;  %v12217_v25 = vmul.f32 %v12165_v52, %v15240_v6 }
 0x384   :  { %15275 = vst [vmem:[#allocation102_spill] sm:$0xff] %v12186_v17  ;;  %v2007_v41 = vadd.f32 %v1991_v58, %v12041_v47  ;;  %v1990_v14 = vadd.f32 %v1974_v43, %v12047_v0  ;;  %8180 = vtanh.f32 %v12178_v48  ;;  %v12207_v58 = vmul.f32 %v12153_v10, %v15238_v23  ;;  %v8163_v47 = vpop.eup %8162 }
 0x385   :  { %v1995_v55 = vadd.f32 %v1979_v42, %v12061_v51  ;;  %8182 = vtanh.f32 %v12192_v61  ;;  %v2112_v20 = vadd.s32 4294967248, %v11957_v4  ;;  %v12229_v50 = vmul.f32 %v12120_v63, %v15243_v11 }
 0x386   :  { %v12198_v40 = vpop.xlane.xlu0 %4795  ;;  %v2055_v0 = vadd.f32 %v2039_v29, %v2007_v41  ;;  %v2006_v43 = vadd.f32 %v1990_v14, %v12058_v59  ;;  %v8165_v17 = vpop.eup %8164  ;;  %8184 = vtanh.f32 %v12207_v58  ;;  %v12243_v63 = vmul.f32 %v12140_v38, %v15245_v7 }
 0x387   :  { %15276 = vst [vmem:[#allocation103_spill] sm:$0xff] %v12198_v40  ;;  %v1978_v40 = vmul.f32 %v8161_v32, %v12079_v13  ;;  %v8167_v41 = vpop.eup %8166  ;;  %v2011_v51 = vadd.f32 %v1995_v55, %v12074_v37  ;;  %v1981_v14 = vmul.f32 %v8165_v17, %v12089_v26  ;;  %v2042_v32 = vmul.f32 %v8163_v47, %v12086_v1 }
 0x388   :  { %v12219_v46 = vpop.xlane.xlu1 %5062  ;;  %2078 = vadd.xlane.f32.xlu1 %v2055_v0  ;;  %v2054_v59 = vadd.f32 %v2038_v44, %v2006_v43  ;;  %v8169_v42 = vpop.eup %8168  ;;  %v12237_v47 = vsub.s32 %v2679_v3, %v15259_v12  ;;  %v2045_v43 = vmul.f32 %v8167_v41, %v12101_v24  ;;  %8186 = vtanh.f32 %v12217_v25 }
 0x389   :  { %15278 = vst [vmem:[#allocation105_spill] sm:$0xff] %v12219_v46  ;;  %v1994_v29 = vadd.f32 %v1978_v40, %v12079_v13  ;;  %v8171_v46 = vpop.eup %8170  ;;  %v2059_v44 = vadd.f32 %v2043_v35, %v2011_v51  ;;  %v1997_v13 = vadd.f32 %v1981_v14, %v12089_v26  ;;  %v1980_v17 = vmul.f32 %v8169_v42, %v12108_v57 }
 0x38a   :  { %2076 = vadd.xlane.f32.xlu0 %v2054_v59  ;;  %v8173_v0 = vpop.eup %8172  ;;  %v12249_v3 = vsub.s32 %v2112_v20, %v15259_v12  ;;  %v2044_v41 = vmul.f32 %v8171_v46, %v12115_v21  ;;  %8188 = vtanh.f32 %v12229_v50  ;;  %v12255_v38 = vmul.f32 %v12153_v10, %v15243_v11 }
 0x38b   :  { %v2010_v37 = vadd.f32 %v1994_v29, %v12086_v1  ;;  %v12234_v40 = vpop.xlane.xlu0 %5060  ;;  %v8175_v55 = vpop.eup %8174  ;;  %v2013_v26 = vadd.f32 %v1997_v13, %v12101_v24  ;;  %v1996_v35 = vadd.f32 %v1980_v17, %v12108_v57  ;;  %v2256_v59 = vmul.f32 %v8173_v0, %v12124_v5 }
 0x38c   :  { %15279 = vst [vmem:[#allocation106_spill] sm:$0xff] %v12234_v40  ;;  %2086 = vadd.xlane.f32.xlu1 %v2059_v44  ;;  %v8177_v51 = vpop.eup %8176  ;;  %15280 = vst [vmem:[#allocation107_spill] sm:$0xff] %v12249_v3  ;;  %v2320_v46 = vmul.f32 %v8175_v55, %v12144_v16  ;;  %8190 = vtanh.f32 %v12243_v63  ;;  %v12266_v10 = vmul.f32 %v12165_v52, %v15245_v7  ;;  %v8666_v44 = vld [vmem:[%s15048_s2 + $0x58] sm:$0xff]  ;;  %v2960_v52 = vadd.s32 4294967192, %v11957_v4 }
 0x38d   :  { %v2058_v1 = vadd.f32 %v2042_v32, %v2010_v37  ;;  %v12257_v29 = vpop.xlane.xlu1 %5066  ;;  %v8179_v14 = vpop.eup %8178  ;;  %v2061_v24 = vadd.f32 %v2045_v43, %v2013_v26  ;;  %v2012_v57 = vadd.f32 %v1996_v35, %v12115_v21  ;;  %v2272_v42 = vadd.f32 %v2256_v59, %v12124_v5  ;;  %v8667_v55 = vld [vmem:[%s15049_s3 + $0x58] sm:$0xff] }
 0x38e   :  { %15281 = vst [vmem:[#allocation108_spill] sm:$0xff] %v12257_v29  ;;  %v2255_v20 = vmul.f32 %v8177_v51, %v12157_v34  ;;  %v8181_v32 = vpop.eup %8180  ;;  %v12272_v37 = vmul.f32 %v8666_v44, %v15233_v30  ;;  %8192 = vtanh.f32 %v12255_v38  ;;  %v2319_v59 = vmul.f32 %v8179_v14, %v12169_v60 }
 0x38f   :  { %2084 = vadd.xlane.f32.xlu0 %v2058_v1  ;;  %v2060_v21 = vadd.f32 %v2044_v41, %v2012_v57  ;;  %v2288_v5 = vadd.f32 %v2272_v42, %v12144_v16  ;;  %v2260_v17 = vmul.f32 %v8181_v32, %v12178_v48  ;;  %v12277_v0 = vpop.xlane.xlu0 %5064  ;;  %v8183_v43 = vpop.eup %8182  ;;  %v12285_v1 = vmul.f32 %v8667_v55, %v15235_v53  ;;  %v8669_v57 = vld [vmem:[%s15049_s3 + $0x50] sm:$0xff] }
 0x390   :  { %2090 = vadd.xlane.f32.xlu1 %v2061_v24  ;;  %v2271_v13 = vadd.f32 %v2255_v20, %v12157_v34  ;;  %15282 = vst [vmem:[#allocation109_spill] sm:$0xff] %v12277_v0  ;;  %v8668_v34 = vld [vmem:[%s15048_s2 + $0x50] sm:$0xff]  ;;  %v8185_v41 = vpop.eup %8184  ;;  %v2324_v24 = vmul.f32 %v8183_v43, %v12192_v61  ;;  %8194 = vtanh.f32 %v12266_v10  ;;  %v12302_v42 = vmul.f32 %v8669_v57, %v15235_v53 }
 0x391   :  { %v12291_v16 = vmul.f32 %v8668_v34, %v15233_v30  ;;  %v2336_v26 = vadd.f32 %v2320_v46, %v2288_v5  ;;  %v2276_v51 = vadd.f32 %v2260_v17, %v12178_v48  ;;  %v12305_v20 = vmul.f32 %v8666_v44, %v15238_v23 }
 0x392   :  { %v2287_v35 = vadd.f32 %v2271_v13, %v12169_v60  ;;  %v12307_v32 = vpop.xlane.xlu1 %5074  ;;  %v2259_v14 = vmul.f32 %v8185_v41, %v12207_v58  ;;  %8196 = vtanh.f32 %v12272_v37  ;;  %v8187_v46 = vpop.eup %8186  ;;  %v2393_v5 = vadd.s32 4294967232, %v11957_v4 }
 0x393   :  { %2088 = vadd.xlane.f32.xlu0 %v2060_v21  ;;  %15283 = vst [vmem:[#allocation110_spill] sm:$0xff] %v12307_v32  ;;  %v2292_v48 = vadd.f32 %v2276_v51, %v12192_v61  ;;  %v12313_v21 = vsub.s32 %v2960_v52, %v15259_v12  ;;  %8198 = vtanh.f32 %v12285_v1  ;;  %v12318_v13 = vmul.f32 %v8667_v55, %v15240_v6 }
 0x394   :  { %2359 = vadd.xlane.f32.xlu1 %v2336_v26  ;;  %v2335_v60 = vadd.f32 %v2319_v59, %v2287_v35  ;;  %v2275_v43 = vadd.f32 %v2259_v14, %v12207_v58  ;;  %8200 = vtanh.f32 %v12291_v16  ;;  %v12323_v61 = vmul.f32 %v8668_v34, %v15238_v23  ;;  %v8189_v52 = vpop.eup %8188 }
 0x395   :  { %v2340_v17 = vadd.f32 %v2324_v24, %v2292_v48  ;;  %v3241_v35 = vadd.s32 4294967176, %v11957_v4  ;;  %8202 = vtanh.f32 %v12302_v42  ;;  %v12330_v59 = vmul.f32 %v8669_v57, %v15240_v6 }
 0x396   :  { %v12333_v51 = vmul.f32 %v8666_v44, %v15243_v11  ;;  %v2291_v58 = vadd.f32 %v2275_v43, %v12217_v25  ;;  %v2323_v41 = vmul.f32 %v8187_v46, %v12217_v25  ;;  %v2262_v24 = vmul.f32 %v8189_v52, %v12229_v50 }
 0x397   :  { %2357 = vadd.xlane.f32.xlu0 %v2335_v60  ;;  %8204 = vtanh.f32 %v12305_v20  ;;  %v8191_v60 = vpop.eup %8190  ;;  %v12340_v48 = vsub.s32 %v2393_v5, %v15259_v12  ;;  %v2674_v14 = vadd.s32 4294967216, %v11957_v4  ;;  %v12345_v44 = vmul.f32 %v8667_v55, %v15245_v7  ;;  %v12364_v55 = vld [vmem:[%s15048_s2 + $0x68] sm:$0xff] }
 0x398   :  { %v12325_v26 = vpop.xlane.xlu0 %5072  ;;  %2367 = vadd.xlane.f32.xlu1 %v2340_v17  ;;  %8206 = vtanh.f32 %v12318_v13  ;;  %v2339_v43 = vadd.f32 %v2323_v41, %v2291_v58  ;;  %v2278_v25 = vadd.f32 %v2262_v24, %v12229_v50  ;;  %v12352_v46 = vmul.f32 %v8668_v34, %v15243_v11  ;;  %v8193_v52 = vpop.eup %8192 }
 0x399   :  { %15284 = vst [vmem:[#allocation111_spill] sm:$0xff] %v12325_v26  ;;  %15285 = vst [vmem:[#allocation112_spill] sm:$0xff] %v12340_v48  ;;  %v12347_v17 = vpop.xlane.xlu1 %5339  ;;  %8208 = vtanh.f32 %v12323_v61  ;;  %v12355_v5 = vsub.s32 %v3241_v35, %v15259_v12  ;;  %v12359_v26 = vmul.f32 %v8669_v57, %v15245_v7  ;;  %v12368_v50 = vmul.f32 %v12364_v55, %v15233_v30 }
 0x39a   :  { %15286 = vst [vmem:[#allocation113_spill] sm:$0xff] %v12347_v17  ;;  %8210 = vtanh.f32 %v12330_v59  ;;  %v2294_v35 = vadd.f32 %v2278_v25, %v12243_v63  ;;  %v2326_v58 = vmul.f32 %v8191_v60, %v12243_v63  ;;  %v2261_v41 = vmul.f32 %v8193_v52, %v12255_v38  ;;  %v8195_v57 = vpop.eup %8194 }
 0x39b   :  { %15287 = vst [vmem:[#allocation114_spill] sm:$0xff] %v12355_v5  ;;  %2365 = vadd.xlane.f32.xlu0 %v2339_v43  ;;  %8212 = vtanh.f32 %v12333_v51  ;;  %v12377_v24 = vsub.s32 %v2674_v14, %v15259_v12  ;;  %v2955_v17 = vadd.s32 4294967200, %v11957_v4  ;;  %v12384_v43 = vld [vmem:[%s15049_s3 + $0x68] sm:$0xff]  ;;  %v3236_v29 = vadd.s32 4294967184, %v11957_v4 }
 0x39c   :  { %v12370_v34 = vpop.xlane.xlu0 %5337  ;;  %8214 = vtanh.f32 %v12345_v44  ;;  %v12388_v63 = vmul.f32 %v12384_v43, %v15235_v53  ;;  %v8197_v25 = vpop.eup %8196  ;;  %v2342_v52 = vadd.f32 %v2326_v58, %v2294_v35  ;;  %v2277_v14 = vadd.f32 %v2261_v41, %v12255_v38  ;;  %v12409_v38 = vld [vmem:[%s15049_s3 + $0x60] sm:$0xff] }
 0x39d   :  { %15288 = vst [vmem:[#allocation115_spill] sm:$0xff] %v12370_v34  ;;  %8216 = vtanh.f32 %v12352_v46  ;;  %v12397_v34 = vld [vmem:[%s15048_s2 + $0x60] sm:$0xff]  ;;  %v8199_v0 = vpop.eup %8198  ;;  %v12413_v35 = vmul.f32 %v12409_v38, %v15235_v53  ;;  %v2325_v4 = vmul.f32 %v8195_v57, %v12266_v10  ;;  %v12425_v3 = vsub.s32 %v2955_v17, %v15259_v12 }
 0x39e   :  { %v12390_v60 = vpop.xlane.xlu1 %5343  ;;  %v12401_v32 = vmul.f32 %v12397_v34, %v15233_v30  ;;  %8218 = vtanh.f32 %v12359_v26  ;;  %v8201_v41 = vpop.eup %8200  ;;  %2371 = vadd.xlane.f32.xlu1 %v2342_v52  ;;  %v2293_v40 = vadd.f32 %v2277_v14, %v12266_v10  ;;  %v2601_v57 = vmul.f32 %v8199_v0, %v12285_v1 }
 0x39f   :  { %15289 = vst [vmem:[#allocation116_spill] sm:$0xff] %v12390_v60  ;;  %v2537_v60 = vmul.f32 %v8197_v25, %v12272_v37  ;;  %8220 = vtanh.f32 %v12368_v50  ;;  %v12422_v25 = vmul.f32 %v12364_v55, %v15238_v23  ;;  %v8203_v48 = vpop.eup %8202  ;;  %15291 = vst [vmem:[#allocation118_spill] sm:$0xff] %v12425_v3  ;;  %v12436_v36 = vmul.f32 %v12384_v43, %v15240_v6 }
 0x3a0   :  { %v12415_v58 = vpop.xlane.xlu0 %5341  ;;  %8222 = vtanh.f32 %v12388_v63  ;;  %v2341_v10 = vadd.f32 %v2325_v4, %v2293_v40  ;;  %v12445_v0 = vsub.s32 %v3236_v29, %v15259_v12  ;;  %v2600_v4 = vmul.f32 %v8203_v48, %v12302_v42 }
 0x3a1   :  { %15290 = vst [vmem:[#allocation117_spill] sm:$0xff] %v12415_v58  ;;  %v2553_v9 = vadd.f32 %v2537_v60, %v12272_v37  ;;  %v2536_v58 = vmul.f32 %v8201_v41, %v12291_v16  ;;  %v8205_v14 = vpop.eup %8204  ;;  %8224 = vtanh.f32 %v12401_v32  ;;  %v2683_v29 = vrot.slane %v10662_v18, %v12237_v47 }
 0x3a2   :  { %v12430_v52 = vpop.xlane.xlu1 %5351  ;;  %v8207_v17 = vpop.eup %8206  ;;  %v2541_v60 = vmul.f32 %v8205_v14, %v12305_v20  ;;  %8226 = vtanh.f32 %v12413_v35  ;;  %15294 = vst [vmem:[#allocation121_spill] sm:$0xff] %v12445_v0  ;;  %2369 = vadd.xlane.f32.xlu0 %v2341_v10  ;;  %v12462_v10 = vmul.f32 %v12409_v38, %v15240_v6 }
 0x3a3   :  { %15292 = vst [vmem:[#allocation119_spill] sm:$0xff] %v12430_v52  ;;  %v2569_v28 = vadd.f32 %v2553_v9, %v12285_v1  ;;  %v2552_v37 = vadd.f32 %v2536_v58, %v12291_v16  ;;  %v8209_v40 = vpop.eup %8208  ;;  %8228 = vtanh.f32 %v12422_v25  ;;  %v12451_v9 = vmul.f32 %v12397_v34, %v15238_v23 }
 0x3a4   :  { %v12442_v41 = vpop.xlane.xlu0 %5349  ;;  %v8211_v1 = vpop.eup %8210  ;;  %v2557_v14 = vadd.f32 %v2541_v60, %v12305_v20  ;;  %v2605_v48 = vmul.f32 %v8207_v17, %v12318_v13  ;;  %8230 = vtanh.f32 %v12436_v36  ;;  %v2964_v17 = vrot.slane %v10693_v54, %v12313_v21 }
 0x3a5   :  { %15293 = vst [vmem:[#allocation120_spill] sm:$0xff] %v12442_v41  ;;  %v2617_v16 = vadd.f32 %v2601_v57, %v2569_v28  ;;  %v2568_v58 = vadd.f32 %v2552_v37, %v12302_v42  ;;  %v2540_v41 = vmul.f32 %v8209_v40, %v12323_v61  ;;  %v8213_v12 = vpop.eup %8212  ;;  %v2604_v60 = vmul.f32 %v8211_v1, %v12330_v59 }
 0x3a6   :  { %v12464_v52 = vpop.xlane.xlu1 %5616  ;;  %v8215_v28 = vpop.eup %8214  ;;  %v2573_v20 = vadd.f32 %v2557_v14, %v12318_v13  ;;  %v2543_v37 = vmul.f32 %v8213_v12, %v12333_v51  ;;  %8232 = vtanh.f32 %v12451_v9  ;;  %v12475_v40 = vmul.f32 %v12364_v55, %v15243_v11 }
 0x3a7   :  { %15295 = vst [vmem:[#allocation122_spill] sm:$0xff] %v12464_v52  ;;  %2640 = vadd.xlane.f32.xlu1 %v2617_v16  ;;  %v2616_v42 = vadd.f32 %v2600_v4, %v2568_v58  ;;  %v2556_v57 = vadd.f32 %v2540_v41, %v12323_v61  ;;  %v8217_v18 = vpop.eup %8216  ;;  %v3245_v1 = vrot.slane %v10742_v31, %v12355_v5  ;;  %8234 = vtanh.f32 %v12462_v10 }
 0x3a8   :  { %v8219_v16 = vpop.eup %8218  ;;  %v2621_v4 = vadd.f32 %v2605_v48, %v2573_v20  ;;  %v2559_v61 = vadd.f32 %v2543_v37, %v12333_v51  ;;  %v2542_v41 = vmul.f32 %v8217_v18, %v12352_v46  ;;  %v2607_v12 = vmul.f32 %v8215_v28, %v12345_v44 }
 0x3a9   :  { %2638 = vadd.xlane.f32.xlu0 %v2616_v42  ;;  %v2572_v13 = vadd.f32 %v2556_v57, %v12330_v59  ;;  %v12480_v58 = vpop.xlane.xlu0 %5614  ;;  %v8221_v14 = vpop.eup %8220  ;;  %v12488_v55 = vmul.f32 %v12384_v43, %v15245_v7  ;;  %v2678_v37 = vrot.slane %v10760_v2, %v12377_v24  ;;  %v2606_v28 = vmul.f32 %v8219_v16, %v12359_v26 }
 0x3aa   :  { %15296 = vst [vmem:[#allocation123_spill] sm:$0xff] %v12480_v58  ;;  %v8223_v48 = vpop.eup %8222  ;;  %v2575_v51 = vadd.f32 %v2559_v61, %v12345_v44  ;;  %v2558_v42 = vadd.f32 %v2542_v41, %v12352_v46  ;;  %v2818_v20 = vmul.f32 %v8221_v14, %v12368_v50  ;;  %8236 = vtanh.f32 %v12475_v40  ;;  %v12501_v18 = vpop.xlane.xlu1 %5620  ;;  %v8674_v61 = vld [vmem:[%s15048_s2 + $0x78] sm:$0xff] }
 0x3ab   :  { %2648 = vadd.xlane.f32.xlu1 %v2621_v4  ;;  %v2620_v59 = vadd.f32 %v2604_v60, %v2572_v13  ;;  %v8225_v57 = vpop.eup %8224  ;;  %v12499_v43 = vmul.f32 %v12397_v34, %v15243_v11  ;;  %15297 = vst [vmem:[#allocation124_spill] sm:$0xff] %v12501_v18  ;;  %v2882_v16 = vmul.f32 %v8223_v48, %v12388_v63  ;;  %8238 = vtanh.f32 %v12488_v55  ;;  %v15318_v18 = vld [vmem:[#allocation25_spill] sm:$0xff] }
 0x3ac   :  { %v8227_v60 = vpop.eup %8226  ;;  %v2623_v44 = vadd.f32 %v2607_v12, %v2575_v51  ;;  %v2574_v46 = vadd.f32 %v2558_v42, %v12359_v26  ;;  %v2834_v4 = vadd.f32 %v2818_v20, %v12368_v50  ;;  %v2817_v2 = vmul.f32 %v8225_v57, %v12401_v32  ;;  %v8675_v51 = vld [vmem:[%s15049_s3 + $0x78] sm:$0xff] }
 0x3ad   :  { %2646 = vadd.xlane.f32.xlu0 %v2620_v59  ;;  %v8229_v13 = vpop.eup %8228  ;;  %v12510_v34 = vmul.f32 %v12409_v38, %v15245_v7  ;;  %v12516_v41 = vmul.f32 %v8674_v61, %v15233_v30  ;;  %v12521_v48 = vpop.xlane.xlu0 %5618  ;;  %v12524_v38 = vsel %vm2684_vm1, %v2683_v29, %v2678_v37  ;;  %8240 = vtanh.f32 %v12499_v43 }
 0x3ae   :  { %v2622_v26 = vadd.f32 %v2606_v28, %v2574_v46  ;;  %v2850_v50 = vadd.f32 %v2834_v4, %v12388_v63  ;;  %v2833_v14 = vadd.f32 %v2817_v2, %v12401_v32  ;;  %v2822_v12 = vmul.f32 %v8229_v13, %v12422_v25  ;;  %15298 = vst [vmem:[#allocation125_spill] sm:$0xff] %v12521_v48  ;;  %v8231_v59 = vpop.eup %8230  ;;  %v8676_v32 = vld [vmem:[%s15048_s2 + $0x70] sm:$0xff] }
 0x3af   :  { %2652 = vadd.xlane.f32.xlu1 %v2623_v44  ;;  %v12531_v42 = vmul.f32 %v8675_v51, %v15235_v53  ;;  %v12537_v63 = vmul.f32 %v8676_v32, %v15233_v30  ;;  %v2881_v57 = vmul.f32 %v8227_v60, %v12413_v35  ;;  %v2886_v44 = vmul.f32 %v8231_v59, %v12436_v36  ;;  %v8677_v46 = vld [vmem:[%s15049_s3 + $0x70] sm:$0xff] }
 0x3b0   :  { %v2898_v29 = vadd.f32 %v2882_v16, %v2850_v50  ;;  %v2849_v20 = vadd.f32 %v2833_v14, %v12413_v35  ;;  %v2838_v37 = vadd.f32 %v2822_v12, %v12422_v25  ;;  %v8233_v28 = vpop.eup %8232  ;;  %8242 = vtanh.f32 %v12510_v34 }
 0x3b1   :  { %2650 = vadd.xlane.f32.xlu0 %v2622_v26  ;;  %v12548_v30 = vmul.f32 %v8677_v46, %v15235_v53  ;;  %v12551_v4 = vmul.f32 %v8674_v61, %v15238_v23  ;;  %v2821_v60 = vmul.f32 %v8233_v28, %v12451_v9  ;;  %8244 = vtanh.f32 %v12516_v41  ;;  %v8235_v13 = vpop.eup %8234 }
 0x3b2   :  { %v2897_v35 = vadd.f32 %v2881_v57, %v2849_v20  ;;  %v2854_v25 = vadd.f32 %v2838_v37, %v12436_v36  ;;  %v4556_v16 = vrot.slane %v10775_v56, %v12096_v33  ;;  %v2959_v53 = vrot.slane %v10804_v62, %v12425_v3 }
 0x3b3   :  { %v12553_v2 = vpop.xlane.xlu1 %5628  ;;  %2921 = vadd.xlane.f32.xlu1 %v2898_v29  ;;  %8246 = vtanh.f32 %v12531_v42  ;;  %v12564_v26 = vmul.f32 %v8675_v51, %v15240_v6  ;;  %v2837_v36 = vadd.f32 %v2821_v60, %v12451_v9  ;;  %v12569_v14 = vmul.f32 %v8676_v32, %v15238_v23 }
 0x3b4   :  { %15299 = vst [vmem:[#allocation126_spill] sm:$0xff] %v12553_v2  ;;  %v2902_v50 = vadd.f32 %v2886_v44, %v2854_v25  ;;  %8248 = vtanh.f32 %v12537_v63  ;;  %v12571_v12 = vpop.xlane.xlu0 %5626  ;;  %v8237_v56 = vpop.eup %8236  ;;  %v12577_v59 = vmul.f32 %v8677_v46, %v15240_v6  ;;  %v12580_v29 = vmul.f32 %v8674_v61, %v15243_v11 }
 0x3b5   :  { %2919 = vadd.xlane.f32.xlu0 %v2897_v35  ;;  %15300 = vst [vmem:[#allocation127_spill] sm:$0xff] %v12571_v12  ;;  %8250 = vtanh.f32 %v12548_v30  ;;  %v2853_v9 = vadd.f32 %v2837_v36, %v12462_v10  ;;  %v2885_v23 = vmul.f32 %v8235_v13, %v12462_v10  ;;  %v2824_v20 = vmul.f32 %v8237_v56, %v12475_v40  ;;  %v8239_v57 = vpop.eup %8238 }
 0x3b6   :  { %8252 = vtanh.f32 %v12551_v4  ;;  %v12590_v37 = vsel %vm2965_vm2, %v2964_v17, %v2959_v53  ;;  %v3240_v6 = vrot.slane %v10840_v49, %v12445_v0  ;;  %v12596_v61 = vmul.f32 %v8675_v51, %v15245_v7  ;;  %v12614_v51 = vld [vmem:[%s15048_s2 + $0x8] sm:$0xff]  ;;  %v15304_v53 = vld [vmem:[#allocation29_spill] sm:$0xff] }
 0x3b7   :  { %2929 = vadd.xlane.f32.xlu1 %v2902_v50  ;;  %8254 = vtanh.f32 %v12564_v26  ;;  %v2901_v28 = vadd.f32 %v2885_v23, %v2853_v9  ;;  %v2840_v44 = vadd.f32 %v2824_v20, %v12475_v40  ;;  %v12603_v54 = vmul.f32 %v8676_v32, %v15243_v11  ;;  %v8241_v17 = vpop.eup %8240  ;;  %v15302_v40 = vld [vmem:[#allocation22_spill] sm:$0xff]  ;;  %v12651_v9 = vld [vmem:[%s15048_s2] sm:$0xff] }
 0x3b8   :  { %8256 = vtanh.f32 %v12569_v14  ;;  %v4552_v35 = vrot.slane %v10863_v8, %v11993_v15  ;;  %v12609_v49 = vmul.f32 %v8677_v46, %v15245_v7  ;;  %v12618_v25 = vmul.f32 %v12614_v51, %v15302_v40 }
 0x3b9   :  { %8258 = vtanh.f32 %v12577_v59  ;;  %2927 = vadd.xlane.f32.xlu0 %v2901_v28  ;;  %v2856_v32 = vadd.f32 %v2840_v44, %v12488_v55  ;;  %v2888_v8 = vmul.f32 %v8239_v57, %v12488_v55  ;;  %v2823_v60 = vmul.f32 %v8241_v17, %v12499_v43  ;;  %v12638_v55 = vld [vmem:[%s15049_s3 + $0x8] sm:$0xff] }
 0x3ba   :  { %8260 = vtanh.f32 %v12580_v29  ;;  %v8243_v7 = vpop.eup %8242  ;;  %v12630_v46 = vsel %vm3246_vm3, %v3245_v1, %v3240_v6  ;;  %v12642_v50 = vmul.f32 %v12638_v55, %v15304_v53  ;;  %v12655_v23 = vmul.f32 %v12651_v9, %v15302_v40 }
 0x3bb   :  { %v12598_v10 = vpop.xlane.xlu1 %5893  ;;  %8262 = vtanh.f32 %v12596_v61  ;;  %v8245_v31 = vpop.eup %8244  ;;  %v2904_v56 = vadd.f32 %v2888_v8, %v2856_v32  ;;  %v2839_v1 = vadd.f32 %v2823_v60, %v12499_v43  ;;  %v12658_v57 = vsel %vm1272_vm4, %v4556_v16, %v4552_v35  ;;  %v12665_v43 = vld [vmem:[%s15049_s3] sm:$0xff]  ;;  %v15307_v32 = vld [vmem:[#allocation24_spill] sm:$0xff] }
 0x3bc   :  { %15301 = vst [vmem:[#allocation128_spill] sm:$0xff] %v12598_v10  ;;  %8264 = vtanh.f32 %v12603_v54  ;;  %v3099_v6 = vmul.f32 %v8245_v31, %v12516_v41  ;;  %v12669_v28 = vmul.f32 %v12665_v43, %v15304_v53  ;;  %v2887_v35 = vmul.f32 %v8243_v7, %v12510_v34  ;;  %v15308_v31 = vld [vmem:[#allocation27_spill] sm:$0xff] }
 0x3bd   :  { %v12620_v11 = vpop.xlane.xlu0 %5891  ;;  %v8247_v20 = vpop.eup %8246  ;;  %8266 = vtanh.f32 %v12609_v49  ;;  %2933 = vadd.xlane.f32.xlu1 %v2904_v56  ;;  %v2855_v16 = vadd.f32 %v2839_v1, %v12510_v34  ;;  %v12678_v8 = vmul.f32 %v12614_v51, %v15307_v32  ;;  %v4830_v13 = vrot.slane %v15308_v31, %v12133_v22 }
 0x3be   :  { %15303 = vst [vmem:[#allocation22_spill] sm:$0xff] %v12620_v11  ;;  %v8249_v17 = vpop.eup %8248  ;;  %8268 = vtanh.f32 %v12618_v25  ;;  %v3115_v62 = vadd.f32 %v3099_v6, %v12516_v41  ;;  %v3163_v7 = vmul.f32 %v8247_v20, %v12531_v42  ;;  %v15312_v20 = vld [vmem:[#allocation96_spill] sm:$0xff] }
 0x3bf   :  { %v12644_v36 = vpop.xlane.xlu1 %5897  ;;  %v8251_v60 = vpop.eup %8250  ;;  %8270 = vtanh.f32 %v12642_v50  ;;  %v2903_v34 = vadd.f32 %v2887_v35, %v2855_v16  ;;  %v15313_v35 = vld [vmem:[#allocation20_spill] sm:$0xff] }
 0x3c0   :  { %15305 = vst [vmem:[#allocation29_spill] sm:$0xff] %v12644_v36  ;;  %v8253_v1 = vpop.eup %8252  ;;  %8272 = vtanh.f32 %v12655_v23  ;;  %v15310_v36 = vld [vmem:[#allocation31_spill] sm:$0xff]  ;;  %v3131_v41 = vadd.f32 %v3115_v62, %v12531_v42  ;;  %v3162_v12 = vmul.f32 %v8251_v60, %v12548_v30  ;;  %v12705_v42 = vmul.f32 %v12651_v9, %v15307_v32 }
 0x3c1   :  { %v12671_v44 = vpop.xlane.xlu0 %5895  ;;  %v12691_v11 = vmul.f32 %v12638_v55, %v15310_v36  ;;  %v8255_v10 = vpop.eup %8254  ;;  %8274 = vtanh.f32 %v12669_v28  ;;  %2931 = vadd.xlane.f32.xlu0 %v2903_v34  ;;  %v15314_v34 = vrot.slane %v10828_v39, %v12005_v45 }
 0x3c2   :  { %15306 = vst [vmem:[#allocation129_spill] sm:$0xff] %v12671_v44  ;;  %v3098_v44 = vmul.f32 %v8249_v17, %v12537_v63  ;;  %v3103_v17 = vmul.f32 %v8253_v1, %v12551_v4  ;;  %v8257_v16 = vpop.eup %8256  ;;  %8276 = vtanh.f32 %v12678_v8  ;;  %v3179_v62 = vadd.f32 %v3163_v7, %v3131_v41 }
 0x3c3   :  { %v12685_v56 = vpop.xlane.xlu1 %6170  ;;  %v12714_v60 = vsel %vm1560_vm5, %v15314_v34, %v4830_v13  ;;  %8278 = vtanh.f32 %v12691_v11  ;;  %v12720_v7 = vmul.f32 %v12665_v43, %v15310_v36 }
 0x3c4   :  { %15309 = vst [vmem:[#allocation24_spill] sm:$0xff] %v12685_v56  ;;  %v3114_v6 = vadd.f32 %v3098_v44, %v12537_v63  ;;  %v8259_v63 = vpop.eup %8258  ;;  %v3119_v1 = vadd.f32 %v3103_v17, %v12551_v4  ;;  %v3167_v56 = vmul.f32 %v8255_v10, %v12564_v26  ;;  %3202 = vadd.xlane.f32.xlu1 %v3179_v62  ;;  %v15317_v10 = vld [vmem:[#allocation28_spill] sm:$0xff]  ;;  %8280 = vtanh.f32 %v12705_v42 }
 0x3c5   :  { %v12697_v31 = vpop.xlane.xlu0 %6168  ;;  %v8261_v2 = vpop.eup %8260  ;;  %v3166_v48 = vmul.f32 %v8259_v63, %v12577_v59  ;;  %v15321_v63 = vld [vmem:[#allocation21_spill] sm:$0xff]  ;;  %8282 = vtanh.f32 %v12720_v7 }
 0x3c6   :  { %15311 = vst [vmem:[#allocation27_spill] sm:$0xff] %v12697_v31  ;;  %v3130_v44 = vadd.f32 %v3114_v6, %v12548_v30  ;;  %v3102_v31 = vmul.f32 %v8257_v16, %v12569_v14  ;;  %v8263_v4 = vpop.eup %8262  ;;  %v3135_v6 = vadd.f32 %v3119_v1, %v12564_v26  ;;  %v3105_v13 = vmul.f32 %v8261_v2, %v12580_v29  ;;  %v15316_v16 = vld [vmem:[#allocation104_spill] sm:$0xff]  ;;  %v15320_v1 = vld [vmem:[#allocation101_spill] sm:$0xff] }
 0x3c7   :  { %v12722_v30 = vpop.xlane.xlu1 %6174  ;;  %v8265_v17 = vpop.eup %8264  ;;  %v5107_v34 = vrot.slane %v15317_v10, %v15316_v16  ;;  %v3169_v58 = vmul.f32 %v8263_v4, %v12596_v61 }
 0x3c8   :  { %15315 = vst [vmem:[#allocation31_spill] sm:$0xff] %v12722_v30  ;;  %v3178_v41 = vadd.f32 %v3162_v12, %v3130_v44  ;;  %v3118_v39 = vadd.f32 %v3102_v31, %v12569_v14  ;;  %v12733_v30 = vmul.f32 %v12614_v51, %v15318_v18  ;;  %v8267_v62 = vpop.eup %8266  ;;  %v3183_v12 = vadd.f32 %v3167_v56, %v3135_v6  ;;  %v15322_v51 = vld [vmem:[#allocation32_spill] sm:$0xff] }
 0x3c9   :  { %v3121_v14 = vadd.f32 %v3105_v13, %v12580_v29  ;;  %v3104_v2 = vmul.f32 %v8265_v17, %v12603_v54  ;;  %v12738_v31 = vpop.xlane.xlu0 %6172  ;;  %v8269_v44 = vpop.eup %8268  ;;  %v15323_v17 = vrot.slane %v10852_v19, %v12069_v27  ;;  %v3168_v10 = vmul.f32 %v8267_v62, %v12609_v49 }
 0x3ca   :  { %3200 = vadd.xlane.f32.xlu0 %v3178_v41  ;;  %v3134_v26 = vadd.f32 %v3118_v39, %v12577_v59  ;;  %15319 = vst [vmem:[#allocation20_spill] sm:$0xff] %v12738_v31  ;;  %v12746_v41 = vmul.f32 %v12638_v55, %v15322_v51  ;;  %v8271_v56 = vpop.eup %8270  ;;  %3210 = vadd.xlane.f32.xlu1 %v3183_v12  ;;  %8284 = vtanh.f32 %v12733_v30 }
 0x3cb   :  { %v3137_v29 = vadd.f32 %v3121_v14, %v12596_v61  ;;  %v3120_v6 = vadd.f32 %v3104_v2, %v12603_v54  ;;  %v4412_v39 = vmul.f32 %v8269_v44, %v12618_v25  ;;  %v8273_v13 = vpop.eup %8272  ;;  %v12755_v4 = vsel %vm1841_vm6, %v15323_v17, %v5107_v34  ;;  %v12763_v61 = vpop.xlane.xlu1 %6447  ;;  %v8682_v14 = vld [vmem:[%s15048_s2 + $0x18] sm:$0xff] }
 0x3cc   :  { %v3182_v59 = vadd.f32 %v3166_v48, %v3134_v26  ;;  %v12761_v48 = vmul.f32 %v12651_v9, %v15318_v18  ;;  %15324 = vst [vmem:[#allocation28_spill] sm:$0xff] %v12763_v61  ;;  %v8275_v54 = vpop.eup %8274  ;;  %v4411_v34 = vmul.f32 %v8273_v13, %v12655_v23  ;;  %v4476_v62 = vmul.f32 %v8271_v56, %v12642_v50 }
 0x3cd   :  { %v3185_v55 = vadd.f32 %v3169_v58, %v3137_v29  ;;  %v3136_v12 = vadd.f32 %v3120_v6, %v12609_v49  ;;  %v4428_v19 = vadd.f32 %v4412_v39, %v12618_v25  ;;  %v8277_v26 = vpop.eup %8276  ;;  %8286 = vtanh.f32 %v12746_v41  ;;  %v12783_v56 = vpop.xlane.xlu0 %6445  ;;  %v15327_v29 = vld [vmem:[#allocation30_spill] sm:$0xff] }
 0x3ce   :  { %3208 = vadd.xlane.f32.xlu0 %v3182_v59  ;;  %v12772_v9 = vmul.f32 %v12665_v43, %v15322_v51  ;;  %v12778_v58 = vmul.f32 %v8682_v14, %v15302_v40  ;;  %v4427_v2 = vadd.f32 %v4411_v34, %v12655_v23  ;;  %v4416_v44 = vmul.f32 %v8277_v26, %v12678_v8  ;;  %v8279_v43 = vpop.eup %8278  ;;  %v15326_v59 = vld [vmem:[#allocation107_spill] sm:$0xff]  ;;  %v8683_v39 = vld [vmem:[%s15049_s3 + $0x18] sm:$0xff]  ;;  %v8685_v26 = vld [vmem:[%s15049_s3 + $0x10] sm:$0xff] }
 0x3cf   :  { %3214 = vadd.xlane.f32.xlu1 %v3185_v55  ;;  %v3184_v49 = vadd.f32 %v3168_v10, %v3136_v12  ;;  %v4444_v25 = vadd.f32 %v4428_v19, %v12642_v50  ;;  %15325 = vst [vmem:[#allocation25_spill] sm:$0xff] %v12783_v56  ;;  %v5384_v6 = vrot.slane %v15327_v29, %v15326_v59  ;;  %8288 = vtanh.f32 %v12761_v48  ;;  %v8684_v50 = vld [vmem:[%s15048_s2 + $0x10] sm:$0xff]  ;;  %v8281_v19 = vpop.eup %8280 }
 0x3d0   :  { %v12792_v10 = vmul.f32 %v8683_v39, %v15304_v53  ;;  %v12798_v23 = vmul.f32 %v8684_v50, %v15302_v40  ;;  %v4443_v17 = vadd.f32 %v4427_v2, %v12669_v28  ;;  %v4475_v55 = vmul.f32 %v8275_v54, %v12669_v28  ;;  %v15329_v2 = vld [vmem:[#allocation74_spill] sm:$0xff] }
 0x3d1   :  { %v4492_v13 = vadd.f32 %v4476_v62, %v4444_v25  ;;  %v4432_v12 = vadd.f32 %v4416_v44, %v12678_v8  ;;  %v4480_v34 = vmul.f32 %v8279_v43, %v12691_v11  ;;  %8290 = vtanh.f32 %v12772_v9  ;;  %v8283_v25 = vpop.eup %8282  ;;  %v15330_v43 = vld [vmem:[#allocation8_spill] sm:$0xff] }
 0x3d2   :  { %3212 = vadd.xlane.f32.xlu0 %v3184_v49  ;;  %v12809_v29 = vmul.f32 %v8685_v26, %v15304_v53  ;;  %v12812_v62 = vmul.f32 %v8682_v14, %v15307_v32  ;;  %v12814_v49 = vpop.xlane.xlu1 %5905  ;;  %v4491_v28 = vadd.f32 %v4475_v55, %v4443_v17  ;;  %v4415_v54 = vmul.f32 %v8281_v19, %v12705_v42  ;;  %v15332_v19 = vld [vmem:[#allocation112_spill] sm:$0xff] }
 0x3d3   :  { %15328 = vst [vmem:[#allocation21_spill] sm:$0xff] %v12814_v49  ;;  %4515 = vadd.xlane.f32.xlu1 %v4492_v13  ;;  %v4448_v8 = vadd.f32 %v4432_v12, %v12691_v11  ;;  %8292 = vtanh.f32 %v12778_v58  ;;  %v2693_v44 = vrot.slane %v15329_v2, %v12237_v47  ;;  %v2689_v56 = vrot.slane %v15330_v43, %v12377_v24  ;;  %v12832_v55 = vpop.xlane.xlu0 %5903  ;;  %v15333_v2 = vld [vmem:[#allocation39_spill] sm:$0xff] }
 0x3d4   :  { %8294 = vtanh.f32 %v12792_v10  ;;  %v12825_v61 = vmul.f32 %v8683_v39, %v15310_v36  ;;  %v4431_v11 = vadd.f32 %v4415_v54, %v12705_v42  ;;  %v12830_v17 = vmul.f32 %v8684_v50, %v15307_v32  ;;  %15331 = vst [vmem:[#allocation32_spill] sm:$0xff] %v12832_v55  ;;  %v8285_v12 = vpop.eup %8284 }
 0x3d5   :  { %v4496_v13 = vadd.f32 %v4480_v34, %v4448_v8  ;;  %8296 = vtanh.f32 %v12798_v23  ;;  %v5661_v43 = vrot.slane %v15333_v2, %v15332_v19  ;;  %v12838_v31 = vmul.f32 %v8685_v26, %v15310_v36  ;;  %v15344_v19 = vld [vmem:[#allocation10_spill] sm:$0xff] }
 0x3d6   :  { %4513 = vadd.xlane.f32.xlu0 %v4491_v28  ;;  %8298 = vtanh.f32 %v12809_v29  ;;  %v12841_v34 = vmul.f32 %v8682_v14, %v15318_v18  ;;  %v4447_v42 = vadd.f32 %v4431_v11, %v12720_v7  ;;  %v4479_v28 = vmul.f32 %v8283_v25, %v12720_v7 }
 0x3d7   :  { %4523 = vadd.xlane.f32.xlu1 %v4496_v13  ;;  %v4418_v8 = vmul.f32 %v8285_v12, %v12733_v30  ;;  %8300 = vtanh.f32 %v12812_v62  ;;  %v8287_v54 = vpop.eup %8286  ;;  %v15334_v2 = vrot.slane %v15313_v35, %v15312_v20  ;;  %v2694_v49 = vsel %vm2684_vm1, %v2693_v44, %v2689_v56  ;;  %v12858_v13 = vpop.xlane.xlu1 %6451 }
 0x3d8   :  { %8302 = vtanh.f32 %v12825_v61  ;;  %v12856_v14 = vmul.f32 %v8683_v39, %v15322_v51  ;;  %15336 = vst [vmem:[#allocation74_spill] sm:$0xff] %v12858_v13  ;;  %v4495_v7 = vadd.f32 %v4479_v28, %v4447_v42  ;;  %v12863_v11 = vmul.f32 %v8684_v50, %v15318_v18 }
 0x3d9   :  { %v12851_v55 = vsel %vm2122_vm7, %v15334_v2, %v5384_v6  ;;  %v4434_v25 = vadd.f32 %v4418_v8, %v12733_v30  ;;  %8304 = vtanh.f32 %v12830_v17  ;;  %v8289_v35 = vpop.eup %8288  ;;  %v15337_v6 = vrot.slane %v15321_v63, %v15320_v1  ;;  %v12876_v30 = vpop.xlane.xlu0 %6449  ;;  %v12884_v63 = vld [vmem:[%s15048_s2 + $0x28] sm:$0xff] }
 0x3da   :  { %15335 = vst [vmem:[#allocation30_spill] sm:$0xff] %v12851_v55  ;;  %v4482_v39 = vmul.f32 %v8287_v54, %v12746_v41  ;;  %8306 = vtanh.f32 %v12838_v31  ;;  %v12874_v44 = vmul.f32 %v8685_v26, %v15322_v51  ;;  %15339 = vst [vmem:[#allocation39_spill] sm:$0xff] %v12876_v30  ;;  %4521 = vadd.xlane.f32.xlu0 %v4495_v7  ;;  %v12900_v8 = vld [vmem:[%s15049_s3 + $0x28] sm:$0xff] }
 0x3db   :  { %v12869_v56 = vsel %vm2403_vm8, %v15337_v6, %v5661_v43  ;;  %v4450_v50 = vadd.f32 %v4434_v25, %v12746_v41  ;;  %v4417_v12 = vmul.f32 %v8289_v35, %v12761_v48  ;;  %8308 = vtanh.f32 %v12841_v34  ;;  %v8291_v26 = vpop.eup %8290  ;;  %v15340_v41 = vld [vmem:[#allocation15_spill] sm:$0xff]  ;;  %v12906_v2 = vpop.xlane.xlu1 %6182 }
 0x3dc   :  { %15338 = vst [vmem:[#allocation8_spill] sm:$0xff] %v12869_v56  ;;  %v12888_v43 = vmul.f32 %v12884_v63, %v15302_v40  ;;  %v12892_v42 = vsel %vm1337_vm9, %v2694_v49, %v12524_v38  ;;  %v2702_v28 = vrot.slane %v15340_v41, %v12237_v47  ;;  %8310 = vtanh.f32 %v12856_v14  ;;  %15341 = vst [vmem:[#allocation15_spill] sm:$0xff] %v12906_v2  ;;  %v12913_v49 = vld [vmem:[%s15048_s2 + $0x20] sm:$0xff] }
 0x3dd   :  { %v12904_v54 = vmul.f32 %v12900_v8, %v15304_v53  ;;  %v8293_v7 = vpop.eup %8292  ;;  %v4498_v25 = vadd.f32 %v4482_v39, %v4450_v50  ;;  %v4433_v38 = vadd.f32 %v4417_v12, %v12761_v48  ;;  %8312 = vtanh.f32 %v12863_v11  ;;  %v15342_v41 = vld [vmem:[#allocation75_spill] sm:$0xff]  ;;  %v12932_v12 = vpop.xlane.xlu0 %6180 }
 0x3de   :  { %v12917_v35 = vmul.f32 %v12913_v49, %v15302_v40  ;;  %v8295_v6 = vpop.eup %8294  ;;  %v2698_v30 = vrot.slane %v15342_v41, %v12377_v24  ;;  %v4690_v39 = vmul.f32 %v8293_v7, %v12778_v58  ;;  %8314 = vtanh.f32 %v12874_v44  ;;  %v12926_v48 = vld [vmem:[%s15049_s3 + $0x20] sm:$0xff]  ;;  %15343 = vst [vmem:[#allocation75_spill] sm:$0xff] %v12932_v12 }
 0x3df   :  { %v12930_v50 = vmul.f32 %v12926_v48, %v15304_v53  ;;  %v8297_v13 = vpop.eup %8296  ;;  %4527 = vadd.xlane.f32.xlu1 %v4498_v25  ;;  %v4449_v2 = vadd.f32 %v4433_v38, %v12772_v9  ;;  %v4481_v41 = vmul.f32 %v8291_v26, %v12772_v9  ;;  %8316 = vtanh.f32 %v12888_v43  ;;  %v12946_v25 = vpop.xlane.xlu1 %6459 }
 0x3e0   :  { %v12939_v7 = vmul.f32 %v12884_v63, %v15307_v32  ;;  %v8299_v56 = vpop.eup %8298  ;;  %v4706_v1 = vadd.f32 %v4690_v39, %v12778_v58  ;;  %v4689_v12 = vmul.f32 %v8297_v13, %v12798_v23  ;;  %8318 = vtanh.f32 %v12904_v54  ;;  %15345 = vst [vmem:[#allocation10_spill] sm:$0xff] %v12946_v25 }
 0x3e1   :  { %v8301_v38 = vpop.eup %8300  ;;  %v4497_v9 = vadd.f32 %v4481_v41, %v4449_v2  ;;  %v4754_v26 = vmul.f32 %v8295_v6, %v12792_v10  ;;  %8320 = vtanh.f32 %v12917_v35  ;;  %v12952_v55 = vmul.f32 %v12900_v8, %v15310_v36  ;;  %v12958_v39 = vpop.xlane.xlu0 %6457 }
 0x3e2   :  { %v8303_v59 = vpop.eup %8302  ;;  %v4722_v52 = vadd.f32 %v4706_v1, %v12792_v10  ;;  %v4705_v58 = vadd.f32 %v4689_v12, %v12798_v23  ;;  %v4694_v13 = vmul.f32 %v8301_v38, %v12812_v62  ;;  %8322 = vtanh.f32 %v12930_v50  ;;  %15346 = vst [vmem:[#allocation130_spill] sm:$0xff] %v12958_v39 }
 0x3e3   :  { %v8305_v2 = vpop.eup %8304  ;;  %v2703_v6 = vsel %vm2684_vm1, %v2702_v28, %v2698_v30  ;;  %4525 = vadd.xlane.f32.xlu0 %v4497_v9  ;;  %v4753_v41 = vmul.f32 %v8299_v56, %v12809_v29  ;;  %8324 = vtanh.f32 %v12939_v7  ;;  %v12965_v25 = vmul.f32 %v12913_v49, %v15307_v32  ;;  %v15347_v30 = vld [vmem:[#allocation17_spill] sm:$0xff] }
 0x3e4   :  { %v8307_v1 = vpop.eup %8306  ;;  %v4770_v10 = vadd.f32 %v4754_v26, %v4722_v52  ;;  %v4721_v23 = vadd.f32 %v4705_v58, %v12809_v29  ;;  %v4710_v12 = vadd.f32 %v4694_v13, %v12812_v62  ;;  %v4693_v38 = vmul.f32 %v8305_v2, %v12830_v17  ;;  %v12978_v20 = vpop.xlane.xlu1 %1227 }
 0x3e5   :  { %v8309_v39 = vpop.eup %8308  ;;  %v4758_v56 = vmul.f32 %v8303_v59, %v12825_v61  ;;  %8326 = vtanh.f32 %v12952_v55  ;;  %v12976_v9 = vmul.f32 %v12926_v48, %v15310_v36  ;;  %15348 = vst [vmem:[#allocation17_spill] sm:$0xff] %v12978_v20  ;;  %v12985_v59 = vsel %vm1339_vm10, %v2703_v6, %v12892_v42  ;;  %v15350_v6 = vld [vmem:[#allocation76_spill] sm:$0xff] }
 0x3e6   :  { %v8311_v52 = vpop.eup %8310  ;;  %4793 = vadd.xlane.f32.xlu1 %v4770_v10  ;;  %v4769_v29 = vadd.f32 %v4753_v41, %v4721_v23  ;;  %v4726_v62 = vadd.f32 %v4710_v12, %v12825_v61  ;;  %v4709_v26 = vadd.f32 %v4693_v38, %v12830_v17  ;;  %v4696_v58 = vmul.f32 %v8309_v39, %v12841_v34  ;;  %v12996_v23 = vpop.xlane.xlu0 %1225 }
 0x3e7   :  { %v8313_v13 = vpop.eup %8312  ;;  %v4757_v2 = vmul.f32 %v8307_v1, %v12838_v31  ;;  %8328 = vtanh.f32 %v12965_v25  ;;  %v12991_v28 = vmul.f32 %v12884_v63, %v15318_v18  ;;  %15349 = vst [vmem:[#allocation131_spill] sm:$0xff] %v12996_v23  ;;  %v2974_v1 = vrot.slane %v15350_v6, %v12313_v21 }
 0x3e8   :  { %v8315_v41 = vpop.eup %8314  ;;  %4791 = vadd.xlane.f32.xlu0 %v4769_v29  ;;  %v4774_v61 = vadd.f32 %v4758_v56, %v4726_v62  ;;  %v4725_v17 = vadd.f32 %v4709_v26, %v12838_v31  ;;  %v4712_v39 = vadd.f32 %v4696_v58, %v12841_v34  ;;  %v4695_v10 = vmul.f32 %v8313_v13, %v12863_v11  ;;  %v15351_v26 = vld [vmem:[#allocation11_spill] sm:$0xff]  ;;  %v13017_v13 = vpop.xlane.xlu1 %1235 }
 0x3e9   :  { %v8317_v42 = vpop.eup %8316  ;;  %v4760_v12 = vmul.f32 %v8311_v52, %v12856_v14  ;;  %8330 = vtanh.f32 %v12976_v9  ;;  %v13004_v63 = vmul.f32 %v12900_v8, %v15322_v51  ;;  %v2970_v58 = vrot.slane %v15351_v26, %v12425_v3  ;;  %15352 = vst [vmem:[#allocation76_spill] sm:$0xff] %v13017_v13 }
 0x3ea   :  { %v8319_v38 = vpop.eup %8318  ;;  %4801 = vadd.xlane.f32.xlu1 %v4774_v61  ;;  %v4773_v31 = vadd.f32 %v4757_v2, %v4725_v17  ;;  %v4728_v34 = vadd.f32 %v4712_v39, %v12856_v14  ;;  %v4711_v56 = vadd.f32 %v4695_v10, %v12863_v11  ;;  %v4967_v29 = vmul.f32 %v8317_v42, %v12888_v43  ;;  %v8690_v10 = vld [vmem:[%s15048_s2 + $0x38] sm:$0xff] }
 0x3eb   :  { %v8321_v62 = vpop.eup %8320  ;;  %v4759_v52 = vmul.f32 %v8315_v41, %v12874_v44  ;;  %8332 = vtanh.f32 %v12991_v28  ;;  %v13015_v8 = vmul.f32 %v12913_v49, %v15318_v18  ;;  %v5031_v41 = vmul.f32 %v8319_v38, %v12904_v54  ;;  %v13037_v38 = vpop.xlane.xlu0 %1233 }
 0x3ec   :  { %v8323_v2 = vpop.eup %8322  ;;  %4799 = vadd.xlane.f32.xlu0 %v4773_v31  ;;  %v4776_v14 = vadd.f32 %v4760_v12, %v4728_v34  ;;  %v4727_v11 = vadd.f32 %v4711_v56, %v12874_v44  ;;  %v4983_v61 = vadd.f32 %v4967_v29, %v12888_v43  ;;  %v4966_v17 = vmul.f32 %v8321_v62, %v12917_v35  ;;  %v8691_v56 = vld [vmem:[%s15049_s3 + $0x38] sm:$0xff] }
 0x3ed   :  { %v8325_v39 = vpop.eup %8324  ;;  %8334 = vtanh.f32 %v13004_v63  ;;  %v13026_v49 = vmul.f32 %v12926_v48, %v15322_v51  ;;  %v13032_v42 = vmul.f32 %v8690_v10, %v15302_v40  ;;  %15353 = vst [vmem:[#allocation11_spill] sm:$0xff] %v13037_v38  ;;  %v2975_v48 = vsel %vm2965_vm2, %v2974_v1, %v2970_v58  ;;  %v8692_v1 = vld [vmem:[%s15048_s2 + $0x30] sm:$0xff] }
 0x3ee   :  { %4805 = vadd.xlane.f32.xlu1 %v4776_v14  ;;  %v4775_v44 = vadd.f32 %v4759_v52, %v4727_v11  ;;  %v4999_v43 = vadd.f32 %v4983_v61, %v12904_v54  ;;  %v4982_v6 = vadd.f32 %v4966_v17, %v12917_v35  ;;  %v4971_v12 = vmul.f32 %v8325_v39, %v12939_v7  ;;  %v15354_v52 = vld [vmem:[#allocation18_spill] sm:$0xff]  ;;  %v13066_v11 = vpop.xlane.xlu1 %1239 }
 0x3ef   :  { %v8327_v31 = vpop.eup %8326  ;;  %v5030_v34 = vmul.f32 %v8323_v2, %v12930_v50  ;;  %8336 = vtanh.f32 %v13015_v8  ;;  %v13046_v29 = vmul.f32 %v8691_v56, %v15304_v53  ;;  %v13054_v26 = vmul.f32 %v8692_v1, %v15302_v40  ;;  %15355 = vst [vmem:[#allocation18_spill] sm:$0xff] %v13066_v11 }
 0x3f0   :  { %4803 = vadd.xlane.f32.xlu0 %v4775_v44  ;;  %v5047_v54 = vadd.f32 %v5031_v41, %v4999_v43  ;;  %v4998_v35 = vadd.f32 %v4982_v6, %v12930_v50  ;;  %v4987_v62 = vadd.f32 %v4971_v12, %v12939_v7  ;;  %v2983_v2 = vrot.slane %v15354_v52, %v12313_v21  ;;  %v8693_v50 = vld [vmem:[%s15049_s3 + $0x30] sm:$0xff] }
 0x3f1   :  { %v8329_v58 = vpop.eup %8328  ;;  %v5035_v14 = vmul.f32 %v8327_v31, %v12952_v55  ;;  %8338 = vtanh.f32 %v13026_v49  ;;  %v13064_v7 = vmul.f32 %v8693_v50, %v15304_v53  ;;  %v15356_v44 = vld [vmem:[#allocation77_spill] sm:$0xff]  ;;  %v13075_v6 = vmul.f32 %v8690_v10, %v15307_v32 }
 0x3f2   :  { %5070 = vadd.xlane.f32.xlu1 %v5047_v54  ;;  %v5046_v61 = vadd.f32 %v5030_v34, %v4998_v35  ;;  %v5003_v17 = vadd.f32 %v4987_v62, %v12952_v55  ;;  %v4970_v39 = vmul.f32 %v8329_v58, %v12965_v25  ;;  %8340 = vtanh.f32 %v13032_v42 }
 0x3f3   :  { %v8331_v41 = vpop.eup %8330  ;;  %v2979_v43 = vrot.slane %v15356_v44, %v12425_v3  ;;  %8342 = vtanh.f32 %v13046_v29  ;;  %v13078_v12 = vmul.f32 %v8691_v56, %v15310_v36  ;;  %v15357_v31 = vrot.slane %v15347_v30, %v12377_v24  ;;  %v13091_v62 = vpop.xlane.xlu0 %1237 }
 0x3f4   :  { %v15358_v55 = vrot.slane %v15344_v19, %v12237_v47  ;;  %5068 = vadd.xlane.f32.xlu0 %v5046_v61  ;;  %v5051_v54 = vadd.f32 %v5035_v14, %v5003_v17  ;;  %v4986_v35 = vadd.f32 %v4970_v39, %v12965_v25  ;;  %8344 = vtanh.f32 %v13054_v26  ;;  %15359 = vst [vmem:[#allocation77_spill] sm:$0xff] %v13091_v62  ;;  %v13114_v44 = vpop.xlane.xlu1 %1516 }
 0x3f5   :  { %v8333_v58 = vpop.eup %8332  ;;  %v3030_v52 = vsel %vm1337_vm9, %v2975_v48, %v12590_v37  ;;  %8346 = vtanh.f32 %v13064_v7  ;;  %v13097_v30 = vmul.f32 %v8692_v1, %v15307_v32  ;;  %v13100_v19 = vmul.f32 %v8693_v50, %v15310_v36  ;;  %15360 = vst [vmem:[#allocation132_spill] sm:$0xff] %v13114_v44  ;;  %v15370_v44 = vld [vmem:[#allocation83_spill] sm:$0xff] }
 0x3f6   :  { %v13087_v34 = vsel %vm2684_vm1, %v15358_v55, %v15357_v31  ;;  %5078 = vadd.xlane.f32.xlu1 %v5051_v54  ;;  %v5002_v14 = vadd.f32 %v4986_v35, %v12976_v9  ;;  %v5034_v25 = vmul.f32 %v8331_v41, %v12976_v9  ;;  %v4973_v61 = vmul.f32 %v8333_v58, %v12991_v28  ;;  %v15361_v31 = vld [vmem:[#allocation80_spill] sm:$0xff] }
 0x3f7   :  { %8348 = vtanh.f32 %v13075_v6  ;;  %v8335_v17 = vpop.eup %8334  ;;  %v2984_v37 = vsel %vm2965_vm2, %v2983_v2, %v2979_v43  ;;  %v13109_v48 = vmul.f32 %v8690_v10, %v15318_v18  ;;  %v13112_v39 = vmul.f32 %v8691_v56, %v15322_v51  ;;  %v15362_v2 = vld [vmem:[#allocation81_spill] sm:$0xff]  ;;  %v13129_v35 = vpop.xlane.xlu0 %1514 }
 0x3f8   :  { %8350 = vtanh.f32 %v13078_v12  ;;  %v3255_v9 = vrot.slane %v15361_v31, %v12355_v5  ;;  %v5050_v41 = vadd.f32 %v5034_v25, %v5002_v14  ;;  %v4989_v55 = vadd.f32 %v4973_v61, %v12991_v28  ;;  %15363 = vst [vmem:[#allocation80_spill] sm:$0xff] %v13129_v35 }
 0x3f9   :  { %8352 = vtanh.f32 %v13097_v30  ;;  %v8337_v54 = vpop.eup %8336  ;;  %v3251_v43 = vrot.slane %v15362_v2, %v12445_v0  ;;  %v13124_v10 = vmul.f32 %v8692_v1, %v15318_v18  ;;  %v13127_v56 = vmul.f32 %v8693_v50, %v15322_v51  ;;  %v15365_v1 = vld [vmem:[#allocation78_spill] sm:$0xff]  ;;  %v13144_v50 = vld [vmem:[%s15048_s2 + $0x48] sm:$0xff] }
 0x3fa   :  { %8354 = vtanh.f32 %v13100_v19  ;;  %5076 = vadd.xlane.f32.xlu0 %v5050_v41  ;;  %v5005_v58 = vadd.f32 %v4989_v55, %v13004_v63  ;;  %v5037_v28 = vmul.f32 %v8335_v17, %v13004_v63  ;;  %v4972_v14 = vmul.f32 %v8337_v54, %v13015_v8  ;;  %v13150_v17 = vpop.xlane.xlu1 %1524 }
 0x3fb   :  { %8356 = vtanh.f32 %v13109_v48  ;;  %v8339_v25 = vpop.eup %8338  ;;  %v13136_v61 = vsel %vm1339_vm10, %v2984_v37, %v3030_v52  ;;  %v3001_v31 = vrot.slane %v15365_v1, %v12313_v21  ;;  %v13148_v63 = vmul.f32 %v13144_v50, %v15302_v40  ;;  %15366 = vst [vmem:[#allocation78_spill] sm:$0xff] %v13150_v17  ;;  %v15367_v52 = vld [vmem:[#allocation79_spill] sm:$0xff]  ;;  %v13162_v17 = vld [vmem:[%s15049_s3 + $0x48] sm:$0xff] }
 0x3fc   :  { %15364 = vst [vmem:[#allocation81_spill] sm:$0xff] %v13136_v61  ;;  %8358 = vtanh.f32 %v13112_v39  ;;  %v8341_v41 = vpop.eup %8340  ;;  %v2997_v37 = vrot.slane %v15367_v52, %v12425_v3  ;;  %v5053_v55 = vadd.f32 %v5037_v28, %v5005_v58  ;;  %v4988_v54 = vadd.f32 %v4972_v14, %v13015_v8  ;;  %v15369_v28 = vld [vmem:[#allocation82_spill] sm:$0xff] }
 0x3fd   :  { %8360 = vtanh.f32 %v13124_v10  ;;  %v8343_v2 = vpop.eup %8342  ;;  %v3256_v1 = vsel %vm3246_vm3, %v3255_v9, %v3251_v43  ;;  %v5244_v35 = vmul.f32 %v8341_v41, %v13032_v42  ;;  %v13166_v52 = vmul.f32 %v13162_v17, %v15304_v53  ;;  %v13168_v58 = vpop.xlane.xlu0 %1522 }
 0x3fe   :  { %8362 = vtanh.f32 %v13127_v56  ;;  %15368 = vst [vmem:[#allocation79_spill] sm:$0xff] %v13168_v58  ;;  %v8345_v8 = vpop.eup %8344  ;;  %v3264_v14 = vrot.slane %v15369_v28, %v12355_v5  ;;  %5082 = vadd.xlane.f32.xlu1 %v5053_v55  ;;  %v5004_v9 = vadd.f32 %v4988_v54, %v13026_v49  ;;  %v5036_v43 = vmul.f32 %v8339_v25, %v13026_v49  ;;  %v13182_v58 = vld [vmem:[%s15048_s2 + $0x40] sm:$0xff]  ;;  %v13188_v49 = vpop.xlane.xlu1 %1528 }
 0x3ff   :  { %8364 = vtanh.f32 %v13148_v63  ;;  %v8347_v41 = vpop.eup %8346  ;;  %v3260_v62 = vrot.slane %v15370_v44, %v12445_v0  ;;  %v5260_v11 = vadd.f32 %v5244_v35, %v13032_v42  ;;  %v5243_v38 = vmul.f32 %v8345_v8, %v13054_v26  ;;  %15371 = vst [vmem:[#allocation82_spill] sm:$0xff] %v13188_v49  ;;  %v13195_v42 = vld [vmem:[%s15049_s3 + $0x40] sm:$0xff] }
 0x400   :  { %v13186_v55 = vmul.f32 %v13182_v58, %v15302_v40  ;;  %v5052_v54 = vadd.f32 %v5036_v43, %v5004_v9  ;;  %v5308_v28 = vmul.f32 %v8343_v2, %v13046_v29  ;;  %8366 = vtanh.f32 %v13166_v52 }
 0x401   :  { %v8349_v25 = vpop.eup %8348  ;;  %v13199_v44 = vmul.f32 %v13195_v42, %v15304_v53  ;;  %v5276_v8 = vadd.f32 %v5260_v11, %v13046_v29  ;;  %v5259_v49 = vadd.f32 %v5243_v38, %v13054_v26  ;;  %v13205_v2 = vpop.xlane.xlu0 %1526  ;;  %v13208_v13 = vsel %vm2965_vm2, %v3001_v31, %v2997_v37  ;;  %v15374_v37 = vld [vmem:[#allocation84_spill] sm:$0xff] }
 0x402   :  { %v8351_v35 = vpop.eup %8350  ;;  %v5248_v9 = vmul.f32 %v8349_v25, %v13075_v6  ;;  %8368 = vtanh.f32 %v13186_v55  ;;  %15372 = vst [vmem:[#allocation83_spill] sm:$0xff] %v13205_v2  ;;  %15373 = vst [vmem:[#allocation133_spill] sm:$0xff] %v13208_v13  ;;  %v13212_v23 = vsel %vm1337_vm9, %v3256_v1, %v12630_v46  ;;  %5080 = vadd.xlane.f32.xlu0 %v5052_v54  ;;  %v13227_v54 = vpop.xlane.xlu1 %1797 }
 0x403   :  { %v8353_v43 = vpop.eup %8352  ;;  %v5307_v20 = vmul.f32 %v8347_v41, %v13064_v7  ;;  %8370 = vtanh.f32 %v13199_v44  ;;  %v5324_v29 = vadd.f32 %v5308_v28, %v5276_v8  ;;  %v5275_v26 = vadd.f32 %v5259_v49, %v13064_v7  ;;  %15375 = vst [vmem:[#allocation84_spill] sm:$0xff] %v13227_v54  ;;  %v15376_v8 = vld [vmem:[#allocation85_spill] sm:$0xff] }
 0x404   :  { %v8355_v38 = vpop.eup %8354  ;;  %v5264_v11 = vadd.f32 %v5248_v9, %v13075_v6  ;;  %v5247_v25 = vmul.f32 %v8353_v43, %v13097_v30  ;;  %v3265_v31 = vsel %vm3246_vm3, %v3264_v14, %v3260_v62  ;;  %v5312_v1 = vmul.f32 %v8351_v35, %v13078_v12 }
 0x405   :  { %v8357_v2 = vpop.eup %8356  ;;  %v13225_v41 = vmul.f32 %v13144_v50, %v15307_v32  ;;  %5347 = vadd.xlane.f32.xlu1 %v5324_v29  ;;  %v5323_v7 = vadd.f32 %v5307_v20, %v5275_v26  ;;  %v3278_v9 = vrot.slane %v15376_v8, %v12445_v0  ;;  %v5311_v35 = vmul.f32 %v8355_v38, %v13100_v19  ;;  %v13243_v26 = vpop.xlane.xlu0 %1795  ;;  %v15378_v38 = vld [vmem:[#allocation86_spill] sm:$0xff]  ;;  %v13413_v0 = vld [vmem:[%s15049_s3 + $0x60] sm:$0xff] }
 0x406   :  { %v8359_v28 = vpop.eup %8358  ;;  %v5280_v6 = vadd.f32 %v5264_v11, %v13078_v12  ;;  %v5263_v49 = vadd.f32 %v5247_v25, %v13097_v30  ;;  %v5250_v62 = vmul.f32 %v8357_v2, %v13109_v48  ;;  %v13237_v43 = vmul.f32 %v13162_v17, %v15310_v36  ;;  %15377 = vst [vmem:[#allocation85_spill] sm:$0xff] %v13243_v26 }
 0x407   :  { %v8361_v14 = vpop.eup %8360  ;;  %8372 = vtanh.f32 %v13225_v41  ;;  %5345 = vadd.xlane.f32.xlu0 %v5323_v7  ;;  %v4565_v25 = vrot.slane %v15378_v38, %v12096_v33  ;;  %v5314_v8 = vmul.f32 %v8359_v28, %v13112_v39  ;;  %v13251_v7 = vmul.f32 %v13182_v58, %v15307_v32  ;;  %v15380_v28 = vld [vmem:[#allocation89_spill] sm:$0xff] }
 0x408   :  { %v8363_v29 = vpop.eup %8362  ;;  %v5328_v20 = vadd.f32 %v5312_v1, %v5280_v6  ;;  %v5279_v12 = vadd.f32 %v5263_v49, %v13100_v19  ;;  %v5266_v30 = vadd.f32 %v5250_v62, %v13109_v48  ;;  %v5249_v2 = vmul.f32 %v8361_v14, %v13124_v10  ;;  %v15379_v62 = vld [vmem:[#allocation87_spill] sm:$0xff] }
 0x409   :  { %v8365_v11 = vpop.eup %8364  ;;  %8374 = vtanh.f32 %v13237_v43  ;;  %v4561_v14 = vrot.slane %v15379_v62, %v11993_v15  ;;  %v4574_v38 = vrot.slane %v15380_v28, %v12096_v33  ;;  %v13262_v46 = vmul.f32 %v13195_v42, %v15310_v36 }
 0x40a   :  { %5355 = vadd.xlane.f32.xlu1 %v5328_v20  ;;  %v5327_v19 = vadd.f32 %v5311_v35, %v5279_v12  ;;  %v5282_v48 = vadd.f32 %v5266_v30, %v13112_v39  ;;  %v5265_v1 = vadd.f32 %v5249_v2, %v13124_v10  ;;  %v5521_v6 = vmul.f32 %v8365_v11, %v13148_v63  ;;  %v8367_v49 = vpop.eup %8366  ;;  %v13265_v35 = vpop.xlane.xlu1 %1805  ;;  %v15382_v11 = vld [vmem:[#allocation90_spill] sm:$0xff] }
 0x40b   :  { %8376 = vtanh.f32 %v13251_v7  ;;  %15381 = vst [vmem:[#allocation86_spill] sm:$0xff] %v13265_v35  ;;  %v5313_v12 = vmul.f32 %v8363_v29, %v13127_v56  ;;  %v4570_v62 = vrot.slane %v15382_v11, %v11993_v15  ;;  %v13276_v35 = vmul.f32 %v13144_v50, %v15318_v18  ;;  %v13284_v29 = vpop.xlane.xlu0 %1803 }
 0x40c   :  { %v8369_v39 = vpop.eup %8368  ;;  %5353 = vadd.xlane.f32.xlu0 %v5327_v19  ;;  %v5330_v10 = vadd.f32 %v5314_v8, %v5282_v48  ;;  %v5281_v20 = vadd.f32 %v5265_v1, %v13127_v56  ;;  %v5537_v30 = vadd.f32 %v5521_v6, %v13148_v63  ;;  %8378 = vtanh.f32 %v13262_v46  ;;  %15383 = vst [vmem:[#allocation87_spill] sm:$0xff] %v13284_v29 }
 0x40d   :  { %v8371_v2 = vpop.eup %8370  ;;  %v5520_v28 = vmul.f32 %v8369_v39, %v13186_v55  ;;  %v5585_v56 = vmul.f32 %v8367_v49, %v13166_v52  ;;  %v13282_v63 = vmul.f32 %v13162_v17, %v15322_v51  ;;  %v13288_v48 = vsel %vm1339_vm10, %v3265_v31, %v13212_v23 }
 0x40e   :  { %5359 = vadd.xlane.f32.xlu1 %v5330_v10  ;;  %v5329_v8 = vadd.f32 %v5313_v12, %v5281_v20  ;;  %v5553_v19 = vadd.f32 %v5537_v30, %v13166_v52  ;;  %15384 = vst [vmem:[#allocation89_spill] sm:$0xff] %v13288_v48  ;;  %8380 = vtanh.f32 %v13276_v35  ;;  %v13294_v6 = vmul.f32 %v13182_v58, %v15318_v18  ;;  %v13306_v20 = vpop.xlane.xlu1 %1809  ;;  %v13327_v30 = vld [vmem:[%s15049_s3 + $0x58] sm:$0xff] }
 0x40f   :  { %v5536_v1 = vadd.f32 %v5520_v28, %v13186_v55  ;;  %v4566_v52 = vsel %vm1272_vm4, %v4565_v25, %v4561_v14  ;;  %8382 = vtanh.f32 %v13282_v63  ;;  %v13300_v39 = vmul.f32 %v13195_v42, %v15322_v51  ;;  %15385 = vst [vmem:[#allocation90_spill] sm:$0xff] %v13306_v20 }
 0x410   :  { %5357 = vadd.xlane.f32.xlu0 %v5329_v8  ;;  %v5601_v49 = vadd.f32 %v5585_v56, %v5553_v19  ;;  %v4575_v31 = vsel %vm1272_vm4, %v4574_v38, %v4570_v62  ;;  %v5584_v10 = vmul.f32 %v8371_v2, %v13199_v44  ;;  %8384 = vtanh.f32 %v13294_v6  ;;  %v13318_v38 = vld [vmem:[%s15048_s2 + $0x58] sm:$0xff]  ;;  %v13339_v62 = vld [vmem:[%s15048_s2 + $0x50] sm:$0xff] }
 0x411   :  { %v8373_v23 = vpop.eup %8372  ;;  %v5552_v55 = vadd.f32 %v5536_v1, %v13199_v44  ;;  %v15386_v25 = vrot.slane %v15374_v37, %v12355_v5  ;;  %v13322_v44 = vmul.f32 %v13318_v38, %v15302_v40  ;;  %v13331_v37 = vmul.f32 %v13327_v30, %v15304_v53  ;;  %v13359_v1 = vpop.xlane.xlu0 %1807 }
 0x412   :  { %5624 = vadd.xlane.f32.xlu1 %v5601_v49  ;;  %v5525_v12 = vmul.f32 %v8373_v23, %v13225_v41  ;;  %v4621_v2 = vsel %vm1337_vm9, %v4566_v52, %v12658_v57  ;;  %8386 = vtanh.f32 %v13300_v39  ;;  %v13343_v28 = vmul.f32 %v13339_v62, %v15302_v40  ;;  %v13353_v57 = vld [vmem:[%s15049_s3 + $0x50] sm:$0xff]  ;;  %15389 = vst [vmem:[#allocation136_spill] sm:$0xff] %v13359_v1  ;;  %v15390_v49 = vld [vmem:[#allocation95_spill] sm:$0xff] }
 0x413   :  { %v13312_v14 = vsel %vm3246_vm3, %v15386_v25, %v3278_v9  ;;  %v8375_v9 = vpop.eup %8374  ;;  %v5600_v11 = vadd.f32 %v5584_v10, %v5552_v55  ;;  %v13346_v8 = vsel %vm1339_vm10, %v4575_v31, %v4621_v2  ;;  %8388 = vtanh.f32 %v13322_v44  ;;  %v15391_v31 = vld [vmem:[#allocation97_spill] sm:$0xff]  ;;  %v13395_v1 = vld [vmem:[%s15048_s2 + $0x60] sm:$0xff] }
 0x414   :  { %15387 = vst [vmem:[#allocation134_spill] sm:$0xff] %v13312_v14  ;;  %15388 = vst [vmem:[#allocation135_spill] sm:$0xff] %v13346_v8  ;;  %v5541_v19 = vadd.f32 %v5525_v12, %v13225_v41  ;;  %v13357_v56 = vmul.f32 %v13353_v57, %v15304_v53  ;;  %v4843_v23 = vrot.slane %v15390_v49, %v12005_v45  ;;  %8390 = vtanh.f32 %v13331_v37  ;;  %v13373_v12 = vld [vmem:[%s15048_s2 + $0x68] sm:$0xff] }
 0x415   :  { %v8377_v52 = vpop.eup %8376  ;;  %v4839_v41 = vrot.slane %v15391_v31, %v12133_v22  ;;  %5622 = vadd.xlane.f32.xlu0 %v5600_v11  ;;  %v5589_v55 = vmul.f32 %v8375_v9, %v13237_v43  ;;  %8392 = vtanh.f32 %v13343_v28  ;;  %v13377_v2 = vmul.f32 %v13373_v12, %v15302_v40  ;;  %v15392_v9 = vld [vmem:[#allocation99_spill] sm:$0xff]  ;;  %v15393_v31 = vld [vmem:[#allocation100_spill] sm:$0xff]  ;;  %v13401_v20 = vpop.xlane.xlu1 %2078 }
 0x416   :  { %v5557_v10 = vadd.f32 %v5541_v19, %v13237_v43  ;;  %v5524_v25 = vmul.f32 %v8377_v52, %v13251_v7  ;;  %v8379_v11 = vpop.eup %8378  ;;  %v4852_v49 = vrot.slane %v15392_v9, %v12005_v45  ;;  %v4848_v43 = vrot.slane %v15393_v31, %v12133_v22  ;;  %v13386_v19 = vld [vmem:[%s15049_s3 + $0x68] sm:$0xff]  ;;  %15394 = vst [vmem:[#allocation95_spill] sm:$0xff] %v13401_v20  ;;  %v15395_v31 = vld [vmem:[#allocation91_spill] sm:$0xff] }
 0x417   :  { %v13390_v52 = vmul.f32 %v13386_v19, %v15304_v53  ;;  %v13399_v9 = vmul.f32 %v13395_v1, %v15302_v40  ;;  %v4592_v29 = vrot.slane %v15395_v31, %v12096_v33  ;;  %8394 = vtanh.f32 %v13357_v56 }
 0x418   :  { %v5605_v26 = vadd.f32 %v5589_v55, %v5557_v10  ;;  %v5540_v54 = vadd.f32 %v5524_v25, %v13251_v7  ;;  %v8381_v8 = vpop.eup %8380  ;;  %v4844_v14 = vsel %vm1560_vm5, %v4843_v23, %v4839_v41  ;;  %v5588_v48 = vmul.f32 %v8379_v11, %v13262_v46  ;;  %v13419_v55 = vpop.xlane.xlu0 %2076  ;;  %v15397_v11 = vld [vmem:[#allocation93_spill] sm:$0xff] }
 0x419   :  { %8396 = vtanh.f32 %v13377_v2  ;;  %v13417_v31 = vmul.f32 %v13413_v0, %v15304_v53  ;;  %15396 = vst [vmem:[#allocation97_spill] sm:$0xff] %v13419_v55  ;;  %v8383_v7 = vpop.eup %8382  ;;  %v5527_v23 = vmul.f32 %v8381_v8, %v13276_v35  ;;  %v13426_v41 = vmul.f32 %v13318_v38, %v15307_v32 }
 0x41a   :  { %5632 = vadd.xlane.f32.xlu1 %v5605_v26  ;;  %v5556_v10 = vadd.f32 %v5540_v54, %v13262_v46  ;;  %8398 = vtanh.f32 %v13390_v52  ;;  %v8385_v25 = vpop.eup %8384  ;;  %v4588_v20 = vrot.slane %v15397_v11, %v11993_v15  ;;  %v4853_v33 = vsel %vm1560_vm5, %v4852_v49, %v4848_v43  ;;  %v13436_v46 = vpop.xlane.xlu1 %2086 }
 0x41b   :  { %8400 = vtanh.f32 %v13399_v9  ;;  %v13434_v26 = vmul.f32 %v13327_v30, %v15310_v36  ;;  %15398 = vst [vmem:[#allocation99_spill] sm:$0xff] %v13436_v46  ;;  %v5543_v8 = vadd.f32 %v5527_v23, %v13276_v35  ;;  %v5526_v55 = vmul.f32 %v8385_v25, %v13294_v6 }
 0x41c   :  { %v5604_v54 = vadd.f32 %v5588_v48, %v5556_v10  ;;  %8402 = vtanh.f32 %v13417_v31  ;;  %v8387_v5 = vpop.eup %8386  ;;  %v4899_v11 = vsel %vm1337_vm9, %v4844_v14, %v12714_v60  ;;  %v5591_v49 = vmul.f32 %v8383_v7, %v13282_v63  ;;  %v13449_v46 = vpop.xlane.xlu0 %2084 }
 0x41d   :  { %8404 = vtanh.f32 %v13426_v41  ;;  %v13447_v43 = vmul.f32 %v13339_v62, %v15307_v32  ;;  %15399 = vst [vmem:[#allocation100_spill] sm:$0xff] %v13449_v46  ;;  %v8389_v48 = vpop.eup %8388  ;;  %v5559_v35 = vadd.f32 %v5543_v8, %v13282_v63  ;;  %v5542_v10 = vadd.f32 %v5526_v55, %v13294_v6 }
 0x41e   :  { %5630 = vadd.xlane.f32.xlu0 %v5604_v54  ;;  %8406 = vtanh.f32 %v13434_v26  ;;  %v13456_v60 = vmul.f32 %v13353_v57, %v15310_v36  ;;  %v8391_v14 = vpop.eup %8390  ;;  %v13459_v7 = vsel %vm1272_vm4, %v4592_v29, %v4588_v20  ;;  %v13462_v23 = vsel %vm1339_vm10, %v4853_v33, %v4899_v11  ;;  %v13466_v63 = vpop.xlane.xlu1 %2090  ;;  %v15403_v29 = vld [vmem:[#allocation105_spill] sm:$0xff] }
 0x41f   :  { %15400 = vst [vmem:[#allocation91_spill] sm:$0xff] %v13459_v7  ;;  %15401 = vst [vmem:[#allocation93_spill] sm:$0xff] %v13462_v23  ;;  %v5798_v25 = vmul.f32 %v8389_v48, %v13322_v44  ;;  %8408 = vtanh.f32 %v13447_v43  ;;  %v8393_v6 = vpop.eup %8392  ;;  %v5607_v55 = vadd.f32 %v5591_v49, %v5559_v35  ;;  %v5558_v54 = vadd.f32 %v5542_v10, %v13300_v39  ;;  %v13478_v48 = vld [vmem:[%s15048_s2 + $0x78] sm:$0xff]  ;;  %v15410_v7 = vld [vmem:[#allocation103_spill] sm:$0xff] }
 0x420   :  { %15402 = vst [vmem:[#allocation137_spill] sm:$0xff] %v13466_v63  ;;  %v5590_v8 = vmul.f32 %v8387_v5, %v13300_v39  ;;  %8410 = vtanh.f32 %v13456_v60  ;;  %v5120_v20 = vrot.slane %v15403_v29, %v12069_v27  ;;  %v5797_v11 = vmul.f32 %v8393_v6, %v13343_v28  ;;  %v13484_v35 = vpop.xlane.xlu0 %2088  ;;  %v15405_v39 = vld [vmem:[#allocation106_spill] sm:$0xff] }
 0x421   :  { %v5814_v33 = vadd.f32 %v5798_v25, %v13322_v44  ;;  %v13482_v49 = vmul.f32 %v13478_v48, %v15302_v40  ;;  %15404 = vst [vmem:[#allocation105_spill] sm:$0xff] %v13484_v35  ;;  %v8395_v5 = vpop.eup %8394  ;;  %v5116_v10 = vrot.slane %v15405_v39, %v15316_v16  ;;  %5636 = vadd.xlane.f32.xlu1 %v5607_v55  ;;  %v13492_v25 = vld [vmem:[%s15049_s3 + $0x78] sm:$0xff] }
 0x422   :  { %v5606_v29 = vadd.f32 %v5590_v8, %v5558_v54  ;;  %v5862_v44 = vmul.f32 %v8391_v14, %v13331_v37  ;;  %v13496_v6 = vmul.f32 %v13492_v25, %v15304_v53  ;;  %v5813_v46 = vadd.f32 %v5797_v11, %v13343_v28  ;;  %v13504_v14 = vld [vmem:[%s15048_s2 + $0x70] sm:$0xff]  ;;  %v15407_v8 = vld [vmem:[#allocation102_spill] sm:$0xff] }
 0x423   :  { %v8397_v63 = vpop.eup %8396  ;;  %v5830_v35 = vadd.f32 %v5814_v33, %v13331_v37  ;;  %8412 = vtanh.f32 %v13482_v49  ;;  %15406 = vst [vmem:[#allocation106_spill] sm:$0xff] %v13504_v14  ;;  %v13508_v55 = vmul.f32 %v13504_v14, %v15302_v40  ;;  %v13517_v28 = vld [vmem:[%s15049_s3 + $0x70] sm:$0xff]  ;;  %v13523_v40 = vpop.xlane.xlu1 %2359  ;;  %v13609_v3 = vmul.f32 %v13413_v0, %v15310_v36 }
 0x424   :  { %v8399_v54 = vpop.eup %8398  ;;  %5634 = vadd.xlane.f32.xlu0 %v5606_v29  ;;  %v6075_v37 = vmul.f32 %v8397_v63, %v13377_v2  ;;  %8414 = vtanh.f32 %v13496_v6  ;;  %15408 = vst [vmem:[#allocation102_spill] sm:$0xff] %v13517_v28  ;;  %v13521_v33 = vmul.f32 %v13517_v28, %v15304_v53  ;;  %15409 = vst [vmem:[#allocation138_spill] sm:$0xff] %v13523_v40 }
 0x425   :  { %v8401_v11 = vpop.eup %8400  ;;  %v5878_v23 = vadd.f32 %v5862_v44, %v5830_v35  ;;  %v5829_v39 = vadd.f32 %v5813_v46, %v13357_v56  ;;  %v5861_v29 = vmul.f32 %v8395_v5, %v13357_v56  ;;  %8416 = vtanh.f32 %v13508_v55  ;;  %v13539_v5 = vpop.xlane.xlu0 %2357 }
 0x426   :  { %v8403_v63 = vpop.eup %8402  ;;  %v6091_v13 = vadd.f32 %v6075_v37, %v13377_v2  ;;  %v6074_v61 = vmul.f32 %v8401_v11, %v13399_v9  ;;  %8418 = vtanh.f32 %v13521_v33  ;;  %v5121_v40 = vsel %vm1841_vm6, %v5120_v20, %v5116_v10  ;;  %15411 = vst [vmem:[#allocation103_spill] sm:$0xff] %v13539_v5  ;;  %v15412_v10 = vld [vmem:[#allocation108_spill] sm:$0xff] }
 0x427   :  { %v8405_v53 = vpop.eup %8404  ;;  %5901 = vadd.xlane.f32.xlu1 %v5878_v23  ;;  %v5877_v35 = vadd.f32 %v5861_v29, %v5829_v39  ;;  %v6139_v46 = vmul.f32 %v8399_v54, %v13390_v52  ;;  %v13537_v56 = vmul.f32 %v13318_v38, %v15318_v18  ;;  %v13546_v20 = vmul.f32 %v13327_v30, %v15322_v51  ;;  %v13559_v15 = vpop.xlane.xlu1 %2367 }
 0x428   :  { %v8407_v44 = vpop.eup %8406  ;;  %v6107_v2 = vadd.f32 %v6091_v13, %v13390_v52  ;;  %v6090_v37 = vadd.f32 %v6074_v61, %v13399_v9  ;;  %v5802_v11 = vmul.f32 %v8405_v53, %v13426_v41  ;;  %v5129_v54 = vrot.slane %v15412_v10, %v12069_v27  ;;  %15413 = vst [vmem:[#allocation108_spill] sm:$0xff] %v13559_v15  ;;  %v15422_v15 = vld [vmem:[#allocation115_spill] sm:$0xff] }
 0x429   :  { %v8409_v23 = vpop.eup %8408  ;;  %5899 = vadd.xlane.f32.xlu0 %v5877_v35  ;;  %v6138_v39 = vmul.f32 %v8403_v63, %v13417_v31  ;;  %8420 = vtanh.f32 %v13537_v56  ;;  %v13554_v13 = vmul.f32 %v13339_v62, %v15318_v18  ;;  %v15414_v35 = vld [vmem:[#allocation109_spill] sm:$0xff]  ;;  %v5866_v63 = vmul.f32 %v8407_v44, %v13434_v26 }
 0x42a   :  { %v8411_v61 = vpop.eup %8410  ;;  %v6155_v52 = vadd.f32 %v6139_v46, %v6107_v2  ;;  %v6106_v9 = vadd.f32 %v6090_v37, %v13417_v31  ;;  %v5818_v29 = vadd.f32 %v5802_v11, %v13426_v41  ;;  %v5801_v53 = vmul.f32 %v8409_v23, %v13447_v43  ;;  %v13580_v23 = vpop.xlane.xlu0 %2365 }
 0x42b   :  { %v5125_v10 = vrot.slane %v15414_v35, %v15316_v16  ;;  %8422 = vtanh.f32 %v13546_v20  ;;  %v13567_v5 = vmul.f32 %v13353_v57, %v15322_v51  ;;  %v5176_v37 = vsel %vm1337_vm9, %v5121_v40, %v12755_v4  ;;  %15415 = vst [vmem:[#allocation109_spill] sm:$0xff] %v13580_v23  ;;  %v15421_v23 = vld [vmem:[#allocation107_spill] sm:$0xff] }
 0x42c   :  { %6178 = vadd.xlane.f32.xlu1 %v6155_v52  ;;  %v6154_v46 = vadd.f32 %v6138_v39, %v6106_v9  ;;  %v5834_v31 = vadd.f32 %v5818_v29, %v13434_v26  ;;  %v5817_v41 = vadd.f32 %v5801_v53, %v13447_v43  ;;  %8424 = vtanh.f32 %v13554_v13  ;;  %v15416_v9 = vld [vmem:[#allocation110_spill] sm:$0xff] }
 0x42d   :  { %v8413_v2 = vpop.eup %8412  ;;  %v5865_v44 = vmul.f32 %v8411_v61, %v13456_v60  ;;  %8426 = vtanh.f32 %v13567_v5  ;;  %v13578_v11 = vmul.f32 %v13373_v12, %v15307_v32  ;;  %v13586_v4 = vmul.f32 %v13386_v19, %v15310_v36 }
 0x42e   :  { %v8415_v39 = vpop.eup %8414  ;;  %6176 = vadd.xlane.f32.xlu0 %v6154_v46  ;;  %v5882_v26 = vadd.f32 %v5866_v63, %v5834_v31  ;;  %v5833_v43 = vadd.f32 %v5817_v41, %v13456_v60  ;;  %v6352_v52 = vmul.f32 %v8413_v2, %v13482_v49  ;;  %v5130_v61 = vsel %vm1841_vm6, %v5129_v54, %v5125_v10  ;;  %v15417_v60 = vld [vmem:[#allocation111_spill] sm:$0xff]  ;;  %v13600_v54 = vpop.xlane.xlu1 %2371  ;;  %v15419_v10 = vld [vmem:[#allocation96_spill] sm:$0xff]  ;;  %v15420_v2 = vld [vmem:[#allocation113_spill] sm:$0xff] }
 0x42f   :  { %v8417_v40 = vpop.eup %8416  ;;  %v5147_v29 = vrot.slane %v15416_v9, %v12069_v27  ;;  %8428 = vtanh.f32 %v13578_v11  ;;  %v13594_v53 = vmul.f32 %v13395_v1, %v15307_v32  ;;  %v5143_v63 = vrot.slane %v15417_v60, %v15316_v16  ;;  %15418 = vst [vmem:[#allocation110_spill] sm:$0xff] %v13600_v54 }
 0x430   :  { %v8419_v35 = vpop.eup %8418  ;;  %5909 = vadd.xlane.f32.xlu1 %v5882_v26  ;;  %v5881_v46 = vadd.f32 %v5865_v44, %v5833_v43  ;;  %v6368_v31 = vadd.f32 %v6352_v52, %v13482_v49  ;;  %v6351_v41 = vmul.f32 %v8417_v40, %v13508_v55  ;;  %v5397_v9 = vrot.slane %v15420_v2, %v15419_v10 }
 0x431   :  { %v5393_v27 = vrot.slane %v15422_v15, %v15421_v23  ;;  %8430 = vtanh.f32 %v13586_v4  ;;  %v6416_v49 = vmul.f32 %v8415_v39, %v13496_v6  ;;  %v6415_v52 = vmul.f32 %v8419_v35, %v13521_v33 }
 0x432   :  { %5907 = vadd.xlane.f32.xlu0 %v5881_v46  ;;  %v6384_v44 = vadd.f32 %v6368_v31, %v13496_v6  ;;  %v6367_v26 = vadd.f32 %v6351_v41, %v13508_v55  ;;  %8432 = vtanh.f32 %v13594_v53  ;;  %v13618_v15 = vmul.f32 %v13373_v12, %v15318_v18  ;;  %v13628_v6 = vpop.xlane.xlu0 %2369 }
 0x433   :  { %v8421_v43 = vpop.eup %8420  ;;  %v13622_v40 = vmul.f32 %v13386_v19, %v15322_v51  ;;  %v13626_v60 = vmul.f32 %v13395_v1, %v15318_v18  ;;  %15423 = vst [vmem:[#allocation111_spill] sm:$0xff] %v13628_v6  ;;  %8434 = vtanh.f32 %v13609_v3  ;;  %v15424_v31 = vrot.slane %v15410_v7, %v12133_v22 }
 0x434   :  { %v6432_v55 = vadd.f32 %v6416_v49, %v6384_v44  ;;  %v6383_v39 = vadd.f32 %v6367_v26, %v13521_v33  ;;  %v5804_v46 = vmul.f32 %v8421_v43, %v13537_v56  ;;  %v15425_v41 = vrot.slane %v15407_v8, %v12005_v45  ;;  %v13655_v26 = vpop.xlane.xlu1 %2640  ;;  %v15429_v43 = vld [vmem:[#allocation116_spill] sm:$0xff] }
 0x435   :  { %v8423_v35 = vpop.eup %8422  ;;  %v13643_v54 = vsel %vm1339_vm10, %v5130_v61, %v5176_v37  ;;  %8436 = vtanh.f32 %v13618_v15  ;;  %v13648_v33 = vmul.f32 %v13413_v0, %v15322_v51  ;;  %v13651_v49 = vsel %vm1841_vm6, %v5147_v29, %v5143_v63  ;;  %v15430_v29 = vld [vmem:[#allocation117_spill] sm:$0xff] }
 0x436   :  { %v13640_v2 = vsel %vm1560_vm5, %v15425_v41, %v15424_v31  ;;  %15427 = vst [vmem:[#allocation115_spill] sm:$0xff] %v13643_v54  ;;  %v8425_v44 = vpop.eup %8424  ;;  %15428 = vst [vmem:[#allocation139_spill] sm:$0xff] %v13651_v49  ;;  %6455 = vadd.xlane.f32.xlu1 %v6432_v55  ;;  %v6431_v7 = vadd.f32 %v6415_v52, %v6383_v39  ;;  %v5820_v8 = vadd.f32 %v5804_v46, %v13537_v56 }
 0x437   :  { %15426 = vst [vmem:[#allocation113_spill] sm:$0xff] %v13640_v2  ;;  %8438 = vtanh.f32 %v13622_v40  ;;  %v8427_v37 = vpop.eup %8426  ;;  %v5398_v61 = vsel %vm2122_vm7, %v5397_v9, %v5393_v27  ;;  %v5406_v31 = vrot.slane %v15429_v43, %v15419_v10  ;;  %v5803_v41 = vmul.f32 %v8425_v44, %v13554_v13  ;;  %v13670_v27 = vpop.xlane.xlu0 %2638 }
 0x438   :  { %8440 = vtanh.f32 %v13626_v60  ;;  %v5402_v63 = vrot.slane %v15430_v29, %v15421_v23  ;;  %6453 = vadd.xlane.f32.xlu0 %v6431_v7  ;;  %v5836_v56 = vadd.f32 %v5820_v8, %v13546_v20  ;;  %v5868_v52 = vmul.f32 %v8423_v35, %v13546_v20  ;;  %v15431_v20 = vld [vmem:[#allocation30_spill] sm:$0xff] }
 0x439   :  { %v13668_v55 = vmul.f32 %v13478_v48, %v15307_v32  ;;  %v8429_v9 = vpop.eup %8428  ;;  %v5819_v39 = vadd.f32 %v5803_v41, %v13554_v13  ;;  %8442 = vtanh.f32 %v13648_v33  ;;  %v13676_v46 = vmul.f32 %v13492_v25, %v15310_v36  ;;  %v13688_v13 = vpop.xlane.xlu1 %2648 }
 0x43a   :  { %v13680_v44 = vmul.f32 %v13504_v14, %v15307_v32  ;;  %v13684_v35 = vsel %vm1337_vm9, %v5398_v61, %v15431_v20  ;;  %v5884_v7 = vadd.f32 %v5868_v52, %v5836_v56  ;;  %v6079_v8 = vmul.f32 %v8429_v9, %v13578_v11  ;;  %v15432_v52 = vld [vmem:[#allocation101_spill] sm:$0xff]  ;;  %v15433_v9 = vld [vmem:[#allocation122_spill] sm:$0xff] }
 0x43b   :  { %8444 = vtanh.f32 %v13668_v55  ;;  %v8431_v43 = vpop.eup %8430  ;;  %v5835_v41 = vadd.f32 %v5819_v39, %v13567_v5  ;;  %v5867_v29 = vmul.f32 %v8427_v37, %v13567_v5  ;;  %v13695_v32 = vmul.f32 %v13517_v28, %v15310_v36  ;;  %v13704_v39 = vpop.xlane.xlu0 %2646  ;;  %v15434_v5 = vld [vmem:[#allocation112_spill] sm:$0xff]  ;;  %v15435_v37 = vld [vmem:[#allocation123_spill] sm:$0xff] }
 0x43c   :  { %8446 = vtanh.f32 %v13676_v46  ;;  %v8433_v61 = vpop.eup %8432  ;;  %v13698_v56 = vsel %vm2122_vm7, %v5406_v31, %v5402_v63  ;;  %v5674_v20 = vrot.slane %v15433_v9, %v15432_v52  ;;  %5913 = vadd.xlane.f32.xlu1 %v5884_v7  ;;  %v6095_v6 = vadd.f32 %v6079_v8, %v13578_v11 }
 0x43d   :  { %8448 = vtanh.f32 %v13680_v44  ;;  %v5670_v49 = vrot.slane %v15435_v37, %v15434_v5  ;;  %v5883_v54 = vadd.f32 %v5867_v29, %v5835_v41  ;;  %v6078_v36 = vmul.f32 %v8433_v61, %v13594_v53  ;;  %v8435_v63 = vpop.eup %8434  ;;  %v13720_v8 = vpop.xlane.xlu1 %2652  ;;  %v15436_v29 = vld [vmem:[#allocation119_spill] sm:$0xff] }
 0x43e   :  { %v13711_v31 = vmul.f32 %v13478_v48, %v15318_v18  ;;  %v6111_v9 = vadd.f32 %v6095_v6, %v13586_v4  ;;  %v6143_v7 = vmul.f32 %v8431_v43, %v13586_v4  ;;  %8450 = vtanh.f32 %v13695_v32 }
 0x43f   :  { %v13718_v11 = vmul.f32 %v13492_v25, %v15322_v51  ;;  %v8437_v41 = vpop.eup %8436  ;;  %v5424_v61 = vrot.slane %v15436_v29, %v15419_v10  ;;  %5911 = vadd.xlane.f32.xlu0 %v5883_v54  ;;  %v6094_v37 = vadd.f32 %v6078_v36, %v13594_v53  ;;  %v13728_v4 = vmul.f32 %v13504_v14, %v15318_v18  ;;  %v13736_v29 = vpop.xlane.xlu0 %2650  ;;  %v15437_v53 = vld [vmem:[#allocation120_spill] sm:$0xff] }
 0x440   :  { %8452 = vtanh.f32 %v13711_v31  ;;  %v6159_v43 = vadd.f32 %v6143_v7, %v6111_v9  ;;  %v6081_v16 = vmul.f32 %v8437_v41, %v13618_v15  ;;  %v13734_v2 = vmul.f32 %v13517_v28, %v15322_v51  ;;  %v15438_v7 = vld [vmem:[#allocation124_spill] sm:$0xff] }
 0x441   :  { %v8439_v6 = vpop.eup %8438  ;;  %8454 = vtanh.f32 %v13718_v11  ;;  %v5420_v36 = vrot.slane %v15437_v53, %v15421_v23  ;;  %v6110_v10 = vadd.f32 %v6094_v37, %v13609_v3  ;;  %v6142_v18 = vmul.f32 %v8435_v63, %v13609_v3  ;;  %v13752_v3 = vld [vmem:[%s15048_s2 + $0x8] sm:$0xff] }
 0x442   :  { %v8441_v54 = vpop.eup %8440  ;;  %8456 = vtanh.f32 %v13728_v4  ;;  %v5675_v9 = vsel %vm2403_vm8, %v5674_v20, %v5670_v49  ;;  %v5683_v41 = vrot.slane %v15438_v7, %v15432_v52  ;;  %6186 = vadd.xlane.f32.xlu1 %v6159_v43  ;;  %v6097_v51 = vadd.f32 %v6081_v16, %v13618_v15  ;;  %15439 = vst [vmem:[#allocation116_spill] sm:$0xff] %v13752_v3  ;;  %v15440_v63 = vld [vmem:[#allocation12_spill] sm:$0xff]  ;;  %v15442_v16 = vld [vmem:[#allocation19_spill] sm:$0xff] }
 0x443   :  { %v6080_v22 = vmul.f32 %v8441_v54, %v13626_v60  ;;  %v8443_v45 = vpop.eup %8442  ;;  %v6158_v28 = vadd.f32 %v6142_v18, %v6110_v10  ;;  %8458 = vtanh.f32 %v13734_v2  ;;  %v13756_v49 = vmul.f32 %v13752_v3, %v15440_v63  ;;  %v13761_v20 = vld [vmem:[%s15049_s3 + $0x8] sm:$0xff]  ;;  %v13767_v10 = vpop.xlane.xlu1 %2921  ;;  %v13775_v18 = vld [vmem:[%s15048_s2] sm:$0xff] }
 0x444   :  { %15441 = vst [vmem:[#allocation117_spill] sm:$0xff] %v13761_v20  ;;  %v13765_v15 = vmul.f32 %v13761_v20, %v15442_v16  ;;  %v6113_v43 = vadd.f32 %v6097_v51, %v13622_v40  ;;  %v6145_v54 = vmul.f32 %v8439_v6, %v13622_v40  ;;  %15443 = vst [vmem:[#allocation30_spill] sm:$0xff] %v13775_v18  ;;  %v15444_v20 = vld [vmem:[#allocation125_spill] sm:$0xff]  ;;  %v13914_v52 = vld [vmem:[%s15049_s3 + $0x20] sm:$0xff] }
 0x445   :  { %v8445_v37 = vpop.eup %8444  ;;  %v6096_v53 = vadd.f32 %v6080_v22, %v13626_v60  ;;  %v13779_v7 = vmul.f32 %v13775_v18, %v15440_v63  ;;  %v5679_v3 = vrot.slane %v15444_v20, %v15434_v5  ;;  %6184 = vadd.xlane.f32.xlu0 %v6158_v28  ;;  %8460 = vtanh.f32 %v13756_v49  ;;  %v13788_v22 = vld [vmem:[%s15049_s3] sm:$0xff]  ;;  %v13797_v28 = vpop.xlane.xlu0 %2919  ;;  %15455 = vst [vmem:[#allocation125_spill] sm:$0xff] %v13914_v52 }
 0x446   :  { %v8447_v23 = vpop.eup %8446  ;;  %v6356_v51 = vmul.f32 %v8445_v37, %v13668_v55  ;;  %15445 = vst [vmem:[#allocation122_spill] sm:$0xff] %v13788_v22  ;;  %v13792_v40 = vmul.f32 %v13788_v22, %v15442_v16  ;;  %v6161_v6 = vadd.f32 %v6145_v54, %v6113_v43  ;;  %v6144_v20 = vmul.f32 %v8443_v45, %v13648_v33  ;;  %v15448_v45 = vld [vmem:[#allocation8_spill] sm:$0xff] }
 0x447   :  { %v8449_v60 = vpop.eup %8448  ;;  %v6112_v18 = vadd.f32 %v6096_v53, %v13648_v33  ;;  %8462 = vtanh.f32 %v13765_v15  ;;  %v13802_v37 = vsel %vm1339_vm10, %v13698_v56, %v13684_v35  ;;  %v13808_v54 = vsel %vm2122_vm7, %v5424_v61, %v5420_v36  ;;  %v13821_v61 = vld [vmem:[%s15048_s2 + $0x18] sm:$0xff] }
 0x448   :  { %15446 = vst [vmem:[#allocation123_spill] sm:$0xff] %v13802_v37  ;;  %v6372_v14 = vadd.f32 %v6356_v51, %v13668_v55  ;;  %v6355_v22 = vmul.f32 %v8449_v60, %v13680_v44  ;;  %8464 = vtanh.f32 %v13779_v7  ;;  %v8451_v43 = vpop.eup %8450  ;;  %15447 = vst [vmem:[#allocation119_spill] sm:$0xff] %v13808_v54  ;;  %v13812_v33 = vsel %vm1337_vm9, %v5675_v9, %v15448_v45  ;;  %v13827_v9 = vpop.xlane.xlu1 %2929  ;;  %v13856_v45 = vld [vmem:[%s15049_s3 + $0x10] sm:$0xff] }
 0x449   :  { %15449 = vst [vmem:[#allocation120_spill] sm:$0xff] %v13812_v33  ;;  %6190 = vadd.xlane.f32.xlu1 %v6161_v6  ;;  %v6160_v53 = vadd.f32 %v6144_v20, %v6112_v18  ;;  %8466 = vtanh.f32 %v13792_v40  ;;  %v6420_v55 = vmul.f32 %v8447_v23, %v13676_v46  ;;  %v13825_v36 = vmul.f32 %v13821_v61, %v15440_v63  ;;  %v13836_v23 = vld [vmem:[%s15049_s3 + $0x18] sm:$0xff] }
 0x44a   :  { %v8453_v35 = vpop.eup %8452  ;;  %v6388_v56 = vadd.f32 %v6372_v14, %v13676_v46  ;;  %v6371_v51 = vadd.f32 %v6355_v22, %v13680_v44  ;;  %v13830_v60 = vsel %vm2403_vm8, %v5683_v41, %v5679_v3  ;;  %v13840_v46 = vmul.f32 %v13836_v23, %v15442_v16  ;;  %v13845_v44 = vld [vmem:[%s15048_s2 + $0x10] sm:$0xff] }
 0x44b   :  { %v8455_v18 = vpop.eup %8454  ;;  %15450 = vst [vmem:[#allocation124_spill] sm:$0xff] %v13830_v60  ;;  %6188 = vadd.xlane.f32.xlu0 %v6160_v53  ;;  %v6358_v14 = vmul.f32 %v8453_v35, %v13711_v31  ;;  %v13849_v41 = vmul.f32 %v13845_v44, %v15440_v63  ;;  %v6419_v20 = vmul.f32 %v8451_v43, %v13695_v32  ;;  %8468 = vtanh.f32 %v13825_v36 }
 0x44c   :  { %v8457_v3 = vpop.eup %8456  ;;  %v6436_v22 = vadd.f32 %v6420_v55, %v6388_v56  ;;  %v6387_v6 = vadd.f32 %v6371_v51, %v13695_v32  ;;  %v13860_v53 = vmul.f32 %v13856_v45, %v15442_v16  ;;  %v13867_v55 = vpop.xlane.xlu0 %2927  ;;  %8470 = vtanh.f32 %v13840_v46 }
 0x44d   :  { %v6374_v33 = vadd.f32 %v6358_v14, %v13711_v31  ;;  %v6357_v56 = vmul.f32 %v8457_v3, %v13728_v4  ;;  %v8459_v32 = vpop.eup %8458  ;;  %v6422_v60 = vmul.f32 %v8455_v18, %v13718_v11  ;;  %8472 = vtanh.f32 %v13849_v41  ;;  %v13880_v3 = vld [vmem:[%s15048_s2 + $0x28] sm:$0xff]  ;;  %v13904_v18 = vpop.xlane.xlu1 %2933 }
 0x44e   :  { %6463 = vadd.xlane.f32.xlu1 %v6436_v22  ;;  %v6435_v54 = vadd.f32 %v6419_v20, %v6387_v6  ;;  %8474 = vtanh.f32 %v13860_v53  ;;  %v13884_v22 = vmul.f32 %v13880_v3, %v15440_v63  ;;  %v6421_v51 = vmul.f32 %v8459_v32, %v13734_v2 }
 0x44f   :  { %v6390_v37 = vadd.f32 %v6374_v33, %v13718_v11  ;;  %v6373_v31 = vadd.f32 %v6357_v56, %v13728_v4  ;;  %v8461_v14 = vpop.eup %8460  ;;  %v13889_v11 = vld [vmem:[%s15049_s3 + $0x28] sm:$0xff] }
 0x450   :  { %6461 = vadd.xlane.f32.xlu0 %v6435_v54  ;;  %15453 = vst [vmem:[#allocation12_spill] sm:$0xff] %v13889_v11  ;;  %v13893_v4 = vmul.f32 %v13889_v11, %v15442_v16  ;;  %v13898_v54 = vld [vmem:[%s15048_s2 + $0x20] sm:$0xff]  ;;  %v1132_v35 = vmul.f32 %v8461_v14, %v13756_v49  ;;  %8476 = vtanh.f32 %v13884_v22  ;;  %v13923_v14 = vpop.xlane.xlu0 %2931 }
 0x451   :  { %15454 = vst [vmem:[#allocation19_spill] sm:$0xff] %v13898_v54  ;;  %v13902_v33 = vmul.f32 %v13898_v54, %v15440_v63  ;;  %v8463_v6 = vpop.eup %8462  ;;  %v6438_v20 = vadd.f32 %v6422_v60, %v6390_v37  ;;  %v6389_v56 = vadd.f32 %v6373_v31, %v13734_v2  ;;  %v13918_v37 = vmul.f32 %v13914_v52, %v15442_v16 }
 0x452   :  { %v8465_v43 = vpop.eup %8464  ;;  %v1196_v5 = vmul.f32 %v8463_v6, %v13765_v15  ;;  %v1148_v32 = vadd.f32 %v1132_v35, %v13756_v49  ;;  %8478 = vtanh.f32 %v13893_v4  ;;  %v2711_v52 = vrot.slane %v13655_v26, %v12237_v47  ;;  %v13937_v35 = vld [vmem:[%s15048_s2 + $0x38] sm:$0xff] }
 0x453   :  { %v8467_v60 = vpop.eup %8466  ;;  %6467 = vadd.xlane.f32.xlu1 %v6438_v20  ;;  %v6437_v2 = vadd.f32 %v6421_v51, %v6389_v56  ;;  %v1131_v31 = vmul.f32 %v8465_v43, %v13779_v7  ;;  %8480 = vtanh.f32 %v13902_v33  ;;  %v2707_v54 = vrot.slane %v13670_v27, %v12377_v24  ;;  %15456 = vst [vmem:[#allocation8_spill] sm:$0xff] %v13937_v35  ;;  %v13947_v27 = vld [vmem:[%s15049_s3 + $0x38] sm:$0xff]  ;;  %v13971_v56 = vpop.xlane.xlu1 %3202 }
 0x454   :  { %v1195_v6 = vmul.f32 %v8467_v60, %v13792_v40  ;;  %v1164_v51 = vadd.f32 %v1148_v32, %v13765_v15  ;;  %8482 = vtanh.f32 %v13918_v37  ;;  %v13941_v43 = vmul.f32 %v13937_v35, %v15440_v63  ;;  %15457 = vst [vmem:[#allocation140_spill] sm:$0xff] %v13947_v27 }
 0x455   :  { %6465 = vadd.xlane.f32.xlu0 %v6437_v2  ;;  %v1147_v49 = vadd.f32 %v1131_v31, %v13779_v7  ;;  %v2712_v26 = vsel %vm2684_vm1, %v2711_v52, %v2707_v54  ;;  %v13951_v15 = vmul.f32 %v13947_v27, %v15442_v16  ;;  %v13956_v7 = vld [vmem:[%s15048_s2 + $0x30] sm:$0xff]  ;;  %v8469_v60 = vpop.eup %8468 }
 0x456   :  { %15458 = vst [vmem:[#allocation141_spill] sm:$0xff] %v13956_v7  ;;  %v13960_v20 = vmul.f32 %v13956_v7, %v15440_v63  ;;  %v13965_v52 = vld [vmem:[%s15049_s3 + $0x30] sm:$0xff]  ;;  %v1212_v2 = vadd.f32 %v1196_v5, %v1164_v51  ;;  %v2751_v31 = vsel %vm1341_vm11, %v2712_v26, %v12985_v59  ;;  %8484 = vtanh.f32 %v13941_v43  ;;  %v8471_v7 = vpop.eup %8470 }
 0x457   :  { %15459 = vst [vmem:[#allocation142_spill] sm:$0xff] %v13965_v52  ;;  %v13969_v54 = vmul.f32 %v13965_v52, %v15442_v16  ;;  %v1163_v32 = vadd.f32 %v1147_v49, %v13792_v40  ;;  %v1421_v27 = vmul.f32 %v8469_v60, %v13825_v36  ;;  %8486 = vtanh.f32 %v13951_v15  ;;  %v13983_v11 = vpop.xlane.xlu0 %3200  ;;  %v8473_v5 = vpop.eup %8472 }
 0x458   :  { %v2729_v52 = vrot.slane %v13688_v13, %v12237_v47  ;;  %v2752_v35 = vsel %vm1343_vm12, %v13087_v34, %v2751_v31  ;;  %1243 = vadd.xlane.f32.xlu1 %v1212_v2  ;;  %v1485_v59 = vmul.f32 %v8471_v7, %v13840_v46  ;;  %8488 = vtanh.f32 %v13960_v20  ;;  %v8475_v49 = vpop.eup %8474  ;;  %v13996_v60 = vpop.xlane.xlu1 %3210 }
 0x459   :  { %v1211_v40 = vadd.f32 %v1195_v6, %v1163_v32  ;;  %v2725_v51 = vrot.slane %v13704_v39, %v12377_v24  ;;  %v1437_v26 = vadd.f32 %v1421_v27, %v13825_v36  ;;  %v1420_v13 = vmul.f32 %v8473_v5, %v13849_v41 }
 0x45a   :  { %8490 = vtanh.f32 %v13969_v54  ;;  %v13994_v34 = vmul.f32 %v13144_v50, %v15440_v63  ;;  %v1484_v6 = vmul.f32 %v8475_v49, %v13860_v53  ;;  %v14002_v39 = vmul.f32 %v13162_v17, %v15442_v16  ;;  %v8477_v27 = vpop.eup %8476 }
 0x45b   :  { %1241 = vadd.xlane.f32.xlu0 %v1211_v40  ;;  %v2730_v7 = vsel %vm2684_vm1, %v2729_v52, %v2725_v51  ;;  %v14006_v36 = vmul.f32 %v13182_v58, %v15440_v63  ;;  %v1453_v2 = vadd.f32 %v1437_v26, %v13840_v46  ;;  %v1436_v50 = vadd.f32 %v1420_v13, %v13849_v41  ;;  %v14012_v31 = vpop.xlane.xlu0 %3208 }
 0x45c   :  { %v2753_v32 = vsel %vm1345_vm13, %v2730_v7, %v2752_v35  ;;  %8492 = vtanh.f32 %v13994_v34  ;;  %v8479_v52 = vpop.eup %8478  ;;  %v1702_v5 = vmul.f32 %v8477_v27, %v13884_v22  ;;  %v14018_v17 = vmul.f32 %v13195_v42, %v15442_v16  ;;  %v14025_v51 = vpop.xlane.xlu1 %3214 }
 0x45d   :  { %8494 = vtanh.f32 %v14002_v39  ;;  %v2738_v58 = vrot.slane %v13720_v8, %v12237_v47  ;;  %v8481_v46 = vpop.eup %8480  ;;  %v1501_v41 = vadd.f32 %v1485_v59, %v1453_v2  ;;  %v1452_v35 = vadd.f32 %v1436_v50, %v13860_v53 }
 0x45e   :  { %v1766_v40 = vmul.f32 %v8479_v52, %v13893_v4  ;;  %8496 = vtanh.f32 %v14006_v36  ;;  %v8483_v49 = vpop.eup %8482  ;;  %v1718_v26 = vadd.f32 %v1702_v5, %v13884_v22  ;;  %v1701_v13 = vmul.f32 %v8481_v46, %v13902_v33 }
 0x45f   :  { %8498 = vtanh.f32 %v14018_v17  ;;  %v2734_v42 = vrot.slane %v13736_v29, %v12377_v24  ;;  %1532 = vadd.xlane.f32.xlu1 %v1501_v41  ;;  %v1500_v8 = vadd.f32 %v1484_v6, %v1452_v35  ;;  %v1765_v53 = vmul.f32 %v8483_v49, %v13918_v37  ;;  %v14041_v22 = vpop.xlane.xlu0 %3212  ;;  %v15460_v49 = vld [vmem:[#allocation118_spill] sm:$0xff] }
 0x460   :  { %v14035_v59 = vmul.f32 %v13318_v38, %v15440_v63  ;;  %v14039_v7 = vmul.f32 %v13327_v30, %v15442_v16  ;;  %v8485_v27 = vpop.eup %8484  ;;  %v1734_v2 = vadd.f32 %v1718_v26, %v13893_v4  ;;  %v1717_v50 = vadd.f32 %v1701_v13, %v13902_v33  ;;  %v14062_v46 = vpop.xlane.xlu1 %4515 }
 0x461   :  { %v2739_v29 = vsel %vm2684_vm1, %v2738_v58, %v2734_v42  ;;  %v14048_v6 = vmul.f32 %v13339_v62, %v15440_v63  ;;  %v8487_v52 = vpop.eup %8486  ;;  %1530 = vadd.xlane.f32.xlu0 %v1500_v8  ;;  %v1983_v38 = vmul.f32 %v8485_v27, %v13941_v43  ;;  %v14057_v4 = vmul.f32 %v13353_v57, %v15442_v16 }
 0x462   :  { %v14052_v30 = vsel %vm1347_vm14, %v2739_v29, %v2753_v32  ;;  %8500 = vtanh.f32 %v14035_v59  ;;  %v8489_v33 = vpop.eup %8488  ;;  %v1782_v5 = vadd.f32 %v1766_v40, %v1734_v2  ;;  %v1733_v58 = vadd.f32 %v1717_v50, %v13918_v37 }
 0x463   :  { %v2047_v62 = vmul.f32 %v8487_v52, %v13951_v15  ;;  %8502 = vtanh.f32 %v14039_v7  ;;  %v1999_v32 = vadd.f32 %v1983_v38, %v13941_v43  ;;  %v1982_v35 = vmul.f32 %v8489_v33, %v13960_v20  ;;  %v15461_v52 = vld [vmem:[#allocation81_spill] sm:$0xff] }
 0x464   :  { %v8491_v41 = vpop.eup %8490  ;;  %8504 = vtanh.f32 %v14048_v6  ;;  %v2992_v57 = vrot.slane %v13767_v10, %v12313_v21  ;;  %1813 = vadd.xlane.f32.xlu1 %v1782_v5  ;;  %v1781_v40 = vadd.f32 %v1765_v53, %v1733_v58  ;;  %v2988_v26 = vrot.slane %v13797_v28, %v15460_v49  ;;  %v14083_v53 = vpop.xlane.xlu0 %4513 }
 0x465   :  { %v2046_v37 = vmul.f32 %v8491_v41, %v13969_v54  ;;  %8506 = vtanh.f32 %v14057_v4  ;;  %v2015_v42 = vadd.f32 %v1999_v32, %v13951_v15  ;;  %v1998_v43 = vadd.f32 %v1982_v35, %v13960_v20  ;;  %v15462_v41 = vld [vmem:[#allocation133_spill] sm:$0xff] }
 0x466   :  { %v8493_v13 = vpop.eup %8492  ;;  %v14077_v8 = vmul.f32 %v13373_v12, %v15440_v63  ;;  %v14081_v10 = vmul.f32 %v13386_v19, %v15442_v16  ;;  %1811 = vadd.xlane.f32.xlu0 %v1781_v40  ;;  %v2993_v28 = vsel %vm2965_vm2, %v2992_v57, %v2988_v26  ;;  %v14089_v15 = vmul.f32 %v13395_v1, %v15440_v63  ;;  %v14104_v1 = vpop.xlane.xlu1 %4523 }
 0x467   :  { %v8495_v27 = vpop.eup %8494  ;;  %v2264_v2 = vmul.f32 %v8493_v13, %v13994_v34  ;;  %v14093_v12 = vmul.f32 %v13413_v0, %v15442_v16  ;;  %v2063_v50 = vadd.f32 %v2047_v62, %v2015_v42  ;;  %v2014_v19 = vadd.f32 %v1998_v43, %v13969_v54 }
 0x468   :  { %v8497_v20 = vpop.eup %8496  ;;  %v2328_v29 = vmul.f32 %v8495_v27, %v14002_v39  ;;  %v3032_v38 = vsel %vm1341_vm11, %v2993_v28, %v15461_v52  ;;  %8508 = vtanh.f32 %v14077_v8  ;;  %v3010_v0 = vrot.slane %v13827_v9, %v12313_v21  ;;  %v14128_v26 = vpop.xlane.xlu0 %4521 }
 0x469   :  { %v8499_v33 = vpop.eup %8498  ;;  %v2280_v5 = vadd.f32 %v2264_v2, %v13994_v34  ;;  %v2263_v58 = vmul.f32 %v8497_v20, %v14006_v36  ;;  %2094 = vadd.xlane.f32.xlu1 %v2063_v50  ;;  %v2062_v62 = vadd.f32 %v2046_v37, %v2014_v19  ;;  %8510 = vtanh.f32 %v14081_v10 }
 0x46a   :  { %v2327_v54 = vmul.f32 %v8499_v33, %v14018_v17  ;;  %v3033_v32 = vsel %vm1343_vm12, %v15462_v41, %v3032_v38  ;;  %8512 = vtanh.f32 %v14089_v15  ;;  %v3006_v9 = vrot.slane %v13867_v55, %v15460_v49  ;;  %v15468_v41 = vld [vmem:[#allocation117_spill] sm:$0xff] }
 0x46b   :  { %v2296_v34 = vadd.f32 %v2280_v5, %v14002_v39  ;;  %v2279_v35 = vadd.f32 %v2263_v58, %v14006_v36  ;;  %2092 = vadd.xlane.f32.xlu0 %v2062_v62  ;;  %8514 = vtanh.f32 %v14093_v12  ;;  %v14118_v40 = vmul.f32 %v13478_v48, %v15440_v63  ;;  %v15463_v39 = vld [vmem:[#allocation106_spill] sm:$0xff]  ;;  %v15466_v58 = vld [vmem:[#allocation116_spill] sm:$0xff] }
 0x46c   :  { %v8501_v57 = vpop.eup %8500  ;;  %v14122_v37 = vmul.f32 %v13492_v25, %v15442_v16  ;;  %v14126_v36 = vmul.f32 %v15463_v39, %v15440_v63  ;;  %v3011_v27 = vsel %vm2965_vm2, %v3010_v0, %v3006_v9  ;;  %v15464_v63 = vld [vmem:[#allocation102_spill] sm:$0xff]  ;;  %v3019_v38 = vrot.slane %v13904_v18, %v12313_v21 }
 0x46d   :  { %v8503_v13 = vpop.eup %8502  ;;  %v2344_v55 = vadd.f32 %v2328_v29, %v2296_v34  ;;  %v2295_v42 = vadd.f32 %v2279_v35, %v14018_v17  ;;  %v2545_v43 = vmul.f32 %v8501_v57, %v14035_v59  ;;  %v3034_v25 = vsel %vm1345_vm13, %v3011_v27, %v3033_v32  ;;  %v14143_v29 = vpop.xlane.xlu1 %4527  ;;  %v15465_v5 = vld [vmem:[#allocation26_spill] sm:$0xff]  ;;  %v15472_v27 = vld [vmem:[#allocation121_spill] sm:$0xff] }
 0x46e   :  { %v8505_v48 = vpop.eup %8504  ;;  %v2609_v2 = vmul.f32 %v8503_v13, %v14039_v7  ;;  %8516 = vtanh.f32 %v14118_v40  ;;  %v14138_v28 = vmul.f32 %v15464_v63, %v15442_v16  ;;  %v3015_v16 = vrot.slane %v13923_v14, %v15460_v49  ;;  %v15469_v18 = vld [vmem:[#allocation30_spill] sm:$0xff] }
 0x46f   :  { %v8507_v20 = vpop.eup %8506  ;;  %2375 = vadd.xlane.f32.xlu1 %v2344_v55  ;;  %v2343_v50 = vadd.f32 %v2327_v54, %v2295_v42  ;;  %v2561_v17 = vadd.f32 %v2545_v43, %v14035_v59  ;;  %v2544_v19 = vmul.f32 %v8505_v48, %v14048_v6  ;;  %8518 = vtanh.f32 %v14122_v37  ;;  %v15467_v54 = vld [vmem:[#allocation33_spill] sm:$0xff]  ;;  %v15471_v42 = vld [vmem:[#allocation114_spill] sm:$0xff] }
 0x470   :  { %v2608_v52 = vmul.f32 %v8507_v20, %v14057_v4  ;;  %8520 = vtanh.f32 %v14126_v36  ;;  %v14156_v0 = vmul.f32 %v15466_v58, %v15465_v5  ;;  %v3020_v62 = vsel %vm2965_vm2, %v3019_v38, %v3015_v16 }
 0x471   :  { %2373 = vadd.xlane.f32.xlu0 %v2343_v50  ;;  %v2577_v33 = vadd.f32 %v2561_v17, %v14039_v7  ;;  %v2560_v59 = vadd.f32 %v2544_v19, %v14048_v6  ;;  %8522 = vtanh.f32 %v14138_v28  ;;  %v14161_v32 = vmul.f32 %v15468_v41, %v15467_v54  ;;  %v15470_v7 = vld [vmem:[#allocation122_spill] sm:$0xff]  ;;  %v14171_v6 = vpop.xlane.xlu0 %4525 }
 0x472   :  { %v14165_v14 = vmul.f32 %v15469_v18, %v15465_v5  ;;  %v14169_v34 = vmul.f32 %v15470_v7, %v15467_v54  ;;  %v8509_v35 = vpop.eup %8508  ;;  %v14175_v39 = vsel %vm1347_vm14, %v3020_v62, %v3034_v25  ;;  %8524 = vtanh.f32 %v14156_v0  ;;  %v15474_v7 = vld [vmem:[#allocation134_spill] sm:$0xff] }
 0x473   :  { %v2625_v9 = vadd.f32 %v2609_v2, %v2577_v33  ;;  %v2576_v57 = vadd.f32 %v2560_v59, %v14057_v4  ;;  %v8511_v13 = vpop.eup %8510  ;;  %v2826_v55 = vmul.f32 %v8509_v35, %v14077_v8  ;;  %8526 = vtanh.f32 %v14161_v32  ;;  %v14190_v20 = vpop.xlane.xlu1 %4793 }
 0x474   :  { %v3273_v43 = vrot.slane %v13971_v56, %v15471_v42  ;;  %v3269_v48 = vrot.slane %v13983_v11, %v15472_v27  ;;  %v8513_v63 = vpop.eup %8512  ;;  %v2890_v4 = vmul.f32 %v8511_v13, %v14081_v10  ;;  %8528 = vtanh.f32 %v14165_v14 }
 0x475   :  { %2656 = vadd.xlane.f32.xlu1 %v2625_v9  ;;  %v2624_v2 = vadd.f32 %v2608_v52, %v2576_v57  ;;  %v14188_v25 = vmul.f32 %v13821_v61, %v15465_v5  ;;  %v8515_v50 = vpop.eup %8514  ;;  %v2842_v17 = vadd.f32 %v2826_v55, %v14077_v8  ;;  %v2825_v56 = vmul.f32 %v8513_v63, %v14089_v15  ;;  %v15473_v52 = vld [vmem:[#allocation89_spill] sm:$0xff]  ;;  %v14204_v16 = vpop.xlane.xlu0 %4791 }
 0x476   :  { %8530 = vtanh.f32 %v14169_v34  ;;  %v3274_v11 = vsel %vm3246_vm3, %v3273_v43, %v3269_v48  ;;  %v2889_v19 = vmul.f32 %v8515_v50, %v14093_v12  ;;  %v14201_v61 = vmul.f32 %v13836_v23, %v15467_v54 }
 0x477   :  { %2654 = vadd.xlane.f32.xlu0 %v2624_v2  ;;  %v3313_v38 = vsel %vm1341_vm11, %v3274_v11, %v15473_v52  ;;  %8532 = vtanh.f32 %v14188_v25  ;;  %v2858_v33 = vadd.f32 %v2842_v17, %v14081_v10  ;;  %v2841_v59 = vadd.f32 %v2825_v56, %v14089_v15  ;;  %v14222_v15 = vpop.xlane.xlu1 %4801  ;;  %v15475_v2 = vld [vmem:[#allocation12_spill] sm:$0xff]  ;;  %v15476_v56 = vld [vmem:[#allocation19_spill] sm:$0xff] }
 0x478   :  { %v8517_v8 = vpop.eup %8516  ;;  %v14210_v58 = vmul.f32 %v13845_v44, %v15465_v5  ;;  %v14214_v62 = vmul.f32 %v13856_v45, %v15467_v54  ;;  %8534 = vtanh.f32 %v14201_v61  ;;  %v3291_v18 = vrot.slane %v13996_v60, %v15471_v42 }
 0x479   :  { %v8519_v41 = vpop.eup %8518  ;;  %v3107_v23 = vmul.f32 %v8517_v8, %v14118_v40  ;;  %v3314_v10 = vsel %vm1343_vm12, %v15474_v7, %v3313_v38  ;;  %v2906_v44 = vadd.f32 %v2890_v4, %v2858_v33  ;;  %v2857_v9 = vadd.f32 %v2841_v59, %v14093_v12  ;;  %v14232_v43 = vpop.xlane.xlu0 %4799 }
 0x47a   :  { %v8521_v35 = vpop.eup %8520  ;;  %v3171_v45 = vmul.f32 %v8519_v41, %v14122_v37  ;;  %8536 = vtanh.f32 %v14210_v58  ;;  %v3287_v60 = vrot.slane %v14012_v31, %v15472_v27  ;;  %v14237_v63 = vmul.f32 %v13880_v3, %v15465_v5 }
 0x47b   :  { %v8523_v57 = vpop.eup %8522  ;;  %v3123_v13 = vadd.f32 %v3107_v23, %v14118_v40  ;;  %v3106_v55 = vmul.f32 %v8521_v35, %v14126_v36  ;;  %8538 = vtanh.f32 %v14214_v62  ;;  %2937 = vadd.xlane.f32.xlu1 %v2906_v44  ;;  %v2905_v48 = vadd.f32 %v2889_v19, %v2857_v9  ;;  %v14250_v19 = vpop.xlane.xlu1 %4805 }
 0x47c   :  { %v3170_v12 = vmul.f32 %v8523_v57, %v14138_v28  ;;  %v14241_v40 = vmul.f32 %v15475_v2, %v15467_v54  ;;  %v8525_v4 = vpop.eup %8524  ;;  %v3292_v31 = vsel %vm3246_vm3, %v3291_v18, %v3287_v60  ;;  %v14248_v11 = vmul.f32 %v15476_v56, %v15465_v5  ;;  %v15479_v2 = vld [vmem:[#allocation140_spill] sm:$0xff] }
 0x47d   :  { %v3139_v50 = vadd.f32 %v3123_v13, %v14122_v37  ;;  %v3122_v17 = vadd.f32 %v3106_v55, %v14126_v36  ;;  %v8527_v52 = vpop.eup %8526  ;;  %2935 = vadd.xlane.f32.xlu0 %v2905_v48  ;;  %v4420_v3 = vmul.f32 %v8525_v4, %v14156_v0  ;;  %v3315_v38 = vsel %vm1345_vm13, %v3292_v31, %v3314_v10  ;;  %v15477_v37 = vld [vmem:[#allocation125_spill] sm:$0xff]  ;;  %v14262_v23 = vpop.xlane.xlu0 %4803  ;;  %v15478_v55 = vld [vmem:[#allocation8_spill] sm:$0xff] }
 0x47e   :  { %8540 = vtanh.f32 %v14237_v63  ;;  %v14257_v8 = vmul.f32 %v15477_v37, %v15467_v54  ;;  %v8529_v36 = vpop.eup %8528  ;;  %v4484_v41 = vmul.f32 %v8527_v52, %v14161_v32  ;;  %v3300_v35 = vrot.slane %v14025_v51, %v15471_v42 }
 0x47f   :  { %v3187_v33 = vadd.f32 %v3171_v45, %v3139_v50  ;;  %v3138_v59 = vadd.f32 %v3122_v17, %v14138_v28  ;;  %8542 = vtanh.f32 %v14241_v40  ;;  %v4436_v7 = vadd.f32 %v4420_v3, %v14156_v0  ;;  %v14280_v51 = vpop.xlane.xlu1 %5070 }
 0x480   :  { %v8531_v18 = vpop.eup %8530  ;;  %v4419_v10 = vmul.f32 %v8529_v36, %v14165_v14  ;;  %8544 = vtanh.f32 %v14248_v11  ;;  %v3296_v45 = vrot.slane %v14041_v22, %v15472_v27  ;;  %v14278_v60 = vmul.f32 %v15478_v55, %v15465_v5  ;;  %v15480_v22 = vld [vmem:[#allocation141_spill] sm:$0xff] }
 0x481   :  { %v8533_v44 = vpop.eup %8532  ;;  %3218 = vadd.xlane.f32.xlu1 %v3187_v33  ;;  %v3186_v9 = vadd.f32 %v3170_v12, %v3138_v59  ;;  %v4483_v28 = vmul.f32 %v8531_v18, %v14169_v34  ;;  %8546 = vtanh.f32 %v14257_v8  ;;  %v4452_v57 = vadd.f32 %v4436_v7, %v14161_v32  ;;  %v15482_v59 = vld [vmem:[#allocation94_spill] sm:$0xff]  ;;  %v14305_v7 = vpop.xlane.xlu0 %5068 }
 0x482   :  { %v4435_v0 = vadd.f32 %v4419_v10, %v14165_v14  ;;  %v4698_v13 = vmul.f32 %v8533_v44, %v14188_v25  ;;  %v8535_v48 = vpop.eup %8534  ;;  %v3301_v12 = vsel %vm3246_vm3, %v3300_v35, %v3296_v45  ;;  %v14285_v4 = vmul.f32 %v15479_v2, %v15467_v54  ;;  %v15481_v14 = vld [vmem:[#allocation142_spill] sm:$0xff] }
 0x483   :  { %3216 = vadd.xlane.f32.xlu0 %v3186_v9  ;;  %v14289_v32 = vmul.f32 %v15480_v22, %v15465_v5  ;;  %v14293_v50 = vmul.f32 %v15481_v14, %v15467_v54  ;;  %v4500_v31 = vadd.f32 %v4484_v41, %v4452_v57  ;;  %v4762_v3 = vmul.f32 %v8535_v48, %v14201_v61  ;;  %v14333_v57 = vpop.xlane.xlu1 %5078  ;;  %v15484_v22 = vld [vmem:[#allocation135_spill] sm:$0xff] }
 0x484   :  { %v8537_v17 = vpop.eup %8536  ;;  %v4451_v56 = vadd.f32 %v4435_v0, %v14169_v34  ;;  %v4714_v52 = vadd.f32 %v4698_v13, %v14188_v25  ;;  %v14300_v33 = vsel %vm1347_vm14, %v3301_v12, %v3315_v38  ;;  %8548 = vtanh.f32 %v14278_v60  ;;  %v15483_v38 = vld [vmem:[#allocation5_spill] sm:$0xff] }
 0x485   :  { %v8539_v37 = vpop.eup %8538  ;;  %v4697_v36 = vmul.f32 %v8537_v17, %v14210_v58  ;;  %v4583_v18 = vrot.slane %v14062_v46, %v15482_v59  ;;  %4531 = vadd.xlane.f32.xlu1 %v4500_v31  ;;  %8550 = vtanh.f32 %v14285_v4  ;;  %v4579_v35 = vrot.slane %v14083_v53, %v15483_v38  ;;  %v8726_v46 = vld [vmem:[%s15048_s2 + $0x48] sm:$0xff]  ;;  %v8728_v53 = vld [vmem:[%s15048_s2 + $0x40] sm:$0xff] }
 0x486   :  { %v4499_v41 = vadd.f32 %v4483_v28, %v4451_v56  ;;  %v4730_v34 = vadd.f32 %v4714_v52, %v14201_v61  ;;  %v4761_v25 = vmul.f32 %v8539_v37, %v14214_v62  ;;  %8552 = vtanh.f32 %v14289_v32  ;;  %v8729_v17 = vld [vmem:[%s15049_s3 + $0x40] sm:$0xff] }
 0x487   :  { %v4713_v10 = vadd.f32 %v4697_v36, %v14210_v58  ;;  %v14318_v44 = vmul.f32 %v8726_v46, %v15465_v5  ;;  %8554 = vtanh.f32 %v14293_v50  ;;  %v8727_v58 = vld [vmem:[%s15049_s3 + $0x48] sm:$0xff]  ;;  %v14331_v45 = vmul.f32 %v8728_v53, %v15465_v5  ;;  %v14352_v37 = vpop.xlane.xlu0 %5076 }
 0x488   :  { %v8541_v9 = vpop.eup %8540  ;;  %4529 = vadd.xlane.f32.xlu0 %v4499_v41  ;;  %v4778_v61 = vadd.f32 %v4762_v3, %v4730_v34  ;;  %v14325_v28 = vmul.f32 %v8727_v58, %v15467_v54  ;;  %v4584_v48 = vsel %vm1272_vm4, %v4583_v18, %v4579_v35  ;;  %v4601_v18 = vrot.slane %v14104_v1, %v15482_v59  ;;  %v15485_v41 = vld [vmem:[#allocation91_spill] sm:$0xff]  ;;  %v8730_v35 = vld [vmem:[%s15048_s2 + $0x58] sm:$0xff] }
 0x489   :  { %v8543_v0 = vpop.eup %8542  ;;  %v4729_v13 = vadd.f32 %v4713_v10, %v14214_v62  ;;  %v4975_v55 = vmul.f32 %v8541_v9, %v14237_v63  ;;  %8556 = vtanh.f32 %v14318_v44  ;;  %v4623_v14 = vsel %vm1341_vm11, %v4584_v48, %v15484_v22  ;;  %v8731_v1 = vld [vmem:[%s15049_s3 + $0x58] sm:$0xff] }
 0x48a   :  { %v8545_v12 = vpop.eup %8544  ;;  %4809 = vadd.xlane.f32.xlu1 %v4778_v61  ;;  %v5039_v2 = vmul.f32 %v8543_v0, %v14241_v40  ;;  %8558 = vtanh.f32 %v14325_v28  ;;  %v14347_v62 = vmul.f32 %v8729_v17, %v15467_v54  ;;  %v4624_v34 = vsel %vm1343_vm12, %v15485_v41, %v4623_v14 }
 0x48b   :  { %v8547_v31 = vpop.eup %8546  ;;  %v4777_v56 = vadd.f32 %v4761_v25, %v4729_v13  ;;  %v4991_v52 = vadd.f32 %v4975_v55, %v14237_v63  ;;  %v4974_v3 = vmul.f32 %v8545_v12, %v14248_v11  ;;  %8560 = vtanh.f32 %v14331_v45  ;;  %v14390_v53 = vpop.xlane.xlu1 %5082 }
 0x48c   :  { %v5038_v36 = vmul.f32 %v8547_v31, %v14257_v8  ;;  %8562 = vtanh.f32 %v14347_v62  ;;  %v4597_v10 = vrot.slane %v14128_v26, %v15483_v38  ;;  %v14368_v46 = vmul.f32 %v8730_v35, %v15465_v5 }
 0x48d   :  { %4807 = vadd.xlane.f32.xlu0 %v4777_v56  ;;  %v5007_v25 = vadd.f32 %v4991_v52, %v14241_v40  ;;  %v4990_v63 = vadd.f32 %v4974_v3, %v14248_v11  ;;  %v14374_v9 = vmul.f32 %v8731_v1, %v15467_v54  ;;  %v8732_v40 = vld [vmem:[%s15048_s2 + $0x50] sm:$0xff]  ;;  %v4610_v58 = vrot.slane %v14143_v29, %v15482_v59 }
 0x48e   :  { %v14380_v26 = vmul.f32 %v8732_v40, %v15465_v5  ;;  %v8733_v11 = vld [vmem:[%s15049_s3 + $0x50] sm:$0xff]  ;;  %v8549_v0 = vpop.eup %8548  ;;  %v4602_v48 = vsel %vm1272_vm4, %v4601_v18, %v4597_v10  ;;  %8564 = vtanh.f32 %v14368_v46  ;;  %v4606_v29 = vrot.slane %v14171_v6, %v15483_v38 }
 0x48f   :  { %v14386_v61 = vmul.f32 %v8733_v11, %v15467_v54  ;;  %v5055_v13 = vadd.f32 %v5039_v2, %v5007_v25  ;;  %v5006_v55 = vadd.f32 %v4990_v63, %v14257_v8  ;;  %v8551_v12 = vpop.eup %8550  ;;  %v5252_v22 = vmul.f32 %v8549_v0, %v14278_v60  ;;  %v8734_v8 = vld [vmem:[%s15048_s2 + $0x68] sm:$0xff]  ;;  %v14408_v52 = vpop.xlane.xlu0 %5080  ;;  %v8736_v11 = vld [vmem:[%s15048_s2 + $0x60] sm:$0xff] }
 0x490   :  { %v4625_v14 = vsel %vm1345_vm13, %v4602_v48, %v4624_v34  ;;  %8566 = vtanh.f32 %v14374_v9  ;;  %v8553_v17 = vpop.eup %8552  ;;  %v5316_v2 = vmul.f32 %v8551_v12, %v14285_v4  ;;  %v14406_v56 = vmul.f32 %v8734_v8, %v15465_v5  ;;  %v8735_v63 = vld [vmem:[%s15049_s3 + $0x68] sm:$0xff] }
 0x491   :  { %5086 = vadd.xlane.f32.xlu1 %v5055_v13  ;;  %v5054_v31 = vadd.f32 %v5038_v36, %v5006_v55  ;;  %8568 = vtanh.f32 %v14380_v26  ;;  %v8555_v3 = vpop.eup %8554  ;;  %v5268_v18 = vadd.f32 %v5252_v22, %v14278_v60  ;;  %v5251_v6 = vmul.f32 %v8553_v17, %v14289_v32  ;;  %v15486_v48 = vld [vmem:[#allocation88_spill] sm:$0xff] }
 0x492   :  { %8570 = vtanh.f32 %v14386_v61  ;;  %v4611_v36 = vsel %vm1272_vm4, %v4610_v58, %v4606_v29  ;;  %v5315_v34 = vmul.f32 %v8555_v3, %v14293_v50  ;;  %v14422_v10 = vmul.f32 %v8735_v63, %v15467_v54  ;;  %v14434_v0 = vpop.xlane.xlu1 %5347 }
 0x493   :  { %v8557_v41 = vpop.eup %8556  ;;  %5084 = vadd.xlane.f32.xlu0 %v5054_v31  ;;  %v14416_v25 = vsel %vm1347_vm14, %v4611_v36, %v4625_v14  ;;  %8572 = vtanh.f32 %v14406_v56  ;;  %v5284_v35 = vadd.f32 %v5268_v18, %v14285_v4  ;;  %v5267_v1 = vadd.f32 %v5251_v6, %v14289_v32  ;;  %v8737_v4 = vld [vmem:[%s15049_s3 + $0x60] sm:$0xff]  ;;  %v15487_v18 = vld [vmem:[#allocation98_spill] sm:$0xff] }
 0x494   :  { %v8559_v60 = vpop.eup %8558  ;;  %v5529_v40 = vmul.f32 %v8557_v41, %v14318_v44  ;;  %v14432_v58 = vmul.f32 %v8736_v11, %v15465_v5  ;;  %8574 = vtanh.f32 %v14422_v10  ;;  %v14442_v32 = vmul.f32 %v8737_v4, %v15467_v54  ;;  %v14449_v8 = vpop.xlane.xlu0 %5345 }
 0x495   :  { %v8561_v13 = vpop.eup %8560  ;;  %v5593_v55 = vmul.f32 %v8559_v60, %v14325_v28  ;;  %v4861_v12 = vrot.slane %v14190_v20, %v15486_v48  ;;  %v5332_v14 = vadd.f32 %v5316_v2, %v5284_v35  ;;  %v5283_v29 = vadd.f32 %v5267_v1, %v14293_v50  ;;  %v8738_v20 = vld [vmem:[%s15048_s2 + $0x78] sm:$0xff] }
 0x496   :  { %v8563_v22 = vpop.eup %8562  ;;  %v5545_v17 = vadd.f32 %v5529_v40, %v14318_v44  ;;  %v5528_v31 = vmul.f32 %v8561_v13, %v14331_v45  ;;  %8576 = vtanh.f32 %v14432_v58  ;;  %v4857_v6 = vrot.slane %v14204_v16, %v15487_v18  ;;  %v8739_v60 = vld [vmem:[%s15049_s3 + $0x78] sm:$0xff]  ;;  %v15488_v13 = vld [vmem:[#allocation93_spill] sm:$0xff] }
 0x497   :  { %v5592_v3 = vmul.f32 %v8563_v22, %v14347_v62  ;;  %v14459_v2 = vmul.f32 %v8738_v20, %v15465_v5  ;;  %5363 = vadd.xlane.f32.xlu1 %v5332_v14  ;;  %v5331_v50 = vadd.f32 %v5315_v34, %v5283_v29  ;;  %8578 = vtanh.f32 %v14442_v32  ;;  %v14464_v41 = vpop.xlane.xlu1 %5355 }
 0x498   :  { %v5561_v44 = vadd.f32 %v5545_v17, %v14325_v28  ;;  %v5544_v36 = vadd.f32 %v5528_v31, %v14331_v45  ;;  %v8565_v63 = vpop.eup %8564  ;;  %v4862_v16 = vsel %vm1560_vm5, %v4861_v12, %v4857_v6  ;;  %v14471_v35 = vmul.f32 %v8739_v60, %v15467_v54  ;;  %v8740_v28 = vld [vmem:[%s15048_s2 + $0x70] sm:$0xff] }
 0x499   :  { %8580 = vtanh.f32 %v14459_v2  ;;  %v14478_v45 = vmul.f32 %v8740_v28, %v15465_v5  ;;  %5361 = vadd.xlane.f32.xlu0 %v5331_v50  ;;  %v5806_v11 = vmul.f32 %v8565_v63, %v14368_v46  ;;  %v4901_v4 = vsel %vm1341_vm11, %v4862_v16, %v15488_v13  ;;  %v14484_v12 = vpop.xlane.xlu0 %5353  ;;  %v8741_v5 = vld [vmem:[%s15049_s3 + $0x70] sm:$0xff]  ;;  %s8776_s3 = smov [#allocation2]  }
 0x49a   :  { %v8567_v34 = vpop.eup %8566  ;;  %v5609_v1 = vadd.f32 %v5593_v55, %v5561_v44  ;;  %v5560_v40 = vadd.f32 %v5544_v36, %v14347_v62  ;;  %8582 = vtanh.f32 %v14471_v35  ;;  %v14492_v55 = vmul.f32 %v8741_v5, %v15467_v54  ;;  %v15489_v54 = vld [vmem:[#allocation113_spill] sm:$0xff]  ;;  %s6575_s30 = sshll.u32 %s8776_s3, 4  ;;  %s6576_s30 = int_to_ptr.vmem [resolvable:$true] %s6575_s30 }
 0x49b   :  { %v8569_v22 = vpop.eup %8568  ;;  %v5870_v14 = vmul.f32 %v8567_v34, %v14374_v9  ;;  %v4879_v62 = vrot.slane %v14222_v15, %v15486_v48  ;;  %v5822_v31 = vadd.f32 %v5806_v11, %v14368_v46  ;;  %8584 = vtanh.f32 %v14478_v45  ;;  %v14499_v20 = vpop.xlane.xlu1 %5359  ;;  %s8742_s5 = scalar_lea.vmem %s6576_s30, 256  ;;  %p8747_p1 = scmp.lt.s32.totalorder %s6576_s30, %s6576_s30 }
 0x49c   :  { %v8571_v29 = vpop.eup %8570  ;;  %5640 = vadd.xlane.f32.xlu1 %v5609_v1  ;;  %v5608_v17 = vadd.f32 %v5592_v3, %v5560_v40  ;;  %v5805_v6 = vmul.f32 %v8569_v22, %v14380_v26  ;;  %8586 = vtanh.f32 %v14492_v55  ;;  %v4902_v36 = vsel %vm1343_vm12, %v15489_v54, %v4901_v4  ;;  %v15490_v1 = vld [vmem:[#allocation92_spill] sm:$0xff]  ;;  %p8743_p0 = scmp.ne.s32.totalorder %s6576_s30, %s8742_s5  ;;  %p8748_p2 = scmp.lt.s32.totalorder %s8742_s5, %s8742_s5 }
 0x49d   :  { %v8573_v50 = vpop.eup %8572  ;;  %v5869_v44 = vmul.f32 %v8571_v29, %v14386_v61  ;;  %v4875_v15 = vrot.slane %v14232_v43, %v15487_v18  ;;  %v5838_v46 = vadd.f32 %v5822_v31, %v14374_v9  ;;  %v4888_v16 = vrot.slane %v14250_v19, %v15486_v48  ;;  %v15491_v43 = vld [vmem:[#allocation104_spill] sm:$0xff]  ;;  %v14522_v19 = vpop.xlane.xlu0 %5357 }
 0x49e   :  { %5638 = vadd.xlane.f32.xlu0 %v5608_v17  ;;  %v5821_v3 = vadd.f32 %v5805_v6, %v14380_v26  ;;  %v6083_v63 = vmul.f32 %v8573_v50, %v14406_v56  ;;  %v8575_v60 = vpop.eup %8574  ;;  %v4884_v34 = vrot.slane %v14262_v23, %v15487_v18  ;;  %v5138_v40 = vrot.slane %v14280_v51, %v15490_v1  ;;  %v15492_v50 = vld [vmem:[#allocation115_spill] sm:$0xff]  ;;  %p8749_p3 = por %p8748_p2, %p8747_p1 }
 0x49f   :  { %v4880_v28 = vsel %vm1560_vm5, %v4879_v62, %v4875_v15  ;;  %v5134_v11 = vrot.slane %v14305_v7, %v15491_v43  ;;  %v5886_v9 = vadd.f32 %v5870_v14, %v5838_v46  ;;  %v6147_v4 = vmul.f32 %v8575_v60, %v14422_v10  ;;  %v5625_v17 = vpop.xlane.xlu1 %5624  ;;  %v15493_v46 = vld [vmem:[#allocation139_spill] sm:$0xff] }
 0x4a0   :  { %v5837_v26 = vadd.f32 %v5821_v3, %v14386_v61  ;;  %v6099_v13 = vadd.f32 %v6083_v63, %v14406_v56  ;;  %v8577_v22 = vpop.eup %8576  ;;  %v4903_v5 = vsel %vm1345_vm13, %v4880_v28, %v4902_v36  ;;  %v4889_v23 = vsel %vm1560_vm5, %v4888_v16, %v4884_v34  ;;  %v15494_v28 = vld [vmem:[#allocation96_spill] sm:$0xff]  ;;  %v15495_v34 = vld [vmem:[#allocation107_spill] sm:$0xff]  ;;  %p8750_p4 = pnand %p8749_p3, %p8743_p0 }
 0x4a1   :  { %v5139_v62 = vsel %vm1841_vm6, %v5138_v40, %v5134_v11  ;;  %v5156_v51 = vrot.slane %v14333_v57, %v15490_v1  ;;  %v8579_v7 = vpop.eup %8578  ;;  %5917 = vadd.xlane.f32.xlu1 %v5886_v9  ;;  %v6082_v56 = vmul.f32 %v8577_v22, %v14432_v58  ;;  %v14532_v29 = vsel %vm1347_vm14, %v4889_v23, %v4903_v5 }
 0x4a2   :  { %v5885_v14 = vadd.f32 %v5869_v44, %v5837_v26  ;;  %v6115_v61 = vadd.f32 %v6099_v13, %v14422_v10  ;;  %v6146_v6 = vmul.f32 %v8579_v7, %v14442_v32  ;;  %v5178_v54 = vsel %vm1341_vm11, %v5139_v62, %v15492_v50  ;;  %v5623_v13 = vpop.xlane.xlu0 %5622  ;;  %v15496_v7 = vld [vmem:[#allocation123_spill] sm:$0xff]  ;;  %v15498_v50 = vld [vmem:[#allocation101_spill] sm:$0xff] }
 0x4a3   :  { %v8581_v31 = vpop.eup %8580  ;;  %v5152_v57 = vrot.slane %v14352_v37, %v15491_v43  ;;  %v5165_v44 = vrot.slane %v14390_v53, %v15490_v1  ;;  %v6098_v36 = vadd.f32 %v6082_v56, %v14432_v58  ;;  %v5179_v3 = vsel %vm1343_vm12, %v15493_v46, %v5178_v54 }
 0x4a4   :  { %5915 = vadd.xlane.f32.xlu0 %v5885_v14  ;;  %v6163_v10 = vadd.f32 %v6147_v4, %v6115_v61  ;;  %v6360_v15 = vmul.f32 %v8581_v31, %v14459_v2  ;;  %v8583_v63 = vpop.eup %8582  ;;  %v5161_v60 = vrot.slane %v14408_v52, %v15491_v43  ;;  %v5415_v37 = vrot.slane %v14434_v0, %v15494_v28 }
 0x4a5   :  { %v5157_v16 = vsel %vm1841_vm6, %v5156_v51, %v5152_v57  ;;  %v5411_v53 = vrot.slane %v14449_v8, %v15495_v34  ;;  %v8585_v40 = vpop.eup %8584  ;;  %v6114_v58 = vadd.f32 %v6098_v36, %v14442_v32  ;;  %v6424_v9 = vmul.f32 %v8583_v63, %v14471_v35  ;;  %v15500_v36 = vld [vmem:[#allocation120_spill] sm:$0xff] }
 0x4a6   :  { %6194 = vadd.xlane.f32.xlu1 %v6163_v10  ;;  %v6376_v11 = vadd.f32 %v6360_v15, %v14459_v2  ;;  %v5180_v26 = vsel %vm1345_vm13, %v5157_v16, %v5179_v3  ;;  %v8587_v4 = vpop.eup %8586  ;;  %v6359_v52 = vmul.f32 %v8585_v40, %v14478_v45  ;;  %v5166_v22 = vsel %vm1841_vm6, %v5165_v44, %v5161_v60  ;;  %v15499_v44 = vld [vmem:[#allocation112_spill] sm:$0xff]  ;;  %v15502_v60 = vld [vmem:[#allocation127_spill] sm:$0xff] }
 0x4a7   :  { %v5416_v0 = vsel %vm2122_vm7, %v5415_v37, %v5411_v53  ;;  %v5433_v8 = vrot.slane %v14464_v41, %v15494_v28  ;;  %v6162_v5 = vadd.f32 %v6146_v6, %v6114_v58  ;;  %v6423_v2 = vmul.f32 %v8587_v4, %v14492_v55  ;;  %v5633_v62 = vpop.xlane.xlu1 %5632  ;;  %v15504_v53 = vld [vmem:[#allocation126_spill] sm:$0xff] }
 0x4a8   :  { %v6392_v32 = vadd.f32 %v6376_v11, %v14471_v35  ;;  %v14564_v23 = vsel %vm1347_vm14, %v5166_v22, %v5180_v26  ;;  %v6375_v51 = vadd.f32 %v6359_v52, %v14478_v45  ;;  %v5455_v14 = vsel %vm1341_vm11, %v5416_v0, %v15496_v7  ;;  %v15497_v35 = vld [vmem:[#allocation119_spill] sm:$0xff]  ;;  %v15507_v7 = vld [vmem:[#allocation22_spill] sm:$0xff] }
 0x4a9   :  { %v5429_v61 = vrot.slane %v14484_v12, %v15495_v34  ;;  %v5442_v41 = vrot.slane %v14499_v20, %v15494_v28  ;;  %6192 = vadd.xlane.f32.xlu0 %v6162_v5  ;;  %v5456_v31 = vsel %vm1343_vm12, %v15497_v35, %v5455_v14  ;;  %v5438_v6 = vrot.slane %v14522_v19, %v15495_v34  ;;  %v15501_v20 = vld [vmem:[#allocation124_spill] sm:$0xff]  ;;  %v15509_v35 = vld [vmem:[#allocation129_spill] sm:$0xff] }
 0x4aa   :  { %v6440_v56 = vadd.f32 %v6424_v9, %v6392_v32  ;;  %v5692_v54 = vrot.slane %v5625_v17, %v15498_v50  ;;  %v6391_v45 = vadd.f32 %v6375_v51, %v14492_v55  ;;  %v5688_v10 = vrot.slane %v5623_v13, %v15499_v44 }
 0x4ab   :  { %v5434_v57 = vsel %vm2122_vm7, %v5433_v8, %v5429_v61  ;;  %v5710_v12 = vrot.slane %v5633_v62, %v15498_v50  ;;  %v5731_v15 = vsel %vm1339_vm10, %v15501_v20, %v15500_v36  ;;  %v5443_v3 = vsel %vm2122_vm7, %v5442_v41, %v5438_v6  ;;  %v5631_v19 = vpop.xlane.xlu0 %5630  ;;  %v15506_v62 = vld [vmem:[#allocation128_spill] sm:$0xff]  ;;  %v15508_v41 = vld [vmem:[#allocation29_spill] sm:$0xff] }
 0x4ac   :  { %6471 = vadd.xlane.f32.xlu1 %v6440_v56  ;;  %v5457_v46 = vsel %vm1345_vm13, %v5434_v57, %v5456_v31  ;;  %v6439_v63 = vadd.f32 %v6423_v2, %v6391_v45  ;;  %v5693_v55 = vsel %vm2403_vm8, %v5692_v54, %v5688_v10  ;;  %v5706_v16 = vrot.slane %v5631_v19, %v15499_v44  ;;  %v15510_v54 = vld [vmem:[#allocation41_spill] sm:$0xff] }
 0x4ad   :  { %v14588_v17 = vsel %vm1347_vm14, %v5443_v3, %v5457_v46  ;;  %v15503_v37 = vrot.slane %v15502_v60, %v15499_v44  ;;  %v15505_v40 = vrot.slane %v15504_v53, %v15498_v50  ;;  %v5732_v11 = vsel %vm1341_vm11, %v5693_v55, %v5731_v15 }
 0x4ae   :  { %6469 = vadd.xlane.f32.xlu0 %v6439_v63  ;;  %v5711_v26 = vsel %vm2403_vm8, %v5710_v12, %v5706_v16  ;;  %v5637_v4 = vpop.xlane.xlu1 %5636  ;;  %v5951_v51 = vrot.slane %v15506_v62, %v12237_v47  ;;  %v5947_v14 = vrot.slane %v15507_v7, %v12377_v24  ;;  %v5960_v56 = vrot.slane %v15508_v41, %v12237_v47  ;;  %v15511_v12 = vld [vmem:[#allocation23_spill] sm:$0xff]  ;;  %v15512_v16 = vld [vmem:[#allocation21_spill] sm:$0xff]  ;;  %v15514_v7 = vld [vmem:[#allocation14_spill] sm:$0xff] }
 0x4af   :  { %v5702_v58 = vsel %vm2403_vm8, %v15505_v40, %v15503_v37  ;;  %v5719_v52 = vrot.slane %v5637_v4, %v15498_v50  ;;  %v5956_v31 = vrot.slane %v15509_v35, %v12377_v24  ;;  %v5938_v45 = vrot.slane %v15510_v54, %v12377_v24  ;;  %v15513_v37 = vld [vmem:[#allocation32_spill] sm:$0xff]  ;;  %v15515_v41 = vld [vmem:[#allocation13_spill] sm:$0xff] }
 0x4b0   :  { %v5733_v9 = vsel %vm1343_vm12, %v5702_v58, %v5732_v11  ;;  %v5942_v36 = vrot.slane %v15511_v12, %v12237_v47  ;;  %v5952_v20 = vsel %vm2684_vm1, %v5951_v51, %v5947_v14  ;;  %v5978_v60 = vrot.slane %v15512_v16, %v12237_v47  ;;  %v15516_v35 = vld [vmem:[#allocation16_spill] sm:$0xff]  ;;  %v15519_v12 = vld [vmem:[#allocation35_spill] sm:$0xff] }
 0x4b1   :  { %v5734_v13 = vsel %vm1345_vm13, %v5711_v26, %v5733_v9  ;;  %v5635_v22 = vpop.xlane.xlu0 %5634  ;;  %v5961_v46 = vsel %vm2684_vm1, %v5960_v56, %v5956_v31  ;;  %v5974_v53 = vrot.slane %v15513_v37, %v12377_v24  ;;  %v1271_v14 = vrot.slane %v15514_v7, %v15482_v59 }
 0x4b2   :  { %v5715_v0 = vrot.slane %v5635_v22, %v15499_v44  ;;  %v5943_v19 = vsel %vm2684_vm1, %v5942_v36, %v5938_v45  ;;  %v1266_v56 = vrot.slane %v15515_v41, %v15483_v38  ;;  %v1554_v31 = vrot.slane %v15516_v35, %v15487_v18  ;;  %v15518_v45 = vld [vmem:[#allocation27_spill] sm:$0xff] }
 0x4b3   :  { %v6007_v55 = vsel %vm1337_vm9, %v5952_v20, %v5943_v19  ;;  %v1835_v36 = vrot.slane %v15519_v12, %v15491_v43  ;;  %v15520_v20 = vld [vmem:[#allocation36_spill] sm:$0xff]  ;;  %v15531_v12 = vld [vmem:[#allocation15_spill] sm:$0xff] }
 0x4b4   :  { %v5720_v8 = vsel %vm2403_vm8, %v5719_v52, %v5715_v0  ;;  %v5902_v5 = vpop.xlane.xlu1 %5901  ;;  %v6008_v58 = vsel %vm1339_vm10, %v5961_v46, %v6007_v55  ;;  %v5979_v52 = vsel %vm2684_vm1, %v5978_v60, %v5974_v53  ;;  %v15521_v46 = vld [vmem:[#allocation31_spill] sm:$0xff]  ;;  %v15522_v19 = vld [vmem:[#allocation20_spill] sm:$0xff]  ;;  %v15523_v55 = vld [vmem:[#allocation6_spill] sm:$0xff] }
 0x4b5   :  { %v14607_v32 = vsel %vm1347_vm14, %v5720_v8, %v5734_v13  ;;  %v5969_v2 = vrot.slane %v5902_v5, %v12237_v47  ;;  %v1559_v16 = vrot.slane %v15523_v55, %v15486_v48  ;;  %v15524_v60 = vld [vmem:[#allocation42_spill] sm:$0xff] }
 0x4b6   :  { %v5900_v61 = vpop.xlane.xlu0 %5899  ;;  %v6215_v37 = vrot.slane %v15524_v60, %v15460_v49 }
 0x4b7   :  { %v5965_v6 = vrot.slane %v5900_v61, %v12377_v24 }
 0x4b9   :  { %v5970_v57 = vsel %vm2684_vm1, %v5969_v2, %v5965_v6  ;;  %v6179_v10 = vpop.xlane.xlu1 %6178  ;;  %v15517_v6 = vld [vmem:[#allocation24_spill] sm:$0xff] }
 0x4ba   :  { %v6246_v15 = vrot.slane %v6179_v10, %v12313_v21  ;;  %v6009_v26 = vsel %vm1341_vm11, %v5970_v57, %v6008_v58  ;;  %v6228_v54 = vrot.slane %v15517_v6, %v12313_v21  ;;  %v6224_v57 = vrot.slane %v15518_v45, %v15460_v49  ;;  %v15530_v6 = vld [vmem:[#allocation45_spill] sm:$0xff] }
 0x4bb   :  { %v6177_v3 = vpop.xlane.xlu0 %6176  ;;  %v6010_v22 = vsel %vm1343_vm12, %v5979_v52, %v6009_v26  ;;  %v15526_v26 = vld [vmem:[#allocation9_spill] sm:$0xff]  ;;  %v14677_v52 = vsel %vm1560_vm5, %v1559_v16, %v1554_v31 }
 0x4bc   :  { %v6242_v63 = vrot.slane %v6177_v3, %v15460_v49  ;;  %v6237_v3 = vrot.slane %v15521_v46, %v12313_v21 }
 0x4bd   :  { %v5910_v40 = vpop.xlane.xlu1 %5909 }
 0x4be   :  { %v6247_v11 = vsel %vm2965_vm2, %v6246_v15, %v6242_v63  ;;  %v5987_v9 = vrot.slane %v5910_v40, %v12237_v47  ;;  %v2116_v15 = vrot.slane %v15520_v20, %v15495_v34  ;;  %v6233_v63 = vrot.slane %v15522_v19, %v15460_v49  ;;  %v15525_v40 = vld [vmem:[#allocation7_spill] sm:$0xff] }
 0x4bf   :  { %v5908_v13 = vpop.xlane.xlu0 %5907  ;;  %v1840_v58 = vrot.slane %v15525_v40, %v15490_v1  ;;  %v15532_v20 = vld [vmem:[#allocation75_spill] sm:$0xff]  ;;  %v15536_v40 = vld [vmem:[#allocation28_spill] sm:$0xff] }
 0x4c0   :  { %v5983_v4 = vrot.slane %v5908_v13, %v12377_v24  ;;  %v2121_v13 = vrot.slane %v15526_v26, %v15494_v28  ;;  %v6238_v41 = vsel %vm2965_vm2, %v6237_v3, %v6233_v63  ;;  %v15533_v3 = vld [vmem:[#allocation43_spill] sm:$0xff]  ;;  %v15534_v63 = vld [vmem:[#allocation44_spill] sm:$0xff]  ;;  %v15537_v26 = vld [vmem:[#allocation25_spill] sm:$0xff] }
 0x4c1   :  { %v14686_v7 = vsel %vm1841_vm6, %v1840_v58, %v1835_v36  ;;  %v6255_v36 = vrot.slane %v15531_v12, %v12313_v21  ;;  %v1277_v19 = vrot.slane %v15533_v3, %v15483_v38  ;;  %v6492_v55 = vrot.slane %v15534_v63, %v15472_v27 }
 0x4c2   :  { %v5988_v0 = vsel %vm2684_vm1, %v5987_v9, %v5983_v4  ;;  %v1273_v9 = vsel %vm1272_vm4, %v1271_v14, %v1266_v56  ;;  %v14689_v14 = vsel %vm2122_vm7, %v2121_v13, %v2116_v15  ;;  %v15529_v56 = vld [vmem:[#allocation37_spill] sm:$0xff]  ;;  %v6251_v15 = vrot.slane %v15532_v20, %v15460_v49  ;;  %v15543_v20 = vld [vmem:[#allocation51_spill] sm:$0xff] }
 0x4c3   :  { %v6011_v8 = vsel %vm1345_vm13, %v5988_v0, %v6010_v22  ;;  %v6456_v5 = vpop.xlane.xlu1 %6455  ;;  %v15527_v22 = vld [vmem:[#allocation38_spill] sm:$0xff]  ;;  %v2397_v35 = vrot.slane %v15529_v56, %v15499_v44  ;;  %v6505_v58 = vrot.slane %v15536_v40, %v15471_v42  ;;  %v1565_v3 = vrot.slane %v15543_v20, %v15487_v18 }
 0x4c4   :  { %v6523_v2 = vrot.slane %v6456_v5, %v15471_v42  ;;  %v6219_v0 = vrot.slane %v15527_v22, %v12313_v21  ;;  %v6229_v5 = vsel %vm2965_vm2, %v6228_v54, %v6224_v57  ;;  %v1281_v54 = vrot.slane %v15530_v6, %v15482_v59  ;;  %v15538_v22 = vld [vmem:[#allocation46_spill] sm:$0xff]  ;;  %v15541_v6 = vld [vmem:[#allocation40_spill] sm:$0xff] }
 0x4c5   :  { %v6454_v62 = vpop.xlane.xlu0 %6453 }
 0x4c6   :  { %v6519_v51 = vrot.slane %v6454_v62, %v15472_v27  ;;  %v15528_v62 = vld [vmem:[#allocation34_spill] sm:$0xff]  ;;  %v6220_v31 = vsel %vm2965_vm2, %v6219_v0, %v6215_v37  ;;  %v15535_v37 = vld [vmem:[#allocation47_spill] sm:$0xff]  ;;  %v1290_v0 = vrot.slane %v15538_v22, %v15482_v59 }
 0x4c8   :  { %v14648_v61 = vsel %vm3246_vm3, %v6523_v2, %v6519_v51  ;;  %v2402_v51 = vrot.slane %v15528_v62, %v15498_v50  ;;  %v15540_v62 = vld [vmem:[#allocation39_spill] sm:$0xff] }
 0x4c9   :  { %v5914_v10 = vpop.xlane.xlu1 %5913 }
 0x4ca   :  { %v5996_v53 = vrot.slane %v5914_v10, %v12237_v47  ;;  %v6284_v10 = vsel %vm1337_vm9, %v6229_v5, %v6220_v31  ;;  %v15539_v5 = vld [vmem:[#allocation74_spill] sm:$0xff]  ;;  %v14727_v31 = vsel %vm2403_vm8, %v2402_v51, %v2397_v35 }
 0x4cb   :  { %v6285_v16 = vsel %vm1339_vm10, %v6238_v41, %v6284_v10  ;;  %v6510_v41 = vrot.slane %v15540_v62, %v15472_v27  ;;  %v15542_v10 = vld [vmem:[#allocation50_spill] sm:$0xff] }
 0x4cc   :  { %v5912_v4 = vpop.xlane.xlu0 %5911  ;;  %v6286_v13 = vsel %vm1341_vm11, %v6247_v11, %v6285_v16  ;;  %v1282_v11 = vsel %vm1272_vm4, %v1281_v54, %v1277_v19  ;;  %v1569_v12 = vrot.slane %v15542_v10, %v15486_v48  ;;  %v15544_v19 = vld [vmem:[#allocation48_spill] sm:$0xff] }
 0x4cd   :  { %v5992_v2 = vrot.slane %v5912_v4, %v12377_v24 }
 0x4cf   :  { %v5997_v45 = vsel %vm2684_vm1, %v5996_v53, %v5992_v2  ;;  %v6187_v57 = vpop.xlane.xlu1 %6186  ;;  %v1286_v53 = vrot.slane %v15535_v37, %v15483_v38  ;;  %v6514_v2 = vrot.slane %v15539_v5, %v15471_v42 }
 0x4d0   :  { %v14704_v46 = vsel %vm1347_vm14, %v5997_v45, %v6011_v8  ;;  %v6264_v60 = vrot.slane %v6187_v57, %v12313_v21  ;;  %v6501_v8 = vrot.slane %v15537_v26, %v15472_v27  ;;  %v6496_v45 = vrot.slane %v15541_v6, %v15471_v42 }
 0x4d1   :  { %v6256_v57 = vsel %vm2965_vm2, %v6255_v36, %v6251_v15  ;;  %v1338_v36 = vsel %vm1337_vm9, %v1282_v11, %v1273_v9  ;;  %v1291_v15 = vsel %vm1272_vm4, %v1290_v0, %v1286_v53  ;;  %v1308_v26 = vrot.slane %v15544_v19, %v15482_v59  ;;  %v15548_v53 = vld [vmem:[#allocation56_spill] sm:$0xff] }
 0x4d2   :  { %v6185_v4 = vpop.xlane.xlu0 %6184  ;;  %v6287_v63 = vsel %vm1343_vm12, %v6256_v57, %v6286_v13  ;;  %v6497_v51 = vsel %vm3246_vm3, %v6496_v45, %v6492_v55  ;;  %v6506_v35 = vsel %vm3246_vm3, %v6505_v58, %v6501_v8  ;;  %v6515_v13 = vsel %vm3246_vm3, %v6514_v2, %v6510_v41  ;;  %v15546_v55 = vld [vmem:[#allocation52_spill] sm:$0xff]  ;;  %v15547_v8 = vld [vmem:[#allocation53_spill] sm:$0xff]  ;;  %v15550_v45 = vld [vmem:[#allocation10_spill] sm:$0xff] }
 0x4d3   :  { %v6260_v56 = vrot.slane %v6185_v4, %v15460_v49  ;;  %v1578_v58 = vrot.slane %v15546_v55, %v15486_v48  ;;  %v1574_v5 = vrot.slane %v15547_v8, %v15487_v18  ;;  %v1570_v9 = vsel %vm1560_vm5, %v1569_v12, %v1565_v3  ;;  %v15551_v57 = vld [vmem:[#allocation130_spill] sm:$0xff]  ;;  %v15552_v12 = vld [vmem:[#allocation17_spill] sm:$0xff] }
 0x4d4   :  { %v1850_v0 = vrot.slane %v15548_v53, %v15490_v1  ;;  %v6561_v41 = vsel %vm1337_vm9, %v6506_v35, %v6497_v51  ;;  %v6532_v11 = vrot.slane %v15550_v45, %v15471_v42  ;;  %v6528_v10 = vrot.slane %v15551_v57, %v15472_v27  ;;  %v15554_v8 = vld [vmem:[#allocation54_spill] sm:$0xff]  ;;  %v15558_v45 = vld [vmem:[#allocation76_spill] sm:$0xff] }
 0x4d5   :  { %v6265_v16 = vsel %vm2965_vm2, %v6264_v60, %v6260_v56  ;;  %v15545_v60 = vld [vmem:[#allocation49_spill] sm:$0xff]  ;;  %v6562_v6 = vsel %vm1339_vm10, %v6515_v13, %v6561_v41  ;;  %v1299_v3 = vrot.slane %v15552_v12, %v15482_v59  ;;  %v1340_v35 = vsel %vm1339_vm10, %v1291_v15, %v1338_v36  ;;  %v15556_v15 = vld [vmem:[#allocation58_spill] sm:$0xff] }
 0x4d6   :  { %v6191_v37 = vpop.xlane.xlu1 %6190  ;;  %v6288_v40 = vsel %vm1345_vm13, %v6265_v16, %v6287_v63  ;;  %v1304_v22 = vrot.slane %v15545_v60, %v15483_v38  ;;  %v15549_v56 = vld [vmem:[#allocation57_spill] sm:$0xff]  ;;  %v15553_v16 = vld [vmem:[#allocation131_spill] sm:$0xff]  ;;  %v1625_v55 = vsel %vm1337_vm9, %v1570_v9, %v14677_v52  ;;  %v15560_v12 = vld [vmem:[#allocation62_spill] sm:$0xff] }
 0x4d7   :  { %v6273_v54 = vrot.slane %v6191_v37, %v12313_v21  ;;  %v1846_v2 = vrot.slane %v15549_v56, %v15491_v43  ;;  %v1295_v37 = vrot.slane %v15553_v16, %v15483_v38  ;;  %v15561_v16 = vld [vmem:[#allocation63_spill] sm:$0xff] }
 0x4d8   :  { %v6189_v4 = vpop.xlane.xlu0 %6188  ;;  %v1309_v13 = vsel %vm1272_vm4, %v1308_v26, %v1304_v22  ;;  %v1859_v26 = vrot.slane %v15556_v15, %v15490_v1  ;;  %v15557_v22 = vld [vmem:[#allocation59_spill] sm:$0xff]  ;;  %v15566_v15 = vld [vmem:[#allocation77_spill] sm:$0xff] }
 0x4d9   :  { %v6269_v62 = vrot.slane %v6189_v4, %v15460_v49  ;;  %v1579_v4 = vsel %vm1560_vm5, %v1578_v58, %v1574_v5  ;;  %v1851_v36 = vsel %vm1841_vm6, %v1850_v0, %v1846_v2  ;;  %v6533_v58 = vsel %vm3246_vm3, %v6532_v11, %v6528_v10  ;;  %v15559_v2 = vld [vmem:[#allocation11_spill] sm:$0xff] }
 0x4da   :  { %v1626_v52 = vsel %vm1339_vm10, %v1579_v4, %v1625_v55  ;;  %v1300_v5 = vsel %vm1272_vm4, %v1299_v3, %v1295_v37  ;;  %v1317_v0 = vrot.slane %v15558_v45, %v15482_v59  ;;  %v1313_v57 = vrot.slane %v15559_v2, %v15483_v38  ;;  %v15563_v55 = vld [vmem:[#allocation64_spill] sm:$0xff]  ;;  %v15569_v45 = vld [vmem:[#allocation61_spill] sm:$0xff] }
 0x4db   :  { %v6274_v20 = vsel %vm2965_vm2, %v6273_v54, %v6269_v62  ;;  %v6464_v63 = vpop.xlane.xlu1 %6463  ;;  %v6563_v54 = vsel %vm1341_vm11, %v14648_v61, %v6562_v6  ;;  %v1596_v62 = vrot.slane %v15554_v8, %v15486_v48  ;;  %v1855_v61 = vrot.slane %v15557_v22, %v15491_v43 }
 0x4dc   :  { %v14772_v19 = vsel %vm1347_vm14, %v6274_v20, %v6288_v40  ;;  %v6541_v51 = vrot.slane %v6464_v63, %v15471_v42  ;;  %v15555_v40 = vld [vmem:[#allocation55_spill] sm:$0xff]  ;;  %v6564_v9 = vsel %vm1343_vm12, %v6533_v58, %v6563_v54  ;;  %v1906_v10 = vsel %vm1337_vm9, %v1851_v36, %v14686_v7  ;;  %v15562_v54 = vld [vmem:[#allocation60_spill] sm:$0xff] }
 0x4dd   :  { %v6462_v60 = vpop.xlane.xlu0 %6461  ;;  %v1592_v53 = vrot.slane %v15555_v40, %v15487_v18  ;;  %v2131_v3 = vrot.slane %v15560_v12, %v15494_v28  ;;  %v2127_v37 = vrot.slane %v15561_v16, %v15495_v34  ;;  %v1860_v4 = vsel %vm1841_vm6, %v1859_v26, %v1855_v61  ;;  %v15564_v40 = vld [vmem:[#allocation65_spill] sm:$0xff]  ;;  %v15567_v61 = vld [vmem:[#allocation132_spill] sm:$0xff] }
 0x4de   :  { %v6537_v56 = vrot.slane %v6462_v60, %v15472_v27  ;;  %v1877_v60 = vrot.slane %v15562_v54, %v15490_v1  ;;  %v2140_v8 = vrot.slane %v15563_v55, %v15494_v28  ;;  %v2136_v7 = vrot.slane %v15564_v40, %v15495_v34  ;;  %v15572_v55 = vld [vmem:[#allocation85_spill] sm:$0xff] }
 0x4df   :  { %v14804_v11 = vsel %vm1560_vm5, %v1596_v62, %v1592_v53  ;;  %v1342_v53 = vsel %vm1341_vm11, %v1300_v5, %v1340_v35  ;;  %v1322_v22 = vrot.slane %v15566_v15, %v15483_v38  ;;  %v1318_v26 = vsel %vm1272_vm4, %v1317_v0, %v1313_v57  ;;  %v15570_v5 = vld [vmem:[#allocation66_spill] sm:$0xff] }
 0x4e0   :  { %v6542_v41 = vsel %vm3246_vm3, %v6541_v51, %v6537_v56  ;;  %v6468_v6 = vpop.xlane.xlu1 %6467  ;;  %v15565_v56 = vld [vmem:[#allocation18_spill] sm:$0xff]  ;;  %v1587_v58 = vrot.slane %v15567_v61, %v15486_v48  ;;  %v1873_v2 = vrot.slane %v15569_v45, %v15491_v43  ;;  %v2132_v35 = vsel %vm2122_vm7, %v2131_v3, %v2127_v37  ;;  %v15573_v3 = vld [vmem:[#allocation67_spill] sm:$0xff] }
 0x4e1   :  { %v6565_v20 = vsel %vm1345_vm13, %v6542_v41, %v6564_v9  ;;  %v6550_v63 = vrot.slane %v6468_v6, %v15471_v42  ;;  %v1326_v36 = vrot.slane %v15565_v56, %v15482_v59  ;;  %v15568_v9 = vld [vmem:[#allocation80_spill] sm:$0xff]  ;;  %v2158_v12 = vrot.slane %v15570_v5, %v15494_v28  ;;  %v15577_v5 = vld [vmem:[#allocation83_spill] sm:$0xff] }
 0x4e2   :  { %v6466_v51 = vpop.xlane.xlu0 %6465  ;;  %v1583_v41 = vrot.slane %v15568_v9, %v15487_v18  ;;  %v1344_v57 = vsel %vm1343_vm12, %v1309_v13, %v1342_v53  ;;  %v2141_v40 = vsel %vm2122_vm7, %v2140_v8, %v2136_v7  ;;  %v2154_v37 = vrot.slane %v15573_v3, %v15495_v34  ;;  %v15574_v53 = vld [vmem:[#allocation78_spill] sm:$0xff] }
 0x4e3   :  { %v6546_v62 = vrot.slane %v6466_v51, %v15472_v27  ;;  %v15571_v51 = vld [vmem:[#allocation84_spill] sm:$0xff]  ;;  %v1346_v56 = vsel %vm1345_vm13, %v1318_v26, %v1344_v57  ;;  %v1605_v61 = vrot.slane %v15574_v53, %v15486_v48  ;;  %v15576_v8 = vld [vmem:[#allocation82_spill] sm:$0xff]  ;;  %v1610_v26 = vrot.slane %v15577_v5, %v15487_v18 }
 0x4e4   :  { %v1868_v54 = vrot.slane %v15571_v51, %v15490_v1  ;;  %v1588_v13 = vsel %vm1560_vm5, %v1587_v58, %v1583_v41  ;;  %v1614_v7 = vrot.slane %v15576_v8, %v15486_v48  ;;  %v1878_v57 = vsel %vm1841_vm6, %v1877_v60, %v1873_v2  ;;  %v15585_v8 = vld [vmem:[#allocation97_spill] sm:$0xff] }
 0x4e5   :  { %v6551_v6 = vsel %vm3246_vm3, %v6550_v63, %v6546_v62  ;;  %v1244_v0 = vpop.xlane.xlu1 %1243  ;;  %v1864_v63 = vrot.slane %v15572_v55, %v15491_v43  ;;  %v2159_v3 = vsel %vm2122_vm7, %v2158_v12, %v2154_v37  ;;  %v15580_v12 = vld [vmem:[#allocation86_spill] sm:$0xff] }
 0x4e6   :  { %v14837_v16 = vsel %vm1347_vm14, %v6551_v6, %v6565_v20  ;;  %v1335_v62 = vrot.slane %v1244_v0, %v15482_v59  ;;  %v1327_v20 = vsel %vm1272_vm4, %v1326_v36, %v1322_v22  ;;  %v15575_v6 = vld [vmem:[#allocation79_spill] sm:$0xff]  ;;  %v2187_v36 = vsel %vm1337_vm9, %v2132_v35, %v14689_v14  ;;  %v15579_v14 = vld [vmem:[#allocation69_spill] sm:$0xff] }
 0x4e7   :  { %v1601_v45 = vrot.slane %v15575_v6, %v15487_v18  ;;  %v1348_v22 = vsel %vm1347_vm14, %v1327_v20, %v1346_v56  ;;  %v1869_v58 = vsel %vm1841_vm6, %v1868_v54, %v1864_v63  ;;  %v1907_v0 = vsel %vm1339_vm10, %v1860_v4, %v1906_v10  ;;  %v15582_v56 = vld [vmem:[#allocation90_spill] sm:$0xff]  ;;  %v15583_v20 = vld [vmem:[#allocation136_spill] sm:$0xff]  ;;  %v15584_v6 = vld [vmem:[#allocation95_spill] sm:$0xff] }
 0x4e8   :  { %v1242_v15 = vpop.xlane.xlu0 %1241  ;;  %v2188_v51 = vsel %vm1339_vm10, %v2141_v40, %v2187_v36  ;;  %v2408_v35 = vrot.slane %v15579_v14, %v15499_v44  ;;  %v1627_v54 = vsel %vm1341_vm11, %v1588_v13, %v1626_v52  ;;  %v1615_v4 = vsel %vm1560_vm5, %v1614_v7, %v1610_v26  ;;  %v15581_v40 = vld [vmem:[#allocation87_spill] sm:$0xff]  ;;  %v15586_v36 = vld [vmem:[#allocation70_spill] sm:$0xff] }
 0x4e9   :  { %v1331_v9 = vrot.slane %v1242_v15, %v15483_v38  ;;  %v15578_v15 = vld [vmem:[#allocation68_spill] sm:$0xff]  ;;  %v1606_v10 = vsel %vm1560_vm5, %v1605_v61, %v1601_v45  ;;  %v1908_v60 = vsel %vm1341_vm11, %v1869_v58, %v1907_v0  ;;  %v1882_v37 = vrot.slane %v15581_v40, %v15491_v43 }
 0x4ea   :  { %v2412_v53 = vrot.slane %v15578_v15, %v15498_v50  ;;  %v1895_v52 = vrot.slane %v15582_v56, %v15490_v1  ;;  %v1891_v13 = vrot.slane %v15583_v20, %v15491_v43  ;;  %v1628_v61 = vsel %vm1343_vm12, %v14804_v11, %v1627_v54 }
 0x4eb   :  { %v1336_v41 = vsel %vm1272_vm4, %v1335_v62, %v1331_v9  ;;  %v1886_v62 = vrot.slane %v15580_v12, %v15490_v1  ;;  %v2149_v45 = vrot.slane %v15584_v6, %v15494_v28  ;;  %v2145_v7 = vrot.slane %v15585_v8, %v15495_v34  ;;  %v15588_v12 = vld [vmem:[#allocation99_spill] sm:$0xff] }
 0x4ec   :  { %v1350_v55 = vsel %vm1349_vm15, %v1336_v41, %v1348_v22  ;;  %v1533_v63 = vpop.xlane.xlu1 %1532  ;;  %v2413_v26 = vsel %vm2403_vm8, %v2412_v53, %v2408_v35  ;;  %v2421_v22 = vrot.slane %v15586_v36, %v15498_v50  ;;  %v1629_v58 = vsel %vm1345_vm13, %v1606_v10, %v1628_v61  ;;  %v15587_v41 = vld [vmem:[#allocation71_spill] sm:$0xff] }
 0x4ed   :  { %1353 = vst.msk [vmem:[#allocation2] sm:$0xff] %vm15134_vm0, %v1350_v55  ;;  %v1623_v2 = vrot.slane %v1533_v63, %v15486_v48  ;;  %vm15135_vm0 = vcmask 261248   ;;  %v2417_v0 = vrot.slane %v15587_v41, %v15499_v44  ;;  %v1630_v11 = vsel %vm1347_vm14, %v1615_v4, %v1629_v58  ;;  %v15589_v4 = vld [vmem:[#allocation100_spill] sm:$0xff] }
 0x4ee   :  { %v1531_v9 = vpop.xlane.xlu0 %1530  ;;  %v1909_v55 = vsel %vm1343_vm12, %v1878_v57, %v1908_v60  ;;  %v1887_v54 = vsel %vm1841_vm6, %v1886_v62, %v1882_v37  ;;  %v1896_v53 = vsel %vm1841_vm6, %v1895_v52, %v1891_v13  ;;  %v2150_v10 = vsel %vm2122_vm7, %v2149_v45, %v2145_v7  ;;  %v15590_v57 = vld [vmem:[#allocation137_spill] sm:$0xff]  ;;  %v15592_v52 = vld [vmem:[#allocation138_spill] sm:$0xff]  ;;  %v15593_v13 = vld [vmem:[#allocation103_spill] sm:$0xff] }
 0x4ef   :  { %v1619_v5 = vrot.slane %v1531_v9, %v15487_v18  ;;  %v2167_v40 = vrot.slane %v15588_v12, %v15494_v28  ;;  %v2163_v56 = vrot.slane %v15589_v4, %v15495_v34  ;;  %v2176_v60 = vrot.slane %v15590_v57, %v15494_v28  ;;  %v15591_v62 = vld [vmem:[#allocation105_spill] sm:$0xff]  ;;  %v15594_v7 = vld [vmem:[#allocation72_spill] sm:$0xff]  ;;  %v15598_v12 = vld [vmem:[#allocation110_spill] sm:$0xff] }
 0x4f0   :  { %v2172_v37 = vrot.slane %v15591_v62, %v15495_v34  ;;  %v2430_v20 = vrot.slane %v15592_v52, %v15498_v50  ;;  %v2426_v9 = vrot.slane %v15593_v13, %v15499_v44  ;;  %v2468_v6 = vsel %vm1337_vm9, %v2413_v26, %v14727_v31  ;;  %v15599_v4 = vld [vmem:[#allocation111_spill] sm:$0xff] }
 0x4f1   :  { %v1624_v15 = vsel %vm1560_vm5, %v1623_v2, %v1619_v5  ;;  %v1814_v14 = vpop.xlane.xlu1 %1813  ;;  %v2422_v45 = vsel %vm2403_vm8, %v2421_v22, %v2417_v0  ;;  %v1910_v8 = vsel %vm1345_vm13, %v1887_v54, %v1909_v55  ;;  %v2439_v5 = vrot.slane %v15594_v7, %v15498_v50  ;;  %v15596_v54 = vld [vmem:[#allocation108_spill] sm:$0xff] }
 0x4f2   :  { %v1631_v35 = vsel %vm1349_vm15, %v1624_v15, %v1630_v11  ;;  %v1904_v63 = vrot.slane %v1814_v14, %v15490_v1  ;;  %v1911_v36 = vsel %vm1347_vm14, %v1896_v53, %v1910_v8  ;;  %v2189_v58 = vsel %vm1341_vm11, %v2150_v10, %v2188_v51  ;;  %v15595_v15 = vld [vmem:[#allocation73_spill] sm:$0xff] }
 0x4f3   :  { %1634 = vst.msk [vmem:[#allocation2] sm:$0xff] %vm15135_vm0, %v1631_v35  ;;  %v1812_v2 = vpop.xlane.xlu0 %1811  ;;  %vm1914_vm0 = vcmask 392448   ;;  %v2435_v14 = vrot.slane %v15595_v15, %v15499_v44  ;;  %v2168_v31 = vsel %vm2122_vm7, %v2167_v40, %v2163_v56  ;;  %v2177_v0 = vsel %vm2122_vm7, %v2176_v60, %v2172_v37  ;;  %v15597_v51 = vld [vmem:[#allocation109_spill] sm:$0xff] }
 0x4f4   :  { %v1900_v61 = vrot.slane %v1812_v2, %v15491_v43  ;;  %v2431_v55 = vsel %vm2403_vm8, %v2430_v20, %v2426_v9  ;;  %v2448_v53 = vrot.slane %v15596_v54, %v15498_v50  ;;  %v2444_v35 = vrot.slane %v15597_v51, %v15499_v44 }
 0x4f5   :  { %v2190_v10 = vsel %vm1343_vm12, %v2159_v3, %v2189_v58  ;;  %v2457_v40 = vrot.slane %v15598_v12, %v15498_v50  ;;  %v2453_v56 = vrot.slane %v15599_v4, %v15499_v44  ;;  %v2469_v60 = vsel %vm1339_vm10, %v2422_v45, %v2468_v6 }
 0x4f6   :  { %v1905_v41 = vsel %vm1841_vm6, %v1904_v63, %v1900_v61  ;;  %v2095_v11 = vpop.xlane.xlu1 %2094  ;;  %v2191_v2 = vsel %vm1345_vm13, %v2168_v31, %v2190_v10  ;;  %vm2195_vm9 = vcmask 523648   ;;  %v2470_v37 = vsel %vm1341_vm11, %v2431_v55, %v2469_v60 }
 0x4f7   :  { %v1912_v26 = vsel %vm1349_vm15, %v1905_v41, %v1911_v36  ;;  %v2185_v22 = vrot.slane %v2095_v11, %v15494_v28  ;;  %v2192_v62 = vsel %vm1347_vm14, %v2177_v0, %v2191_v2  ;;  %v2449_v20 = vsel %vm2403_vm8, %v2448_v53, %v2444_v35 }
 0x4f8   :  { %1915 = vst.msk [vmem:[#allocation2] sm:$0xff] %vm1914_vm0, %v1912_v26  ;;  %v2093_v63 = vpop.xlane.xlu0 %2092  ;;  %v2440_v61 = vsel %vm2403_vm8, %v2439_v5, %v2435_v14  ;;  %v2458_v6 = vsel %vm2403_vm8, %v2457_v40, %v2453_v56  ;;  %vm2476_vm10 = vcmask 654848   ;;  %vm2757_vm11 = vcmask 786048  }
 0x4f9   :  { %v2181_v57 = vrot.slane %v2093_v63, %v15495_v34  ;;  %v2471_v8 = vsel %vm1343_vm12, %v2440_v61, %v2470_v37  ;;  %vm3038_vm12 = vcmask 917248  }
 0x4fa   :  { %v2472_v36 = vsel %vm1345_vm13, %v2449_v20, %v2471_v8  ;;  %vm15136_vm13 = vcmask 1048448  }
 0x4fb   :  { %v2186_v52 = vsel %vm2122_vm7, %v2185_v22, %v2181_v57  ;;  %v2473_v58 = vsel %vm1347_vm14, %v2458_v6, %v2472_v36  ;;  %vm15600_vm14 = vcmask 130048  }
 0x4fc   :  { %v2376_v3 = vpop.xlane.xlu1 %2375  ;;  %v2193_v13 = vsel %vm1349_vm15, %v2186_v52, %v2192_v62 }
 0x4fd   :  { %v2466_v9 = vrot.slane %v2376_v3, %v15498_v50  ;;  %2196 = vst.msk [vmem:[#allocation2] sm:$0xff] %vm2195_vm9, %v2193_v13 }
 0x4fe   :  { %v2374_v45 = vpop.xlane.xlu0 %2373 }
 0x4ff   :  { %v2462_v7 = vrot.slane %v2374_v45, %v15499_v44 }
 0x501   :  { %v2467_v41 = vsel %vm2403_vm8, %v2466_v9, %v2462_v7 }
 0x502   :  { %v2474_v11 = vsel %vm1349_vm15, %v2467_v41, %v2473_v58  ;;  %v2657_v15 = vpop.xlane.xlu1 %2656 }
 0x503   :  { %2477 = vst.msk [vmem:[#allocation2] sm:$0xff] %vm2476_vm10, %v2474_v11  ;;  %v2747_v5 = vrot.slane %v2657_v15, %v12237_v47 }
 0x504   :  { %v2655_v14 = vpop.xlane.xlu0 %2654 }
 0x505   :  { %v2743_v31 = vrot.slane %v2655_v14, %v12377_v24 }
 0x507   :  { %v2748_v26 = vsel %vm2684_vm1, %v2747_v5, %v2743_v31 }
 0x508   :  { %v2755_v22 = vsel %vm1349_vm15, %v2748_v26, %v14052_v30  ;;  %v2938_v0 = vpop.xlane.xlu1 %2937 }
 0x509   :  { %2758 = vst.msk [vmem:[#allocation2] sm:$0xff] %vm2757_vm11, %v2755_v22  ;;  %v3028_v55 = vrot.slane %v2938_v0, %v12313_v21 }
 0x50a   :  { %v2936_v54 = vpop.xlane.xlu0 %2935 }
 0x50b   :  { %v3024_v53 = vrot.slane %v2936_v54, %v15460_v49 }
 0x50d   :  { %v3029_v51 = vsel %vm2965_vm2, %v3028_v55, %v3024_v53 }
 0x50e   :  { %v3219_v35 = vpop.xlane.xlu1 %3218  ;;  %v3036_v63 = vsel %vm1349_vm15, %v3029_v51, %v14175_v39 }
 0x50f   :  { %v3309_v10 = vrot.slane %v3219_v35, %v15471_v42  ;;  %3039 = vst.msk [vmem:[#allocation2] sm:$0xff] %vm3038_vm12, %v3036_v63 }
 0x510   :  { %v3217_v30 = vpop.xlane.xlu0 %3216 }
 0x511   :  { %v3305_v12 = vrot.slane %v3217_v30, %v15472_v27 }
 0x512   :  { %v4532_v4 = vpop.xlane.xlu1 %4531 }
 0x513   :  { %v3310_v40 = vsel %vm3246_vm3, %v3309_v10, %v3305_v12  ;;  %v4619_v57 = vrot.slane %v4532_v4, %v15482_v59 }
 0x514   :  { %v3317_v56 = vsel %vm1349_vm15, %v3310_v40, %v14300_v33 }
 0x515   :  { %v4530_v60 = vpop.xlane.xlu0 %4529  ;;  %3320 = vst.msk [vmem:[#allocation2] sm:$0xff] %vm15136_vm13, %v3317_v56  ;;  %vm15601_vm13 = vcmask 261248  }
 0x516   :  { %v4615_v39 = vrot.slane %v4530_v60, %v15483_v38 }
 0x517   :  { %v4810_v2 = vpop.xlane.xlu1 %4809 }
 0x518   :  { %v4620_v62 = vsel %vm1272_vm4, %v4619_v57, %v4615_v39  ;;  %v4897_v52 = vrot.slane %v4810_v2, %v15486_v48 }
 0x519   :  { %v4627_v37 = vsel %vm1349_vm15, %v4620_v62, %v14416_v25 }
 0x51a   :  { %4630 = vst.msk [vmem:[#allocation2 + $0x8] sm:$0xff] %vm15600_vm14, %v4627_v37  ;;  %v4808_v3 = vpop.xlane.xlu0 %4807 }
 0x51b   :  { %v4893_v33 = vrot.slane %v4808_v3, %v15487_v18 }
 0x51d   :  { %v4898_v59 = vsel %vm1560_vm5, %v4897_v52, %v4893_v33 }
 0x51e   :  { %v4905_v20 = vsel %vm1349_vm15, %v4898_v59, %v14532_v29  ;;  %v5087_v13 = vpop.xlane.xlu1 %5086 }
 0x51f   :  { %4907 = vst.msk [vmem:[#allocation2 + $0x8] sm:$0xff] %vm15601_vm13, %v4905_v20  ;;  %v5174_v38 = vrot.slane %v5087_v13, %v15490_v1 }
 0x520   :  { %v5085_v9 = vpop.xlane.xlu0 %5084 }
 0x521   :  { %v5170_v25 = vrot.slane %v5085_v9, %v15491_v43 }
 0x523   :  { %v5175_v48 = vsel %vm1841_vm6, %v5174_v38, %v5170_v25 }
 0x524   :  { %v5182_v61 = vsel %vm1349_vm15, %v5175_v48, %v14564_v23  ;;  %v5364_v18 = vpop.xlane.xlu1 %5363 }
 0x525   :  { %5184 = vst.msk [vmem:[#allocation2 + $0x8] sm:$0xff] %vm1914_vm0, %v5182_v61  ;;  %v5451_v6 = vrot.slane %v5364_v18, %v15494_v28 }
 0x526   :  { %v5362_v45 = vpop.xlane.xlu0 %5361 }
 0x527   :  { %v5447_v29 = vrot.slane %v5362_v45, %v15495_v34 }
 0x529   :  { %v5641_v8 = vpop.xlane.xlu1 %5640  ;;  %v5452_v7 = vsel %vm2122_vm7, %v5451_v6, %v5447_v29 }
 0x52a   :  { %v5728_v1 = vrot.slane %v5641_v8, %v15498_v50  ;;  %v5459_v43 = vsel %vm1349_vm15, %v5452_v7, %v14588_v17 }
 0x52b   :  { %v5639_v36 = vpop.xlane.xlu0 %5638  ;;  %5461 = vst.msk [vmem:[#allocation2 + $0x8] sm:$0xff] %vm2195_vm9, %v5459_v43 }
 0x52c   :  { %v5724_v23 = vrot.slane %v5639_v36, %v15499_v44 }
 0x52e   :  { %v5729_v58 = vsel %vm2403_vm8, %v5728_v1, %v5724_v23  ;;  %v5918_v41 = vpop.xlane.xlu1 %5917 }
 0x52f   :  { %v5736_v28 = vsel %vm1349_vm15, %v5729_v58, %v14607_v32  ;;  %v6005_v34 = vrot.slane %v5918_v41, %v12237_v47 }
 0x530   :  { %5738 = vst.msk [vmem:[#allocation2 + $0x8] sm:$0xff] %vm2476_vm10, %v5736_v28 }
 0x531   :  { %v5916_v11 = vpop.xlane.xlu0 %5915 }
 0x532   :  { %v6001_v50 = vrot.slane %v5916_v11, %v12377_v24 }
 0x533   :  { %v6195_v15 = vpop.xlane.xlu1 %6194 }
 0x534   :  { %v6006_v17 = vsel %vm2684_vm1, %v6005_v34, %v6001_v50  ;;  %v6282_v44 = vrot.slane %v6195_v15, %v12313_v21  ;;  %vm15602_vm1 = vcmask 1048448  }
 0x535   :  { %v6013_v5 = vsel %vm1349_vm15, %v6006_v17, %v14704_v46 }
 0x536   :  { %6015 = vst.msk [vmem:[#allocation2 + $0x8] sm:$0xff] %vm2757_vm11, %v6013_v5  ;;  %v6193_v14 = vpop.xlane.xlu0 %6192 }
 0x537   :  { %v6278_v32 = vrot.slane %v6193_v14, %v15460_v49 }
 0x539   :  { %v6472_v31 = vpop.xlane.xlu1 %6471  ;;  %v6283_v26 = vsel %vm2965_vm2, %v6282_v44, %v6278_v32 }
 0x53a   :  { %v6290_v47 = vsel %vm1349_vm15, %v6283_v26, %v14772_v19  ;;  %v6559_v24 = vrot.slane %v6472_v31, %v15471_v42 }
 0x53b   :  { %6292 = vst.msk [vmem:[#allocation2 + $0x8] sm:$0xff] %vm3038_vm12, %v6290_v47  ;;  %v6470_v22 = vpop.xlane.xlu0 %6469 }
 0x53c   :  { %v6555_v46 = vrot.slane %v6470_v22, %v15472_v27 }
 0x53e   :  { %v6560_v21 = vsel %vm3246_vm3, %v6559_v24, %v6555_v46 }
 0x53f   :  { %v6567_v49 = vsel %vm1349_vm15, %v6560_v21, %v14837_v16 }
 0x540   :  { %6569 = vst.msk [vmem:[#allocation2 + $0x8] sm:$0xff] %vm15602_vm1, %v6567_v49 }
 0x541   :  { %8753 = shalt.err (!%p8750_p4)
}
 0x542   :  { %s8754_s8 = scalar_lea.hbm %s15050_s4, 256 }
 0x543   :  { %p8755_p5 = scmp.ne.s32.totalorder %s15050_s4, %s8754_s8  ;;  %p8758_p6 = scmp.lt.u32.totalorder %s8754_s8, %s15050_s4 }
 0x545   :  { %p8760_p7 = pnand %p8758_p6, %p8755_p5 }
 0x547   :  { %8763 = shalt.err (!%p8760_p7)
}
 0x548   :  { %s8777_s13 = smov 128   ;;  %s8778_s14 = smov 8  }
 0x549   :  { %6581 = dma.vmem_to_hbm [thread:$0]  %s6576_s30, 256, %s15050_s4, [#allocation3], %s8777_s13, %s8777_s13, %s8778_s14  }
 0x54a   :  { %8764 = dma.done.wait [#allocation3], 256  }
 0x54b   :  { %8765 = vsyncadd [#allocation3], 4294967040 }
 0x54c   :  { %6585 = vsyncpa [#allocation3], 1 }

</bundles_post_ra>
